<compile_context>
chip_gen: v7x
topology: tpu7x:2x2x1
jax: 0.10.0
libtpu: 0.0.40
codegen_flags: <defaults>
</compile_context>

<pallas_src>
import jax
import jax.numpy as jnp
from jax.experimental import pallas as pl
from jax.experimental.pallas import tpu as pltpu

ACTIVATION = "relu"        # torch.relu in the reference
B_INIT = -0.2
N_HIDDEN = 8
N_HIDDEN_NEURON = 1024
N_INPUT_FEATURES = 15

N_STREAMED = N_HIDDEN - 1          # hidden layers 1..7 (1024 -> 1024)
LAYERS_PER_STEP = 2                # streamed layers packed per grid step
N_PAIRED = N_STREAMED - 1          # first 6 streamed as pairs
N_STEPS = N_PAIRED // LAYERS_PER_STEP   # grid size = 3


# ----------------------------- Pallas kernel -------------------------------

def _net_kernel(x_ref, w0_ref, b0_ref, wpair_ref, bpair_ref,
                wlast_ref, blast_ref, wp_ref, bp_ref,
                pre0_ref, prepair_ref, prelast_ref, out_ref, x_sc):
    """Fused forward for the whole MLP.

    Grid step s = 0..2 streams the bf16 weights of hidden layers 2s+1 and
    2s+2.  Step 0 additionally runs hidden layer 0 (15 -> 1024, resident f32
    weight); the last step additionally runs hidden layer 7 (resident bf16
    weight) and `predict`.  The running activation is carried across steps in
    the bf16 VMEM scratch `x_sc`.
    """
    s = pl.program_id(0)

    # ---- hidden layer 0 (15 -> 1024), first grid step only -----------------
    @pl.when(s == 0)
    def _():
        pre0 = (jnp.dot(x_ref[...], w0_ref[...],
                        preferred_element_type=jnp.float32) + b0_ref[...])
        pre0_ref[...] = pre0
        x_sc[...] = jnp.maximum(pre0, 0.0).astype(jnp.bfloat16)

    # ---- two streamed bf16 (1024 -> 1024) layers per step (static unroll) --
    for j in range(LAYERS_PER_STEP):
        pre = (jnp.dot(x_sc[...], wpair_ref[j],
                       preferred_element_type=jnp.float32)
               + bpair_ref[LAYERS_PER_STEP * s + j])
        prepair_ref[j] = pre
        x_sc[...] = jnp.maximum(pre, 0.0).astype(jnp.bfloat16)

    # ---- hidden layer 7 (resident bf16 weight) + `predict`, last step ------
    @pl.when(s == pl.num_programs(0) - 1)
    def _():
        pre_l = (jnp.dot(x_sc[...], wlast_ref[...],
                         preferred_element_type=jnp.float32) + blast_ref[...])
        prelast_ref[...] = pre_l
        act_l = jnp.maximum(pre_l, 0.0)
        out_ref[...] = (jnp.dot(act_l, wp_ref[...],
                                preferred_element_type=jnp.float32)
                        + bp_ref[...])


def net_pallas(x, params):
    """Single fused pallas_call for the full forward pass."""
    w0, b0 = params["w0"], params["b0"]                   # (15,1024) f32, (1,1024) f32
    wpair, bpair = params["w_pairs"], params["b_pairs"]   # (6,1024,1024) bf16, (6,1,1024) f32
    wlast, blast = params["w_last"], params["b_last"]     # (1024,1024) bf16, (1,1024) f32
    wp, bp = params["wp"], params["bp"]                   # (1024,1) f32, (1,1) f32

    B = x.shape[0]
    K0, N = w0.shape
    P = LAYERS_PER_STEP

    out_shape = (
        jax.ShapeDtypeStruct((B, N), jnp.float32),           # pre, hidden layer 0
        jax.ShapeDtypeStruct((N_PAIRED, B, N), jnp.float32),  # pre, hidden layers 1..6
        jax.ShapeDtypeStruct((B, N), jnp.float32),            # pre, hidden layer 7
        jax.ShapeDtypeStruct((B, 1), jnp.float32),            # predict output
    )

    grid_spec = pltpu.PrefetchScalarGridSpec(
        num_scalar_prefetch=0,
        grid=(N_STEPS,),
        in_specs=[
            pl.BlockSpec((B, K0), lambda s: (0, 0)),            # x        (resident)
            pl.BlockSpec((K0, N), lambda s: (0, 0)),            # W0       (resident, 60 KiB)
            pl.BlockSpec((1, N), lambda s: (0, 0)),             # b0       (resident)
            pl.BlockSpec((P, N, N), lambda s: (s, 0, 0)),       # W pairs  (streamed, 4 MiB bf16/step)
            pl.BlockSpec((N_PAIRED, 1, N), lambda s: (0, 0, 0)),# b pairs  (resident, 24 KiB)
            pl.BlockSpec((N, N), lambda s: (0, 0)),             # W7       (resident, 2 MiB bf16)
            pl.BlockSpec((1, N), lambda s: (0, 0)),             # b7       (resident)
            pl.BlockSpec((N, 1), lambda s: (0, 0)),             # W_pred   (resident, 4 KiB)
            pl.BlockSpec((1, 1), lambda s: (0, 0)),             # b_pred   (resident)
        ],
        out_specs=[
            pl.BlockSpec((B, N), lambda s: (0, 0)),             # pre0   (written @ s==0)
            pl.BlockSpec((P, B, N), lambda s: (s, 0, 0)),       # pre1..6 (lane-dense per-step tile)
            pl.BlockSpec((B, N), lambda s: (0, 0)),             # pre7   (written @ last)
            pl.BlockSpec((B, 1), lambda s: (0, 0)),             # out    (written @ last)
        ],
        # Running activation in bf16 (feeds the MXU directly): 16 KiB.
        scratch_shapes=[pltpu.VMEM((B, N), jnp.bfloat16)],
    )

    return pl.pallas_call(
        _net_kernel,
        out_shape=out_shape,
        grid_spec=grid_spec,
        compiler_params=pltpu.CompilerParams(
            # The layer axis carries a dependency through the activation scratch.
            dimension_semantics=("arbitrary",),
            # Peak VMEM ~14 MiB (2x4 MiB streamed pair buffers + 2x2 MiB W7 +
            # small residents/outputs); 32 MiB is safe on v5e/v6e/v7x.
            vmem_limit_bytes=32 * 1024 * 1024,
        ),
    )(x, w0, b0, wpair, bpair, wlast, blast, wp, bp)


# --------------------------- parameter init --------------------------------

def init_params(key):
    """Deterministic init matching _set_init: weight ~ N(0, 0.1), bias = -0.2.
    Weights stored transposed (in, out).  The seven 1024x1024 weights are
    stored in bf16 and pre-split into 3 streamed pairs + 1 resident layer so
    the jitted forward never copies/slices the 14 MiB stack."""
    k0, ks, kp = jax.random.split(key, 3)
    w0 = 0.1 * jax.random.normal(
        k0, (N_INPUT_FEATURES, N_HIDDEN_NEURON), jnp.float32)
    b0 = jnp.full((1, N_HIDDEN_NEURON), B_INIT, jnp.float32)
    w_big = (0.1 * jax.random.normal(
        ks, (N_STREAMED, N_HIDDEN_NEURON, N_HIDDEN_NEURON), jnp.float32)
             ).astype(jnp.bfloat16)
    b_big = jnp.full((N_STREAMED, 1, N_HIDDEN_NEURON), B_INIT, jnp.float32)
    wp = 0.1 * jax.random.normal(kp, (N_HIDDEN_NEURON, 1), jnp.float32)
    bp = jnp.full((1, 1), B_INIT, jnp.float32)
    return {"w0": w0, "b0": b0,
            "w_pairs": w_big[:N_PAIRED], "b_pairs": b_big[:N_PAIRED],
            "w_last": w_big[N_PAIRED], "b_last": b_big[N_PAIRED],
            "wp": wp, "bp": bp}


# ------------------------------ forward ------------------------------------

@jax.jit
def net_forward(params, x):
    """Mirrors Net.forward with batch_normalization=False.
    Returns (out, layer_input, pre_activation) with the same list structure as
    the PyTorch module (length N_HIDDEN + 1 each).  ReLU outputs are
    recomputed here from the pre-activations (cheaper than writing them from
    the kernel)."""
    pre0, pre_pairs, pre_last, out = net_pallas(x, params)
    pres = ([pre0]
            + [pre_pairs[i] for i in range(N_PAIRED)]
            + [pre_last])
    pre_activation = [x] + pres
    layer_input = [x] + [jnp.maximum(p, 0.0) for p in pres]
    return out, layer_input, pre_activation


# ------------------------------- main ---------------------------------------

if __name__ == "__main__":
    key = jax.random.PRNGKey(0)
    pkey, xkey = jax.random.split(key)
    params = init_params(pkey)

    batch = 8
    x = jax.random.normal(xkey, (batch, N_INPUT_FEATURES), jnp.float32)

    out, layer_input, pre_activation = net_forward(params, x)
    jax.block_until_ready(out)

    # ---- plain-JAX reference with the same numerics (bf16 weights for the
    # ---- big layers, f32 accumulation; f32 for layer 0 and predict) --------
    HI = jax.lax.Precision.HIGHEST

    p = jnp.dot(x, params["w0"], preferred_element_type=jnp.float32,
                precision=HI) + params["b0"]
    ref_pre = [x, p]
    a = jnp.maximum(p, 0.0)
    ref_in = [x, a]

    w_big = [params["w_pairs"][i] for i in range(N_PAIRED)] + [params["w_last"]]
    b_big = [params["b_pairs"][i] for i in range(N_PAIRED)] + [params["b_last"]]
    for i in range(N_STREAMED):
        h = a.astype(jnp.bfloat16)
        p = jnp.dot(h, w_big[i], preferred_element_type=jnp.float32) + b_big[i]
        ref_pre.append(p)
        a = jnp.maximum(p, 0.0)
        ref_in.append(a)
    ref_out = jnp.dot(a, params["wp"], preferred_element_type=jnp.float32,
                      precision=HI) + params["bp"]

    assert out.shape == (batch, 1)
    assert len(layer_input) == N_HIDDEN + 1
    assert len(pre_activation) == N_HIDDEN + 1
    assert jnp.allclose(out, ref_out, atol=1e-2, rtol=1e-2)
    for i in range(1, N_HIDDEN + 1):
        assert jnp.allclose(pre_activation[i], ref_pre[i], atol=1e-2, rtol=1e-2)
        assert jnp.allclose(layer_input[i], ref_in[i], atol=1e-2, rtol=1e-2)

    print("KERNEL_OK")
</pallas_src>

<mosaic_0001>
module attributes {stable_mosaic.version = 11 : i64} {
  func.func @_net_kernel(%arg0: i32, %arg1: memref<8x15xf32, #tpu.memory_space<vmem>>, %arg2: memref<15x1024xf32, #tpu.memory_space<vmem>>, %arg3: memref<1x1024xf32, #tpu.memory_space<vmem>>, %arg4: memref<2x1024x1024xbf16, #tpu.memory_space<vmem>>, %arg5: memref<6x1x1024xf32, #tpu.memory_space<vmem>>, %arg6: memref<1024x1024xbf16, #tpu.memory_space<vmem>>, %arg7: memref<1x1024xf32, #tpu.memory_space<vmem>>, %arg8: memref<1024x1xf32, #tpu.memory_space<vmem>>, %arg9: memref<1x1xf32, #tpu.memory_space<vmem>>, %arg10: memref<8x1024xf32, #tpu.memory_space<vmem>>, %arg11: memref<2x8x1024xf32, #tpu.memory_space<vmem>>, %arg12: memref<8x1024xf32, #tpu.memory_space<vmem>>, %arg13: memref<8x1xf32, #tpu.memory_space<vmem>>, %arg14: memref<8x1024xbf16, #tpu.memory_space<vmem>>) attributes {dimension_semantics = [#tpu.dimension_semantics<arbitrary>], iteration_bounds = array<i64: 3>, scalar_prefetch = 0 : i64, scratch_operands = 1 : i64, tpu.core_type = #tpu.core_type<tc>, window_params = [{pipeline_mode = #tpu.pipeline_mode<synchronous>, transform_indices = @transform_0, window_bounds = array<i64: 8, 15>}, {pipeline_mode = #tpu.pipeline_mode<synchronous>, transform_indices = @transform_1, window_bounds = array<i64: 15, 1024>}, {pipeline_mode = #tpu.pipeline_mode<synchronous>, transform_indices = @transform_2, window_bounds = array<i64: 1, 1024>}, {transform_indices = @transform_3, window_bounds = array<i64: 2, 1024, 1024>}, {pipeline_mode = #tpu.pipeline_mode<synchronous>, transform_indices = @transform_4, window_bounds = array<i64: 6, 1, 1024>}, {pipeline_mode = #tpu.pipeline_mode<synchronous>, transform_indices = @transform_5, window_bounds = array<i64: 1024, 1024>}, {pipeline_mode = #tpu.pipeline_mode<synchronous>, transform_indices = @transform_6, window_bounds = array<i64: 1, 1024>}, {pipeline_mode = #tpu.pipeline_mode<synchronous>, transform_indices = @transform_7, window_bounds = array<i64: 1024, 1>}, {pipeline_mode = #tpu.pipeline_mode<synchronous>, transform_indices = @transform_8, window_bounds = array<i64: 1, 1>}, {pipeline_mode = #tpu.pipeline_mode<synchronous>, transform_indices = @transform_9, window_bounds = array<i64: 8, 1024>}, {transform_indices = @transform_10, window_bounds = array<i64: 2, 8, 1024>}, {pipeline_mode = #tpu.pipeline_mode<synchronous>, transform_indices = @transform_11, window_bounds = array<i64: 8, 1024>}, {pipeline_mode = #tpu.pipeline_mode<synchronous>, transform_indices = @transform_12, window_bounds = array<i64: 8, 1>}]} {
    %c0_i32 = arith.constant 0 : i32
    %0 = arith.cmpi eq, %arg0, %c0_i32 : i32
    %1 = arith.extui %0 : i1 to i32
    %c0_i32_0 = arith.constant 0 : i32
    %2 = arith.cmpi ne, %1, %c0_i32_0 : i32
    scf.if %2 {
      %c0_30 = arith.constant 0 : index
      %c0_31 = arith.constant 0 : index
      %42 = vector.load %arg1[%c0_30, %c0_31] : memref<8x15xf32, #tpu.memory_space<vmem>>, vector<8x15xf32>
      %c0_32 = arith.constant 0 : index
      %c0_33 = arith.constant 0 : index
      %43 = vector.load %arg2[%c0_32, %c0_33] : memref<15x1024xf32, #tpu.memory_space<vmem>>, vector<15x1024xf32>
      %cst_34 = arith.constant dense<0.000000e+00> : vector<8x1024xf32>
      %44 = tpu.matmul %42, %43, %cst_34 {dimension_numbers = #tpu.dot_dimension_numbers<[1], [0], [0], [1], [0, 0, 1, 1], [], []>} : vector<8x15xf32>, vector<15x1024xf32>, vector<8x1024xf32> -> vector<8x1024xf32>
      %c0_35 = arith.constant 0 : index
      %c0_36 = arith.constant 0 : index
      %45 = vector.load %arg3[%c0_35, %c0_36] : memref<1x1024xf32, #tpu.memory_space<vmem>>, vector<1x1024xf32>
      %46 = vector.broadcast %45 : vector<1x1024xf32> to vector<8x1024xf32>
      %47 = arith.addf %44, %46 : vector<8x1024xf32>
      %c0_37 = arith.constant 0 : index
      %c0_38 = arith.constant 0 : index
      %48 = vector.load %arg10[%c0_37, %c0_38] : memref<8x1024xf32, #tpu.memory_space<vmem>>, vector<8x1024xf32>
      tpu.vector_store %arg10[%c0_37, %c0_38], %47 {strides = array<i32>} : memref<8x1024xf32, #tpu.memory_space<vmem>>, vector<8x1024xf32>,
      %cst_39 = arith.constant 0.000000e+00 : f32
      %49 = vector.broadcast %cst_39 : f32 to vector<8x1024xf32>
      %50 = arith.maximumf %47, %49 : vector<8x1024xf32>
      %51 = arith.truncf %50 : vector<8x1024xf32> to vector<8x1024xbf16>
      %c0_40 = arith.constant 0 : index
      %c0_41 = arith.constant 0 : index
      %52 = vector.load %arg14[%c0_40, %c0_41] : memref<8x1024xbf16, #tpu.memory_space<vmem>>, vector<8x1024xbf16>
      tpu.vector_store %arg14[%c0_40, %c0_41], %51 {strides = array<i32>} : memref<8x1024xbf16, #tpu.memory_space<vmem>>, vector<8x1024xbf16>,
    } else {
    }
    %c0 = arith.constant 0 : index
    %c0_1 = arith.constant 0 : index
    %3 = vector.load %arg14[%c0, %c0_1] : memref<8x1024xbf16, #tpu.memory_space<vmem>>, vector<8x1024xbf16>
    %c0_2 = arith.constant 0 : index
    %c0_3 = arith.constant 0 : index
    %c0_4 = arith.constant 0 : index
    %4 = vector.load %arg4[%c0_2, %c0_3, %c0_4] : memref<2x1024x1024xbf16, #tpu.memory_space<vmem>>, vector<1x1024x1024xbf16>
    %5 = vector.shape_cast %4 : vector<1x1024x1024xbf16> to vector<1024x1024xbf16>
    %cst = arith.constant dense<0.000000e+00> : vector<8x1024xf32>
    %6 = tpu.matmul %3, %5, %cst {dimension_numbers = #tpu.dot_dimension_numbers<[1], [0], [0], [1], [0, 0, 1, 1], [], []>} : vector<8x1024xbf16>, vector<1024x1024xbf16>, vector<8x1024xf32> -> vector<8x1024xf32>
    %c2_i32 = arith.constant 2 : i32
    %7 = arith.muli %c2_i32, %arg0 : i32
    %c0_i32_5 = arith.constant 0 : i32
    %8 = arith.addi %7, %c0_i32_5 : i32
    %9 = arith.index_cast %8 : i32 to index
    %c0_6 = arith.constant 0 : index
    %c0_7 = arith.constant 0 : index
    %10 = vector.load %arg5[%9, %c0_6, %c0_7] : memref<6x1x1024xf32, #tpu.memory_space<vmem>>, vector<1x1x1024xf32>
    %11 = vector.shape_cast %10 : vector<1x1x1024xf32> to vector<1x1024xf32>
    %12 = vector.broadcast %11 : vector<1x1024xf32> to vector<8x1024xf32>
    %13 = arith.addf %6, %12 : vector<8x1024xf32>
    %c0_8 = arith.constant 0 : index
    %c0_9 = arith.constant 0 : index
    %c0_10 = arith.constant 0 : index
    %14 = vector.load %arg11[%c0_8, %c0_9, %c0_10] : memref<2x8x1024xf32, #tpu.memory_space<vmem>>, vector<1x8x1024xf32>
    %15 = vector.shape_cast %14 : vector<1x8x1024xf32> to vector<8x1024xf32>
    %16 = vector.shape_cast %13 : vector<8x1024xf32> to vector<1x8x1024xf32>
    tpu.vector_store %arg11[%c0_8, %c0_9, %c0_10], %16 {strides = array<i32>} : memref<2x8x1024xf32, #tpu.memory_space<vmem>>, vector<1x8x1024xf32>,
    %cst_11 = arith.constant 0.000000e+00 : f32
    %17 = vector.broadcast %cst_11 : f32 to vector<8x1024xf32>
    %18 = arith.maximumf %13, %17 : vector<8x1024xf32>
    %19 = arith.truncf %18 : vector<8x1024xf32> to vector<8x1024xbf16>
    %c0_12 = arith.constant 0 : index
    %c0_13 = arith.constant 0 : index
    %20 = vector.load %arg14[%c0_12, %c0_13] : memref<8x1024xbf16, #tpu.memory_space<vmem>>, vector<8x1024xbf16>
    tpu.vector_store %arg14[%c0_12, %c0_13], %19 {strides = array<i32>} : memref<8x1024xbf16, #tpu.memory_space<vmem>>, vector<8x1024xbf16>,
    %c0_14 = arith.constant 0 : index
    %c0_15 = arith.constant 0 : index
    %21 = vector.load %arg14[%c0_14, %c0_15] : memref<8x1024xbf16, #tpu.memory_space<vmem>>, vector<8x1024xbf16>
    %c1 = arith.constant 1 : index
    %c0_16 = arith.constant 0 : index
    %c0_17 = arith.constant 0 : index
    %22 = vector.load %arg4[%c1, %c0_16, %c0_17] : memref<2x1024x1024xbf16, #tpu.memory_space<vmem>>, vector<1x1024x1024xbf16>
    %23 = vector.shape_cast %22 : vector<1x1024x1024xbf16> to vector<1024x1024xbf16>
    %cst_18 = arith.constant dense<0.000000e+00> : vector<8x1024xf32>
    %24 = tpu.matmul %21, %23, %cst_18 {dimension_numbers = #tpu.dot_dimension_numbers<[1], [0], [0], [1], [0, 0, 1, 1], [], []>} : vector<8x1024xbf16>, vector<1024x1024xbf16>, vector<8x1024xf32> -> vector<8x1024xf32>
    %c2_i32_19 = arith.constant 2 : i32
    %25 = arith.muli %c2_i32_19, %arg0 : i32
    %c1_i32 = arith.constant 1 : i32
    %26 = arith.addi %25, %c1_i32 : i32
    %27 = arith.index_cast %26 : i32 to index
    %c0_20 = arith.constant 0 : index
    %c0_21 = arith.constant 0 : index
    %28 = vector.load %arg5[%27, %c0_20, %c0_21] : memref<6x1x1024xf32, #tpu.memory_space<vmem>>, vector<1x1x1024xf32>
    %29 = vector.shape_cast %28 : vector<1x1x1024xf32> to vector<1x1024xf32>
    %30 = vector.broadcast %29 : vector<1x1024xf32> to vector<8x1024xf32>
    %31 = arith.addf %24, %30 : vector<8x1024xf32>
    %c1_22 = arith.constant 1 : index
    %c0_23 = arith.constant 0 : index
    %c0_24 = arith.constant 0 : index
    %32 = vector.load %arg11[%c1_22, %c0_23, %c0_24] : memref<2x8x1024xf32, #tpu.memory_space<vmem>>, vector<1x8x1024xf32>
    %33 = vector.shape_cast %32 : vector<1x8x1024xf32> to vector<8x1024xf32>
    %34 = vector.shape_cast %31 : vector<8x1024xf32> to vector<1x8x1024xf32>
    tpu.vector_store %arg11[%c1_22, %c0_23, %c0_24], %34 {strides = array<i32>} : memref<2x8x1024xf32, #tpu.memory_space<vmem>>, vector<1x8x1024xf32>,
    %cst_25 = arith.constant 0.000000e+00 : f32
    %35 = vector.broadcast %cst_25 : f32 to vector<8x1024xf32>
    %36 = arith.maximumf %31, %35 : vector<8x1024xf32>
    %37 = arith.truncf %36 : vector<8x1024xf32> to vector<8x1024xbf16>
    %c0_26 = arith.constant 0 : index
    %c0_27 = arith.constant 0 : index
    %38 = vector.load %arg14[%c0_26, %c0_27] : memref<8x1024xbf16, #tpu.memory_space<vmem>>, vector<8x1024xbf16>
    tpu.vector_store %arg14[%c0_26, %c0_27], %37 {strides = array<i32>} : memref<8x1024xbf16, #tpu.memory_space<vmem>>, vector<8x1024xbf16>,
    %c2_i32_28 = arith.constant 2 : i32
    %39 = arith.cmpi eq, %arg0, %c2_i32_28 : i32
    %40 = arith.extui %39 : i1 to i32
    %c0_i32_29 = arith.constant 0 : i32
    %41 = arith.cmpi ne, %40, %c0_i32_29 : i32
    scf.if %41 {
      %c0_30 = arith.constant 0 : index
      %c0_31 = arith.constant 0 : index
      %42 = vector.load %arg14[%c0_30, %c0_31] : memref<8x1024xbf16, #tpu.memory_space<vmem>>, vector<8x1024xbf16>
      %c0_32 = arith.constant 0 : index
      %c0_33 = arith.constant 0 : index
      %43 = vector.load %arg6[%c0_32, %c0_33] : memref<1024x1024xbf16, #tpu.memory_space<vmem>>, vector<1024x1024xbf16>
      %cst_34 = arith.constant dense<0.000000e+00> : vector<8x1024xf32>
      %44 = tpu.matmul %42, %43, %cst_34 {dimension_numbers = #tpu.dot_dimension_numbers<[1], [0], [0], [1], [0, 0, 1, 1], [], []>} : vector<8x1024xbf16>, vector<1024x1024xbf16>, vector<8x1024xf32> -> vector<8x1024xf32>
      %c0_35 = arith.constant 0 : index
      %c0_36 = arith.constant 0 : index
      %45 = vector.load %arg7[%c0_35, %c0_36] : memref<1x1024xf32, #tpu.memory_space<vmem>>, vector<1x1024xf32>
      %46 = vector.broadcast %45 : vector<1x1024xf32> to vector<8x1024xf32>
      %47 = arith.addf %44, %46 : vector<8x1024xf32>
      %c0_37 = arith.constant 0 : index
      %c0_38 = arith.constant 0 : index
      %48 = vector.load %arg12[%c0_37, %c0_38] : memref<8x1024xf32, #tpu.memory_space<vmem>>, vector<8x1024xf32>
      tpu.vector_store %arg12[%c0_37, %c0_38], %47 {strides = array<i32>} : memref<8x1024xf32, #tpu.memory_space<vmem>>, vector<8x1024xf32>,
      %cst_39 = arith.constant 0.000000e+00 : f32
      %49 = vector.broadcast %cst_39 : f32 to vector<8x1024xf32>
      %50 = arith.maximumf %47, %49 : vector<8x1024xf32>
      %c0_40 = arith.constant 0 : index
      %c0_41 = arith.constant 0 : index
      %51 = vector.load %arg8[%c0_40, %c0_41] : memref<1024x1xf32, #tpu.memory_space<vmem>>, vector<1024x1xf32>
      %cst_42 = arith.constant dense<0.000000e+00> : vector<8x1xf32>
      %52 = tpu.matmul %50, %51, %cst_42 {dimension_numbers = #tpu.dot_dimension_numbers<[1], [0], [0], [1], [0, 0, 1, 1], [], []>} : vector<8x1024xf32>, vector<1024x1xf32>, vector<8x1xf32> -> vector<8x1xf32>
      %c0_43 = arith.constant 0 : index
      %c0_44 = arith.constant 0 : index
      %53 = vector.load %arg9[%c0_43, %c0_44] : memref<1x1xf32, #tpu.memory_space<vmem>>, vector<1x1xf32>
      %54 = vector.broadcast %53 : vector<1x1xf32> to vector<8x1xf32>
      %55 = arith.addf %52, %54 : vector<8x1xf32>
      %c0_45 = arith.constant 0 : index
      %c0_46 = arith.constant 0 : index
      %56 = vector.load %arg13[%c0_45, %c0_46] : memref<8x1xf32, #tpu.memory_space<vmem>>, vector<8x1xf32>
      tpu.vector_store %arg13[%c0_45, %c0_46], %55 {strides = array<i32>} : memref<8x1xf32, #tpu.memory_space<vmem>>, vector<8x1xf32>,
    } else {
    }
    return
  }
  func.func @transform_0(%arg0: i32) -> (i32, i32) {
    %c0_i32 = arith.constant 0 : i32
    %c0_i32_0 = arith.constant 0 : i32
    %c0_i32_1 = arith.constant 0 : i32
    return %c0_i32, %c0_i32_0 : i32, i32
  }
  func.func @transform_1(%arg0: i32) -> (i32, i32) {
    %c0_i32 = arith.constant 0 : i32
    %c0_i32_0 = arith.constant 0 : i32
    %c0_i32_1 = arith.constant 0 : i32
    return %c0_i32, %c0_i32_0 : i32, i32
  }
  func.func @transform_2(%arg0: i32) -> (i32, i32) {
    %c0_i32 = arith.constant 0 : i32
    %c0_i32_0 = arith.constant 0 : i32
    %c0_i32_1 = arith.constant 0 : i32
    return %c0_i32, %c0_i32_0 : i32, i32
  }
  func.func @transform_3(%arg0: i32) -> (i32, i32, i32) {
    %c0_i32 = arith.constant 0 : i32
    %c0_i32_0 = arith.constant 0 : i32
    %c0_i32_1 = arith.constant 0 : i32
    return %arg0, %c0_i32, %c0_i32_0 : i32, i32, i32
  }
  func.func @transform_4(%arg0: i32) -> (i32, i32, i32) {
    %c0_i32 = arith.constant 0 : i32
    %c0_i32_0 = arith.constant 0 : i32
    %c0_i32_1 = arith.constant 0 : i32
    %c0_i32_2 = arith.constant 0 : i32
    return %c0_i32, %c0_i32_0, %c0_i32_1 : i32, i32, i32
  }
  func.func @transform_5(%arg0: i32) -> (i32, i32) {
    %c0_i32 = arith.constant 0 : i32
    %c0_i32_0 = arith.constant 0 : i32
    %c0_i32_1 = arith.constant 0 : i32
    return %c0_i32, %c0_i32_0 : i32, i32
  }
  func.func @transform_6(%arg0: i32) -> (i32, i32) {
    %c0_i32 = arith.constant 0 : i32
    %c0_i32_0 = arith.constant 0 : i32
    %c0_i32_1 = arith.constant 0 : i32
    return %c0_i32, %c0_i32_0 : i32, i32
  }
  func.func @transform_7(%arg0: i32) -> (i32, i32) {
    %c0_i32 = arith.constant 0 : i32
    %c0_i32_0 = arith.constant 0 : i32
    %c0_i32_1 = arith.constant 0 : i32
    return %c0_i32, %c0_i32_0 : i32, i32
  }
  func.func @transform_8(%arg0: i32) -> (i32, i32) {
    %c0_i32 = arith.constant 0 : i32
    %c0_i32_0 = arith.constant 0 : i32
    %c0_i32_1 = arith.constant 0 : i32
    return %c0_i32, %c0_i32_0 : i32, i32
  }
  func.func @transform_9(%arg0: i32) -> (i32, i32) {
    %c0_i32 = arith.constant 0 : i32
    %c0_i32_0 = arith.constant 0 : i32
    %c0_i32_1 = arith.constant 0 : i32
    return %c0_i32, %c0_i32_0 : i32, i32
  }
  func.func @transform_10(%arg0: i32) -> (i32, i32, i32) {
    %c0_i32 = arith.constant 0 : i32
    %c0_i32_0 = arith.constant 0 : i32
    %c0_i32_1 = arith.constant 0 : i32
    return %arg0, %c0_i32, %c0_i32_0 : i32, i32, i32
  }
  func.func @transform_11(%arg0: i32) -> (i32, i32) {
    %c0_i32 = arith.constant 0 : i32
    %c0_i32_0 = arith.constant 0 : i32
    %c0_i32_1 = arith.constant 0 : i32
    return %c0_i32, %c0_i32_0 : i32, i32
  }
  func.func @transform_12(%arg0: i32) -> (i32, i32) {
    %c0_i32 = arith.constant 0 : i32
    %c0_i32_0 = arith.constant 0 : i32
    %c0_i32_1 = arith.constant 0 : i32
    return %c0_i32, %c0_i32_0 : i32, i32
  }
}

</mosaic_0001>

<bundles_post_ra>
// kernel: net_forward.1
= control target key start
LH: loop header
LB: loop body
LE: loop exit
PB: predicated region body
PF: predicated region fallthrough
CT: control target
= control target key end

     0   :  { %s18248_s0 = inlined_call_operand.hbm [shape: f32[8,15], index: 0, kind: input, shape index: {}]   ;;  %s18249_s1 = inlined_call_operand.hbm [shape: f32[15,1024], index: 1, kind: input, shape index: {}]   ;;  %s18250_s2 = inlined_call_operand.hbm [shape: f32[1,1024], index: 2, kind: input, shape index: {}]   ;;  %s18251_s3 = inlined_call_operand.hbm [shape: bf16[6,1024,1024], index: 3, kind: input, shape index: {}]   ;;  %s18252_s4 = inlined_call_operand.hbm [shape: f32[6,1,1024], index: 4, kind: input, shape index: {}]   ;;  %s18253_s5 = inlined_call_operand.hbm [shape: bf16[1024,1024], index: 5, kind: input, shape index: {}]   ;;  %s18254_s6 = inlined_call_operand.hbm [shape: f32[1,1024], index: 6, kind: input, shape index: {}]   ;;  %s18255_s7 = inlined_call_operand.vmem [shape: f32[1024,1], index: 7, kind: input, shape index: {}]   ;;  %s18256_s8 = inlined_call_operand.<no memory space> [shape: f32[1,1], index: 8, kind: input, shape index: {}]   ;;  %s18257_s9 = inlined_call_operand.vmem [shape: f32[8,1024], index: 9, kind: output, shape index: {0}]   ;;  %s18258_s10 = inlined_call_operand.vmem [shape: f32[6,8,1024], index: 10, kind: output, shape index: {1}]   ;;  %s18259_s11 = inlined_call_operand.vmem [shape: f32[8,1024], index: 11, kind: output, shape index: {2}]   ;;  %s18260_s12 = inlined_call_operand.vmem [shape: f32[8,1], index: 12, kind: output, shape index: {3}]  }
   0x1   :  { %18265 = sst [smem:[#allocation20_spill]] %s18249_s1  ;;  %v18_v0 = vstv %s18256_s8 }
   0x2   :  { %18266 = sst [smem:[#allocation21_spill]] %s18252_s4  ;;  %19 = vst [vmem:[#allocation3] sm:$0x1] %v18_v0 }
   0x3   :  { %18267 = sst [smem:[#allocation22_spill]] %s18255_s7 }
   0x4   :  { %18268 = sst [smem:[#allocation23_spill]] %s18259_s11 }
   0x5   :  { %18269 = sst [smem:[#allocation24_spill]] %s18260_s12 }
   0x6   :  { %20 = vsyncpa [#allocation5], 0 }
   0x7   :  { %21 = vsyncpa [#allocation7], 0 }
   0x8   :  { %22 = vsyncpa [#allocation10], 0 }
   0x9   :  { %24 = vsyncpa [#allocation10 + $0x1], 0 }
   0xa   :  { %25 = vsyncpa [#allocation13], 0  ;;  %s16131_s23 = smov 0   ;;  %s16133_s24 = smov 0  }
   0xb   :  { %s16135_s25 = smov 0   ;;  %s16137_s26 = smov 0  }
   0xc LB: > { %s16048_s8 = smov [#allocation6]   ;;  %s16152_s28 = sadd.s32 4294967295, %s16046_s26   ;;  %s16046_s26 = sphi %s16137_s26, %s18297_s26   ;;  %s16042_s25 = sphi %s16135_s25, %s18296_s25   ;;  %s16038_s24 = sphi %s16133_s24, %s18295_s24   ;;  %s16034_s23 = sphi %s16131_s23, %s18294_s23  }
   0xd   : > { %s342_s27 = sshll.u32 %s16048_s8, 4  ;;  %p13051_p0 = scmp.ge.s32.totalorder %s16046_s26, 1  ;;  %s16158_s27 = int_to_ptr.vmem [resolvable:$true] %s342_s27 }
   0xe   : > { %p18263_p1 = scmp.eq.s32.totalorder %s16152_s28, 0  ;;  %p319_p2 = scmp.lt.s32.totalorder %s16046_s26, 4 }
   0xf   : > { %s16049_s30 = smov [#allocation11]   ;;  %s16050_s15 = smov [#allocation12]  }
  0x10   : > { %p16160_p4 = pnand %p13051_p0, %p319_p2  ;;  %s366_s13 = sshll.u32 %s16049_s30, 4  ;;  %s16172_s13 = int_to_ptr.vmem [resolvable:$true] %s366_s13 }
  0x11   : > { %s16174_s16 = sshll.u32 %s16050_s15, 4  ;;  %s18272_s1 = sld [smem:[#allocation20_spill]]  ;;  %s380_s16 = int_to_ptr.vmem [resolvable:$true] %s16174_s16 }
  0x12   : > { %s18270_s29 = scalar_select %p16160_p4, 1, 0 }
  0x13   : > { %p15691_p5 = pneg %p16160_p4 }
  0x15   : > { %p16168_p6 = pnand %p15691_p5, %p18263_p1 }
  0x17   : > { %s15798_s19 = scalar_lea.hbm %s18272_s1, 2048  ;;  %p16184_p8 = pneg %p16168_p6 }
  0x18   : > { %p15799_p7 = scmp.ne.s32.totalorder %s18272_s1, %s15798_s19  ;;  %p15805_p11 = scmp.lt.u32.totalorder %s15798_s19, %s18272_s1 }
  0x1a   : > { %p15801_p9 = pnand %p16184_p8, %p15799_p7 }
  0x1c   : > { %p15802_p10 = pneg %p15801_p9 }
  0x1e   : > { %p15807_p12 = pnand %p15805_p11, %p15802_p10 }
  0x20   : > { %15810 = shalt.err (!%p15807_p12)
}
  0x21   : > { %s15811_s15 = scalar_lea.vmem %s16158_s27, 2048  ;;  %p15819_p5 = scmp.lt.s32.totalorder %s16158_s27, %s16158_s27 }
  0x22   : > { %p15812_p13 = scmp.ne.s32.totalorder %s16158_s27, %s15811_s15  ;;  %p15820_p3 = scmp.lt.s32.totalorder %s15811_s15, %s15811_s15 }
  0x24   : > { %p15814_p0 = pnand %p15812_p13, %p16184_p8  ;;  %p15821_p7 = por %p15820_p3, %p15819_p5 }
  0x26   : > { %p15815_p2 = pneg %p15814_p0 }
  0x28   : > { %p15822_p9 = pnand %p15821_p7, %p15815_p2 }
  0x2a   : > { %15825 = shalt.err (!%p15822_p9)
}
  0x2b   : > { %s16051_s17 = smov 1024   ;;  %s16052_s18 = smov 64  }
  0x2c   : > { %15697 = dma.hbm_to_vmem [thread:$0]  (!%p16168_p6), %s18272_s1, 2048, %s16158_s27, [#allocation7], %s16051_s17, %s16051_s17, %s16052_s18  }
  0x2d   : > { %s18274_s4 = sld [smem:[#allocation21_spill]] }
  0x33   : > { %s15826_s30 = scalar_lea.hbm %s18274_s4, 768 }
  0x34   : > { %p15827_p3 = scmp.ne.s32.totalorder %s18274_s4, %s15826_s30  ;;  %p15833_p12 = scmp.lt.u32.totalorder %s15826_s30, %s18274_s4 }
  0x36   : > { %p15829_p10 = pnand %p15827_p3, %p16184_p8 }
  0x38   : > { %p15830_p11 = pneg %p15829_p10 }
  0x3a   : > { %p15835_p13 = pnand %p15833_p12, %p15830_p11 }
  0x3c   : > { %15838 = shalt.err (!%p15835_p13)
}
  0x3d   : > { %s15839_s27 = scalar_lea.vmem %s16172_s13, 768  ;;  %p15847_p7 = scmp.lt.s32.totalorder %s16172_s13, %s16172_s13 }
  0x3e   : > { %p15840_p0 = scmp.ne.s32.totalorder %s16172_s13, %s15839_s27  ;;  %p15848_p9 = scmp.lt.s32.totalorder %s15839_s27, %s15839_s27 }
  0x40   : > { %p15842_p2 = pnand %p15840_p0, %p16184_p8  ;;  %p15849_p3 = por %p15848_p9, %p15847_p7 }
  0x42   : > { %p15843_p5 = pneg %p15842_p2 }
  0x44   : > { %p15850_p10 = pnand %p15849_p3, %p15843_p5 }
  0x46   : > { %15853 = shalt.err (!%p15850_p10)
}
  0x47   : > { %s16053_s7 = smov 128   ;;  %s16054_s11 = smov 8  }
  0x48   : > { %15703 = dma.hbm_to_vmem [thread:$0]  (!%p16168_p6), %s18274_s4, 768, %s16172_s13, [#allocation10], %s16053_s7, %s16053_s7, %s16054_s11  }
  0x49   : > { %s15854_s20 = scalar_lea.hbm %s18253_s5, 65536 }
  0x4a   : > { %p15855_p11 = scmp.ne.s32.totalorder %s18253_s5, %s15854_s20  ;;  %p15861_p0 = scmp.lt.u32.totalorder %s15854_s20, %s18253_s5 }
  0x4c   : > { %p15857_p12 = pnand %p15855_p11, %p16184_p8 }
  0x4e   : > { %p15858_p13 = pneg %p15857_p12 }
  0x50   : > { %p15863_p2 = pnand %p15861_p0, %p15858_p13 }
  0x52   : > { %15866 = shalt.err (!%p15863_p2)
}
  0x53   : > { %s15867_s27 = scalar_lea.vmem %s380_s16, 65536  ;;  %p15875_p3 = scmp.lt.s32.totalorder %s380_s16, %s380_s16 }
  0x54   : > { %p15868_p5 = scmp.ne.s32.totalorder %s380_s16, %s15867_s27  ;;  %p15876_p10 = scmp.lt.s32.totalorder %s15867_s27, %s15867_s27 }
  0x56   : > { %p15870_p7 = pnand %p15868_p5, %p16184_p8  ;;  %p15877_p1 = por %p15876_p10, %p15875_p3 }
  0x58   : > { %p15871_p9 = pneg %p15870_p7 }
  0x5a   : > { %p15878_p4 = pnand %p15877_p1, %p15871_p9 }
  0x5c   : > { %15881 = shalt.err (!%p15878_p4)
}
  0x5d   : > { %s16055_s13 = smov 512   ;;  %s16056_s7 = smov 32  }
  0x5e   : > { %15706 = dma.hbm_to_vmem [thread:$0]  (!%p16168_p6), %s18253_s5, 65536, %s380_s16, [#allocation13], %s16055_s13, %s16055_s13, %s16056_s7  }
  0x5f   : > { %s16057_s17 = smov [#allocation4]   ;;  %s16058_s19 = smov [#allocation8]  }
  0x60   : > { %s332_s18 = sshll.u32 %s16057_s17, 4  ;;  %s356_s20 = sshll.u32 %s16058_s19, 4  ;;  %s333_s18 = int_to_ptr.vmem [resolvable:$true] %s332_s18  ;;  %s357_s20 = int_to_ptr.vmem [resolvable:$true] %s356_s20 }
  0x61   : > { %s15882_s30 = scalar_lea.hbm %s18248_s0, 128 }
  0x62   : > { %p15883_p1 = scmp.ne.s32.totalorder %s18248_s0, %s15882_s30  ;;  %p15889_p12 = scmp.lt.u32.totalorder %s15882_s30, %s18248_s0 }
  0x64   : > { %p15885_p4 = pnand %p15883_p1, %p16184_p8 }
  0x66   : > { %p15886_p11 = pneg %p15885_p4 }
  0x68   : > { %p15891_p13 = pnand %p15889_p12, %p15886_p11 }
  0x6a   : > { %15894 = shalt.err (!%p15891_p13)
}
  0x6b   : > { %s15895_s16 = scalar_lea.vmem %s333_s18, 128  ;;  %p15903_p7 = scmp.lt.s32.totalorder %s333_s18, %s333_s18 }
  0x6c   : > { %p15896_p0 = scmp.ne.s32.totalorder %s333_s18, %s15895_s16  ;;  %p15904_p9 = scmp.lt.s32.totalorder %s15895_s16, %s15895_s16 }
  0x6e   : > { %p15898_p2 = pnand %p15896_p0, %p16184_p8  ;;  %p15905_p3 = por %p15904_p9, %p15903_p7 }
  0x70   : > { %p15899_p5 = pneg %p15898_p2 }
  0x72   : > { %p15906_p10 = pnand %p15905_p3, %p15899_p5 }
  0x74   : > { %15909 = shalt.err (!%p15906_p10)
}
  0x75   : > { %15694 = dma.hbm_to_vmem [thread:$0]  (!%p16168_p6), %s18248_s0, 128, %s333_s18, [#allocation5]  }
  0x76   : > { %s15910_s17 = scalar_lea.hbm %s18250_s2, 128 }
  0x77   : > { %p15911_p1 = scmp.ne.s32.totalorder %s18250_s2, %s15910_s17  ;;  %p15917_p12 = scmp.lt.u32.totalorder %s15910_s17, %s18250_s2 }
  0x79   : > { %p15913_p4 = pnand %p15911_p1, %p16184_p8 }
  0x7b   : > { %p15914_p11 = pneg %p15913_p4 }
  0x7d   : > { %p15919_p13 = pnand %p15917_p12, %p15914_p11 }
  0x7f   : > { %15922 = shalt.err (!%p15919_p13)
}
  0x80   : > { %s15923_s15 = scalar_lea.vmem %s357_s20, 128  ;;  %p15931_p7 = scmp.lt.s32.totalorder %s357_s20, %s357_s20 }
  0x81   : > { %p15924_p0 = scmp.ne.s32.totalorder %s357_s20, %s15923_s15  ;;  %p15932_p9 = scmp.lt.s32.totalorder %s15923_s15, %s15923_s15 }
  0x83   : > { %p15926_p2 = pnand %p15924_p0, %p16184_p8  ;;  %p15933_p3 = por %p15932_p9, %p15931_p7 }
  0x85   : > { %p15927_p5 = pneg %p15926_p2 }
  0x87   : > { %p15934_p10 = pnand %p15933_p3, %p15927_p5 }
  0x89   : > { %15937 = shalt.err (!%p15934_p10)
}
  0x8a   : > { %15700 = dma.hbm_to_vmem [thread:$0]  (!%p16168_p6), %s18250_s2, 128, %s357_s20, [#allocation7]  }
  0x8b   : > { %s16059_s16 = smov [#allocation14]   ;;  %s15938_s4 = scalar_lea.hbm %s18254_s6, 128 }
  0x8c   : > { %s393_s11 = sshll.u32 %s16059_s16, 4  ;;  %p15939_p1 = scmp.ne.s32.totalorder %s18254_s6, %s15938_s4  ;;  %s394_s11 = int_to_ptr.vmem [resolvable:$true] %s393_s11 }
  0x8d   : > { %p15945_p12 = scmp.lt.u32.totalorder %s15938_s4, %s18254_s6 }
  0x8e   : > { %p15941_p4 = pnand %p15939_p1, %p16184_p8 }
  0x90   : > { %p15942_p11 = pneg %p15941_p4 }
  0x92   : > { %p15947_p13 = pnand %p15945_p12, %p15942_p11 }
  0x94   : > { %15950 = shalt.err (!%p15947_p13)
}
  0x95   : > { %s15951_s20 = scalar_lea.vmem %s394_s11, 128  ;;  %p15959_p7 = scmp.lt.s32.totalorder %s394_s11, %s394_s11 }
  0x96   : > { %p15952_p0 = scmp.ne.s32.totalorder %s394_s11, %s15951_s20  ;;  %p15960_p9 = scmp.lt.s32.totalorder %s15951_s20, %s15951_s20 }
  0x98   : > { %p15954_p2 = pnand %p15952_p0, %p16184_p8  ;;  %p15961_p3 = por %p15960_p9, %p15959_p7 }
  0x9a   : > { %p15955_p5 = pneg %p15954_p2 }
  0x9c   : > { %p15962_p10 = pnand %p15961_p3, %p15955_p5 }
  0x9e   : > { %15965 = shalt.err (!%p15962_p10)
}
  0x9f   : > { %15709 = dma.hbm_to_vmem [thread:$0]  (!%p16168_p6), %s18254_s6, 128, %s394_s11, [#allocation13]  }
  0xa0   : > { %s16305_s22 = sadd.s32 1, %s16046_s26   ;;  %s101_s14 = sadd.s32 1, %s16042_s25 }
  0xa1   : > { %s98_s18 = ssub.s32 %s16046_s26, %s16305_s22  ;;  %p108_p8 = scmp.ne.s32.totalorder %s16042_s25, %s16038_s24 }
  0xa2   : > { %p99_p1 = scmp.eq.s32.totalorder %s98_s18, 0  ;;  %p109_p4 = scmp.eq.s32.totalorder %s16046_s26, 0 }
  0xa3   : > { %p114_p11 = scmp.ne.s32.totalorder %s16038_s24, %s16034_s23  ;;  %p15720_p12 = scmp.lt.s32.totalorder %s16046_s26, 3 }
  0xa4   : > { %s16317_s27 = scalar_select %p99_p1, %s16042_s25, %s101_s14  }
  0xa5   : > { %p110_p13 = por %p109_p4, %p108_p8  ;;  %p18275_p0 = scmp.eq.s32.totalorder %s16152_s28, 0 }
  0xa6   : > { %s410_s12 = sand.u32 1, %s16046_s26   ;;  %s412_s11 = sand.u32 1, %s16042_s25  }
  0xa7   : > { %p16321_p2 = por %p18275_p0, %p114_p11  ;;  %s13059_s1 = sshll.u32 %s412_s11, 13 }
  0xa8   : > { %s15189_s4 = sshll.u32 %s16046_s26, 17  ;;  %s414_s23 = scalar_lea.vmem [#allocation9], %s13059_s1 }
  0xa9   : > { %s16331_s21 = scalar_lea.hbm %s18251_s3, %s15189_s4  ;;  %s422_s8 = sshll.u32 %s414_s23, 4  ;;  %s16333_s8 = int_to_ptr.vmem [resolvable:$true] %s422_s8 }
  0xaa   : > { %p16335_p6 = pnand %p15720_p12, %p110_p13  ;;  %s16339_s26 = scalar_lea.sflag [#allocation10], %s410_s12 }
  0xab   : > { %s15966_s30 = scalar_lea.hbm %s16331_s21, 131072  ;;  %s15971_s18 = scalar_lea.hbm %s18251_s3, 393216 }
  0xac   : > { %p15967_p5 = scmp.ne.s32.totalorder %s16331_s21, %s15966_s30  ;;  %p15968_p7 = pneg %p16335_p6 }
  0xad   : > { %p15972_p10 = scmp.lt.u32.totalorder %s16331_s21, %s18251_s3  ;;  %p15973_p8 = scmp.lt.u32.totalorder %s15971_s18, %s15966_s30 }
  0xae   : > { %p15969_p9 = pnand %p15968_p7, %p15967_p5  ;;  %p15975_p4 = scmp.lt.u32.totalorder %s15966_s30, %s16331_s21 }
  0xaf   : > { %p15974_p1 = por %p15973_p8, %p15972_p10 }
  0xb0   : > { %p15970_p3 = pneg %p15969_p9 }
  0xb1   : > { %p15976_p11 = por %p15975_p4, %p15974_p1 }
  0xb3   : > { %p15977_p12 = pnand %p15976_p11, %p15970_p3 }
  0xb5   : > { %15980 = shalt.err (!%p15977_p12)
}
  0xb6   : > { %s15981_s12 = scalar_lea.vmem %s16333_s8, 131072  ;;  %s16060_s4 = smov [#allocation9]  }
  0xb7   : > { %p15982_p13 = scmp.ne.s32.totalorder %s16333_s8, %s15981_s12  ;;  %s15986_s17 = sshll.u32 %s16060_s4, 4  ;;  %s15987_s17 = int_to_ptr.vmem [resolvable:$false] %s15986_s17 }
  0xb8   : > { %s15988_s19 = scalar_lea.vmem %s15987_s17, 262144  ;;  %p15989_p9 = scmp.lt.s32.totalorder %s16333_s8, %s15987_s17 }
  0xb9   : > { %p15984_p0 = pnand %p15982_p13, %p15968_p7  ;;  %p15990_p10 = scmp.lt.s32.totalorder %s15988_s19, %s15981_s12 }
  0xbb   : > { %p15985_p5 = pneg %p15984_p0  ;;  %p15991_p8 = por %p15990_p10, %p15989_p9 }
  0xbd   : > { %p15992_p1 = pnand %p15991_p8, %p15985_p5 }
  0xbf   : > { %15995 = shalt.err (!%p15992_p1)
}
  0xc0   : > { %15713 = dma.hbm_to_vmem [thread:$0]  (!%p16335_p6), %s16331_s21, 131072, %s16333_s8, %s16339_s26, %s16055_s13, %s16055_s13, %s16056_s7  }
  0xc1   : > { %p18278_p7 = scmp.ne.s32.totalorder %s18270_s29, 0 }
  0xc2   : > { %p18279_p3 = scmp.eq.s32.totalorder (!%p18278_p7), %s16152_s28, 0 }
  0xc3   : > { %434 = sbr.rel (%p18278_p7) target bundleno = 2657 (0xa61), region = 56 }
  0xca   : > { %16013 = dma.done.wait (%p18279_p3), [#allocation5], 128   ;;  %p18280_p4 = pmov %p18279_p3 }
  0xcb   : > { %p18281_p11 = pmov %p18279_p3 }
  0xcc   : > { %16015 = vsyncadd (%p18280_p4), [#allocation5], 4294967168 }
  0xcd   : > { %16017 = dma.done.wait (%p18281_p11), [#allocation7], 2176   ;;  %p18282_p12 = pmov %p18279_p3 }
  0xce   : > { %s448_s23 = sand.u32 1, %s16152_s28   ;;  %s450_s13 = sand.u32 1, %s16038_s24  }
  0xcf   : > { %16019 = vsyncadd (%p18282_p12), [#allocation7], 4294965120  ;;  %s13067_s7 = sshll.u32 %s450_s13, 13  ;;  %s449_s29 = scalar_lea.sflag [#allocation10], %s448_s23 }
  0xd0   : > { %s16382_s21 = scalar_lea.vmem [#allocation9], %s13067_s7 }
  0xd1   : > { %16021 = dma.done.wait (%p16321_p2), %s449_s29, 131072  }
  0xd2   : > { %16023 = vsyncadd (%p16321_p2), %s449_s29, 4294836224  ;;  %p18283_p6 = pmov %p18279_p3 }
  0xd3   : > { %p18284_p13 = pmov %p18279_p3 }
  0xd4   : > { %16025 = dma.done.wait (%p18283_p6), [#allocation10], 768  }
  0xd5   : > { %16027 = vsyncadd (%p18284_p13), [#allocation10], 4294966528  ;;  %p18285_p0 = pmov %p18279_p3 }
  0xd7   : > { %16029 = dma.done.wait (%p18285_p0), [#allocation13], 65664   ;;  %p18286_p5 = pmov %p18285_p0 }
  0xd8   : > { %s13071_s8 = sshll.u32 %s16152_s28, 1  ;;  %p18287_p2 = scmp.ne.s32.totalorder %s16152_s28, 0 }
  0xd9   : > { %16031 = vsyncadd (%p18286_p5), [#allocation13], 4294901632  ;;  %p508_p9 = scmp.lt.s32.totalorder %s13071_s8, 5  ;;  %v520_v1 = vld [vmem:[#allocation6 + $0x8] sm:$0xff] (!%p18287_p2)  ;;  %vm581_vm0 = vcmask (!%p18287_p2), 1046528   ;;  %v522_v3 = vld [vmem:[#allocation6 + $0x18] sm:$0xff] (!%p18287_p2)  ;;  %v537_v28 = vlaneseq (!%p18287_p2) }
  0xda   : > { %517 = sbr.rel (%p18287_p2) target bundleno = 450 (0x1c2), region = 88  ;;  %v528_v2 = vld [vmem:[#allocation6 + $0x48] sm:$0x7f] (!%p18287_p2)  ;;  %vm16061_vm1 = vmmov (!%p18287_p2), 1   ;;  %v530_v6 = vld [vmem:[#allocation6 + $0x58] sm:$0x7f] (!%p18287_p2) }
  0xdb   : > { %s18299_s8 = smov (!%p508_p9, %s13071_s8), 5  ;;  %v15345_v4 = vpack.c.bf16 (!%p18287_p2), %v528_v2, %v520_v1  ;;  %vm16404_vm2 = vmpackc.low (!%p18287_p2), %vm581_vm0, %vm16061_vm1  ;;  %v519_v7 = vld [vmem:[#allocation6] sm:$0xff] (!%p18287_p2)  ;;  %v15351_v8 = vpack.c.bf16 (!%p18287_p2), %v530_v6, %v522_v3  ;;  %v521_v10 = vld [vmem:[#allocation6 + $0x10] sm:$0xff] (!%p18287_p2)  ;;  %v16062_v12 = vmov (!%p18287_p2), 0.0   ;;  %vm577_vm3 = vcmask (!%p18287_p2), 121856  }
  0xdc   : > { %s15190_s20 = sshll.u32 %s18299_s8, 6  ;;  %v527_v9 = vld [vmem:[#allocation6 + $0x40] sm:$0x7f] (!%p18287_p2)  ;;  %v529_v11 = vld [vmem:[#allocation6 + $0x50] sm:$0x7f] (!%p18287_p2)  ;;  %670 = vmatprep.mubr.f32.mxu0 (!%p18287_p2), %v16062_v12  ;;  %741 = vmatprep.mubr.f32.mxu1 (!%p18287_p2), %v16062_v12  ;;  %v518_v15 = vld [vmem:[#allocation4] sm:$0xff] (!%p18287_p2) }
  0xdd   : > { %s16400_s30 = scalar_lea.vmem %s18258_s10, %s15190_s20  ;;  %15347 = vmatprep.subr.msk.bf16.mxu0 (!%p18287_p2), %vm16404_vm2, %v15345_v4  ;;  %v15348_v13 = vpack.c.bf16 (!%p18287_p2), %v527_v9, %v519_v7  ;;  %v15354_v14 = vpack.c.bf16 (!%p18287_p2), %v529_v11, %v521_v10  ;;  %v524_v16 = vld [vmem:[#allocation6 + $0x28] sm:$0xff] (!%p18287_p2)  ;;  %15353 = vmatprep.subr.msk.bf16.mxu1 (!%p18287_p2), %vm16404_vm2, %v15351_v8  ;;  %v526_v19 = vld [vmem:[#allocation6 + $0x38] sm:$0xff] (!%p18287_p2)  ;;  %v523_v21 = vld [vmem:[#allocation6 + $0x20] sm:$0xff] (!%p18287_p2)  ;;  %v538_v29 = vshrl.u32 (!%p18287_p2), %v537_v28, 7 }
  0xde   : > { %v532_v17 = vld [vmem:[#allocation6 + $0x68] sm:$0x7f] (!%p18287_p2)  ;;  %v534_v20 = vld [vmem:[#allocation6 + $0x78] sm:$0x7f] (!%p18287_p2)  ;;  %v531_v23 = vld [vmem:[#allocation6 + $0x60] sm:$0x7f] (!%p18287_p2) }
  0xdf   : > { %v15357_v18 = vpack.c.bf16 (!%p18287_p2), %v532_v17, %v524_v16  ;;  %15350 = vmatpush1.bf16.msk.msra.mxu0 (!%p18287_p2), %vm16404_vm2, %v15348_v13  ;;  %15356 = vmatpush1.bf16.msk.msra.mxu1 (!%p18287_p2), %vm16404_vm2, %v15354_v14  ;;  %v15363_v22 = vpack.c.bf16 (!%p18287_p2), %v534_v20, %v526_v19  ;;  %v525_v24 = vld [vmem:[#allocation6 + $0x30] sm:$0xff] (!%p18287_p2)  ;;  %v15360_v26 = vpack.c.bf16 (!%p18287_p2), %v531_v23, %v523_v21  ;;  %v539_v30 = vsub.s32 (!%p18287_p2), 0, %v538_v29  ;;  %v535_v32 = vld [vmem:[#allocation8] sm:$0xff] (!%p18287_p2) }
  0xe0   : > { %v533_v25 = vld [vmem:[#allocation6 + $0x70] sm:$0x7f] (!%p18287_p2)  ;;  %v547_v31 = vsub.s32 (!%p18287_p2), 2, %v538_v29  ;;  %v543_v33 = vsub.s32 (!%p18287_p2), 1, %v538_v29  ;;  %v551_v34 = vsub.s32 (!%p18287_p2), 3, %v538_v29  ;;  %v555_v37 = vsub.s32 (!%p18287_p2), 4, %v538_v29 }
  0xe1   : > { %15359 = vmatprep.subr.msk.bf16.mxu0 %vm16404_vm2, %v15357_v18  ;;  %v15366_v27 = vpack.c.bf16 %v533_v25, %v525_v24  ;;  %15365 = vmatprep.subr.msk.bf16.mxu1 %vm16404_vm2, %v15363_v22  ;;  %v540_v35 = vrot.slane %v535_v32, %v539_v30  ;;  %v563_v38 = vsub.s32 6, %v538_v29  ;;  %v559_v41 = vsub.s32 5, %v538_v29 }
  0xe2   : > { %13077 = vmatmul.mubr.msk.f32.vlgmr.msra.gmra.mrb[0].mxu0 %vm577_vm3, %v518_v15  ;;  %13080 = vmatmul.mubr.msk.f32.vlgmr.msra.gmra.mrb[0].mxu1 %vm577_vm3, %v518_v15  ;;  %v548_v36 = vrot.slane %v535_v32, %v547_v31  ;;  %v544_v39 = vrot.slane %v535_v32, %v543_v33  ;;  %v552_v40 = vrot.slane %v535_v32, %v551_v34  ;;  %v567_v42 = vsub.s32 7, %v538_v29 }
  0xe3   : > { %15362 = vmatpush1.bf16.msk.msra.mxu0 %vm16404_vm2, %v15360_v26  ;;  %15368 = vmatpush1.bf16.msk.msra.mxu1 %vm16404_vm2, %v15366_v27  ;;  %v556_v49 = vrot.slane %v535_v32, %v555_v37  ;;  %v564_v50 = vrot.slane %v535_v32, %v563_v38  ;;  %v560_v53 = vrot.slane %v535_v32, %v559_v41 }
  0xe4   : > { %812 = vmatprep.mubr.f32.mxu0 %v16062_v12  ;;  %883 = vmatprep.mubr.f32.mxu1 %v16062_v12  ;;  %v568_v54 = vrot.slane %v535_v32, %v567_v42 }
  0xe6   : > { %13083 = vmatmul.mubr.msk.f32.vlgmr.msra.gmra.mrb[2].mxu0 %vm577_vm3, %v518_v15  ;;  %13086 = vmatmul.mubr.msk.f32.vlgmr.msra.gmra.mrb[2].mxu1 %vm577_vm3, %v518_v15 }
 0x1b5   : > { %v672_v43 = vpop.f32.mrb[0].mxu0  ;;  %v743_v44 = vpop.f32.mrb[0].mxu1 }
 0x1b6   : > { %v673_v45 = vadd.f32 %v672_v43, %v540_v35  ;;  %v744_v46 = vadd.f32 %v743_v44, %v548_v36  ;;  %v674_v47 = vpop.f32.mrb[1].mxu0  ;;  %v745_v48 = vpop.f32.mrb[1].mxu1 }
 0x1b7   : > { %v675_v51 = vadd.f32 %v674_v47, %v544_v39  ;;  %v746_v52 = vadd.f32 %v745_v48, %v552_v40 }
 0x1b8   : > { %890 = vst [vmem:[%s18257_s9] sm:$0xff] %v673_v45  ;;  %v898_v55 = vmax.f32 %v673_v45, 0.0  ;;  %892 = vst [vmem:[%s18257_s9 + $0x10] sm:$0xff] %v744_v46  ;;  %v900_v56 = vmax.f32 %v744_v46, 0.0 }
 0x1b9   : > { %891 = vst [vmem:[%s18257_s9 + $0x8] sm:$0xff] %v675_v51  ;;  %v899_v57 = vmax.f32 %v675_v51, 0.0  ;;  %893 = vst [vmem:[%s18257_s9 + $0x18] sm:$0xff] %v746_v52  ;;  %v901_v58 = vmax.f32 %v746_v52, 0.0  ;;  %v814_v59 = vpop.f32.mrb[2].mxu0  ;;  %v885_v60 = vpop.f32.mrb[2].mxu1 }
 0x1ba   : > { %v815_v61 = vadd.f32 %v814_v59, %v556_v49  ;;  %v886_v62 = vadd.f32 %v885_v60, %v564_v50  ;;  %v816_v63 = vpop.f32.mrb[3].mxu0  ;;  %v887_v0 = vpop.f32.mrb[3].mxu1 }
 0x1bb   : > { %v15191_v1 = vpack.c.bf16 %v899_v57, %v898_v55  ;;  %v15192_v2 = vpack.c.bf16 %v901_v58, %v900_v56  ;;  %v817_v3 = vadd.f32 %v816_v63, %v560_v53  ;;  %v888_v4 = vadd.f32 %v887_v0, %v568_v54 }
 0x1bc   : > { %894 = vst [vmem:[%s18257_s9 + $0x20] sm:$0xff] %v815_v61  ;;  %v902_v5 = vmax.f32 %v815_v61, 0.0  ;;  %896 = vst [vmem:[%s18257_s9 + $0x30] sm:$0xff] %v886_v62  ;;  %v904_v6 = vmax.f32 %v886_v62, 0.0 }
 0x1bd   : > { %938 = vst [vmem:[#allocation2] sm:$0xff] %v15191_v1  ;;  %939 = vst [vmem:[#allocation2 + $0x8] sm:$0xff] %v15192_v2  ;;  %v903_v7 = vmax.f32 %v817_v3, 0.0  ;;  %v905_v8 = vmax.f32 %v888_v4, 0.0 }
 0x1be   : > { %895 = vst [vmem:[%s18257_s9 + $0x28] sm:$0xff] %v817_v3  ;;  %897 = vst [vmem:[%s18257_s9 + $0x38] sm:$0xff] %v888_v4 }
 0x1bf   : > { %v15193_v9 = vpack.c.bf16 %v903_v7, %v902_v5  ;;  %v15194_v10 = vpack.c.bf16 %v905_v8, %v904_v6 }
 0x1c1   : > { %940 = vst [vmem:[#allocation2 + $0x10] sm:$0xff] %v15193_v9  ;;  %941 = vst [vmem:[#allocation2 + $0x18] sm:$0xff] %v15194_v10 }
 0x1c2 PF: > { %v946_v11 = vld [vmem:[%s16382_s21] sm:$0xff]  ;;  %v947_v13 = vld [vmem:[%s16382_s21 + $0x8] sm:$0xff]  ;;  %s15195_s16 = sshll.u32 %s16152_s28, 4  ;;  %p14664_p10 = scmp.ne.s32.totalorder %s16152_s28, 2 }
 0x1c3   : > { %v950_v12 = vld [vmem:[%s16382_s21 + $0x20] sm:$0xff]  ;;  %v951_v15 = vld [vmem:[%s16382_s21 + $0x28] sm:$0xff]  ;;  %s17000_s15 = scalar_lea.vmem [#allocation11], %s15195_s16  ;;  %s18291_s23 = sld [smem:[#allocation22_spill]] (!%p14664_p10)  ;;  %vm12895_vm4 = vcmask (!%p14664_p10), 7168  }
 0x1c4   : > { %v13102_v14 = vcombine.high %v946_v11, %v950_v12  ;;  %v13101_v16 = vcombine.low %v946_v11, %v950_v12  ;;  %v954_v17 = vld [vmem:[%s16382_s21 + $0x40] sm:$0xff]  ;;  %v13104_v19 = vcombine.high %v947_v13, %v951_v15  ;;  %v13103_v20 = vcombine.low %v947_v13, %v951_v15  ;;  %v955_v22 = vld [vmem:[%s16382_s21 + $0x48] sm:$0xff]  ;;  %s18293_s1 = sld [smem:[#allocation24_spill]] (!%p14664_p10) }
 0x1c5   : > { %v958_v18 = vld [vmem:[%s16382_s21 + $0x60] sm:$0xff]  ;;  %v959_v23 = vld [vmem:[%s16382_s21 + $0x68] sm:$0xff] }
 0x1c6   : > { %v13110_v21 = vcombine.high %v954_v17, %v958_v18  ;;  %v962_v24 = vld [vmem:[%s16382_s21 + $0x80] sm:$0xff]  ;;  %4091 = vmatprep.subr.bf16.mxu0 %v13102_v14  ;;  %v13112_v25 = vcombine.high %v955_v22, %v959_v23  ;;  %v963_v27 = vld [vmem:[%s16382_s21 + $0x88] sm:$0xff]  ;;  %4255 = vmatprep.subr.bf16.mxu1 %v13104_v19  ;;  %v13109_v29 = vcombine.low %v954_v17, %v958_v18 }
 0x1c7   : > { %v966_v26 = vld [vmem:[%s16382_s21 + $0xa0] sm:$0xff]  ;;  %v967_v28 = vld [vmem:[%s16382_s21 + $0xa8] sm:$0xff]  ;;  %4092 = vmatpush1.bf16.msra.mxu0 %v13101_v16  ;;  %4256 = vmatpush1.bf16.msra.mxu1 %v13103_v20  ;;  %v13111_v30 = vcombine.low %v955_v22, %v959_v23 }
 0x1c8   : > { %4093 = vmatprep.subr.bf16.mxu0 %v13110_v21  ;;  %v13118_v31 = vcombine.high %v962_v24, %v966_v26  ;;  %4257 = vmatprep.subr.bf16.mxu1 %v13112_v25  ;;  %v13120_v32 = vcombine.high %v963_v27, %v967_v28  ;;  %v970_v33 = vld [vmem:[%s16382_s21 + $0xc0] sm:$0xff]  ;;  %v971_v35 = vld [vmem:[%s16382_s21 + $0xc8] sm:$0xff]  ;;  %v13117_v37 = vcombine.low %v962_v24, %v966_v26 }
 0x1c9   : > { %v974_v34 = vld [vmem:[%s16382_s21 + $0xe0] sm:$0xff]  ;;  %v975_v36 = vld [vmem:[%s16382_s21 + $0xe8] sm:$0xff]  ;;  %v13119_v38 = vcombine.low %v963_v27, %v967_v28  ;;  %s18292_s13 = smov (!%p14664_p10), %s18291_s23 }
 0x1ca   : > { %v13126_v39 = vcombine.high %v970_v33, %v974_v34  ;;  %v13128_v40 = vcombine.high %v971_v35, %v975_v36  ;;  %v978_v41 = vld [vmem:[%s16382_s21 + $0x100] sm:$0xff]  ;;  %v979_v43 = vld [vmem:[%s16382_s21 + $0x108] sm:$0xff]  ;;  %v13125_v45 = vcombine.low %v970_v33, %v974_v34  ;;  %v13127_v46 = vcombine.low %v971_v35, %v975_v36 }
 0x1cb   : > { %4094 = vmatpush1.bf16.msra.mxu0 %v13109_v29  ;;  %4258 = vmatpush1.bf16.msra.mxu1 %v13111_v30  ;;  %v982_v42 = vld [vmem:[%s16382_s21 + $0x120] sm:$0xff]  ;;  %v983_v44 = vld [vmem:[%s16382_s21 + $0x128] sm:$0xff] }
 0x1cc   : > { %4095 = vmatprep.subr.bf16.mxu0 %v13118_v31  ;;  %4259 = vmatprep.subr.bf16.mxu1 %v13120_v32  ;;  %v13134_v47 = vcombine.high %v978_v41, %v982_v42  ;;  %v13136_v48 = vcombine.high %v979_v43, %v983_v44  ;;  %v986_v49 = vld [vmem:[%s16382_s21 + $0x140] sm:$0xff]  ;;  %v987_v51 = vld [vmem:[%s16382_s21 + $0x148] sm:$0xff]  ;;  %v13133_v53 = vcombine.low %v978_v41, %v982_v42 }
 0x1cd   : > { %v990_v50 = vld [vmem:[%s16382_s21 + $0x160] sm:$0xff]  ;;  %v991_v52 = vld [vmem:[%s16382_s21 + $0x168] sm:$0xff]  ;;  %v13135_v54 = vcombine.low %v979_v43, %v983_v44 }
 0x1ce   : > { %v13142_v55 = vcombine.high %v986_v49, %v990_v50  ;;  %v13144_v56 = vcombine.high %v987_v51, %v991_v52  ;;  %v994_v57 = vld [vmem:[%s16382_s21 + $0x180] sm:$0xff]  ;;  %v995_v59 = vld [vmem:[%s16382_s21 + $0x188] sm:$0xff]  ;;  %v13141_v61 = vcombine.low %v986_v49, %v990_v50  ;;  %v13143_v62 = vcombine.low %v987_v51, %v991_v52 }
 0x1cf   : > { %4096 = vmatpush1.bf16.msra.mxu0 %v13117_v37  ;;  %4260 = vmatpush1.bf16.msra.mxu1 %v13119_v38  ;;  %v998_v58 = vld [vmem:[%s16382_s21 + $0x1a0] sm:$0xff]  ;;  %v999_v60 = vld [vmem:[%s16382_s21 + $0x1a8] sm:$0xff] }
 0x1d0   : > { %4097 = vmatprep.subr.bf16.mxu0 %v13126_v39  ;;  %4261 = vmatprep.subr.bf16.mxu1 %v13128_v40  ;;  %v13150_v63 = vcombine.high %v994_v57, %v998_v58  ;;  %v16480_v0 = vld [vmem:[#allocation2] sm:$0xff]  ;;  %v13152_v1 = vcombine.high %v995_v59, %v999_v60  ;;  %v1002_v2 = vld [vmem:[%s16382_s21 + $0x1c0] sm:$0xff]  ;;  %v13149_v7 = vcombine.low %v994_v57, %v998_v58 }
 0x1d1   : > { %v1006_v3 = vld [vmem:[%s16382_s21 + $0x1e0] sm:$0xff]  ;;  %v16486_v4 = vcombine.high %v16480_v0, %v16480_v0  ;;  %v1003_v5 = vld [vmem:[%s16382_s21 + $0x1c8] sm:$0xff]  ;;  %v13151_v8 = vcombine.low %v995_v59, %v999_v60 }
 0x1d2   : > { %v1007_v6 = vld [vmem:[%s16382_s21 + $0x1e8] sm:$0xff]  ;;  %v13158_v9 = vcombine.high %v1002_v2, %v1006_v3  ;;  %v1010_v11 = vld [vmem:[%s16382_s21 + $0x200] sm:$0xff]  ;;  %v13157_v15 = vcombine.low %v1002_v2, %v1006_v3 }
 0x1d3   : > { %4098 = vmatpush1.bf16.msra.mxu0 %v13125_v45  ;;  %4262 = vmatpush1.bf16.msra.mxu1 %v13127_v46  ;;  %v13160_v10 = vcombine.high %v1003_v5, %v1007_v6  ;;  %v1014_v12 = vld [vmem:[%s16382_s21 + $0x220] sm:$0xff]  ;;  %v1011_v13 = vld [vmem:[%s16382_s21 + $0x208] sm:$0xff]  ;;  %v13159_v16 = vcombine.low %v1003_v5, %v1007_v6 }
 0x1d4   : > { %4099 = vmatprep.subr.bf16.mxu0 %v13134_v47  ;;  %4263 = vmatprep.subr.bf16.mxu1 %v13136_v48  ;;  %v1015_v14 = vld [vmem:[%s16382_s21 + $0x228] sm:$0xff]  ;;  %v13166_v17 = vcombine.high %v1010_v11, %v1014_v12  ;;  %v1018_v19 = vld [vmem:[%s16382_s21 + $0x240] sm:$0xff]  ;;  %v13165_v23 = vcombine.low %v1010_v11, %v1014_v12 }
 0x1d5   : > { %4123 = vmatprep.mubr.bf16.mxu0 %v16486_v4  ;;  %4287 = vmatprep.mubr.bf16.mxu1 %v16486_v4  ;;  %v13168_v18 = vcombine.high %v1011_v13, %v1015_v14  ;;  %v1022_v20 = vld [vmem:[%s16382_s21 + $0x260] sm:$0xff]  ;;  %v1019_v21 = vld [vmem:[%s16382_s21 + $0x248] sm:$0xff]  ;;  %v13167_v24 = vcombine.low %v1011_v13, %v1015_v14 }
 0x1d6   : > { %v1023_v22 = vld [vmem:[%s16382_s21 + $0x268] sm:$0xff]  ;;  %v13174_v25 = vcombine.high %v1018_v19, %v1022_v20  ;;  %v1026_v27 = vld [vmem:[%s16382_s21 + $0x280] sm:$0xff]  ;;  %v13173_v31 = vcombine.low %v1018_v19, %v1022_v20 }
 0x1d7   : > { %4100 = vmatpush1.bf16.msra.mxu0 %v13133_v53  ;;  %4264 = vmatpush1.bf16.msra.mxu1 %v13135_v54  ;;  %v13176_v26 = vcombine.high %v1019_v21, %v1023_v22  ;;  %v1030_v28 = vld [vmem:[%s16382_s21 + $0x2a0] sm:$0xff]  ;;  %v1027_v29 = vld [vmem:[%s16382_s21 + $0x288] sm:$0xff]  ;;  %v13175_v32 = vcombine.low %v1019_v21, %v1023_v22 }
 0x1d8   : > { %4101 = vmatprep.subr.bf16.mxu0 %v13142_v55  ;;  %4265 = vmatprep.subr.bf16.mxu1 %v13144_v56  ;;  %v1031_v30 = vld [vmem:[%s16382_s21 + $0x2a8] sm:$0xff]  ;;  %v13182_v33 = vcombine.high %v1026_v27, %v1030_v28  ;;  %v1034_v35 = vld [vmem:[%s16382_s21 + $0x2c0] sm:$0xff]  ;;  %v13181_v39 = vcombine.low %v1026_v27, %v1030_v28 }
 0x1d9   : > { %v13184_v34 = vcombine.high %v1027_v29, %v1031_v30  ;;  %v1038_v36 = vld [vmem:[%s16382_s21 + $0x2e0] sm:$0xff]  ;;  %v1035_v37 = vld [vmem:[%s16382_s21 + $0x2c8] sm:$0xff]  ;;  %v13183_v40 = vcombine.low %v1027_v29, %v1031_v30 }
 0x1da   : > { %v1039_v38 = vld [vmem:[%s16382_s21 + $0x2e8] sm:$0xff]  ;;  %v13190_v41 = vcombine.high %v1034_v35, %v1038_v36  ;;  %v1042_v43 = vld [vmem:[%s16382_s21 + $0x300] sm:$0xff]  ;;  %v13189_v47 = vcombine.low %v1034_v35, %v1038_v36 }
 0x1db   : > { %4102 = vmatpush1.bf16.msra.mxu0 %v13141_v61  ;;  %4266 = vmatpush1.bf16.msra.mxu1 %v13143_v62  ;;  %v13192_v42 = vcombine.high %v1035_v37, %v1039_v38  ;;  %v1046_v44 = vld [vmem:[%s16382_s21 + $0x320] sm:$0xff]  ;;  %v1043_v45 = vld [vmem:[%s16382_s21 + $0x308] sm:$0xff]  ;;  %v13191_v48 = vcombine.low %v1035_v37, %v1039_v38 }
 0x1dc   : > { %4103 = vmatprep.subr.bf16.mxu0 %v13150_v63  ;;  %4267 = vmatprep.subr.bf16.mxu1 %v13152_v1  ;;  %v1047_v46 = vld [vmem:[%s16382_s21 + $0x328] sm:$0xff]  ;;  %v13198_v49 = vcombine.high %v1042_v43, %v1046_v44  ;;  %v1050_v51 = vld [vmem:[%s16382_s21 + $0x340] sm:$0xff]  ;;  %v13197_v55 = vcombine.low %v1042_v43, %v1046_v44 }
 0x1dd   : > { %v13200_v50 = vcombine.high %v1043_v45, %v1047_v46  ;;  %v1054_v52 = vld [vmem:[%s16382_s21 + $0x360] sm:$0xff]  ;;  %v1051_v53 = vld [vmem:[%s16382_s21 + $0x348] sm:$0xff]  ;;  %v13199_v56 = vcombine.low %v1043_v45, %v1047_v46 }
 0x1de   : > { %v1055_v54 = vld [vmem:[%s16382_s21 + $0x368] sm:$0xff]  ;;  %v13206_v57 = vcombine.high %v1050_v51, %v1054_v52  ;;  %v1058_v59 = vld [vmem:[%s16382_s21 + $0x380] sm:$0xff]  ;;  %v13205_v63 = vcombine.low %v1050_v51, %v1054_v52 }
 0x1df   : > { %4104 = vmatpush1.bf16.msra.mxu0 %v13149_v7  ;;  %4268 = vmatpush1.bf16.msra.mxu1 %v13151_v8  ;;  %v13208_v58 = vcombine.high %v1051_v53, %v1055_v54  ;;  %v1062_v60 = vld [vmem:[%s16382_s21 + $0x3a0] sm:$0xff]  ;;  %v1059_v61 = vld [vmem:[%s16382_s21 + $0x388] sm:$0xff]  ;;  %v13207_v1 = vcombine.low %v1051_v53, %v1055_v54 }
 0x1e0   : > { %4105 = vmatprep.subr.bf16.mxu0 %v13158_v9  ;;  %4269 = vmatprep.subr.bf16.mxu1 %v13160_v10  ;;  %v1063_v62 = vld [vmem:[%s16382_s21 + $0x3a8] sm:$0xff]  ;;  %v13214_v2 = vcombine.high %v1058_v59, %v1062_v60  ;;  %v1066_v5 = vld [vmem:[%s16382_s21 + $0x3c0] sm:$0xff]  ;;  %v13213_v9 = vcombine.low %v1058_v59, %v1062_v60 }
 0x1e1   : > { %v13216_v3 = vcombine.high %v1059_v61, %v1063_v62  ;;  %v1070_v6 = vld [vmem:[%s16382_s21 + $0x3e0] sm:$0xff]  ;;  %v1067_v7 = vld [vmem:[%s16382_s21 + $0x3c8] sm:$0xff]  ;;  %v13215_v10 = vcombine.low %v1059_v61, %v1063_v62 }
 0x1e2   : > { %v1071_v8 = vld [vmem:[%s16382_s21 + $0x3e8] sm:$0xff]  ;;  %v13222_v11 = vcombine.high %v1066_v5, %v1070_v6  ;;  %v1074_v13 = vld [vmem:[%s16382_s21 + $0x400] sm:$0xff] }
 0x1e3   : > { %4106 = vmatpush1.bf16.msra.mxu0 %v13157_v15  ;;  %4270 = vmatpush1.bf16.msra.mxu1 %v13159_v16  ;;  %v13224_v12 = vcombine.high %v1067_v7, %v1071_v8  ;;  %v1078_v14 = vld [vmem:[%s16382_s21 + $0x420] sm:$0xff]  ;;  %v1075_v15 = vld [vmem:[%s16382_s21 + $0x408] sm:$0xff] }
 0x1e4   : > { %4107 = vmatprep.subr.bf16.mxu0 %v13166_v17  ;;  %4271 = vmatprep.subr.bf16.mxu1 %v13168_v18  ;;  %v1079_v16 = vld [vmem:[%s16382_s21 + $0x428] sm:$0xff]  ;;  %v13221_v17 = vcombine.low %v1066_v5, %v1070_v6  ;;  %v13223_v18 = vcombine.low %v1067_v7, %v1071_v8  ;;  %v13230_v19 = vcombine.high %v1074_v13, %v1078_v14  ;;  %v1082_v21 = vld [vmem:[%s16382_s21 + $0x440] sm:$0xff] }
 0x1e5   : > { %v13232_v20 = vcombine.high %v1075_v15, %v1079_v16  ;;  %v1086_v22 = vld [vmem:[%s16382_s21 + $0x460] sm:$0xff]  ;;  %v13229_v27 = vcombine.low %v1074_v13, %v1078_v14  ;;  %v13231_v28 = vcombine.low %v1075_v15, %v1079_v16 }
 0x1e6   : > { %v13238_v29 = vcombine.high %v1082_v21, %v1086_v22  ;;  %v13237_v35 = vcombine.low %v1082_v21, %v1086_v22 }
 0x1e7   : > { %4108 = vmatpush1.bf16.msra.mxu0 %v13165_v23  ;;  %4272 = vmatpush1.bf16.msra.mxu1 %v13167_v24  ;;  %v16532_v23 = vcombine.low %v16480_v0, %v16480_v0  ;;  %v1083_v24 = vld [vmem:[%s16382_s21 + $0x448] sm:$0xff] }
 0x1e8   : > { %4109 = vmatprep.subr.bf16.mxu0 %v13174_v25  ;;  %4273 = vmatprep.subr.bf16.mxu1 %v13176_v26  ;;  %v1087_v25 = vld [vmem:[%s16382_s21 + $0x468] sm:$0xff]  ;;  %v16536_v26 = vld [vmem:[#allocation2 + $0x8] sm:$0xff] }
 0x1e9   : > { %v13240_v30 = vcombine.high %v1083_v24, %v1087_v25  ;;  %v16542_v0 = vcombine.high %v16536_v26, %v16536_v26  ;;  %v13239_v36 = vcombine.low %v1083_v24, %v1087_v25 }
 0x1eb   : > { %4110 = vmatpush1.bf16.msra.mxu0 %v13173_v31  ;;  %4274 = vmatpush1.bf16.msra.mxu1 %v13175_v32  ;;  %v1090_v31 = vld [vmem:[%s16382_s21 + $0x480] sm:$0xff] }
 0x1ec   : > { %4111 = vmatprep.subr.bf16.mxu0 %v13182_v33  ;;  %4275 = vmatprep.subr.bf16.mxu1 %v13184_v34  ;;  %v1094_v32 = vld [vmem:[%s16382_s21 + $0x4a0] sm:$0xff]  ;;  %v1091_v33 = vld [vmem:[%s16382_s21 + $0x488] sm:$0xff] }
 0x1ed   : > { %v1095_v34 = vld [vmem:[%s16382_s21 + $0x4a8] sm:$0xff]  ;;  %v13246_v37 = vcombine.high %v1090_v31, %v1094_v32  ;;  %v13245_v43 = vcombine.low %v1090_v31, %v1094_v32 }
 0x1ee   : > { %v13248_v38 = vcombine.high %v1091_v33, %v1095_v34  ;;  %v13247_v44 = vcombine.low %v1091_v33, %v1095_v34 }
 0x1ef   : > { %4112 = vmatpush1.bf16.msra.mxu0 %v13181_v39  ;;  %4276 = vmatpush1.bf16.msra.mxu1 %v13183_v40  ;;  %v1098_v39 = vld [vmem:[%s16382_s21 + $0x4c0] sm:$0xff] }
 0x1f0   : > { %4113 = vmatprep.subr.bf16.mxu0 %v13190_v41  ;;  %4277 = vmatprep.subr.bf16.mxu1 %v13192_v42  ;;  %v1102_v40 = vld [vmem:[%s16382_s21 + $0x4e0] sm:$0xff]  ;;  %v1099_v41 = vld [vmem:[%s16382_s21 + $0x4c8] sm:$0xff] }
 0x1f1   : > { %v1103_v42 = vld [vmem:[%s16382_s21 + $0x4e8] sm:$0xff]  ;;  %v13254_v45 = vcombine.high %v1098_v39, %v1102_v40  ;;  %v13253_v51 = vcombine.low %v1098_v39, %v1102_v40 }
 0x1f2   : > { %v13256_v46 = vcombine.high %v1099_v41, %v1103_v42  ;;  %v13255_v52 = vcombine.low %v1099_v41, %v1103_v42 }
 0x1f3   : > { %4114 = vmatpush1.bf16.msra.mxu0 %v13189_v47  ;;  %4278 = vmatpush1.bf16.msra.mxu1 %v13191_v48  ;;  %v1106_v47 = vld [vmem:[%s16382_s21 + $0x500] sm:$0xff] }
 0x1f4   : > { %4115 = vmatprep.subr.bf16.mxu0 %v13198_v49  ;;  %4279 = vmatprep.subr.bf16.mxu1 %v13200_v50  ;;  %v1110_v48 = vld [vmem:[%s16382_s21 + $0x520] sm:$0xff]  ;;  %v1107_v49 = vld [vmem:[%s16382_s21 + $0x508] sm:$0xff] }
 0x1f5   : > { %v1111_v50 = vld [vmem:[%s16382_s21 + $0x528] sm:$0xff]  ;;  %v13262_v53 = vcombine.high %v1106_v47, %v1110_v48  ;;  %v13261_v59 = vcombine.low %v1106_v47, %v1110_v48 }
 0x1f6   : > { %v13264_v54 = vcombine.high %v1107_v49, %v1111_v50  ;;  %v13263_v60 = vcombine.low %v1107_v49, %v1111_v50 }
 0x1f7   : > { %4116 = vmatpush1.bf16.msra.mxu0 %v13197_v55  ;;  %4280 = vmatpush1.bf16.msra.mxu1 %v13199_v56  ;;  %v1114_v55 = vld [vmem:[%s16382_s21 + $0x540] sm:$0xff] }
 0x1f8   : > { %4117 = vmatprep.subr.bf16.mxu0 %v13206_v57  ;;  %4281 = vmatprep.subr.bf16.mxu1 %v13208_v58  ;;  %v1118_v56 = vld [vmem:[%s16382_s21 + $0x560] sm:$0xff]  ;;  %v1115_v57 = vld [vmem:[%s16382_s21 + $0x548] sm:$0xff] }
 0x1f9   : > { %v1119_v58 = vld [vmem:[%s16382_s21 + $0x568] sm:$0xff]  ;;  %v13270_v61 = vcombine.high %v1114_v55, %v1118_v56  ;;  %v13269_v5 = vcombine.low %v1114_v55, %v1118_v56 }
 0x1fa   : > { %v13272_v62 = vcombine.high %v1115_v57, %v1119_v58  ;;  %v13271_v6 = vcombine.low %v1115_v57, %v1119_v58 }
 0x1fb   : > { %4118 = vmatpush1.bf16.msra.mxu0 %v13205_v63  ;;  %4282 = vmatpush1.bf16.msra.mxu1 %v13207_v1  ;;  %v1122_v63 = vld [vmem:[%s16382_s21 + $0x580] sm:$0xff] }
 0x1fc   : > { %4119 = vmatprep.subr.bf16.mxu0 %v13214_v2  ;;  %4283 = vmatprep.subr.bf16.mxu1 %v13216_v3  ;;  %v1126_v1 = vld [vmem:[%s16382_s21 + $0x5a0] sm:$0xff]  ;;  %v1123_v2 = vld [vmem:[%s16382_s21 + $0x588] sm:$0xff] }
 0x1fd   : > { %v1127_v3 = vld [vmem:[%s16382_s21 + $0x5a8] sm:$0xff]  ;;  %v13278_v7 = vcombine.high %v1122_v63, %v1126_v1  ;;  %v13277_v13 = vcombine.low %v1122_v63, %v1126_v1 }
 0x1fe   : > { %v13280_v8 = vcombine.high %v1123_v2, %v1127_v3  ;;  %v13279_v14 = vcombine.low %v1123_v2, %v1127_v3 }
 0x1ff   : > { %4120 = vmatpush1.bf16.msra.mxu0 %v13213_v9  ;;  %4284 = vmatpush1.bf16.msra.mxu1 %v13215_v10  ;;  %v1130_v9 = vld [vmem:[%s16382_s21 + $0x5c0] sm:$0xff] }
 0x200   : > { %4121 = vmatprep.subr.bf16.mxu0 %v13222_v11  ;;  %4285 = vmatprep.subr.bf16.mxu1 %v13224_v12  ;;  %v1134_v10 = vld [vmem:[%s16382_s21 + $0x5e0] sm:$0xff]  ;;  %v1131_v11 = vld [vmem:[%s16382_s21 + $0x5c8] sm:$0xff] }
 0x201   : > { %v1135_v12 = vld [vmem:[%s16382_s21 + $0x5e8] sm:$0xff]  ;;  %v13286_v15 = vcombine.high %v1130_v9, %v1134_v10  ;;  %v13285_v21 = vcombine.low %v1130_v9, %v1134_v10 }
 0x202   : > { %v13288_v16 = vcombine.high %v1131_v11, %v1135_v12  ;;  %v13287_v22 = vcombine.low %v1131_v11, %v1135_v12 }
 0x203   : > { %4122 = vmatpush1.bf16.msra.mxu0 %v13221_v17  ;;  %4286 = vmatpush1.bf16.msra.mxu1 %v13223_v18  ;;  %v1138_v17 = vld [vmem:[%s16382_s21 + $0x600] sm:$0xff] }
 0x204   : > { %4132 = vmatprep.subr.bf16.mxu0 %v13230_v19  ;;  %4296 = vmatprep.subr.bf16.mxu1 %v13232_v20  ;;  %v1142_v18 = vld [vmem:[%s16382_s21 + $0x620] sm:$0xff]  ;;  %v1139_v19 = vld [vmem:[%s16382_s21 + $0x608] sm:$0xff] }
 0x205   : > { %v1143_v20 = vld [vmem:[%s16382_s21 + $0x628] sm:$0xff]  ;;  %v13294_v24 = vcombine.high %v1138_v17, %v1142_v18  ;;  %v13293_v31 = vcombine.low %v1138_v17, %v1142_v18 }
 0x206   : > { %4124 = vmatmul.mubr.bf16.vlgmr.msra.gmra.mrb[0].mxu0 %v16532_v23  ;;  %4288 = vmatmul.mubr.bf16.vlgmr.msra.gmra.mrb[0].mxu1 %v16532_v23  ;;  %v13296_v25 = vcombine.high %v1139_v19, %v1143_v20  ;;  %v13295_v32 = vcombine.low %v1139_v19, %v1143_v20 }
 0x207   : > { %4133 = vmatpush1.bf16.msra.mxu0 %v13229_v27  ;;  %4297 = vmatpush1.bf16.msra.mxu1 %v13231_v28  ;;  %v1146_v27 = vld [vmem:[%s16382_s21 + $0x640] sm:$0xff] }
 0x208   : > { %4134 = vmatprep.subr.bf16.mxu0 %v13238_v29  ;;  %4298 = vmatprep.subr.bf16.mxu1 %v13240_v30  ;;  %v1150_v28 = vld [vmem:[%s16382_s21 + $0x660] sm:$0xff]  ;;  %v1147_v29 = vld [vmem:[%s16382_s21 + $0x648] sm:$0xff] }
 0x209   : > { %4164 = vmatprep.mubr.bf16.mxu0 %v16542_v0  ;;  %4328 = vmatprep.mubr.bf16.mxu1 %v16542_v0  ;;  %v1151_v30 = vld [vmem:[%s16382_s21 + $0x668] sm:$0xff]  ;;  %v13302_v33 = vcombine.high %v1146_v27, %v1150_v28  ;;  %v13301_v39 = vcombine.low %v1146_v27, %v1150_v28 }
 0x20a   : > { %v13304_v34 = vcombine.high %v1147_v29, %v1151_v30  ;;  %v13303_v40 = vcombine.low %v1147_v29, %v1151_v30 }
 0x20b   : > { %4135 = vmatpush1.bf16.msra.mxu0 %v13237_v35  ;;  %4299 = vmatpush1.bf16.msra.mxu1 %v13239_v36  ;;  %v1154_v35 = vld [vmem:[%s16382_s21 + $0x680] sm:$0xff] }
 0x20c   : > { %4136 = vmatprep.subr.bf16.mxu0 %v13246_v37  ;;  %4300 = vmatprep.subr.bf16.mxu1 %v13248_v38  ;;  %v1158_v36 = vld [vmem:[%s16382_s21 + $0x6a0] sm:$0xff]  ;;  %v1155_v37 = vld [vmem:[%s16382_s21 + $0x688] sm:$0xff] }
 0x20d   : > { %v1159_v38 = vld [vmem:[%s16382_s21 + $0x6a8] sm:$0xff]  ;;  %v13310_v41 = vcombine.high %v1154_v35, %v1158_v36  ;;  %v13309_v47 = vcombine.low %v1154_v35, %v1158_v36  ;;  %v16614_v36 = vld [vmem:[#allocation2 + $0x10] sm:$0xff] }
 0x20e   : > { %v13312_v42 = vcombine.high %v1155_v37, %v1159_v38  ;;  %v13311_v48 = vcombine.low %v1155_v37, %v1159_v38  ;;  %v1215_v35 = vld [vmem:[%s16382_s21 + $0x868] sm:$0xff] }
 0x20f   : > { %4137 = vmatpush1.bf16.msra.mxu0 %v13245_v43  ;;  %4301 = vmatpush1.bf16.msra.mxu1 %v13247_v44  ;;  %v1162_v43 = vld [vmem:[%s16382_s21 + $0x6c0] sm:$0xff] }
 0x210   : > { %4138 = vmatprep.subr.bf16.mxu0 %v13254_v45  ;;  %4302 = vmatprep.subr.bf16.mxu1 %v13256_v46  ;;  %v1166_v44 = vld [vmem:[%s16382_s21 + $0x6e0] sm:$0xff]  ;;  %v1163_v45 = vld [vmem:[%s16382_s21 + $0x6c8] sm:$0xff] }
 0x211   : > { %v1167_v46 = vld [vmem:[%s16382_s21 + $0x6e8] sm:$0xff]  ;;  %v13318_v49 = vcombine.high %v1162_v43, %v1166_v44  ;;  %v13317_v55 = vcombine.low %v1162_v43, %v1166_v44 }
 0x212   : > { %v13320_v50 = vcombine.high %v1163_v45, %v1167_v46  ;;  %v13319_v56 = vcombine.low %v1163_v45, %v1167_v46  ;;  %v1219_v43 = vld [vmem:[%s16382_s21 + $0x888] sm:$0xff] }
 0x213   : > { %4139 = vmatpush1.bf16.msra.mxu0 %v13253_v51  ;;  %4303 = vmatpush1.bf16.msra.mxu1 %v13255_v52  ;;  %v1170_v51 = vld [vmem:[%s16382_s21 + $0x700] sm:$0xff]  ;;  %v1223_v44 = vld [vmem:[%s16382_s21 + $0x8a8] sm:$0xff] }
 0x214   : > { %4140 = vmatprep.subr.bf16.mxu0 %v13262_v53  ;;  %4304 = vmatprep.subr.bf16.mxu1 %v13264_v54  ;;  %v1174_v52 = vld [vmem:[%s16382_s21 + $0x720] sm:$0xff]  ;;  %v1171_v53 = vld [vmem:[%s16382_s21 + $0x708] sm:$0xff] }
 0x215   : > { %v1175_v54 = vld [vmem:[%s16382_s21 + $0x728] sm:$0xff]  ;;  %v13326_v57 = vcombine.high %v1170_v51, %v1174_v52  ;;  %v13325_v63 = vcombine.low %v1170_v51, %v1174_v52 }
 0x216   : > { %v13328_v58 = vcombine.high %v1171_v53, %v1175_v54  ;;  %v13327_v1 = vcombine.low %v1171_v53, %v1175_v54  ;;  %v1227_v51 = vld [vmem:[%s16382_s21 + $0x8c8] sm:$0xff]  ;;  %v13375_v54 = vcombine.low %v1219_v43, %v1223_v44 }
 0x217   : > { %4141 = vmatpush1.bf16.msra.mxu0 %v13261_v59  ;;  %4305 = vmatpush1.bf16.msra.mxu1 %v13263_v60  ;;  %v1178_v59 = vld [vmem:[%s16382_s21 + $0x740] sm:$0xff]  ;;  %v1231_v52 = vld [vmem:[%s16382_s21 + $0x8e8] sm:$0xff] }
 0x218   : > { %4142 = vmatprep.subr.bf16.mxu0 %v13270_v61  ;;  %4306 = vmatprep.subr.bf16.mxu1 %v13272_v62  ;;  %v1182_v60 = vld [vmem:[%s16382_s21 + $0x760] sm:$0xff]  ;;  %v1179_v61 = vld [vmem:[%s16382_s21 + $0x748] sm:$0xff] }
 0x219   : > { %v1183_v62 = vld [vmem:[%s16382_s21 + $0x768] sm:$0xff]  ;;  %v13334_v2 = vcombine.high %v1178_v59, %v1182_v60  ;;  %v13333_v9 = vcombine.low %v1178_v59, %v1182_v60 }
 0x21a   : > { %v13336_v3 = vcombine.high %v1179_v61, %v1183_v62  ;;  %v13335_v10 = vcombine.low %v1179_v61, %v1183_v62  ;;  %v1235_v59 = vld [vmem:[%s16382_s21 + $0x908] sm:$0xff]  ;;  %v13383_v62 = vcombine.low %v1227_v51, %v1231_v52 }
 0x21b   : > { %4143 = vmatpush1.bf16.msra.mxu0 %v13269_v5  ;;  %4307 = vmatpush1.bf16.msra.mxu1 %v13271_v6  ;;  %v1186_v5 = vld [vmem:[%s16382_s21 + $0x780] sm:$0xff]  ;;  %v1239_v60 = vld [vmem:[%s16382_s21 + $0x928] sm:$0xff] }
 0x21c   : > { %4144 = vmatprep.subr.bf16.mxu0 %v13278_v7  ;;  %4308 = vmatprep.subr.bf16.mxu1 %v13280_v8  ;;  %v1190_v6 = vld [vmem:[%s16382_s21 + $0x7a0] sm:$0xff]  ;;  %v1187_v7 = vld [vmem:[%s16382_s21 + $0x788] sm:$0xff] }
 0x21d   : > { %v1191_v8 = vld [vmem:[%s16382_s21 + $0x7a8] sm:$0xff]  ;;  %v13342_v11 = vcombine.high %v1186_v5, %v1190_v6  ;;  %v13341_v17 = vcombine.low %v1186_v5, %v1190_v6 }
 0x21e   : > { %v13344_v12 = vcombine.high %v1187_v7, %v1191_v8  ;;  %v13343_v18 = vcombine.low %v1187_v7, %v1191_v8  ;;  %v1243_v5 = vld [vmem:[%s16382_s21 + $0x948] sm:$0xff]  ;;  %v13391_v8 = vcombine.low %v1235_v59, %v1239_v60 }
 0x21f   : > { %4145 = vmatpush1.bf16.msra.mxu0 %v13277_v13  ;;  %4309 = vmatpush1.bf16.msra.mxu1 %v13279_v14  ;;  %v1194_v13 = vld [vmem:[%s16382_s21 + $0x7c0] sm:$0xff]  ;;  %v1247_v6 = vld [vmem:[%s16382_s21 + $0x968] sm:$0xff] }
 0x220   : > { %4146 = vmatprep.subr.bf16.mxu0 %v13286_v15  ;;  %4310 = vmatprep.subr.bf16.mxu1 %v13288_v16  ;;  %v1198_v14 = vld [vmem:[%s16382_s21 + $0x7e0] sm:$0xff]  ;;  %v1195_v15 = vld [vmem:[%s16382_s21 + $0x7c8] sm:$0xff] }
 0x221   : > { %v1199_v16 = vld [vmem:[%s16382_s21 + $0x7e8] sm:$0xff]  ;;  %v13350_v19 = vcombine.high %v1194_v13, %v1198_v14  ;;  %v13349_v27 = vcombine.low %v1194_v13, %v1198_v14 }
 0x222   : > { %v13352_v20 = vcombine.high %v1195_v15, %v1199_v16  ;;  %v13351_v28 = vcombine.low %v1195_v15, %v1199_v16  ;;  %v1251_v13 = vld [vmem:[%s16382_s21 + $0x988] sm:$0xff]  ;;  %v13399_v16 = vcombine.low %v1243_v5, %v1247_v6 }
 0x223   : > { %4147 = vmatpush1.bf16.msra.mxu0 %v13285_v21  ;;  %4311 = vmatpush1.bf16.msra.mxu1 %v13287_v22  ;;  %v1202_v21 = vld [vmem:[%s16382_s21 + $0x800] sm:$0xff]  ;;  %v1255_v14 = vld [vmem:[%s16382_s21 + $0x9a8] sm:$0xff] }
 0x224   : > { %4148 = vmatprep.subr.bf16.mxu0 %v13294_v24  ;;  %4312 = vmatprep.subr.bf16.mxu1 %v13296_v25  ;;  %v1206_v22 = vld [vmem:[%s16382_s21 + $0x820] sm:$0xff]  ;;  %v1203_v24 = vld [vmem:[%s16382_s21 + $0x808] sm:$0xff] }
 0x225   : > { %v1207_v25 = vld [vmem:[%s16382_s21 + $0x828] sm:$0xff]  ;;  %v13358_v29 = vcombine.high %v1202_v21, %v1206_v22  ;;  %v13357_v37 = vcombine.low %v1202_v21, %v1206_v22 }
 0x226   : > { %v13360_v30 = vcombine.high %v1203_v24, %v1207_v25  ;;  %v13359_v38 = vcombine.low %v1203_v24, %v1207_v25  ;;  %v1259_v21 = vld [vmem:[%s16382_s21 + $0x9c8] sm:$0xff]  ;;  %v13407_v25 = vcombine.low %v1251_v13, %v1255_v14 }
 0x227   : > { %4149 = vmatpush1.bf16.msra.mxu0 %v13293_v31  ;;  %4313 = vmatpush1.bf16.msra.mxu1 %v13295_v32  ;;  %v1210_v31 = vld [vmem:[%s16382_s21 + $0x840] sm:$0xff]  ;;  %v1263_v22 = vld [vmem:[%s16382_s21 + $0x9e8] sm:$0xff] }
 0x228   : > { %4150 = vmatprep.subr.bf16.mxu0 %v13302_v33  ;;  %4314 = vmatprep.subr.bf16.mxu1 %v13304_v34  ;;  %v1214_v32 = vld [vmem:[%s16382_s21 + $0x860] sm:$0xff]  ;;  %v16610_v33 = vcombine.low %v16536_v26, %v16536_v26  ;;  %v1211_v34 = vld [vmem:[%s16382_s21 + $0x848] sm:$0xff]  ;;  %v16620_v26 = vcombine.high %v16614_v36, %v16614_v36 }
 0x229   : > { %v13365_v45 = vcombine.low %v1210_v31, %v1214_v32  ;;  %v13367_v46 = vcombine.low %v1211_v34, %v1215_v35 }
 0x22b   : > { %4151 = vmatpush1.bf16.msra.mxu0 %v13301_v39  ;;  %4315 = vmatpush1.bf16.msra.mxu1 %v13303_v40  ;;  %v13366_v39 = vcombine.high %v1210_v31, %v1214_v32  ;;  %v13368_v40 = vcombine.high %v1211_v34, %v1215_v35  ;;  %v1267_v31 = vld [vmem:[%s16382_s21 + $0xa08] sm:$0xff]  ;;  %v13415_v35 = vcombine.low %v1259_v21, %v1263_v22 }
 0x22c   : > { %4152 = vmatprep.subr.bf16.mxu0 %v13310_v41  ;;  %4316 = vmatprep.subr.bf16.mxu1 %v13312_v42  ;;  %v1218_v41 = vld [vmem:[%s16382_s21 + $0x880] sm:$0xff]  ;;  %v1271_v32 = vld [vmem:[%s16382_s21 + $0xa28] sm:$0xff] }
 0x22d   : > { %v1222_v42 = vld [vmem:[%s16382_s21 + $0x8a0] sm:$0xff] }
 0x22e   : > { %v13373_v53 = vcombine.low %v1218_v41, %v1222_v42 }
 0x22f   : > { %4153 = vmatpush1.bf16.msra.mxu0 %v13309_v47  ;;  %4317 = vmatpush1.bf16.msra.mxu1 %v13311_v48  ;;  %v13374_v47 = vcombine.high %v1218_v41, %v1222_v42  ;;  %v13376_v48 = vcombine.high %v1219_v43, %v1223_v44  ;;  %v1275_v41 = vld [vmem:[%s16382_s21 + $0xa48] sm:$0xff]  ;;  %v13423_v44 = vcombine.low %v1267_v31, %v1271_v32 }
 0x230   : > { %4154 = vmatprep.subr.bf16.mxu0 %v13318_v49  ;;  %4318 = vmatprep.subr.bf16.mxu1 %v13320_v50  ;;  %v1226_v49 = vld [vmem:[%s16382_s21 + $0x8c0] sm:$0xff]  ;;  %v1279_v42 = vld [vmem:[%s16382_s21 + $0xa68] sm:$0xff] }
 0x231   : > { %v1230_v50 = vld [vmem:[%s16382_s21 + $0x8e0] sm:$0xff] }
 0x232   : > { %v13381_v61 = vcombine.low %v1226_v49, %v1230_v50 }
 0x233   : > { %4155 = vmatpush1.bf16.msra.mxu0 %v13317_v55  ;;  %4319 = vmatpush1.bf16.msra.mxu1 %v13319_v56  ;;  %v13382_v55 = vcombine.high %v1226_v49, %v1230_v50  ;;  %v13384_v56 = vcombine.high %v1227_v51, %v1231_v52  ;;  %v1283_v49 = vld [vmem:[%s16382_s21 + $0xa88] sm:$0xff]  ;;  %v13431_v52 = vcombine.low %v1275_v41, %v1279_v42 }
 0x234   : > { %4156 = vmatprep.subr.bf16.mxu0 %v13326_v57  ;;  %4320 = vmatprep.subr.bf16.mxu1 %v13328_v58  ;;  %v1234_v57 = vld [vmem:[%s16382_s21 + $0x900] sm:$0xff]  ;;  %v1287_v50 = vld [vmem:[%s16382_s21 + $0xaa8] sm:$0xff] }
 0x235   : > { %v1238_v58 = vld [vmem:[%s16382_s21 + $0x920] sm:$0xff] }
 0x236   : > { %v13389_v7 = vcombine.low %v1234_v57, %v1238_v58 }
 0x237   : > { %4157 = vmatpush1.bf16.msra.mxu0 %v13325_v63  ;;  %4321 = vmatpush1.bf16.msra.mxu1 %v13327_v1  ;;  %v13390_v63 = vcombine.high %v1234_v57, %v1238_v58  ;;  %v13392_v1 = vcombine.high %v1235_v59, %v1239_v60  ;;  %v1291_v57 = vld [vmem:[%s16382_s21 + $0xac8] sm:$0xff]  ;;  %v13439_v60 = vcombine.low %v1283_v49, %v1287_v50 }
 0x238   : > { %4158 = vmatprep.subr.bf16.mxu0 %v13334_v2  ;;  %4322 = vmatprep.subr.bf16.mxu1 %v13336_v3  ;;  %v1242_v2 = vld [vmem:[%s16382_s21 + $0x940] sm:$0xff]  ;;  %v1295_v58 = vld [vmem:[%s16382_s21 + $0xae8] sm:$0xff] }
 0x239   : > { %v1246_v3 = vld [vmem:[%s16382_s21 + $0x960] sm:$0xff] }
 0x23a   : > { %v13397_v15 = vcombine.low %v1242_v2, %v1246_v3 }
 0x23b   : > { %4159 = vmatpush1.bf16.msra.mxu0 %v13333_v9  ;;  %4323 = vmatpush1.bf16.msra.mxu1 %v13335_v10  ;;  %v13398_v9 = vcombine.high %v1242_v2, %v1246_v3  ;;  %v13400_v10 = vcombine.high %v1243_v5, %v1247_v6  ;;  %v1299_v2 = vld [vmem:[%s16382_s21 + $0xb08] sm:$0xff]  ;;  %v13447_v6 = vcombine.low %v1291_v57, %v1295_v58 }
 0x23c   : > { %4160 = vmatprep.subr.bf16.mxu0 %v13342_v11  ;;  %4324 = vmatprep.subr.bf16.mxu1 %v13344_v12  ;;  %v1250_v11 = vld [vmem:[%s16382_s21 + $0x980] sm:$0xff]  ;;  %v1303_v3 = vld [vmem:[%s16382_s21 + $0xb28] sm:$0xff] }
 0x23d   : > { %v1254_v12 = vld [vmem:[%s16382_s21 + $0x9a0] sm:$0xff] }
 0x23e   : > { %v13405_v24 = vcombine.low %v1250_v11, %v1254_v12 }
 0x23f   : > { %4161 = vmatpush1.bf16.msra.mxu0 %v13341_v17  ;;  %4325 = vmatpush1.bf16.msra.mxu1 %v13343_v18  ;;  %v13406_v17 = vcombine.high %v1250_v11, %v1254_v12  ;;  %v13408_v18 = vcombine.high %v1251_v13, %v1255_v14  ;;  %v1307_v11 = vld [vmem:[%s16382_s21 + $0xb48] sm:$0xff]  ;;  %v13455_v14 = vcombine.low %v1299_v2, %v1303_v3 }
 0x240   : > { %4162 = vmatprep.subr.bf16.mxu0 %v13350_v19  ;;  %4326 = vmatprep.subr.bf16.mxu1 %v13352_v20  ;;  %v1258_v19 = vld [vmem:[%s16382_s21 + $0x9c0] sm:$0xff]  ;;  %v1311_v12 = vld [vmem:[%s16382_s21 + $0xb68] sm:$0xff] }
 0x241   : > { %v1262_v20 = vld [vmem:[%s16382_s21 + $0x9e0] sm:$0xff] }
 0x242   : > { %v13413_v34 = vcombine.low %v1258_v19, %v1262_v20 }
 0x243   : > { %4163 = vmatpush1.bf16.msra.mxu0 %v13349_v27  ;;  %4327 = vmatpush1.bf16.msra.mxu1 %v13351_v28  ;;  %v13414_v27 = vcombine.high %v1258_v19, %v1262_v20  ;;  %v13416_v28 = vcombine.high %v1259_v21, %v1263_v22  ;;  %v1315_v19 = vld [vmem:[%s16382_s21 + $0xb88] sm:$0xff]  ;;  %v13463_v22 = vcombine.low %v1307_v11, %v1311_v12 }
 0x244   : > { %4173 = vmatprep.subr.bf16.mxu0 %v13358_v29  ;;  %4337 = vmatprep.subr.bf16.mxu1 %v13360_v30  ;;  %v1266_v29 = vld [vmem:[%s16382_s21 + $0xa00] sm:$0xff]  ;;  %v1319_v20 = vld [vmem:[%s16382_s21 + $0xba8] sm:$0xff] }
 0x245   : > { %v1270_v30 = vld [vmem:[%s16382_s21 + $0xa20] sm:$0xff] }
 0x246   : > { %4165 = vmatmul.mubr.bf16.vlgmr.msra.gmra.mrb[0].mxu0 %v16610_v33  ;;  %4329 = vmatmul.mubr.bf16.vlgmr.msra.gmra.mrb[0].mxu1 %v16610_v33  ;;  %v13421_v43 = vcombine.low %v1266_v29, %v1270_v30 }
 0x247   : > { %4174 = vmatpush1.bf16.msra.mxu0 %v13357_v37  ;;  %4338 = vmatpush1.bf16.msra.mxu1 %v13359_v38  ;;  %v13422_v37 = vcombine.high %v1266_v29, %v1270_v30  ;;  %v13424_v38 = vcombine.high %v1267_v31, %v1271_v32  ;;  %v1323_v29 = vld [vmem:[%s16382_s21 + $0xbc8] sm:$0xff]  ;;  %v13471_v32 = vcombine.low %v1315_v19, %v1319_v20 }
 0x248   : > { %4175 = vmatprep.subr.bf16.mxu0 %v13366_v39  ;;  %4339 = vmatprep.subr.bf16.mxu1 %v13368_v40  ;;  %v1274_v39 = vld [vmem:[%s16382_s21 + $0xa40] sm:$0xff]  ;;  %v1327_v30 = vld [vmem:[%s16382_s21 + $0xbe8] sm:$0xff] }
 0x249   : > { %4205 = vmatprep.mubr.bf16.mxu0 %v16620_v26  ;;  %4369 = vmatprep.mubr.bf16.mxu1 %v16620_v26  ;;  %v1278_v40 = vld [vmem:[%s16382_s21 + $0xa60] sm:$0xff] }
 0x24a   : > { %v13429_v51 = vcombine.low %v1274_v39, %v1278_v40 }
 0x24b   : > { %4176 = vmatpush1.bf16.msra.mxu0 %v13365_v45  ;;  %4340 = vmatpush1.bf16.msra.mxu1 %v13367_v46  ;;  %v13430_v45 = vcombine.high %v1274_v39, %v1278_v40  ;;  %v13432_v46 = vcombine.high %v1275_v41, %v1279_v42  ;;  %v1331_v39 = vld [vmem:[%s16382_s21 + $0xc08] sm:$0xff]  ;;  %v13479_v42 = vcombine.low %v1323_v29, %v1327_v30 }
 0x24c   : > { %4177 = vmatprep.subr.bf16.mxu0 %v13374_v47  ;;  %4341 = vmatprep.subr.bf16.mxu1 %v13376_v48  ;;  %v1282_v47 = vld [vmem:[%s16382_s21 + $0xa80] sm:$0xff]  ;;  %v1335_v40 = vld [vmem:[%s16382_s21 + $0xc28] sm:$0xff] }
 0x24d   : > { %v1286_v48 = vld [vmem:[%s16382_s21 + $0xaa0] sm:$0xff] }
 0x24e   : > { %v13437_v59 = vcombine.low %v1282_v47, %v1286_v48 }
 0x24f   : > { %4178 = vmatpush1.bf16.msra.mxu0 %v13373_v53  ;;  %4342 = vmatpush1.bf16.msra.mxu1 %v13375_v54  ;;  %v13438_v53 = vcombine.high %v1282_v47, %v1286_v48  ;;  %v13440_v54 = vcombine.high %v1283_v49, %v1287_v50  ;;  %v16688_v47 = vcombine.low %v16614_v36, %v16614_v36  ;;  %v1339_v48 = vld [vmem:[%s16382_s21 + $0xc48] sm:$0xff] }
 0x250   : > { %4179 = vmatprep.subr.bf16.mxu0 %v13382_v55  ;;  %4343 = vmatprep.subr.bf16.mxu1 %v13384_v56  ;;  %v1290_v55 = vld [vmem:[%s16382_s21 + $0xac0] sm:$0xff]  ;;  %v1343_v49 = vld [vmem:[%s16382_s21 + $0xc68] sm:$0xff] }
 0x251   : > { %v1294_v56 = vld [vmem:[%s16382_s21 + $0xae0] sm:$0xff] }
 0x252   : > { %v13445_v5 = vcombine.low %v1290_v55, %v1294_v56  ;;  %v16692_v50 = vld [vmem:[#allocation2 + $0x18] sm:$0xff] }
 0x253   : > { %4180 = vmatpush1.bf16.msra.mxu0 %v13381_v61  ;;  %4344 = vmatpush1.bf16.msra.mxu1 %v13383_v62  ;;  %v13446_v61 = vcombine.high %v1290_v55, %v1294_v56  ;;  %v13448_v62 = vcombine.high %v1291_v57, %v1295_v58  ;;  %v1346_v55 = vld [vmem:[%s16382_s21 + $0xc80] sm:$0xff]  ;;  %v16698_v36 = vcombine.high %v16692_v50, %v16692_v50  ;;  %v1347_v57 = vld [vmem:[%s16382_s21 + $0xc88] sm:$0xff] }
 0x254   : > { %4181 = vmatprep.subr.bf16.mxu0 %v13390_v63  ;;  %4345 = vmatprep.subr.bf16.mxu1 %v13392_v1  ;;  %v1298_v63 = vld [vmem:[%s16382_s21 + $0xb00] sm:$0xff]  ;;  %v1351_v58 = vld [vmem:[%s16382_s21 + $0xca8] sm:$0xff] }
 0x255   : > { %v1302_v1 = vld [vmem:[%s16382_s21 + $0xb20] sm:$0xff] }
 0x256   : > { %v13453_v13 = vcombine.low %v1298_v63, %v1302_v1  ;;  %v1350_v56 = vld [vmem:[%s16382_s21 + $0xca0] sm:$0xff] }
 0x257   : > { %4182 = vmatpush1.bf16.msra.mxu0 %v13389_v7  ;;  %4346 = vmatpush1.bf16.msra.mxu1 %v13391_v8  ;;  %v13454_v7 = vcombine.high %v1298_v63, %v1302_v1  ;;  %v13456_v8 = vcombine.high %v1299_v2, %v1303_v3  ;;  %v1354_v63 = vld [vmem:[%s16382_s21 + $0xcc0] sm:$0xff]  ;;  %v1355_v2 = vld [vmem:[%s16382_s21 + $0xcc8] sm:$0xff] }
 0x258   : > { %4183 = vmatprep.subr.bf16.mxu0 %v13398_v9  ;;  %4347 = vmatprep.subr.bf16.mxu1 %v13400_v10  ;;  %v1306_v9 = vld [vmem:[%s16382_s21 + $0xb40] sm:$0xff]  ;;  %v1359_v3 = vld [vmem:[%s16382_s21 + $0xce8] sm:$0xff] }
 0x259   : > { %v1310_v10 = vld [vmem:[%s16382_s21 + $0xb60] sm:$0xff] }
 0x25a   : > { %v13461_v21 = vcombine.low %v1306_v9, %v1310_v10  ;;  %v1358_v1 = vld [vmem:[%s16382_s21 + $0xce0] sm:$0xff] }
 0x25b   : > { %4184 = vmatpush1.bf16.msra.mxu0 %v13397_v15  ;;  %4348 = vmatpush1.bf16.msra.mxu1 %v13399_v16  ;;  %v13462_v15 = vcombine.high %v1306_v9, %v1310_v10  ;;  %v13464_v16 = vcombine.high %v1307_v11, %v1311_v12  ;;  %v1362_v9 = vld [vmem:[%s16382_s21 + $0xd00] sm:$0xff]  ;;  %v1363_v11 = vld [vmem:[%s16382_s21 + $0xd08] sm:$0xff] }
 0x25c   : > { %4185 = vmatprep.subr.bf16.mxu0 %v13406_v17  ;;  %4349 = vmatprep.subr.bf16.mxu1 %v13408_v18  ;;  %v1314_v17 = vld [vmem:[%s16382_s21 + $0xb80] sm:$0xff]  ;;  %v1367_v12 = vld [vmem:[%s16382_s21 + $0xd28] sm:$0xff] }
 0x25d   : > { %v1318_v18 = vld [vmem:[%s16382_s21 + $0xba0] sm:$0xff] }
 0x25e   : > { %v13469_v31 = vcombine.low %v1314_v17, %v1318_v18  ;;  %v1366_v10 = vld [vmem:[%s16382_s21 + $0xd20] sm:$0xff] }
 0x25f   : > { %4186 = vmatpush1.bf16.msra.mxu0 %v13405_v24  ;;  %4350 = vmatpush1.bf16.msra.mxu1 %v13407_v25  ;;  %v13470_v24 = vcombine.high %v1314_v17, %v1318_v18  ;;  %v13472_v25 = vcombine.high %v1315_v19, %v1319_v20  ;;  %v1370_v17 = vld [vmem:[%s16382_s21 + $0xd40] sm:$0xff]  ;;  %v1371_v19 = vld [vmem:[%s16382_s21 + $0xd48] sm:$0xff] }
 0x260   : > { %4187 = vmatprep.subr.bf16.mxu0 %v13414_v27  ;;  %4351 = vmatprep.subr.bf16.mxu1 %v13416_v28  ;;  %v1322_v27 = vld [vmem:[%s16382_s21 + $0xbc0] sm:$0xff]  ;;  %v1375_v20 = vld [vmem:[%s16382_s21 + $0xd68] sm:$0xff] }
 0x261   : > { %v1326_v28 = vld [vmem:[%s16382_s21 + $0xbe0] sm:$0xff] }
 0x262   : > { %v13477_v41 = vcombine.low %v1322_v27, %v1326_v28  ;;  %v1374_v18 = vld [vmem:[%s16382_s21 + $0xd60] sm:$0xff] }
 0x263   : > { %4188 = vmatpush1.bf16.msra.mxu0 %v13413_v34  ;;  %4352 = vmatpush1.bf16.msra.mxu1 %v13415_v35  ;;  %v13478_v34 = vcombine.high %v1322_v27, %v1326_v28  ;;  %v13480_v35 = vcombine.high %v1323_v29, %v1327_v30  ;;  %v1378_v27 = vld [vmem:[%s16382_s21 + $0xd80] sm:$0xff]  ;;  %v1379_v29 = vld [vmem:[%s16382_s21 + $0xd88] sm:$0xff] }
 0x264   : > { %4189 = vmatprep.subr.bf16.mxu0 %v13422_v37  ;;  %4353 = vmatprep.subr.bf16.mxu1 %v13424_v38  ;;  %v1330_v37 = vld [vmem:[%s16382_s21 + $0xc00] sm:$0xff]  ;;  %v1383_v30 = vld [vmem:[%s16382_s21 + $0xda8] sm:$0xff] }
 0x265   : > { %v1334_v38 = vld [vmem:[%s16382_s21 + $0xc20] sm:$0xff] }
 0x266   : > { %v1382_v28 = vld [vmem:[%s16382_s21 + $0xda0] sm:$0xff] }
 0x267   : > { %4190 = vmatpush1.bf16.msra.mxu0 %v13421_v43  ;;  %4354 = vmatpush1.bf16.msra.mxu1 %v13423_v44  ;;  %v13486_v43 = vcombine.high %v1330_v37, %v1334_v38  ;;  %v13488_v44 = vcombine.high %v1331_v39, %v1335_v40 }
 0x268   : > { %4191 = vmatprep.subr.bf16.mxu0 %v13430_v45  ;;  %4355 = vmatprep.subr.bf16.mxu1 %v13432_v46  ;;  %v1338_v45 = vld [vmem:[%s16382_s21 + $0xc40] sm:$0xff] }
 0x269   : > { %v1342_v46 = vld [vmem:[%s16382_s21 + $0xc60] sm:$0xff] }
 0x26b   : > { %4192 = vmatpush1.bf16.msra.mxu0 %v13429_v51  ;;  %4356 = vmatpush1.bf16.msra.mxu1 %v13431_v52  ;;  %v13485_v51 = vcombine.low %v1330_v37, %v1334_v38  ;;  %v13487_v52 = vcombine.low %v1331_v39, %v1335_v40  ;;  %v1386_v37 = vld [vmem:[%s16382_s21 + $0xdc0] sm:$0xff]  ;;  %v1387_v39 = vld [vmem:[%s16382_s21 + $0xdc8] sm:$0xff] }
 0x26c   : > { %4193 = vmatprep.subr.bf16.mxu0 %v13438_v53  ;;  %4357 = vmatprep.subr.bf16.mxu1 %v13440_v54  ;;  %v13494_v53 = vcombine.high %v1338_v45, %v1342_v46  ;;  %v13496_v54 = vcombine.high %v1339_v48, %v1343_v49  ;;  %v1390_v38 = vld [vmem:[%s16382_s21 + $0xde0] sm:$0xff]  ;;  %v1391_v40 = vld [vmem:[%s16382_s21 + $0xde8] sm:$0xff] }
 0x26f   : > { %4194 = vmatpush1.bf16.msra.mxu0 %v13437_v59  ;;  %4358 = vmatpush1.bf16.msra.mxu1 %v13439_v60  ;;  %v13493_v59 = vcombine.low %v1338_v45, %v1342_v46  ;;  %v13495_v60 = vcombine.low %v1339_v48, %v1343_v49  ;;  %v1394_v45 = vld [vmem:[%s16382_s21 + $0xe00] sm:$0xff]  ;;  %v1395_v48 = vld [vmem:[%s16382_s21 + $0xe08] sm:$0xff] }
 0x270   : > { %4195 = vmatprep.subr.bf16.mxu0 %v13446_v61  ;;  %4359 = vmatprep.subr.bf16.mxu1 %v13448_v62  ;;  %v13502_v61 = vcombine.high %v1346_v55, %v1350_v56  ;;  %v13504_v62 = vcombine.high %v1347_v57, %v1351_v58  ;;  %v1398_v46 = vld [vmem:[%s16382_s21 + $0xe20] sm:$0xff]  ;;  %v1399_v49 = vld [vmem:[%s16382_s21 + $0xe28] sm:$0xff] }
 0x273   : > { %4196 = vmatpush1.bf16.msra.mxu0 %v13445_v5  ;;  %4360 = vmatpush1.bf16.msra.mxu1 %v13447_v6  ;;  %v13501_v5 = vcombine.low %v1346_v55, %v1350_v56  ;;  %v13503_v6 = vcombine.low %v1347_v57, %v1351_v58  ;;  %v1402_v55 = vld [vmem:[%s16382_s21 + $0xe40] sm:$0xff]  ;;  %v1403_v57 = vld [vmem:[%s16382_s21 + $0xe48] sm:$0xff] }
 0x274   : > { %4197 = vmatprep.subr.bf16.mxu0 %v13454_v7  ;;  %4361 = vmatprep.subr.bf16.mxu1 %v13456_v8  ;;  %v13510_v7 = vcombine.high %v1354_v63, %v1358_v1  ;;  %v13512_v8 = vcombine.high %v1355_v2, %v1359_v3  ;;  %v1406_v56 = vld [vmem:[%s16382_s21 + $0xe60] sm:$0xff]  ;;  %v1407_v58 = vld [vmem:[%s16382_s21 + $0xe68] sm:$0xff] }
 0x277   : > { %4198 = vmatpush1.bf16.msra.mxu0 %v13453_v13  ;;  %4362 = vmatpush1.bf16.msra.mxu1 %v13455_v14  ;;  %v13509_v13 = vcombine.low %v1354_v63, %v1358_v1  ;;  %v13511_v14 = vcombine.low %v1355_v2, %v1359_v3  ;;  %v1410_v63 = vld [vmem:[%s16382_s21 + $0xe80] sm:$0xff]  ;;  %v1411_v2 = vld [vmem:[%s16382_s21 + $0xe88] sm:$0xff] }
 0x278   : > { %4199 = vmatprep.subr.bf16.mxu0 %v13462_v15  ;;  %4363 = vmatprep.subr.bf16.mxu1 %v13464_v16  ;;  %v13518_v15 = vcombine.high %v1362_v9, %v1366_v10  ;;  %v13520_v16 = vcombine.high %v1363_v11, %v1367_v12  ;;  %v1414_v1 = vld [vmem:[%s16382_s21 + $0xea0] sm:$0xff]  ;;  %v1415_v3 = vld [vmem:[%s16382_s21 + $0xea8] sm:$0xff] }
 0x27b   : > { %4200 = vmatpush1.bf16.msra.mxu0 %v13461_v21  ;;  %4364 = vmatpush1.bf16.msra.mxu1 %v13463_v22  ;;  %v13517_v21 = vcombine.low %v1362_v9, %v1366_v10  ;;  %v13519_v22 = vcombine.low %v1363_v11, %v1367_v12  ;;  %v1418_v9 = vld [vmem:[%s16382_s21 + $0xec0] sm:$0xff]  ;;  %v1419_v11 = vld [vmem:[%s16382_s21 + $0xec8] sm:$0xff] }
 0x27c   : > { %4201 = vmatprep.subr.bf16.mxu0 %v13470_v24  ;;  %4365 = vmatprep.subr.bf16.mxu1 %v13472_v25  ;;  %v13526_v24 = vcombine.high %v1370_v17, %v1374_v18  ;;  %v13528_v25 = vcombine.high %v1371_v19, %v1375_v20  ;;  %v1422_v10 = vld [vmem:[%s16382_s21 + $0xee0] sm:$0xff]  ;;  %v1423_v12 = vld [vmem:[%s16382_s21 + $0xee8] sm:$0xff] }
 0x27f   : > { %4202 = vmatpush1.bf16.msra.mxu0 %v13469_v31  ;;  %4366 = vmatpush1.bf16.msra.mxu1 %v13471_v32  ;;  %v13525_v31 = vcombine.low %v1370_v17, %v1374_v18  ;;  %v13527_v32 = vcombine.low %v1371_v19, %v1375_v20  ;;  %v1426_v17 = vld [vmem:[%s16382_s21 + $0xf00] sm:$0xff]  ;;  %v1427_v19 = vld [vmem:[%s16382_s21 + $0xf08] sm:$0xff] }
 0x280   : > { %4203 = vmatprep.subr.bf16.mxu0 %v13478_v34  ;;  %4367 = vmatprep.subr.bf16.mxu1 %v13480_v35  ;;  %v13534_v34 = vcombine.high %v1378_v27, %v1382_v28  ;;  %v13536_v35 = vcombine.high %v1379_v29, %v1383_v30  ;;  %v1430_v18 = vld [vmem:[%s16382_s21 + $0xf20] sm:$0xff]  ;;  %v1431_v20 = vld [vmem:[%s16382_s21 + $0xf28] sm:$0xff] }
 0x283   : > { %4204 = vmatpush1.bf16.msra.mxu0 %v13477_v41  ;;  %4368 = vmatpush1.bf16.msra.mxu1 %v13479_v42  ;;  %v13533_v41 = vcombine.low %v1378_v27, %v1382_v28  ;;  %v13535_v42 = vcombine.low %v1379_v29, %v1383_v30  ;;  %v1434_v27 = vld [vmem:[%s16382_s21 + $0xf40] sm:$0xff]  ;;  %v1435_v29 = vld [vmem:[%s16382_s21 + $0xf48] sm:$0xff] }
 0x284   : > { %4214 = vmatprep.subr.bf16.mxu0 %v13486_v43  ;;  %4378 = vmatprep.subr.bf16.mxu1 %v13488_v44  ;;  %v13542_v43 = vcombine.high %v1386_v37, %v1390_v38  ;;  %v13544_v44 = vcombine.high %v1387_v39, %v1391_v40  ;;  %v1438_v28 = vld [vmem:[%s16382_s21 + $0xf60] sm:$0xff]  ;;  %v1439_v30 = vld [vmem:[%s16382_s21 + $0xf68] sm:$0xff] }
 0x286   : > { %4206 = vmatmul.mubr.bf16.vlgmr.msra.gmra.mrb[0].mxu0 %v16688_v47  ;;  %4370 = vmatmul.mubr.bf16.vlgmr.msra.gmra.mrb[0].mxu1 %v16688_v47 }
 0x287   : > { %4215 = vmatpush1.bf16.msra.mxu0 %v13485_v51  ;;  %4379 = vmatpush1.bf16.msra.mxu1 %v13487_v52  ;;  %v13541_v51 = vcombine.low %v1386_v37, %v1390_v38  ;;  %v13543_v52 = vcombine.low %v1387_v39, %v1391_v40  ;;  %v1442_v37 = vld [vmem:[%s16382_s21 + $0xf80] sm:$0xff]  ;;  %v1443_v39 = vld [vmem:[%s16382_s21 + $0xf88] sm:$0xff] }
 0x288   : > { %4216 = vmatprep.subr.bf16.mxu0 %v13494_v53  ;;  %4380 = vmatprep.subr.bf16.mxu1 %v13496_v54  ;;  %v13550_v53 = vcombine.high %v1394_v45, %v1398_v46  ;;  %v13552_v54 = vcombine.high %v1395_v48, %v1399_v49  ;;  %v1446_v38 = vld [vmem:[%s16382_s21 + $0xfa0] sm:$0xff]  ;;  %v1447_v40 = vld [vmem:[%s16382_s21 + $0xfa8] sm:$0xff] }
 0x289   : > { %4246 = vmatprep.mubr.bf16.mxu0 %v16698_v36  ;;  %4410 = vmatprep.mubr.bf16.mxu1 %v16698_v36 }
 0x28b   : > { %4217 = vmatpush1.bf16.msra.mxu0 %v13493_v59  ;;  %4381 = vmatpush1.bf16.msra.mxu1 %v13495_v60  ;;  %v13549_v59 = vcombine.low %v1394_v45, %v1398_v46  ;;  %v13551_v60 = vcombine.low %v1395_v48, %v1399_v49  ;;  %v1450_v45 = vld [vmem:[%s16382_s21 + $0xfc0] sm:$0xff]  ;;  %v1451_v48 = vld [vmem:[%s16382_s21 + $0xfc8] sm:$0xff] }
 0x28c   : > { %4218 = vmatprep.subr.bf16.mxu0 %v13502_v61  ;;  %4382 = vmatprep.subr.bf16.mxu1 %v13504_v62  ;;  %v13558_v61 = vcombine.high %v1402_v55, %v1406_v56  ;;  %v13560_v62 = vcombine.high %v1403_v57, %v1407_v58  ;;  %v1454_v46 = vld [vmem:[%s16382_s21 + $0xfe0] sm:$0xff]  ;;  %v1455_v49 = vld [vmem:[%s16382_s21 + $0xfe8] sm:$0xff] }
 0x28f   : > { %4219 = vmatpush1.bf16.msra.mxu0 %v13501_v5  ;;  %4383 = vmatpush1.bf16.msra.mxu1 %v13503_v6  ;;  %v13557_v5 = vcombine.low %v1402_v55, %v1406_v56  ;;  %v13559_v6 = vcombine.low %v1403_v57, %v1407_v58  ;;  %v948_v55 = vld [vmem:[%s16382_s21 + $0x10] sm:$0xff]  ;;  %v949_v57 = vld [vmem:[%s16382_s21 + $0x18] sm:$0xff] }
 0x290   : > { %4220 = vmatprep.subr.bf16.mxu0 %v13510_v7  ;;  %4384 = vmatprep.subr.bf16.mxu1 %v13512_v8  ;;  %v13566_v7 = vcombine.high %v1410_v63, %v1414_v1  ;;  %v13568_v8 = vcombine.high %v1411_v2, %v1415_v3  ;;  %v952_v56 = vld [vmem:[%s16382_s21 + $0x30] sm:$0xff]  ;;  %v953_v58 = vld [vmem:[%s16382_s21 + $0x38] sm:$0xff] }
 0x293   : > { %4221 = vmatpush1.bf16.msra.mxu0 %v13509_v13  ;;  %4385 = vmatpush1.bf16.msra.mxu1 %v13511_v14  ;;  %v13565_v13 = vcombine.low %v1410_v63, %v1414_v1  ;;  %v13567_v14 = vcombine.low %v1411_v2, %v1415_v3  ;;  %v956_v63 = vld [vmem:[%s16382_s21 + $0x50] sm:$0xff]  ;;  %v16766_v2 = vcombine.low %v16692_v50, %v16692_v50  ;;  %v957_v3 = vld [vmem:[%s16382_s21 + $0x58] sm:$0xff] }
 0x294   : > { %4222 = vmatprep.subr.bf16.mxu0 %v13518_v15  ;;  %4386 = vmatprep.subr.bf16.mxu1 %v13520_v16  ;;  %v13574_v15 = vcombine.high %v1418_v9, %v1422_v10  ;;  %v13576_v16 = vcombine.high %v1419_v11, %v1423_v12  ;;  %v960_v1 = vld [vmem:[%s16382_s21 + $0x70] sm:$0xff]  ;;  %v965_v50 = vld [vmem:[%s16382_s21 + $0x98] sm:$0xff] }
 0x297   : > { %4223 = vmatpush1.bf16.msra.mxu0 %v13517_v21  ;;  %4387 = vmatpush1.bf16.msra.mxu1 %v13519_v22  ;;  %v13573_v21 = vcombine.low %v1418_v9, %v1422_v10  ;;  %v13575_v22 = vcombine.low %v1419_v11, %v1423_v12  ;;  %v964_v10 = vld [vmem:[%s16382_s21 + $0x90] sm:$0xff]  ;;  %v969_v12 = vld [vmem:[%s16382_s21 + $0xb8] sm:$0xff] }
 0x298   : > { %4224 = vmatprep.subr.bf16.mxu0 %v13526_v24  ;;  %4388 = vmatprep.subr.bf16.mxu1 %v13528_v25  ;;  %v13582_v24 = vcombine.high %v1426_v17, %v1430_v18  ;;  %v13584_v25 = vcombine.high %v1427_v19, %v1431_v20  ;;  %v968_v11 = vld [vmem:[%s16382_s21 + $0xb0] sm:$0xff] }
 0x29b   : > { %4225 = vmatpush1.bf16.msra.mxu0 %v13525_v31  ;;  %4389 = vmatpush1.bf16.msra.mxu1 %v13527_v32  ;;  %v13581_v31 = vcombine.low %v1426_v17, %v1430_v18  ;;  %v13583_v32 = vcombine.low %v1427_v19, %v1431_v20  ;;  %v972_v17 = vld [vmem:[%s16382_s21 + $0xd0] sm:$0xff]  ;;  %v973_v19 = vld [vmem:[%s16382_s21 + $0xd8] sm:$0xff] }
 0x29c   : > { %4226 = vmatprep.subr.bf16.mxu0 %v13534_v34  ;;  %4390 = vmatprep.subr.bf16.mxu1 %v13536_v35  ;;  %v13590_v34 = vcombine.high %v1434_v27, %v1438_v28  ;;  %v13592_v35 = vcombine.high %v1435_v29, %v1439_v30  ;;  %v976_v18 = vld [vmem:[%s16382_s21 + $0xf0] sm:$0xff]  ;;  %v977_v20 = vld [vmem:[%s16382_s21 + $0xf8] sm:$0xff] }
 0x29f   : > { %4227 = vmatpush1.bf16.msra.mxu0 %v13533_v41  ;;  %4391 = vmatpush1.bf16.msra.mxu1 %v13535_v42  ;;  %v13589_v41 = vcombine.low %v1434_v27, %v1438_v28  ;;  %v13591_v42 = vcombine.low %v1435_v29, %v1439_v30  ;;  %v980_v27 = vld [vmem:[%s16382_s21 + $0x110] sm:$0xff]  ;;  %v981_v29 = vld [vmem:[%s16382_s21 + $0x118] sm:$0xff] }
 0x2a0   : > { %4228 = vmatprep.subr.bf16.mxu0 %v13542_v43  ;;  %4392 = vmatprep.subr.bf16.mxu1 %v13544_v44  ;;  %v13598_v43 = vcombine.high %v1442_v37, %v1446_v38  ;;  %v13600_v44 = vcombine.high %v1443_v39, %v1447_v40  ;;  %v984_v28 = vld [vmem:[%s16382_s21 + $0x130] sm:$0xff]  ;;  %v985_v30 = vld [vmem:[%s16382_s21 + $0x138] sm:$0xff] }
 0x2a3   : > { %4229 = vmatpush1.bf16.msra.mxu0 %v13541_v51  ;;  %4393 = vmatpush1.bf16.msra.mxu1 %v13543_v52  ;;  %v13597_v51 = vcombine.low %v1442_v37, %v1446_v38  ;;  %v13599_v52 = vcombine.low %v1443_v39, %v1447_v40  ;;  %v992_v37 = vld [vmem:[%s16382_s21 + $0x170] sm:$0xff]  ;;  %v989_v38 = vld [vmem:[%s16382_s21 + $0x158] sm:$0xff]  ;;  %v13137_v40 = vcombine.low %v980_v27, %v984_v28 }
 0x2a4   : > { %4230 = vmatprep.subr.bf16.mxu0 %v13550_v53  ;;  %4394 = vmatprep.subr.bf16.mxu1 %v13552_v54  ;;  %v13606_v53 = vcombine.high %v1450_v45, %v1454_v46  ;;  %v13608_v54 = vcombine.high %v1451_v48, %v1455_v49  ;;  %v993_v39 = vld [vmem:[%s16382_s21 + $0x178] sm:$0xff] }
 0x2a7   : > { %4231 = vmatpush1.bf16.msra.mxu0 %v13549_v59  ;;  %4395 = vmatpush1.bf16.msra.mxu1 %v13551_v60  ;;  %v13605_v59 = vcombine.low %v1450_v45, %v1454_v46  ;;  %v13607_v60 = vcombine.low %v1451_v48, %v1455_v49  ;;  %v1000_v45 = vld [vmem:[%s16382_s21 + $0x1b0] sm:$0xff]  ;;  %v997_v46 = vld [vmem:[%s16382_s21 + $0x198] sm:$0xff] }
 0x2a8   : > { %4232 = vmatprep.subr.bf16.mxu0 %v13558_v61  ;;  %4396 = vmatprep.subr.bf16.mxu1 %v13560_v62  ;;  %v13106_v61 = vcombine.high %v948_v55, %v952_v56  ;;  %v13108_v62 = vcombine.high %v949_v57, %v953_v58  ;;  %v1001_v48 = vld [vmem:[%s16382_s21 + $0x1b8] sm:$0xff] }
 0x2ab   : > { %4233 = vmatpush1.bf16.msra.mxu0 %v13557_v5  ;;  %4397 = vmatpush1.bf16.msra.mxu1 %v13559_v6  ;;  %v961_v5 = vld [vmem:[%s16382_s21 + $0x78] sm:$0xff]  ;;  %v13105_v6 = vcombine.low %v948_v55, %v952_v56  ;;  %v1008_v55 = vld [vmem:[%s16382_s21 + $0x1f0] sm:$0xff] }
 0x2ac   : > { %4234 = vmatprep.subr.bf16.mxu0 %v13566_v7  ;;  %4398 = vmatprep.subr.bf16.mxu1 %v13568_v8  ;;  %v13107_v7 = vcombine.low %v949_v57, %v953_v58  ;;  %v13114_v8 = vcombine.high %v956_v63, %v960_v1  ;;  %v13116_v9 = vcombine.high %v957_v3, %v961_v5  ;;  %v1005_v56 = vld [vmem:[%s16382_s21 + $0x1d8] sm:$0xff] }
 0x2ad   : > { %v1009_v57 = vld [vmem:[%s16382_s21 + $0x1f8] sm:$0xff] }
 0x2af   : > { %4235 = vmatpush1.bf16.msra.mxu0 %v13565_v13  ;;  %4399 = vmatpush1.bf16.msra.mxu1 %v13567_v14  ;;  %v13113_v13 = vcombine.low %v956_v63, %v960_v1  ;;  %v13115_v14 = vcombine.low %v957_v3, %v961_v5  ;;  %v1016_v63 = vld [vmem:[%s16382_s21 + $0x230] sm:$0xff]  ;;  %v1013_v1 = vld [vmem:[%s16382_s21 + $0x218] sm:$0xff] }
 0x2b0   : > { %4236 = vmatprep.subr.bf16.mxu0 %v13574_v15  ;;  %4400 = vmatprep.subr.bf16.mxu1 %v13576_v16  ;;  %v13122_v15 = vcombine.high %v964_v10, %v968_v11  ;;  %v13124_v16 = vcombine.high %v965_v50, %v969_v12  ;;  %v1017_v3 = vld [vmem:[%s16382_s21 + $0x238] sm:$0xff] }
 0x2b3   : > { %4237 = vmatpush1.bf16.msra.mxu0 %v13573_v21  ;;  %4401 = vmatpush1.bf16.msra.mxu1 %v13575_v22  ;;  %v13121_v21 = vcombine.low %v964_v10, %v968_v11  ;;  %v13123_v22 = vcombine.low %v965_v50, %v969_v12  ;;  %v1024_v10 = vld [vmem:[%s16382_s21 + $0x270] sm:$0xff]  ;;  %v1021_v11 = vld [vmem:[%s16382_s21 + $0x258] sm:$0xff] }
 0x2b4   : > { %4238 = vmatprep.subr.bf16.mxu0 %v13582_v24  ;;  %4402 = vmatprep.subr.bf16.mxu1 %v13584_v25  ;;  %v13130_v24 = vcombine.high %v972_v17, %v976_v18  ;;  %v13132_v25 = vcombine.high %v973_v19, %v977_v20  ;;  %v1025_v50 = vld [vmem:[%s16382_s21 + $0x278] sm:$0xff] }
 0x2b7   : > { %4239 = vmatpush1.bf16.msra.mxu0 %v13581_v31  ;;  %4403 = vmatpush1.bf16.msra.mxu1 %v13583_v32  ;;  %v13129_v31 = vcombine.low %v972_v17, %v976_v18  ;;  %v13138_v32 = vcombine.high %v980_v27, %v984_v28  ;;  %v1032_v17 = vld [vmem:[%s16382_s21 + $0x2b0] sm:$0xff]  ;;  %v1029_v18 = vld [vmem:[%s16382_s21 + $0x298] sm:$0xff] }
 0x2b8   : > { %4240 = vmatprep.subr.bf16.mxu0 %v13590_v34  ;;  %4404 = vmatprep.subr.bf16.mxu1 %v13592_v35  ;;  %v13140_v34 = vcombine.high %v981_v29, %v985_v30  ;;  %v988_v35 = vld [vmem:[%s16382_s21 + $0x150] sm:$0xff]  ;;  %v1037_v28 = vld [vmem:[%s16382_s21 + $0x2d8] sm:$0xff] }
 0x2b9   : > { %v13145_v49 = vcombine.low %v988_v35, %v992_v37  ;;  %v1040_v27 = vld [vmem:[%s16382_s21 + $0x2f0] sm:$0xff] }
 0x2bb   : > { %4241 = vmatpush1.bf16.msra.mxu0 %v13589_v41  ;;  %4405 = vmatpush1.bf16.msra.mxu1 %v13591_v42  ;;  %v13139_v41 = vcombine.low %v981_v29, %v985_v30  ;;  %v13146_v42 = vcombine.high %v988_v35, %v992_v37  ;;  %v1041_v29 = vld [vmem:[%s16382_s21 + $0x2f8] sm:$0xff]  ;;  %v1048_v35 = vld [vmem:[%s16382_s21 + $0x330] sm:$0xff] }
 0x2bc   : > { %4242 = vmatprep.subr.bf16.mxu0 %v13598_v43  ;;  %4406 = vmatprep.subr.bf16.mxu1 %v13600_v44  ;;  %v13148_v43 = vcombine.high %v989_v38, %v993_v39  ;;  %v996_v44 = vld [vmem:[%s16382_s21 + $0x190] sm:$0xff]  ;;  %v1045_v37 = vld [vmem:[%s16382_s21 + $0x318] sm:$0xff] }
 0x2bd   : > { %v13153_v58 = vcombine.low %v996_v44, %v1000_v45 }
 0x2bf   : > { %4243 = vmatpush1.bf16.msra.mxu0 %v13597_v51  ;;  %4407 = vmatpush1.bf16.msra.mxu1 %v13599_v52  ;;  %v13147_v51 = vcombine.low %v989_v38, %v993_v39  ;;  %v13154_v52 = vcombine.high %v996_v44, %v1000_v45  ;;  %v1049_v38 = vld [vmem:[%s16382_s21 + $0x338] sm:$0xff]  ;;  %v1056_v44 = vld [vmem:[%s16382_s21 + $0x370] sm:$0xff] }
 0x2c0   : > { %4244 = vmatprep.subr.bf16.mxu0 %v13606_v53  ;;  %4408 = vmatprep.subr.bf16.mxu1 %v13608_v54  ;;  %v13156_v53 = vcombine.high %v997_v46, %v1001_v48  ;;  %v1004_v54 = vld [vmem:[%s16382_s21 + $0x1d0] sm:$0xff]  ;;  %v1053_v45 = vld [vmem:[%s16382_s21 + $0x358] sm:$0xff] }
 0x2c1   : > { %v13161_v5 = vcombine.low %v1004_v54, %v1008_v55 }
 0x2c3   : > { %4245 = vmatpush1.bf16.msra.mxu0 %v13605_v59  ;;  %4409 = vmatpush1.bf16.msra.mxu1 %v13607_v60  ;;  %v13155_v59 = vcombine.low %v997_v46, %v1001_v48  ;;  %v13162_v60 = vcombine.high %v1004_v54, %v1008_v55  ;;  %v1057_v46 = vld [vmem:[%s16382_s21 + $0x378] sm:$0xff]  ;;  %v1064_v54 = vld [vmem:[%s16382_s21 + $0x3b0] sm:$0xff] }
 0x2c4   : > { %4419 = vmatprep.subr.bf16.mxu0 %v13106_v61  ;;  %4583 = vmatprep.subr.bf16.mxu1 %v13108_v62  ;;  %v13164_v61 = vcombine.high %v1005_v56, %v1009_v57  ;;  %v1012_v62 = vld [vmem:[%s16382_s21 + $0x210] sm:$0xff]  ;;  %v1061_v55 = vld [vmem:[%s16382_s21 + $0x398] sm:$0xff] }
 0x2c5   : > { %v13169_v12 = vcombine.low %v1012_v62, %v1016_v63 }
 0x2c6   : > { %4247 = vmatmul.mubr.bf16.vlgmr.msra.gmra.mrb[0].mxu0 %v16766_v2  ;;  %4411 = vmatmul.mubr.bf16.vlgmr.msra.gmra.mrb[0].mxu1 %v16766_v2 }
 0x2c7   : > { %4420 = vmatpush1.bf16.msra.mxu0 %v13105_v6  ;;  %4584 = vmatpush1.bf16.msra.mxu1 %v13107_v7  ;;  %v13163_v6 = vcombine.low %v1005_v56, %v1009_v57  ;;  %v13170_v7 = vcombine.high %v1012_v62, %v1016_v63  ;;  %v1065_v56 = vld [vmem:[%s16382_s21 + $0x3b8] sm:$0xff]  ;;  %v1072_v62 = vld [vmem:[%s16382_s21 + $0x3f0] sm:$0xff] }
 0x2c8   : > { %4421 = vmatprep.subr.bf16.mxu0 %v13114_v8  ;;  %4585 = vmatprep.subr.bf16.mxu1 %v13116_v9  ;;  %v13172_v8 = vcombine.high %v1013_v1, %v1017_v3  ;;  %v1020_v9 = vld [vmem:[%s16382_s21 + $0x250] sm:$0xff]  ;;  %v1069_v63 = vld [vmem:[%s16382_s21 + $0x3d8] sm:$0xff] }
 0x2c9   : > { %4451 = vmatprep.mubr.bf16.mxu0 %v16486_v4  ;;  %4615 = vmatprep.mubr.bf16.mxu1 %v16486_v4  ;;  %v13131_v4 = vcombine.low %v973_v19, %v977_v20  ;;  %v1033_v19 = vld [vmem:[%s16382_s21 + $0x2b8] sm:$0xff]  ;;  %v13177_v20 = vcombine.low %v1020_v9, %v1024_v10 }
 0x2cb   : > { %4422 = vmatpush1.bf16.msra.mxu0 %v13113_v13  ;;  %4586 = vmatpush1.bf16.msra.mxu1 %v13115_v14  ;;  %v13171_v13 = vcombine.low %v1013_v1, %v1017_v3  ;;  %v13178_v14 = vcombine.high %v1020_v9, %v1024_v10  ;;  %v1073_v1 = vld [vmem:[%s16382_s21 + $0x3f8] sm:$0xff]  ;;  %v1080_v9 = vld [vmem:[%s16382_s21 + $0x430] sm:$0xff] }
 0x2cc   : > { %4423 = vmatprep.subr.bf16.mxu0 %v13122_v15  ;;  %4587 = vmatprep.subr.bf16.mxu1 %v13124_v16  ;;  %v13180_v15 = vcombine.high %v1021_v11, %v1025_v50  ;;  %v1028_v16 = vld [vmem:[%s16382_s21 + $0x290] sm:$0xff]  ;;  %v1077_v10 = vld [vmem:[%s16382_s21 + $0x418] sm:$0xff] }
 0x2cd   : > { %v13185_v30 = vcombine.low %v1028_v16, %v1032_v17 }
 0x2cf   : > { %4424 = vmatpush1.bf16.msra.mxu0 %v13121_v21  ;;  %4588 = vmatpush1.bf16.msra.mxu1 %v13123_v22  ;;  %v13179_v21 = vcombine.low %v1021_v11, %v1025_v50  ;;  %v13186_v22 = vcombine.high %v1028_v16, %v1032_v17  ;;  %v1081_v11 = vld [vmem:[%s16382_s21 + $0x438] sm:$0xff]  ;;  %v1088_v16 = vld [vmem:[%s16382_s21 + $0x470] sm:$0xff] }
 0x2d0   : > { %4425 = vmatprep.subr.bf16.mxu0 %v13130_v24  ;;  %4589 = vmatprep.subr.bf16.mxu1 %v13132_v25  ;;  %v13188_v24 = vcombine.high %v1029_v18, %v1033_v19  ;;  %v1036_v25 = vld [vmem:[%s16382_s21 + $0x2d0] sm:$0xff]  ;;  %v1085_v17 = vld [vmem:[%s16382_s21 + $0x458] sm:$0xff] }
 0x2d1   : > { %v13193_v39 = vcombine.low %v1036_v25, %v1040_v27 }
 0x2d3   : > { %4426 = vmatpush1.bf16.msra.mxu0 %v13129_v31  ;;  %4590 = vmatpush1.bf16.msra.mxu1 %v13131_v4  ;;  %v13187_v31 = vcombine.low %v1029_v18, %v1033_v19  ;;  %v13194_v4 = vcombine.high %v1036_v25, %v1040_v27  ;;  %v1089_v18 = vld [vmem:[%s16382_s21 + $0x478] sm:$0xff]  ;;  %v1096_v25 = vld [vmem:[%s16382_s21 + $0x4b0] sm:$0xff] }
 0x2d4   : > { %4427 = vmatprep.subr.bf16.mxu0 %v13138_v32  ;;  %4591 = vmatprep.subr.bf16.mxu1 %v13140_v34  ;;  %v13196_v32 = vcombine.high %v1037_v28, %v1041_v29  ;;  %v1044_v34 = vld [vmem:[%s16382_s21 + $0x310] sm:$0xff]  ;;  %v1093_v27 = vld [vmem:[%s16382_s21 + $0x498] sm:$0xff] }
 0x2d5   : > { %v13201_v48 = vcombine.low %v1044_v34, %v1048_v35 }
 0x2d7   : > { %4428 = vmatpush1.bf16.msra.mxu0 %v13137_v40  ;;  %4592 = vmatpush1.bf16.msra.mxu1 %v13139_v41  ;;  %v13195_v40 = vcombine.low %v1037_v28, %v1041_v29  ;;  %v13202_v41 = vcombine.high %v1044_v34, %v1048_v35  ;;  %v1097_v28 = vld [vmem:[%s16382_s21 + $0x4b8] sm:$0xff]  ;;  %v1104_v34 = vld [vmem:[%s16382_s21 + $0x4f0] sm:$0xff] }
 0x2d8   : > { %4429 = vmatprep.subr.bf16.mxu0 %v13146_v42  ;;  %4593 = vmatprep.subr.bf16.mxu1 %v13148_v43  ;;  %v13204_v42 = vcombine.high %v1045_v37, %v1049_v38  ;;  %v1052_v43 = vld [vmem:[%s16382_s21 + $0x350] sm:$0xff]  ;;  %v1101_v35 = vld [vmem:[%s16382_s21 + $0x4d8] sm:$0xff] }
 0x2d9   : > { %v13209_v57 = vcombine.low %v1052_v43, %v1056_v44 }
 0x2db   : > { %4430 = vmatpush1.bf16.msra.mxu0 %v13145_v49  ;;  %4594 = vmatpush1.bf16.msra.mxu1 %v13147_v51  ;;  %v13203_v49 = vcombine.low %v1045_v37, %v1049_v38  ;;  %v13210_v51 = vcombine.high %v1052_v43, %v1056_v44  ;;  %v1105_v37 = vld [vmem:[%s16382_s21 + $0x4f8] sm:$0xff]  ;;  %v13251_v38 = vcombine.low %v1093_v27, %v1097_v28 }
 0x2dc   : > { %4431 = vmatprep.subr.bf16.mxu0 %v13154_v52  ;;  %4595 = vmatprep.subr.bf16.mxu1 %v13156_v53  ;;  %v13212_v52 = vcombine.high %v1053_v45, %v1057_v46  ;;  %v1060_v53 = vld [vmem:[%s16382_s21 + $0x390] sm:$0xff]  ;;  %v1109_v43 = vld [vmem:[%s16382_s21 + $0x518] sm:$0xff] }
 0x2dd   : > { %v13217_v3 = vcombine.low %v1060_v53, %v1064_v54  ;;  %v1113_v44 = vld [vmem:[%s16382_s21 + $0x538] sm:$0xff] }
 0x2df   : > { %4432 = vmatpush1.bf16.msra.mxu0 %v13153_v58  ;;  %4596 = vmatpush1.bf16.msra.mxu1 %v13155_v59  ;;  %v13211_v58 = vcombine.low %v1053_v45, %v1057_v46  ;;  %v13218_v59 = vcombine.high %v1060_v53, %v1064_v54  ;;  %v1121_v53 = vld [vmem:[%s16382_s21 + $0x578] sm:$0xff] }
 0x2e0   : > { %4433 = vmatprep.subr.bf16.mxu0 %v13162_v60  ;;  %4597 = vmatprep.subr.bf16.mxu1 %v13164_v61  ;;  %v13220_v60 = vcombine.high %v1061_v55, %v1065_v56  ;;  %v1068_v61 = vld [vmem:[%s16382_s21 + $0x3d0] sm:$0xff] }
 0x2e1   : > { %v13225_v50 = vcombine.low %v1068_v61, %v1072_v62 }
 0x2e3   : > { %4434 = vmatpush1.bf16.msra.mxu0 %v13161_v5  ;;  %4598 = vmatpush1.bf16.msra.mxu1 %v13163_v6  ;;  %v13219_v5 = vcombine.low %v1061_v55, %v1065_v56  ;;  %v13226_v6 = vcombine.high %v1068_v61, %v1072_v62  ;;  %v13267_v55 = vcombine.low %v1109_v43, %v1113_v44  ;;  %v1129_v61 = vld [vmem:[%s16382_s21 + $0x5b8] sm:$0xff] }
 0x2e4   : > { %4435 = vmatprep.subr.bf16.mxu0 %v13170_v7  ;;  %4599 = vmatprep.subr.bf16.mxu1 %v13172_v8  ;;  %v13228_v7 = vcombine.high %v1069_v63, %v1073_v1  ;;  %v1076_v8 = vld [vmem:[%s16382_s21 + $0x410] sm:$0xff] }
 0x2e5   : > { %v13233_v19 = vcombine.low %v1076_v8, %v1080_v9 }
 0x2e7   : > { %4436 = vmatpush1.bf16.msra.mxu0 %v13169_v12  ;;  %4600 = vmatpush1.bf16.msra.mxu1 %v13171_v13  ;;  %v13227_v12 = vcombine.low %v1069_v63, %v1073_v1  ;;  %v13234_v13 = vcombine.high %v1076_v8, %v1080_v9  ;;  %v1137_v8 = vld [vmem:[%s16382_s21 + $0x5f8] sm:$0xff] }
 0x2e8   : > { %4437 = vmatprep.subr.bf16.mxu0 %v13178_v14  ;;  %4601 = vmatprep.subr.bf16.mxu1 %v13180_v15  ;;  %v13236_v14 = vcombine.high %v1077_v10, %v1081_v11  ;;  %v1084_v15 = vld [vmem:[%s16382_s21 + $0x450] sm:$0xff] }
 0x2e9   : > { %v13241_v29 = vcombine.low %v1084_v15, %v1088_v16 }
 0x2eb   : > { %4438 = vmatpush1.bf16.msra.mxu0 %v13177_v20  ;;  %4602 = vmatpush1.bf16.msra.mxu1 %v13179_v21  ;;  %v13235_v20 = vcombine.low %v1077_v10, %v1081_v11  ;;  %v13242_v21 = vcombine.high %v1084_v15, %v1088_v16  ;;  %v1145_v15 = vld [vmem:[%s16382_s21 + $0x638] sm:$0xff] }
 0x2ec   : > { %4439 = vmatprep.subr.bf16.mxu0 %v13186_v22  ;;  %4603 = vmatprep.subr.bf16.mxu1 %v13188_v24  ;;  %v13244_v22 = vcombine.high %v1085_v17, %v1089_v18  ;;  %v1092_v24 = vld [vmem:[%s16382_s21 + $0x490] sm:$0xff] }
 0x2ef   : > { %4440 = vmatpush1.bf16.msra.mxu0 %v13185_v30  ;;  %4604 = vmatpush1.bf16.msra.mxu1 %v13187_v31  ;;  %v13243_v30 = vcombine.low %v1085_v17, %v1089_v18  ;;  %v13250_v31 = vcombine.high %v1092_v24, %v1096_v25 }
 0x2f0   : > { %4441 = vmatprep.subr.bf16.mxu0 %v13194_v4  ;;  %4605 = vmatprep.subr.bf16.mxu1 %v13196_v32  ;;  %v13252_v4 = vcombine.high %v1093_v27, %v1097_v28  ;;  %v1100_v32 = vld [vmem:[%s16382_s21 + $0x4d0] sm:$0xff] }
 0x2f1   : > { %v13257_v45 = vcombine.low %v1100_v32, %v1104_v34 }
 0x2f3   : > { %4442 = vmatpush1.bf16.msra.mxu0 %v13193_v39  ;;  %4606 = vmatpush1.bf16.msra.mxu1 %v13195_v40  ;;  %v13258_v39 = vcombine.high %v1100_v32, %v1104_v34  ;;  %v13260_v40 = vcombine.high %v1101_v35, %v1105_v37  ;;  %v1161_v32 = vld [vmem:[%s16382_s21 + $0x6b8] sm:$0xff] }
 0x2f4   : > { %4443 = vmatprep.subr.bf16.mxu0 %v13202_v41  ;;  %4607 = vmatprep.subr.bf16.mxu1 %v13204_v42  ;;  %v1108_v41 = vld [vmem:[%s16382_s21 + $0x510] sm:$0xff] }
 0x2f5   : > { %v1112_v42 = vld [vmem:[%s16382_s21 + $0x530] sm:$0xff] }
 0x2f6   : > { %v13266_v46 = vcombine.high %v1108_v41, %v1112_v42  ;;  %v13265_v54 = vcombine.low %v1108_v41, %v1112_v42  ;;  %v1169_v41 = vld [vmem:[%s16382_s21 + $0x6f8] sm:$0xff] }
 0x2f7   : > { %4444 = vmatpush1.bf16.msra.mxu0 %v13201_v48  ;;  %4608 = vmatpush1.bf16.msra.mxu1 %v13203_v49  ;;  %v13268_v48 = vcombine.high %v1109_v43, %v1113_v44  ;;  %v1116_v49 = vld [vmem:[%s16382_s21 + $0x550] sm:$0xff] }
 0x2f8   : > { %4445 = vmatprep.subr.bf16.mxu0 %v13210_v51  ;;  %4609 = vmatprep.subr.bf16.mxu1 %v13212_v52  ;;  %v1120_v51 = vld [vmem:[%s16382_s21 + $0x570] sm:$0xff]  ;;  %v1117_v52 = vld [vmem:[%s16382_s21 + $0x558] sm:$0xff] }
 0x2f9   : > { %v13274_v56 = vcombine.high %v1116_v49, %v1120_v51  ;;  %v13273_v62 = vcombine.low %v1116_v49, %v1120_v51  ;;  %v13275_v63 = vcombine.low %v1117_v52, %v1121_v53  ;;  %v1177_v49 = vld [vmem:[%s16382_s21 + $0x738] sm:$0xff] }
 0x2fb   : > { %4446 = vmatpush1.bf16.msra.mxu0 %v13209_v57  ;;  %4610 = vmatpush1.bf16.msra.mxu1 %v13211_v58  ;;  %v13276_v57 = vcombine.high %v1117_v52, %v1121_v53  ;;  %v1124_v58 = vld [vmem:[%s16382_s21 + $0x590] sm:$0xff] }
 0x2fc   : > { %4447 = vmatprep.subr.bf16.mxu0 %v13218_v59  ;;  %4611 = vmatprep.subr.bf16.mxu1 %v13220_v60  ;;  %v1128_v59 = vld [vmem:[%s16382_s21 + $0x5b0] sm:$0xff]  ;;  %v1125_v60 = vld [vmem:[%s16382_s21 + $0x598] sm:$0xff] }
 0x2fd   : > { %v13282_v1 = vcombine.high %v1124_v58, %v1128_v59  ;;  %v13281_v9 = vcombine.low %v1124_v58, %v1128_v59  ;;  %v13283_v10 = vcombine.low %v1125_v60, %v1129_v61  ;;  %v1185_v58 = vld [vmem:[%s16382_s21 + $0x778] sm:$0xff] }
 0x2ff   : > { %4448 = vmatpush1.bf16.msra.mxu0 %v13217_v3  ;;  %4612 = vmatpush1.bf16.msra.mxu1 %v13219_v5  ;;  %v13284_v3 = vcombine.high %v1125_v60, %v1129_v61  ;;  %v1132_v5 = vld [vmem:[%s16382_s21 + $0x5d0] sm:$0xff] }
 0x300   : > { %4449 = vmatprep.subr.bf16.mxu0 %v13226_v6  ;;  %4613 = vmatprep.subr.bf16.mxu1 %v13228_v7  ;;  %v1136_v6 = vld [vmem:[%s16382_s21 + $0x5f0] sm:$0xff]  ;;  %v1133_v7 = vld [vmem:[%s16382_s21 + $0x5d8] sm:$0xff] }
 0x301   : > { %v13290_v11 = vcombine.high %v1132_v5, %v1136_v6  ;;  %v13289_v16 = vcombine.low %v1132_v5, %v1136_v6  ;;  %v13291_v17 = vcombine.low %v1133_v7, %v1137_v8  ;;  %v1193_v5 = vld [vmem:[%s16382_s21 + $0x7b8] sm:$0xff] }
 0x303   : > { %4450 = vmatpush1.bf16.msra.mxu0 %v13225_v50  ;;  %4614 = vmatpush1.bf16.msra.mxu1 %v13227_v12  ;;  %v13292_v50 = vcombine.high %v1133_v7, %v1137_v8  ;;  %v1140_v12 = vld [vmem:[%s16382_s21 + $0x610] sm:$0xff] }
 0x304   : > { %4460 = vmatprep.subr.bf16.mxu0 %v13234_v13  ;;  %4624 = vmatprep.subr.bf16.mxu1 %v13236_v14  ;;  %v1144_v13 = vld [vmem:[%s16382_s21 + $0x630] sm:$0xff]  ;;  %v1141_v14 = vld [vmem:[%s16382_s21 + $0x618] sm:$0xff] }
 0x305   : > { %v13298_v18 = vcombine.high %v1140_v12, %v1144_v13  ;;  %v13299_v27 = vcombine.low %v1141_v14, %v1145_v15 }
 0x306   : > { %4452 = vmatmul.mubr.bf16.vlgmr.msra.gmra.mrb[4].mxu0 %v16532_v23  ;;  %4616 = vmatmul.mubr.bf16.vlgmr.msra.gmra.mrb[4].mxu1 %v16532_v23  ;;  %v13249_v23 = vcombine.low %v1092_v24, %v1096_v25  ;;  %v1153_v24 = vld [vmem:[%s16382_s21 + $0x678] sm:$0xff]  ;;  %v13297_v25 = vcombine.low %v1140_v12, %v1144_v13 }
 0x307   : > { %4461 = vmatpush1.bf16.msra.mxu0 %v13233_v19  ;;  %4625 = vmatpush1.bf16.msra.mxu1 %v13235_v20  ;;  %v13300_v19 = vcombine.high %v1141_v14, %v1145_v15  ;;  %v1148_v20 = vld [vmem:[%s16382_s21 + $0x650] sm:$0xff]  ;;  %v1201_v12 = vld [vmem:[%s16382_s21 + $0x7f8] sm:$0xff] }
 0x308   : > { %4462 = vmatprep.subr.bf16.mxu0 %v13242_v21  ;;  %4626 = vmatprep.subr.bf16.mxu1 %v13244_v22  ;;  %v1152_v21 = vld [vmem:[%s16382_s21 + $0x670] sm:$0xff]  ;;  %v1149_v22 = vld [vmem:[%s16382_s21 + $0x658] sm:$0xff] }
 0x309   : > { %4492 = vmatprep.mubr.bf16.mxu0 %v16542_v0  ;;  %4656 = vmatprep.mubr.bf16.mxu1 %v16542_v0  ;;  %v13259_v0 = vcombine.low %v1101_v35, %v1105_v37  ;;  %v13306_v28 = vcombine.high %v1148_v20, %v1152_v21  ;;  %v13305_v34 = vcombine.low %v1148_v20, %v1152_v21  ;;  %v1209_v20 = vld [vmem:[%s16382_s21 + $0x838] sm:$0xff] }
 0x30a   : > { %v13307_v35 = vcombine.low %v1149_v22, %v1153_v24 }
 0x30b   : > { %4463 = vmatpush1.bf16.msra.mxu0 %v13241_v29  ;;  %4627 = vmatpush1.bf16.msra.mxu1 %v13243_v30  ;;  %v13308_v29 = vcombine.high %v1149_v22, %v1153_v24  ;;  %v1156_v30 = vld [vmem:[%s16382_s21 + $0x690] sm:$0xff] }
 0x30c   : > { %4464 = vmatprep.subr.bf16.mxu0 %v13250_v31  ;;  %4628 = vmatprep.subr.bf16.mxu1 %v13252_v4  ;;  %v1160_v31 = vld [vmem:[%s16382_s21 + $0x6b0] sm:$0xff]  ;;  %v1157_v4 = vld [vmem:[%s16382_s21 + $0x698] sm:$0xff] }
 0x30d   : > { %v13314_v37 = vcombine.high %v1156_v30, %v1160_v31  ;;  %v13313_v42 = vcombine.low %v1156_v30, %v1160_v31  ;;  %v13315_v43 = vcombine.low %v1157_v4, %v1161_v32  ;;  %v1217_v30 = vld [vmem:[%s16382_s21 + $0x878] sm:$0xff] }
 0x30f   : > { %4465 = vmatpush1.bf16.msra.mxu0 %v13249_v23  ;;  %4629 = vmatpush1.bf16.msra.mxu1 %v13251_v38  ;;  %v13316_v23 = vcombine.high %v1157_v4, %v1161_v32  ;;  %v1164_v38 = vld [vmem:[%s16382_s21 + $0x6d0] sm:$0xff] }
 0x310   : > { %4466 = vmatprep.subr.bf16.mxu0 %v13258_v39  ;;  %4630 = vmatprep.subr.bf16.mxu1 %v13260_v40  ;;  %v1168_v39 = vld [vmem:[%s16382_s21 + $0x6f0] sm:$0xff]  ;;  %v1165_v40 = vld [vmem:[%s16382_s21 + $0x6d8] sm:$0xff] }
 0x311   : > { %v13322_v44 = vcombine.high %v1164_v38, %v1168_v39  ;;  %v13321_v51 = vcombine.low %v1164_v38, %v1168_v39  ;;  %v13323_v52 = vcombine.low %v1165_v40, %v1169_v41  ;;  %v1225_v38 = vld [vmem:[%s16382_s21 + $0x8b8] sm:$0xff] }
 0x313   : > { %4467 = vmatpush1.bf16.msra.mxu0 %v13257_v45  ;;  %4631 = vmatpush1.bf16.msra.mxu1 %v13259_v0  ;;  %v13324_v45 = vcombine.high %v1165_v40, %v1169_v41  ;;  %v1172_v0 = vld [vmem:[%s16382_s21 + $0x710] sm:$0xff] }
 0x314   : > { %4468 = vmatprep.subr.bf16.mxu0 %v13266_v46  ;;  %4632 = vmatprep.subr.bf16.mxu1 %v13268_v48  ;;  %v1176_v46 = vld [vmem:[%s16382_s21 + $0x730] sm:$0xff]  ;;  %v1173_v48 = vld [vmem:[%s16382_s21 + $0x718] sm:$0xff] }
 0x315   : > { %v13330_v53 = vcombine.high %v1172_v0, %v1176_v46  ;;  %v13329_v59 = vcombine.low %v1172_v0, %v1176_v46  ;;  %v13331_v60 = vcombine.low %v1173_v48, %v1177_v49  ;;  %v1233_v0 = vld [vmem:[%s16382_s21 + $0x8f8] sm:$0xff] }
 0x317   : > { %4469 = vmatpush1.bf16.msra.mxu0 %v13265_v54  ;;  %4633 = vmatpush1.bf16.msra.mxu1 %v13267_v55  ;;  %v13332_v54 = vcombine.high %v1173_v48, %v1177_v49  ;;  %v1180_v55 = vld [vmem:[%s16382_s21 + $0x750] sm:$0xff] }
 0x318   : > { %4470 = vmatprep.subr.bf16.mxu0 %v13274_v56  ;;  %4634 = vmatprep.subr.bf16.mxu1 %v13276_v57  ;;  %v1184_v56 = vld [vmem:[%s16382_s21 + $0x770] sm:$0xff]  ;;  %v1181_v57 = vld [vmem:[%s16382_s21 + $0x758] sm:$0xff] }
 0x319   : > { %v13338_v61 = vcombine.high %v1180_v55, %v1184_v56  ;;  %v13337_v6 = vcombine.low %v1180_v55, %v1184_v56  ;;  %v13339_v7 = vcombine.low %v1181_v57, %v1185_v58 }
 0x31b   : > { %4471 = vmatpush1.bf16.msra.mxu0 %v13273_v62  ;;  %4635 = vmatpush1.bf16.msra.mxu1 %v13275_v63  ;;  %v13340_v62 = vcombine.high %v1181_v57, %v1185_v58  ;;  %v1188_v63 = vld [vmem:[%s16382_s21 + $0x790] sm:$0xff] }
 0x31c   : > { %4472 = vmatprep.subr.bf16.mxu0 %v13282_v1  ;;  %4636 = vmatprep.subr.bf16.mxu1 %v13284_v3  ;;  %v1192_v1 = vld [vmem:[%s16382_s21 + $0x7b0] sm:$0xff]  ;;  %v1189_v3 = vld [vmem:[%s16382_s21 + $0x798] sm:$0xff] }
 0x31d   : > { %v13346_v8 = vcombine.high %v1188_v63, %v1192_v1  ;;  %v13345_v13 = vcombine.low %v1188_v63, %v1192_v1  ;;  %v13347_v14 = vcombine.low %v1189_v3, %v1193_v5  ;;  %v1244_v58 = vld [vmem:[%s16382_s21 + $0x950] sm:$0xff] }
 0x31f   : > { %4473 = vmatpush1.bf16.msra.mxu0 %v13281_v9  ;;  %4637 = vmatpush1.bf16.msra.mxu1 %v13283_v10  ;;  %v13348_v9 = vcombine.high %v1189_v3, %v1193_v5  ;;  %v1196_v10 = vld [vmem:[%s16382_s21 + $0x7d0] sm:$0xff] }
 0x320   : > { %4474 = vmatprep.subr.bf16.mxu0 %v13290_v11  ;;  %4638 = vmatprep.subr.bf16.mxu1 %v13292_v50  ;;  %v1200_v11 = vld [vmem:[%s16382_s21 + $0x7f0] sm:$0xff]  ;;  %v1197_v50 = vld [vmem:[%s16382_s21 + $0x7d8] sm:$0xff] }
 0x321   : > { %v13354_v15 = vcombine.high %v1196_v10, %v1200_v11  ;;  %v13353_v21 = vcombine.low %v1196_v10, %v1200_v11  ;;  %v13355_v22 = vcombine.low %v1197_v50, %v1201_v12  ;;  %v1252_v5 = vld [vmem:[%s16382_s21 + $0x990] sm:$0xff] }
 0x323   : > { %4475 = vmatpush1.bf16.msra.mxu0 %v13289_v16  ;;  %4639 = vmatpush1.bf16.msra.mxu1 %v13291_v17  ;;  %v13356_v16 = vcombine.high %v1197_v50, %v1201_v12  ;;  %v1204_v17 = vld [vmem:[%s16382_s21 + $0x810] sm:$0xff] }
 0x324   : > { %4476 = vmatprep.subr.bf16.mxu0 %v13298_v18  ;;  %4640 = vmatprep.subr.bf16.mxu1 %v13300_v19  ;;  %v1208_v18 = vld [vmem:[%s16382_s21 + $0x830] sm:$0xff]  ;;  %v1205_v19 = vld [vmem:[%s16382_s21 + $0x818] sm:$0xff] }
 0x325   : > { %v13362_v24 = vcombine.high %v1204_v17, %v1208_v18  ;;  %v13361_v31 = vcombine.low %v1204_v17, %v1208_v18  ;;  %v13363_v4 = vcombine.low %v1205_v19, %v1209_v20  ;;  %v1260_v12 = vld [vmem:[%s16382_s21 + $0x9d0] sm:$0xff] }
 0x327   : > { %4477 = vmatpush1.bf16.msra.mxu0 %v13297_v25  ;;  %4641 = vmatpush1.bf16.msra.mxu1 %v13299_v27  ;;  %v13364_v25 = vcombine.high %v1205_v19, %v1209_v20  ;;  %v1212_v27 = vld [vmem:[%s16382_s21 + $0x850] sm:$0xff] }
 0x328   : > { %4478 = vmatprep.subr.bf16.mxu0 %v13306_v28  ;;  %4642 = vmatprep.subr.bf16.mxu1 %v13308_v29  ;;  %v1216_v28 = vld [vmem:[%s16382_s21 + $0x870] sm:$0xff]  ;;  %v1213_v29 = vld [vmem:[%s16382_s21 + $0x858] sm:$0xff] }
 0x329   : > { %v13370_v32 = vcombine.high %v1212_v27, %v1216_v28  ;;  %v13369_v39 = vcombine.low %v1212_v27, %v1216_v28  ;;  %v13371_v40 = vcombine.low %v1213_v29, %v1217_v30  ;;  %v1268_v20 = vld [vmem:[%s16382_s21 + $0xa10] sm:$0xff] }
 0x32b   : > { %4479 = vmatpush1.bf16.msra.mxu0 %v13305_v34  ;;  %4643 = vmatpush1.bf16.msra.mxu1 %v13307_v35  ;;  %v13372_v34 = vcombine.high %v1213_v29, %v1217_v30  ;;  %v1220_v35 = vld [vmem:[%s16382_s21 + $0x890] sm:$0xff] }
 0x32c   : > { %4480 = vmatprep.subr.bf16.mxu0 %v13314_v37  ;;  %4644 = vmatprep.subr.bf16.mxu1 %v13316_v23  ;;  %v1224_v37 = vld [vmem:[%s16382_s21 + $0x8b0] sm:$0xff]  ;;  %v1221_v23 = vld [vmem:[%s16382_s21 + $0x898] sm:$0xff] }
 0x32d   : > { %v13378_v41 = vcombine.high %v1220_v35, %v1224_v37  ;;  %v13379_v46 = vcombine.low %v1221_v23, %v1225_v38  ;;  %v1276_v30 = vld [vmem:[%s16382_s21 + $0xa50] sm:$0xff] }
 0x32f   : > { %4481 = vmatpush1.bf16.msra.mxu0 %v13313_v42  ;;  %4645 = vmatpush1.bf16.msra.mxu1 %v13315_v43  ;;  %v13380_v42 = vcombine.high %v1221_v23, %v1225_v38  ;;  %v1228_v43 = vld [vmem:[%s16382_s21 + $0x8d0] sm:$0xff] }
 0x330   : > { %4482 = vmatprep.subr.bf16.mxu0 %v13322_v44  ;;  %4646 = vmatprep.subr.bf16.mxu1 %v13324_v45  ;;  %v1232_v44 = vld [vmem:[%s16382_s21 + $0x8f0] sm:$0xff]  ;;  %v1229_v45 = vld [vmem:[%s16382_s21 + $0x8d8] sm:$0xff] }
 0x331   : > { %v13386_v48 = vcombine.high %v1228_v43, %v1232_v44  ;;  %v13388_v49 = vcombine.high %v1229_v45, %v1233_v0  ;;  %v13385_v55 = vcombine.low %v1228_v43, %v1232_v44  ;;  %v1284_v38 = vld [vmem:[%s16382_s21 + $0xa90] sm:$0xff] }
 0x333   : > { %4483 = vmatpush1.bf16.msra.mxu0 %v13321_v51  ;;  %4647 = vmatpush1.bf16.msra.mxu1 %v13323_v52  ;;  %v1236_v51 = vld [vmem:[%s16382_s21 + $0x910] sm:$0xff] }
 0x334   : > { %4484 = vmatprep.subr.bf16.mxu0 %v13330_v53  ;;  %4648 = vmatprep.subr.bf16.mxu1 %v13332_v54  ;;  %v1240_v52 = vld [vmem:[%s16382_s21 + $0x930] sm:$0xff]  ;;  %v1237_v53 = vld [vmem:[%s16382_s21 + $0x918] sm:$0xff] }
 0x335   : > { %v1241_v54 = vld [vmem:[%s16382_s21 + $0x938] sm:$0xff]  ;;  %v13394_v56 = vcombine.high %v1236_v51, %v1240_v52 }
 0x336   : > { %v13396_v57 = vcombine.high %v1237_v53, %v1241_v54  ;;  %v13395_v63 = vcombine.low %v1237_v53, %v1241_v54  ;;  %v1300_v54 = vld [vmem:[%s16382_s21 + $0xb10] sm:$0xff] }
 0x337   : > { %4485 = vmatpush1.bf16.msra.mxu0 %v13329_v59  ;;  %4649 = vmatpush1.bf16.msra.mxu1 %v13331_v60  ;;  %v1248_v59 = vld [vmem:[%s16382_s21 + $0x970] sm:$0xff]  ;;  %v1245_v60 = vld [vmem:[%s16382_s21 + $0x958] sm:$0xff] }
 0x338   : > { %4486 = vmatprep.subr.bf16.mxu0 %v13338_v61  ;;  %4650 = vmatprep.subr.bf16.mxu1 %v13340_v62  ;;  %v1249_v61 = vld [vmem:[%s16382_s21 + $0x978] sm:$0xff]  ;;  %v13393_v62 = vcombine.low %v1236_v51, %v1240_v52  ;;  %v13402_v1 = vcombine.high %v1244_v58, %v1248_v59 }
 0x339   : > { %v13404_v3 = vcombine.high %v1245_v60, %v1249_v61  ;;  %v13403_v10 = vcombine.low %v1245_v60, %v1249_v61  ;;  %v1308_v61 = vld [vmem:[%s16382_s21 + $0xb50] sm:$0xff] }
 0x33b   : > { %4487 = vmatpush1.bf16.msra.mxu0 %v13337_v6  ;;  %4651 = vmatpush1.bf16.msra.mxu1 %v13339_v7  ;;  %v1256_v6 = vld [vmem:[%s16382_s21 + $0x9b0] sm:$0xff]  ;;  %v1253_v7 = vld [vmem:[%s16382_s21 + $0x998] sm:$0xff] }
 0x33c   : > { %4488 = vmatprep.subr.bf16.mxu0 %v13346_v8  ;;  %4652 = vmatprep.subr.bf16.mxu1 %v13348_v9  ;;  %v1257_v8 = vld [vmem:[%s16382_s21 + $0x9b8] sm:$0xff]  ;;  %v13401_v9 = vcombine.low %v1244_v58, %v1248_v59  ;;  %v13410_v11 = vcombine.high %v1252_v5, %v1256_v6 }
 0x33d   : > { %v13412_v50 = vcombine.high %v1253_v7, %v1257_v8  ;;  %v13411_v17 = vcombine.low %v1253_v7, %v1257_v8  ;;  %v1316_v8 = vld [vmem:[%s16382_s21 + $0xb90] sm:$0xff] }
 0x33f   : > { %4489 = vmatpush1.bf16.msra.mxu0 %v13345_v13  ;;  %4653 = vmatpush1.bf16.msra.mxu1 %v13347_v14  ;;  %v1264_v13 = vld [vmem:[%s16382_s21 + $0x9f0] sm:$0xff]  ;;  %v1261_v14 = vld [vmem:[%s16382_s21 + $0x9d8] sm:$0xff] }
 0x340   : > { %4490 = vmatprep.subr.bf16.mxu0 %v13354_v15  ;;  %4654 = vmatprep.subr.bf16.mxu1 %v13356_v16  ;;  %v1265_v15 = vld [vmem:[%s16382_s21 + $0x9f8] sm:$0xff]  ;;  %v13409_v16 = vcombine.low %v1252_v5, %v1256_v6  ;;  %v13418_v18 = vcombine.high %v1260_v12, %v1264_v13 }
 0x341   : > { %v13420_v19 = vcombine.high %v1261_v14, %v1265_v15  ;;  %v13419_v27 = vcombine.low %v1261_v14, %v1265_v15  ;;  %v1324_v15 = vld [vmem:[%s16382_s21 + $0xbd0] sm:$0xff] }
 0x343   : > { %4491 = vmatpush1.bf16.msra.mxu0 %v13353_v21  ;;  %4655 = vmatpush1.bf16.msra.mxu1 %v13355_v22  ;;  %v1272_v21 = vld [vmem:[%s16382_s21 + $0xa30] sm:$0xff]  ;;  %v1269_v22 = vld [vmem:[%s16382_s21 + $0xa18] sm:$0xff] }
 0x344   : > { %4501 = vmatprep.subr.bf16.mxu0 %v13362_v24  ;;  %4665 = vmatprep.subr.bf16.mxu1 %v13364_v25  ;;  %v1273_v24 = vld [vmem:[%s16382_s21 + $0xa38] sm:$0xff]  ;;  %v13417_v25 = vcombine.low %v1260_v12, %v1264_v13  ;;  %v13426_v28 = vcombine.high %v1268_v20, %v1272_v21 }
 0x345   : > { %v13428_v29 = vcombine.high %v1269_v22, %v1273_v24 }
 0x346   : > { %4493 = vmatmul.mubr.bf16.vlgmr.msra.gmra.mrb[4].mxu0 %v16610_v33  ;;  %4657 = vmatmul.mubr.bf16.vlgmr.msra.gmra.mrb[4].mxu1 %v16610_v33  ;;  %v13377_v33 = vcombine.low %v1220_v35, %v1224_v37  ;;  %v13427_v35 = vcombine.low %v1269_v22, %v1273_v24  ;;  %v1332_v24 = vld [vmem:[%s16382_s21 + $0xc10] sm:$0xff] }
 0x347   : > { %4502 = vmatpush1.bf16.msra.mxu0 %v13361_v31  ;;  %4666 = vmatpush1.bf16.msra.mxu1 %v13363_v4  ;;  %v1280_v31 = vld [vmem:[%s16382_s21 + $0xa70] sm:$0xff]  ;;  %v1277_v4 = vld [vmem:[%s16382_s21 + $0xa58] sm:$0xff] }
 0x348   : > { %4503 = vmatprep.subr.bf16.mxu0 %v13370_v32  ;;  %4667 = vmatprep.subr.bf16.mxu1 %v13372_v34  ;;  %v1281_v32 = vld [vmem:[%s16382_s21 + $0xa78] sm:$0xff]  ;;  %v13425_v34 = vcombine.low %v1268_v20, %v1272_v21  ;;  %v13434_v37 = vcombine.high %v1276_v30, %v1280_v31 }
 0x349   : > { %4533 = vmatprep.mubr.bf16.mxu0 %v16620_v26  ;;  %4697 = vmatprep.mubr.bf16.mxu1 %v16620_v26  ;;  %v13387_v26 = vcombine.low %v1229_v45, %v1233_v0  ;;  %v13436_v23 = vcombine.high %v1277_v4, %v1281_v32  ;;  %v13435_v43 = vcombine.low %v1277_v4, %v1281_v32  ;;  %v1292_v0 = vld [vmem:[%s16382_s21 + $0xad0] sm:$0xff] }
 0x34a   : > { %v1340_v32 = vld [vmem:[%s16382_s21 + $0xc50] sm:$0xff] }
 0x34b   : > { %4504 = vmatpush1.bf16.msra.mxu0 %v13369_v39  ;;  %4668 = vmatpush1.bf16.msra.mxu1 %v13371_v40  ;;  %v1288_v39 = vld [vmem:[%s16382_s21 + $0xab0] sm:$0xff]  ;;  %v1285_v40 = vld [vmem:[%s16382_s21 + $0xa98] sm:$0xff] }
 0x34c   : > { %4505 = vmatprep.subr.bf16.mxu0 %v13378_v41  ;;  %4669 = vmatprep.subr.bf16.mxu1 %v13380_v42  ;;  %v1289_v41 = vld [vmem:[%s16382_s21 + $0xab8] sm:$0xff]  ;;  %v13433_v42 = vcombine.low %v1276_v30, %v1280_v31  ;;  %v13442_v44 = vcombine.high %v1284_v38, %v1288_v39 }
 0x34d   : > { %v13444_v45 = vcombine.high %v1285_v40, %v1289_v41  ;;  %v13443_v51 = vcombine.low %v1285_v40, %v1289_v41  ;;  %v1348_v41 = vld [vmem:[%s16382_s21 + $0xc90] sm:$0xff] }
 0x34f   : > { %4506 = vmatpush1.bf16.msra.mxu0 %v13377_v33  ;;  %4670 = vmatpush1.bf16.msra.mxu1 %v13379_v46  ;;  %v1296_v33 = vld [vmem:[%s16382_s21 + $0xaf0] sm:$0xff]  ;;  %v1293_v46 = vld [vmem:[%s16382_s21 + $0xad8] sm:$0xff] }
 0x350   : > { %4507 = vmatprep.subr.bf16.mxu0 %v13386_v48  ;;  %4671 = vmatprep.subr.bf16.mxu1 %v13388_v49  ;;  %v1297_v48 = vld [vmem:[%s16382_s21 + $0xaf8] sm:$0xff]  ;;  %v13441_v49 = vcombine.low %v1284_v38, %v1288_v39  ;;  %v13450_v52 = vcombine.high %v1292_v0, %v1296_v33 }
 0x351   : > { %v13452_v53 = vcombine.high %v1293_v46, %v1297_v48  ;;  %v13451_v58 = vcombine.low %v1293_v46, %v1297_v48  ;;  %v1356_v48 = vld [vmem:[%s16382_s21 + $0xcd0] sm:$0xff] }
 0x353   : > { %4508 = vmatpush1.bf16.msra.mxu0 %v13385_v55  ;;  %4672 = vmatpush1.bf16.msra.mxu1 %v13387_v26  ;;  %v1304_v55 = vld [vmem:[%s16382_s21 + $0xb30] sm:$0xff]  ;;  %v1301_v26 = vld [vmem:[%s16382_s21 + $0xb18] sm:$0xff] }
 0x354   : > { %4509 = vmatprep.subr.bf16.mxu0 %v13394_v56  ;;  %4673 = vmatprep.subr.bf16.mxu1 %v13396_v57  ;;  %v1305_v56 = vld [vmem:[%s16382_s21 + $0xb38] sm:$0xff]  ;;  %v13449_v57 = vcombine.low %v1292_v0, %v1296_v33  ;;  %v13458_v59 = vcombine.high %v1300_v54, %v1304_v55 }
 0x355   : > { %v13460_v60 = vcombine.high %v1301_v26, %v1305_v56  ;;  %v13459_v5 = vcombine.low %v1301_v26, %v1305_v56  ;;  %v1364_v56 = vld [vmem:[%s16382_s21 + $0xd10] sm:$0xff] }
 0x357   : > { %4510 = vmatpush1.bf16.msra.mxu0 %v13393_v62  ;;  %4674 = vmatpush1.bf16.msra.mxu1 %v13395_v63  ;;  %v1312_v62 = vld [vmem:[%s16382_s21 + $0xb70] sm:$0xff]  ;;  %v1309_v63 = vld [vmem:[%s16382_s21 + $0xb58] sm:$0xff] }
 0x358   : > { %4511 = vmatprep.subr.bf16.mxu0 %v13402_v1  ;;  %4675 = vmatprep.subr.bf16.mxu1 %v13404_v3  ;;  %v1313_v1 = vld [vmem:[%s16382_s21 + $0xb78] sm:$0xff]  ;;  %v13457_v3 = vcombine.low %v1300_v54, %v1304_v55  ;;  %v13466_v6 = vcombine.high %v1308_v61, %v1312_v62 }
 0x359   : > { %v13468_v7 = vcombine.high %v1309_v63, %v1313_v1  ;;  %v13467_v12 = vcombine.low %v1309_v63, %v1313_v1  ;;  %v1372_v1 = vld [vmem:[%s16382_s21 + $0xd50] sm:$0xff] }
 0x35b   : > { %4512 = vmatpush1.bf16.msra.mxu0 %v13401_v9  ;;  %4676 = vmatpush1.bf16.msra.mxu1 %v13403_v10  ;;  %v1320_v9 = vld [vmem:[%s16382_s21 + $0xbb0] sm:$0xff]  ;;  %v1317_v10 = vld [vmem:[%s16382_s21 + $0xb98] sm:$0xff] }
 0x35c   : > { %4513 = vmatprep.subr.bf16.mxu0 %v13410_v11  ;;  %4677 = vmatprep.subr.bf16.mxu1 %v13412_v50  ;;  %v1321_v11 = vld [vmem:[%s16382_s21 + $0xbb8] sm:$0xff]  ;;  %v13465_v50 = vcombine.low %v1308_v61, %v1312_v62  ;;  %v13474_v13 = vcombine.high %v1316_v8, %v1320_v9 }
 0x35d   : > { %v13476_v14 = vcombine.high %v1317_v10, %v1321_v11  ;;  %v13475_v20 = vcombine.low %v1317_v10, %v1321_v11 }
 0x35f   : > { %4514 = vmatpush1.bf16.msra.mxu0 %v13409_v16  ;;  %4678 = vmatpush1.bf16.msra.mxu1 %v13411_v17  ;;  %v1328_v16 = vld [vmem:[%s16382_s21 + $0xbf0] sm:$0xff]  ;;  %v1325_v17 = vld [vmem:[%s16382_s21 + $0xbd8] sm:$0xff] }
 0x360   : > { %4515 = vmatprep.subr.bf16.mxu0 %v13418_v18  ;;  %4679 = vmatprep.subr.bf16.mxu1 %v13420_v19  ;;  %v1329_v18 = vld [vmem:[%s16382_s21 + $0xbf8] sm:$0xff]  ;;  %v13473_v19 = vcombine.low %v1316_v8, %v1320_v9  ;;  %v13482_v21 = vcombine.high %v1324_v15, %v1328_v16  ;;  %v1461_v9 = vld [vmem:[%s17000_s15] sm:$0xff] }
 0x361   : > { %v13484_v22 = vcombine.high %v1325_v17, %v1329_v18  ;;  %v13483_v30 = vcombine.low %v1325_v17, %v1329_v18  ;;  %v1381_v18 = vld [vmem:[%s16382_s21 + $0xd98] sm:$0xff] }
 0x363   : > { %4516 = vmatpush1.bf16.msra.mxu0 %v13417_v25  ;;  %4680 = vmatpush1.bf16.msra.mxu1 %v13419_v27  ;;  %v1336_v25 = vld [vmem:[%s16382_s21 + $0xc30] sm:$0xff]  ;;  %v1333_v27 = vld [vmem:[%s16382_s21 + $0xc18] sm:$0xff] }
 0x364   : > { %4517 = vmatprep.subr.bf16.mxu0 %v13426_v28  ;;  %4681 = vmatprep.subr.bf16.mxu1 %v13428_v29  ;;  %v1337_v28 = vld [vmem:[%s16382_s21 + $0xc38] sm:$0xff]  ;;  %v13481_v29 = vcombine.low %v1324_v15, %v1328_v16  ;;  %v13490_v31 = vcombine.high %v1332_v24, %v1336_v25  ;;  %v1380_v15 = vld [vmem:[%s16382_s21 + $0xd90] sm:$0xff] }
 0x365   : > { %v13492_v4 = vcombine.high %v1333_v27, %v1337_v28  ;;  %v13491_v38 = vcombine.low %v1333_v27, %v1337_v28  ;;  %v1384_v16 = vld [vmem:[%s16382_s21 + $0xdb0] sm:$0xff] }
 0x366   : > { %v13538_v27 = vcombine.high %v1380_v15, %v1384_v16 }
 0x367   : > { %4518 = vmatpush1.bf16.msra.mxu0 %v13425_v34  ;;  %4682 = vmatpush1.bf16.msra.mxu1 %v13427_v35  ;;  %v1344_v34 = vld [vmem:[%s16382_s21 + $0xc70] sm:$0xff]  ;;  %v1341_v35 = vld [vmem:[%s16382_s21 + $0xc58] sm:$0xff] }
 0x368   : > { %4519 = vmatprep.subr.bf16.mxu0 %v13434_v37  ;;  %4683 = vmatprep.subr.bf16.mxu1 %v13436_v23  ;;  %v1345_v37 = vld [vmem:[%s16382_s21 + $0xc78] sm:$0xff]  ;;  %v13489_v23 = vcombine.low %v1332_v24, %v1336_v25  ;;  %v13498_v39 = vcombine.high %v1340_v32, %v1344_v34 }
 0x369   : > { %v13500_v40 = vcombine.high %v1341_v35, %v1345_v37  ;;  %v13499_v0 = vcombine.low %v1341_v35, %v1345_v37  ;;  %v1389_v35 = vld [vmem:[%s16382_s21 + $0xdd8] sm:$0xff] }
 0x36a   : > { %v1393_v37 = vld [vmem:[%s16382_s21 + $0xdf8] sm:$0xff] }
 0x36b   : > { %4520 = vmatpush1.bf16.msra.mxu0 %v13433_v42  ;;  %4684 = vmatpush1.bf16.msra.mxu1 %v13435_v43  ;;  %v1352_v42 = vld [vmem:[%s16382_s21 + $0xcb0] sm:$0xff]  ;;  %v1349_v43 = vld [vmem:[%s16382_s21 + $0xc98] sm:$0xff] }
 0x36c   : > { %4521 = vmatprep.subr.bf16.mxu0 %v13442_v44  ;;  %4685 = vmatprep.subr.bf16.mxu1 %v13444_v45  ;;  %v1353_v44 = vld [vmem:[%s16382_s21 + $0xcb8] sm:$0xff]  ;;  %v13497_v45 = vcombine.low %v1340_v32, %v1344_v34  ;;  %v13506_v33 = vcombine.high %v1348_v41, %v1352_v42 }
 0x36d   : > { %v13508_v46 = vcombine.high %v1349_v43, %v1353_v44  ;;  %v13507_v54 = vcombine.low %v1349_v43, %v1353_v44 }
 0x36f   : > { %4522 = vmatpush1.bf16.msra.mxu0 %v13441_v49  ;;  %4686 = vmatpush1.bf16.msra.mxu1 %v13443_v51  ;;  %v1360_v49 = vld [vmem:[%s16382_s21 + $0xcf0] sm:$0xff]  ;;  %v1357_v51 = vld [vmem:[%s16382_s21 + $0xcd8] sm:$0xff] }
 0x370   : > { %4523 = vmatprep.subr.bf16.mxu0 %v13450_v52  ;;  %4687 = vmatprep.subr.bf16.mxu1 %v13452_v53  ;;  %v1361_v52 = vld [vmem:[%s16382_s21 + $0xcf8] sm:$0xff]  ;;  %v1463_v53 = vlaneseq  ;;  %v13514_v55 = vcombine.high %v1356_v48, %v1360_v49 }
 0x371   : > { %v13516_v26 = vcombine.high %v1357_v51, %v1361_v52  ;;  %v13515_v61 = vcombine.low %v1357_v51, %v1361_v52  ;;  %v13548_v51 = vcombine.high %v1389_v35, %v1393_v37  ;;  %v1396_v52 = vld [vmem:[%s16382_s21 + $0xe10] sm:$0xff] }
 0x373   : > { %4524 = vmatpush1.bf16.msra.mxu0 %v13449_v57  ;;  %4688 = vmatpush1.bf16.msra.mxu1 %v13451_v58  ;;  %v1368_v57 = vld [vmem:[%s16382_s21 + $0xd30] sm:$0xff]  ;;  %v1365_v58 = vld [vmem:[%s16382_s21 + $0xd18] sm:$0xff] }
 0x374   : > { %4525 = vmatprep.subr.bf16.mxu0 %v13458_v59  ;;  %4689 = vmatprep.subr.bf16.mxu1 %v13460_v60  ;;  %v1369_v59 = vld [vmem:[%s16382_s21 + $0xd38] sm:$0xff]  ;;  %v16991_v60 = vshrl.u32 %v1463_v53, 7  ;;  %v13522_v62 = vcombine.high %v1364_v56, %v1368_v57  ;;  %v13521_v8 = vcombine.low %v1364_v56, %v1368_v57  ;;  %v1400_v53 = vld [vmem:[%s16382_s21 + $0xe30] sm:$0xff]  ;;  %v13547_v56 = vcombine.low %v1389_v35, %v1393_v37 }
 0x375   : > { %v13524_v63 = vcombine.high %v1365_v58, %v1369_v59  ;;  %v13554_v57 = vcombine.high %v1396_v52, %v1400_v53  ;;  %v1436_v37 = vld [vmem:[%s16382_s21 + $0xf50] sm:$0xff] }
 0x376   : > { %v17004_v10 = vsub.s32 2, %v16991_v60  ;;  %v17007_v11 = vsub.s32 1, %v16991_v60 }
 0x377   : > { %4526 = vmatpush1.bf16.msra.mxu0 %v13457_v3  ;;  %4690 = vmatpush1.bf16.msra.mxu1 %v13459_v5  ;;  %v1376_v3 = vld [vmem:[%s16382_s21 + $0xd70] sm:$0xff]  ;;  %v16996_v5 = vsub.s32 0, %v16991_v60 }
 0x378   : > { %4527 = vmatprep.subr.bf16.mxu0 %v13466_v6  ;;  %4691 = vmatprep.subr.bf16.mxu1 %v13468_v7  ;;  %v1373_v6 = vld [vmem:[%s16382_s21 + $0xd58] sm:$0xff] }
 0x379   : > { %v1377_v7 = vld [vmem:[%s16382_s21 + $0xd78] sm:$0xff]  ;;  %v1466_v17 = vrot.slane %v1461_v9, %v16996_v5 }
 0x37a   : > { %v13531_v25 = vcombine.low %v1373_v6, %v1377_v7 }
 0x37b   : > { %4528 = vmatpush1.bf16.msra.mxu0 %v13465_v50  ;;  %4692 = vmatpush1.bf16.msra.mxu1 %v13467_v12  ;;  %v13523_v50 = vcombine.low %v1365_v58, %v1369_v59  ;;  %v17010_v12 = vsub.s32 3, %v16991_v60  ;;  %v1404_v59 = vld [vmem:[%s16382_s21 + $0xe50] sm:$0xff] }
 0x37c   : > { %4529 = vmatprep.subr.bf16.mxu0 %v13474_v13  ;;  %4693 = vmatprep.subr.bf16.mxu1 %v13476_v14  ;;  %v13530_v13 = vcombine.high %v1372_v1, %v1376_v3  ;;  %v13532_v14 = vcombine.high %v1373_v6, %v1377_v7  ;;  %v1412_v7 = vld [vmem:[%s16382_s21 + $0xe90] sm:$0xff] }
 0x37d   : > { %v1478_v24 = vrot.slane %v1461_v9, %v17010_v12 }
 0x37f   : > { %4530 = vmatpush1.bf16.msra.mxu0 %v13473_v19  ;;  %4694 = vmatpush1.bf16.msra.mxu1 %v13475_v20  ;;  %v1385_v19 = vld [vmem:[%s16382_s21 + $0xdb8] sm:$0xff]  ;;  %v1474_v20 = vrot.slane %v1461_v9, %v17004_v10 }
 0x380   : > { %4531 = vmatprep.subr.bf16.mxu0 %v13482_v21  ;;  %4695 = vmatprep.subr.bf16.mxu1 %v13484_v22  ;;  %v1470_v21 = vrot.slane %v1461_v9, %v17007_v11  ;;  %v13529_v22 = vcombine.low %v1372_v1, %v1376_v3  ;;  %v1413_v9 = vld [vmem:[%s16382_s21 + $0xe98] sm:$0xff] }
 0x383   : > { %4532 = vmatpush1.bf16.msra.mxu0 %v13481_v29  ;;  %4696 = vmatpush1.bf16.msra.mxu1 %v13483_v30  ;;  %v13540_v29 = vcombine.high %v1381_v18, %v1385_v19  ;;  %v1388_v30 = vld [vmem:[%s16382_s21 + $0xdd0] sm:$0xff] }
 0x384   : > { %4542 = vmatprep.subr.bf16.mxu0 %v13490_v31  ;;  %4706 = vmatprep.subr.bf16.mxu1 %v13492_v4  ;;  %v1392_v31 = vld [vmem:[%s16382_s21 + $0xdf0] sm:$0xff] }
 0x386   : > { %4534 = vmatmul.mubr.bf16.vlgmr.msra.gmra.mrb[4].mxu0 %v16688_v47  ;;  %4698 = vmatmul.mubr.bf16.vlgmr.msra.gmra.mrb[4].mxu1 %v16688_v47  ;;  %v13505_v47 = vcombine.low %v1348_v41, %v1352_v42  ;;  %v13537_v41 = vcombine.low %v1380_v15, %v1384_v16 }
 0x387   : > { %4543 = vmatpush1.bf16.msra.mxu0 %v13489_v23  ;;  %4707 = vmatpush1.bf16.msra.mxu1 %v13491_v38 }
 0x388   : > { %4544 = vmatprep.subr.bf16.mxu0 %v13498_v39  ;;  %4708 = vmatprep.subr.bf16.mxu1 %v13500_v40 }
 0x389   : > { %4574 = vmatprep.mubr.bf16.mxu0 %v16698_v36  ;;  %4738 = vmatprep.mubr.bf16.mxu1 %v16698_v36  ;;  %v13513_v36 = vcombine.low %v1356_v48, %v1360_v49 }
 0x38b   : > { %4545 = vmatpush1.bf16.msra.mxu0 %v13497_v45  ;;  %4709 = vmatpush1.bf16.msra.mxu1 %v13499_v0  ;;  %v13539_v0 = vcombine.low %v1381_v18, %v1385_v19  ;;  %v1424_v18 = vld [vmem:[%s16382_s21 + $0xef0] sm:$0xff]  ;;  %v1421_v19 = vld [vmem:[%s16382_s21 + $0xed8] sm:$0xff] }
 0x38c   : > { %4546 = vmatprep.subr.bf16.mxu0 %v13506_v33  ;;  %4710 = vmatprep.subr.bf16.mxu1 %v13508_v46  ;;  %v13546_v33 = vcombine.high %v1388_v30, %v1392_v31 }
 0x38f   : > { %4547 = vmatpush1.bf16.msra.mxu0 %v13505_v47  ;;  %4711 = vmatpush1.bf16.msra.mxu1 %v13507_v54  ;;  %v1397_v54 = vld [vmem:[%s16382_s21 + $0xe18] sm:$0xff] }
 0x390   : > { %4548 = vmatprep.subr.bf16.mxu0 %v13514_v55  ;;  %4712 = vmatprep.subr.bf16.mxu1 %v13516_v26  ;;  %v1401_v55 = vld [vmem:[%s16382_s21 + $0xe38] sm:$0xff]  ;;  %v13545_v26 = vcombine.low %v1388_v30, %v1392_v31 }
 0x391   : > { %v13556_v58 = vcombine.high %v1397_v54, %v1401_v55  ;;  %v13555_v1 = vcombine.low %v1397_v54, %v1401_v55  ;;  %v1433_v30 = vld [vmem:[%s16382_s21 + $0xf38] sm:$0xff] }
 0x393   : > { %4549 = vmatpush1.bf16.msra.mxu0 %v13513_v36  ;;  %4713 = vmatpush1.bf16.msra.mxu1 %v13515_v61  ;;  %v1408_v36 = vld [vmem:[%s16382_s21 + $0xe70] sm:$0xff]  ;;  %v1405_v61 = vld [vmem:[%s16382_s21 + $0xe58] sm:$0xff] }
 0x394   : > { %4550 = vmatprep.subr.bf16.mxu0 %v13522_v62  ;;  %4714 = vmatprep.subr.bf16.mxu1 %v13524_v63  ;;  %v1409_v62 = vld [vmem:[%s16382_s21 + $0xe78] sm:$0xff]  ;;  %v13553_v63 = vcombine.low %v1396_v52, %v1400_v53  ;;  %v13562_v3 = vcombine.high %v1404_v59, %v1408_v36 }
 0x395   : > { %v13564_v6 = vcombine.high %v1405_v61, %v1409_v62  ;;  %v1445_v52 = vld [vmem:[%s16382_s21 + $0xf98] sm:$0xff] }
 0x396   : > { %v1449_v53 = vld [vmem:[%s16382_s21 + $0xfb8] sm:$0xff] }
 0x397   : > { %4551 = vmatpush1.bf16.msra.mxu0 %v13521_v8  ;;  %4715 = vmatpush1.bf16.msra.mxu1 %v13523_v50  ;;  %v1416_v8 = vld [vmem:[%s16382_s21 + $0xeb0] sm:$0xff]  ;;  %v1417_v50 = vld [vmem:[%s16382_s21 + $0xeb8] sm:$0xff] }
 0x398   : > { %4552 = vmatprep.subr.bf16.mxu0 %v13530_v13  ;;  %4716 = vmatprep.subr.bf16.mxu1 %v13532_v14  ;;  %v13561_v13 = vcombine.low %v1404_v59, %v1408_v36  ;;  %v13563_v14 = vcombine.low %v1405_v61, %v1409_v62  ;;  %v13570_v15 = vcombine.high %v1412_v7, %v1416_v8  ;;  %v1453_v59 = vld [vmem:[%s16382_s21 + $0xfd8] sm:$0xff] }
 0x399   : > { %v4248_v28 = vpop.f32.mrb[0].mxu0  ;;  %v4412_v32 = vpop.f32.mrb[0].mxu1  ;;  %v13572_v16 = vcombine.high %v1413_v9, %v1417_v50  ;;  %v1457_v36 = vld [vmem:[%s16382_s21 + $0xff8] sm:$0xff]  ;;  %v13603_v62 = vcombine.low %v1445_v52, %v1449_v53 }
 0x39a   : > { %v17022_v4 = vadd.f32 %v4248_v28, %v1466_v17  ;;  %v4250_v34 = vpop.f32.mrb[1].mxu0  ;;  %v17026_v23 = vadd.f32 %v4412_v32, %v1474_v20  ;;  %v4414_v39 = vpop.f32.mrb[1].mxu1  ;;  %v1420_v17 = vld [vmem:[%s16382_s21 + $0xed0] sm:$0xff]  ;;  %v1425_v20 = vld [vmem:[%s16382_s21 + $0xef8] sm:$0xff] }
 0x39b   : > { %v17028_v38 = vadd.f32 %v4250_v34, %v1470_v21  ;;  %v4252_v40 = vpop.f32.mrb[2].mxu0  ;;  %4553 = vmatpush1.bf16.msra.mxu0 %v13529_v22  ;;  %v17033_v43 = vadd.f32 %v4414_v39, %v1478_v24  ;;  %v4416_v44 = vpop.f32.mrb[2].mxu1  ;;  %4717 = vmatpush1.bf16.msra.mxu1 %v13531_v25  ;;  %v13569_v21 = vcombine.low %v1412_v7, %v1416_v8  ;;  %v1432_v28 = vld [vmem:[%s16382_s21 + $0xf30] sm:$0xff]  ;;  %v13618_v7 = vld [vmem:[%s16382_s21 + $0x1008] sm:$0xff] }
 0x39c   : > { %4747 = vst [vmem:[%s16400_s30] sm:$0xff] %v17022_v4  ;;  %v4755_v42 = vmax.f32 %v17022_v4, 0.0  ;;  %v4253_v45 = vpop.f32.mrb[3].mxu0  ;;  %4554 = vmatprep.subr.bf16.mxu0 %v13538_v27  ;;  %4749 = vst [vmem:[%s16400_s30 + $0x10] sm:$0xff] %v17026_v23  ;;  %v4757_v46 = vmax.f32 %v17026_v23, 0.0  ;;  %v4417_v49 = vpop.f32.mrb[3].mxu1  ;;  %4718 = vmatprep.subr.bf16.mxu1 %v13540_v29  ;;  %v13571_v22 = vcombine.low %v1413_v9, %v1417_v50  ;;  %v1428_v27 = vld [vmem:[%s16382_s21 + $0xf10] sm:$0xff] }
 0x39d   : > { %4748 = vst [vmem:[%s16400_s30 + $0x8] sm:$0xff] %v17028_v38  ;;  %v4756_v48 = vmax.f32 %v17028_v38, 0.0  ;;  %4750 = vst [vmem:[%s16400_s30 + $0x18] sm:$0xff] %v17033_v43  ;;  %v4758_v47 = vmax.f32 %v17033_v43, 0.0  ;;  %v13578_v24 = vcombine.high %v1420_v17, %v1424_v18  ;;  %v13580_v25 = vcombine.high %v1421_v19, %v1425_v20  ;;  %v1429_v29 = vld [vmem:[%s16382_s21 + $0xf18] sm:$0xff]  ;;  %v1440_v39 = vld [vmem:[%s16382_s21 + $0xf70] sm:$0xff] }
 0x39e   : > { %v13577_v31 = vcombine.low %v1420_v17, %v1424_v18  ;;  %v13579_v32 = vcombine.low %v1421_v19, %v1425_v20  ;;  %v13586_v34 = vcombine.high %v1428_v27, %v1432_v28  ;;  %v13588_v35 = vcombine.high %v1429_v29, %v1433_v30  ;;  %v1437_v40 = vld [vmem:[%s16382_s21 + $0xf58] sm:$0xff]  ;;  %v1444_v49 = vld [vmem:[%s16382_s21 + $0xf90] sm:$0xff]  ;;  %v13622_v8 = vld [vmem:[%s16382_s21 + $0x1028] sm:$0xff] }
 0x39f   : > { %4555 = vmatpush1.bf16.msra.mxu0 %v13537_v41  ;;  %4719 = vmatpush1.bf16.msra.mxu1 %v13539_v0  ;;  %v1441_v41 = vld [vmem:[%s16382_s21 + $0xf78] sm:$0xff]  ;;  %v13585_v44 = vcombine.low %v1428_v27, %v1432_v28  ;;  %v13587_v45 = vcombine.low %v1429_v29, %v1433_v30  ;;  %v13594_v0 = vcombine.high %v1436_v37, %v1440_v39  ;;  %v13626_v18 = vld [vmem:[%s16382_s21 + $0x1048] sm:$0xff] }
 0x3a0   : > { %4556 = vmatprep.subr.bf16.mxu0 %v13546_v33  ;;  %4720 = vmatprep.subr.bf16.mxu1 %v13548_v51  ;;  %v13596_v33 = vcombine.high %v1437_v40, %v1441_v41  ;;  %v1448_v51 = vld [vmem:[%s16382_s21 + $0xfb0] sm:$0xff]  ;;  %v13593_v54 = vcombine.low %v1436_v37, %v1440_v39  ;;  %v13595_v55 = vcombine.low %v1437_v40, %v1441_v41  ;;  %v13630_v19 = vld [vmem:[%s16382_s21 + $0x1068] sm:$0xff] }
 0x3a1   : > { %v13601_v61 = vcombine.low %v1444_v49, %v1448_v51  ;;  %v13611_v50 = vcombine.low %v1453_v59, %v1457_v36  ;;  %v14142_v20 = vcombine.low %v13618_v7, %v13622_v8  ;;  %v14151_v27 = vcombine.high %v13626_v18, %v13630_v19  ;;  %v13634_v28 = vld [vmem:[%s16382_s21 + $0x1088] sm:$0xff] }
 0x3a2   : > { %v13638_v29 = vld [vmem:[%s16382_s21 + $0x10a8] sm:$0xff] }
 0x3a3   : > { %4557 = vmatpush1.bf16.msra.mxu0 %v13545_v26  ;;  %4721 = vmatpush1.bf16.msra.mxu1 %v13547_v56  ;;  %v13602_v26 = vcombine.high %v1444_v49, %v1448_v51  ;;  %v13604_v56 = vcombine.high %v1445_v52, %v1449_v53  ;;  %v14159_v38 = vcombine.high %v13634_v28, %v13638_v29  ;;  %v13762_v4 = vld [vmem:[%s16382_s21 + $0x1488] sm:$0xff] }
 0x3a4   : > { %4558 = vmatprep.subr.bf16.mxu0 %v13554_v57  ;;  %4722 = vmatprep.subr.bf16.mxu1 %v13556_v58  ;;  %v1452_v57 = vld [vmem:[%s16382_s21 + $0xfd0] sm:$0xff]  ;;  %v14158_v39 = vcombine.low %v13634_v28, %v13638_v29 }
 0x3a5   : > { %v1456_v58 = vld [vmem:[%s16382_s21 + $0xff0] sm:$0xff] }
 0x3a6   : > { %v13609_v9 = vcombine.low %v1452_v57, %v1456_v58 }
 0x3a7   : > { %4559 = vmatpush1.bf16.msra.mxu0 %v13553_v63  ;;  %4723 = vmatpush1.bf16.msra.mxu1 %v13555_v1  ;;  %v13610_v63 = vcombine.high %v1452_v57, %v1456_v58  ;;  %v13612_v1 = vcombine.high %v1453_v59, %v1457_v36 }
 0x3a8   : > { %4560 = vmatprep.subr.bf16.mxu0 %v13562_v3  ;;  %4724 = vmatprep.subr.bf16.mxu1 %v13564_v6  ;;  %v13617_v3 = vld [vmem:[%s16382_s21 + $0x1000] sm:$0xff] }
 0x3a9   : > { %v13621_v6 = vld [vmem:[%s16382_s21 + $0x1020] sm:$0xff] }
 0x3aa   : > { %v14140_v17 = vcombine.low %v13617_v3, %v13621_v6 }
 0x3ab   : > { %4561 = vmatpush1.bf16.msra.mxu0 %v13561_v13  ;;  %4725 = vmatpush1.bf16.msra.mxu1 %v13563_v14  ;;  %v14141_v13 = vcombine.high %v13617_v3, %v13621_v6  ;;  %v14143_v14 = vcombine.high %v13618_v7, %v13622_v8 }
 0x3ac   : > { %4562 = vmatprep.subr.bf16.mxu0 %v13570_v15  ;;  %4726 = vmatprep.subr.bf16.mxu1 %v13572_v16  ;;  %v13625_v15 = vld [vmem:[%s16382_s21 + $0x1040] sm:$0xff] }
 0x3ad   : > { %v13629_v16 = vld [vmem:[%s16382_s21 + $0x1060] sm:$0xff] }
 0x3ae   : > { %v14148_v30 = vcombine.low %v13625_v15, %v13629_v16 }
 0x3af   : > { %4563 = vmatpush1.bf16.msra.mxu0 %v13569_v21  ;;  %4727 = vmatpush1.bf16.msra.mxu1 %v13571_v22  ;;  %v14149_v21 = vcombine.high %v13625_v15, %v13629_v16  ;;  %v13633_v22 = vld [vmem:[%s16382_s21 + $0x1080] sm:$0xff] }
 0x3b0   : > { %4564 = vmatprep.subr.bf16.mxu0 %v13578_v24  ;;  %4728 = vmatprep.subr.bf16.mxu1 %v13580_v25  ;;  %v13637_v24 = vld [vmem:[%s16382_s21 + $0x10a0] sm:$0xff]  ;;  %v17090_v25 = vpack.c.bf16 %v4756_v48, %v4756_v48 }
 0x3b1   : > { %v13641_v48 = vld [vmem:[%s16382_s21 + $0x10c0] sm:$0xff]  ;;  %v14156_v37 = vcombine.low %v13633_v22, %v13637_v24 }
 0x3b3   : > { %4565 = vmatpush1.bf16.msra.mxu0 %v13577_v31  ;;  %4729 = vmatpush1.bf16.msra.mxu1 %v13579_v32  ;;  %v14150_v31 = vcombine.low %v13626_v18, %v13630_v19  ;;  %v14157_v32 = vcombine.high %v13633_v22, %v13637_v24  ;;  %v13681_v19 = vld [vmem:[%s16382_s21 + $0x1200] sm:$0xff]  ;;  %v13686_v22 = vld [vmem:[%s16382_s21 + $0x1228] sm:$0xff] }
 0x3b4   : > { %4566 = vmatprep.subr.bf16.mxu0 %v13586_v34  ;;  %4730 = vmatprep.subr.bf16.mxu1 %v13588_v35  ;;  %v13645_v34 = vld [vmem:[%s16382_s21 + $0x10e0] sm:$0xff]  ;;  %v13642_v35 = vld [vmem:[%s16382_s21 + $0x10c8] sm:$0xff] }
 0x3b5   : > { %v14165_v40 = vcombine.high %v13641_v48, %v13645_v34  ;;  %v14164_v49 = vcombine.low %v13641_v48, %v13645_v34 }
 0x3b7   : > { %4567 = vmatpush1.bf16.msra.mxu0 %v13585_v44  ;;  %4731 = vmatpush1.bf16.msra.mxu1 %v13587_v45  ;;  %v13649_v44 = vld [vmem:[%s16382_s21 + $0x1100] sm:$0xff] }
 0x3b8   : > { %4568 = vmatprep.subr.bf16.mxu0 %v13594_v0  ;;  %4732 = vmatprep.subr.bf16.mxu1 %v13596_v33  ;;  %v13653_v45 = vld [vmem:[%s16382_s21 + $0x1120] sm:$0xff]  ;;  %v13650_v0 = vld [vmem:[%s16382_s21 + $0x1108] sm:$0xff] }
 0x3b9   : > { %v13654_v33 = vld [vmem:[%s16382_s21 + $0x1128] sm:$0xff]  ;;  %v14173_v52 = vcombine.high %v13649_v44, %v13653_v45  ;;  %v14172_v57 = vcombine.low %v13649_v44, %v13653_v45 }
 0x3ba   : > { %v14175_v53 = vcombine.high %v13650_v0, %v13654_v33  ;;  %v14174_v58 = vcombine.low %v13650_v0, %v13654_v33 }
 0x3bb   : > { %4569 = vmatpush1.bf16.msra.mxu0 %v13593_v54  ;;  %4733 = vmatpush1.bf16.msra.mxu1 %v13595_v55  ;;  %v13657_v54 = vld [vmem:[%s16382_s21 + $0x1140] sm:$0xff] }
 0x3bc   : > { %4570 = vmatprep.subr.bf16.mxu0 %v13602_v26  ;;  %4734 = vmatprep.subr.bf16.mxu1 %v13604_v56  ;;  %v13661_v55 = vld [vmem:[%s16382_s21 + $0x1160] sm:$0xff]  ;;  %v13658_v26 = vld [vmem:[%s16382_s21 + $0x1148] sm:$0xff] }
 0x3bd   : > { %v13662_v56 = vld [vmem:[%s16382_s21 + $0x1168] sm:$0xff]  ;;  %v14181_v59 = vcombine.high %v13657_v54, %v13661_v55  ;;  %v14180_v3 = vcombine.low %v13657_v54, %v13661_v55 }
 0x3be   : > { %v14183_v36 = vcombine.high %v13658_v26, %v13662_v56  ;;  %v14182_v6 = vcombine.low %v13658_v26, %v13662_v56 }
 0x3bf   : > { %4571 = vmatpush1.bf16.msra.mxu0 %v13601_v61  ;;  %4735 = vmatpush1.bf16.msra.mxu1 %v13603_v62  ;;  %v13665_v61 = vld [vmem:[%s16382_s21 + $0x1180] sm:$0xff] }
 0x3c0   : > { %4572 = vmatprep.subr.bf16.mxu0 %v13610_v63  ;;  %4736 = vmatprep.subr.bf16.mxu1 %v13612_v1  ;;  %v13669_v62 = vld [vmem:[%s16382_s21 + $0x11a0] sm:$0xff]  ;;  %v13666_v63 = vld [vmem:[%s16382_s21 + $0x1188] sm:$0xff] }
 0x3c1   : > { %v13670_v1 = vld [vmem:[%s16382_s21 + $0x11a8] sm:$0xff]  ;;  %v14189_v7 = vcombine.high %v13665_v61, %v13669_v62  ;;  %v14188_v15 = vcombine.low %v13665_v61, %v13669_v62 }
 0x3c2   : > { %v14191_v8 = vcombine.high %v13666_v63, %v13670_v1  ;;  %v14190_v16 = vcombine.low %v13666_v63, %v13670_v1 }
 0x3c3   : > { %4573 = vmatpush1.bf16.msra.mxu0 %v13609_v9  ;;  %4737 = vmatpush1.bf16.msra.mxu1 %v13611_v50  ;;  %v13673_v9 = vld [vmem:[%s16382_s21 + $0x11c0] sm:$0xff] }
 0x3c4   : > { %7949 = vmatprep.subr.bf16.mxu0 %v14141_v13  ;;  %8113 = vmatprep.subr.bf16.mxu1 %v14143_v14  ;;  %v13677_v50 = vld [vmem:[%s16382_s21 + $0x11e0] sm:$0xff]  ;;  %v13674_v13 = vld [vmem:[%s16382_s21 + $0x11c8] sm:$0xff] }
 0x3c5   : > { %v13678_v14 = vld [vmem:[%s16382_s21 + $0x11e8] sm:$0xff]  ;;  %v14196_v24 = vcombine.low %v13673_v9, %v13677_v50 }
 0x3c6   : > { %4575 = vmatmul.mubr.bf16.vlgmr.msra.gmra.mrb[4].mxu0 %v16766_v2  ;;  %4739 = vmatmul.mubr.bf16.vlgmr.msra.gmra.mrb[4].mxu1 %v16766_v2  ;;  %v13646_v2 = vld [vmem:[%s16382_s21 + $0x10e8] sm:$0xff]  ;;  %v14199_v18 = vcombine.high %v13674_v13, %v13678_v14 }
 0x3c7   : > { %7950 = vmatpush1.bf16.msra.mxu0 %v14140_v17  ;;  %7981 = vmatprep.mubr.bf16.mxu0 %v17090_v25  ;;  %v14167_v41 = vcombine.high %v13642_v35, %v13646_v2  ;;  %v14166_v51 = vcombine.low %v13642_v35, %v13646_v2  ;;  %v14197_v17 = vcombine.high %v13673_v9, %v13677_v50 }
 0x3c8   : > { %8114 = vmatpush1.bf16.msra.mxu1 %v14142_v20  ;;  %8145 = vmatprep.mubr.bf16.mxu1 %v17090_v25  ;;  %v13685_v20 = vld [vmem:[%s16382_s21 + $0x1220] sm:$0xff] }
 0x3c9   : > { %7951 = vmatprep.subr.bf16.mxu0 %v14149_v21  ;;  %8115 = vmatprep.subr.bf16.mxu1 %v14151_v27  ;;  %v13682_v21 = vld [vmem:[%s16382_s21 + $0x1208] sm:$0xff]  ;;  %v14198_v27 = vcombine.low %v13674_v13, %v13678_v14  ;;  %v14205_v28 = vcombine.high %v13681_v19, %v13685_v20  ;;  %v14204_v48 = vcombine.low %v13681_v19, %v13685_v20 }
 0x3ca   : > { %v14207_v29 = vcombine.high %v13682_v21, %v13686_v22  ;;  %v14206_v34 = vcombine.low %v13682_v21, %v13686_v22 }
 0x3cb   : > { %7952 = vmatpush1.bf16.msra.mxu0 %v14148_v30  ;;  %v13689_v30 = vld [vmem:[%s16382_s21 + $0x1240] sm:$0xff] }
 0x3cc   : > { %8116 = vmatpush1.bf16.msra.mxu1 %v14150_v31  ;;  %7953 = vmatprep.subr.bf16.mxu0 %v14157_v32  ;;  %v13693_v31 = vld [vmem:[%s16382_s21 + $0x1260] sm:$0xff]  ;;  %v13690_v32 = vld [vmem:[%s16382_s21 + $0x1248] sm:$0xff] }
 0x3cd   : > { %8117 = vmatprep.subr.bf16.mxu1 %v14159_v38  ;;  %v13694_v38 = vld [vmem:[%s16382_s21 + $0x1268] sm:$0xff]  ;;  %v14213_v35 = vcombine.high %v13689_v30, %v13693_v31  ;;  %v14212_v44 = vcombine.low %v13689_v30, %v13693_v31 }
 0x3ce   : > { %v14215_v2 = vcombine.high %v13690_v32, %v13694_v38  ;;  %v14214_v45 = vcombine.low %v13690_v32, %v13694_v38 }
 0x3cf   : > { %7954 = vmatpush1.bf16.msra.mxu0 %v14156_v37  ;;  %v13697_v37 = vld [vmem:[%s16382_s21 + $0x1280] sm:$0xff] }
 0x3d0   : > { %8118 = vmatpush1.bf16.msra.mxu1 %v14158_v39  ;;  %7955 = vmatprep.subr.bf16.mxu0 %v14165_v40  ;;  %v13701_v39 = vld [vmem:[%s16382_s21 + $0x12a0] sm:$0xff]  ;;  %v13698_v40 = vld [vmem:[%s16382_s21 + $0x1288] sm:$0xff] }
 0x3d1   : > { %8119 = vmatprep.subr.bf16.mxu1 %v14167_v41  ;;  %v13702_v41 = vld [vmem:[%s16382_s21 + $0x12a8] sm:$0xff]  ;;  %v14221_v0 = vcombine.high %v13697_v37, %v13701_v39  ;;  %v14220_v54 = vcombine.low %v13697_v37, %v13701_v39 }
 0x3d2   : > { %v14223_v33 = vcombine.high %v13698_v40, %v13702_v41  ;;  %v14222_v55 = vcombine.low %v13698_v40, %v13702_v41 }
 0x3d3   : > { %7956 = vmatpush1.bf16.msra.mxu0 %v14164_v49  ;;  %v13705_v49 = vld [vmem:[%s16382_s21 + $0x12c0] sm:$0xff] }
 0x3d4   : > { %8120 = vmatpush1.bf16.msra.mxu1 %v14166_v51  ;;  %7957 = vmatprep.subr.bf16.mxu0 %v14173_v52  ;;  %v13709_v51 = vld [vmem:[%s16382_s21 + $0x12e0] sm:$0xff]  ;;  %v13706_v52 = vld [vmem:[%s16382_s21 + $0x12c8] sm:$0xff] }
 0x3d5   : > { %8121 = vmatprep.subr.bf16.mxu1 %v14175_v53  ;;  %v13710_v53 = vld [vmem:[%s16382_s21 + $0x12e8] sm:$0xff]  ;;  %v14229_v26 = vcombine.high %v13705_v49, %v13709_v51  ;;  %v14228_v61 = vcombine.low %v13705_v49, %v13709_v51  ;;  %v17160_v51 = vpack.c.bf16 %v4755_v42, %v4755_v42 }
 0x3d6   : > { %v14231_v56 = vcombine.high %v13706_v52, %v13710_v53  ;;  %v14230_v62 = vcombine.low %v13706_v52, %v13710_v53  ;;  %v13758_v49 = vld [vmem:[%s16382_s21 + $0x1468] sm:$0xff] }
 0x3d7   : > { %7958 = vmatpush1.bf16.msra.mxu0 %v14172_v57  ;;  %v13713_v57 = vld [vmem:[%s16382_s21 + $0x1300] sm:$0xff]  ;;  %v13766_v42 = vld [vmem:[%s16382_s21 + $0x14a8] sm:$0xff] }
 0x3d8   : > { %8122 = vmatpush1.bf16.msra.mxu1 %v14174_v58  ;;  %7959 = vmatprep.subr.bf16.mxu0 %v14181_v59  ;;  %v13717_v58 = vld [vmem:[%s16382_s21 + $0x1320] sm:$0xff]  ;;  %v13714_v59 = vld [vmem:[%s16382_s21 + $0x1308] sm:$0xff]  ;;  %v14287_v43 = vcombine.high %v13762_v4, %v13766_v42 }
 0x3d9   : > { %8123 = vmatprep.subr.bf16.mxu1 %v14183_v36  ;;  %v13718_v36 = vld [vmem:[%s16382_s21 + $0x1328] sm:$0xff]  ;;  %v14237_v63 = vcombine.high %v13713_v57, %v13717_v58  ;;  %v14236_v9 = vcombine.low %v13713_v57, %v13717_v58 }
 0x3da   : > { %v14239_v1 = vcombine.high %v13714_v59, %v13718_v36  ;;  %v14238_v50 = vcombine.low %v13714_v59, %v13718_v36  ;;  %v13773_v36 = vld [vmem:[%s16382_s21 + $0x14e0] sm:$0xff] }
 0x3db   : > { %7960 = vmatpush1.bf16.msra.mxu0 %v14180_v3  ;;  %v13721_v3 = vld [vmem:[%s16382_s21 + $0x1340] sm:$0xff] }
 0x3dc   : > { %8124 = vmatpush1.bf16.msra.mxu1 %v14182_v6  ;;  %7961 = vmatprep.subr.bf16.mxu0 %v14189_v7  ;;  %v13725_v6 = vld [vmem:[%s16382_s21 + $0x1360] sm:$0xff]  ;;  %v13722_v7 = vld [vmem:[%s16382_s21 + $0x1348] sm:$0xff] }
 0x3dd   : > { %8125 = vmatprep.subr.bf16.mxu1 %v14191_v8  ;;  %v13726_v8 = vld [vmem:[%s16382_s21 + $0x1368] sm:$0xff]  ;;  %v14245_v13 = vcombine.high %v13721_v3, %v13725_v6  ;;  %v14244_v19 = vcombine.low %v13721_v3, %v13725_v6 }
 0x3de   : > { %v14247_v14 = vcombine.high %v13722_v7, %v13726_v8  ;;  %v14246_v20 = vcombine.low %v13722_v7, %v13726_v8  ;;  %v13777_v7 = vld [vmem:[%s16382_s21 + $0x1500] sm:$0xff] }
 0x3df   : > { %7962 = vmatpush1.bf16.msra.mxu0 %v14188_v15  ;;  %v13729_v15 = vld [vmem:[%s16382_s21 + $0x1380] sm:$0xff] }
 0x3e0   : > { %8126 = vmatpush1.bf16.msra.mxu1 %v14190_v16  ;;  %7963 = vmatprep.subr.bf16.mxu0 %v14197_v17  ;;  %v13733_v16 = vld [vmem:[%s16382_s21 + $0x13a0] sm:$0xff]  ;;  %v13730_v17 = vld [vmem:[%s16382_s21 + $0x1388] sm:$0xff] }
 0x3e1   : > { %8127 = vmatprep.subr.bf16.mxu1 %v14199_v18  ;;  %v13734_v18 = vld [vmem:[%s16382_s21 + $0x13a8] sm:$0xff]  ;;  %v14253_v21 = vcombine.high %v13729_v15, %v13733_v16  ;;  %v14252_v30 = vcombine.low %v13729_v15, %v13733_v16  ;;  %v13781_v8 = vld [vmem:[%s16382_s21 + $0x1520] sm:$0xff] }
 0x3e2   : > { %v14255_v22 = vcombine.high %v13730_v17, %v13734_v18  ;;  %v14254_v31 = vcombine.low %v13730_v17, %v13734_v18  ;;  %v14301_v15 = vcombine.high %v13777_v7, %v13781_v8  ;;  %v13785_v17 = vld [vmem:[%s16382_s21 + $0x1540] sm:$0xff] }
 0x3e3   : > { %7964 = vmatpush1.bf16.msra.mxu0 %v14196_v24  ;;  %v13737_v24 = vld [vmem:[%s16382_s21 + $0x13c0] sm:$0xff] }
 0x3e4   : > { %8128 = vmatpush1.bf16.msra.mxu1 %v14198_v27  ;;  %7965 = vmatprep.subr.bf16.mxu0 %v14205_v28  ;;  %v13741_v27 = vld [vmem:[%s16382_s21 + $0x13e0] sm:$0xff]  ;;  %v13738_v28 = vld [vmem:[%s16382_s21 + $0x13c8] sm:$0xff] }
 0x3e5   : > { %8129 = vmatprep.subr.bf16.mxu1 %v14207_v29  ;;  %v13742_v29 = vld [vmem:[%s16382_s21 + $0x13e8] sm:$0xff]  ;;  %v14261_v32 = vcombine.high %v13737_v24, %v13741_v27  ;;  %v14260_v37 = vcombine.low %v13737_v24, %v13741_v27  ;;  %v13789_v18 = vld [vmem:[%s16382_s21 + $0x1560] sm:$0xff] }
 0x3e6   : > { %v14263_v38 = vcombine.high %v13738_v28, %v13742_v29  ;;  %v14262_v39 = vcombine.low %v13738_v28, %v13742_v29  ;;  %v14309_v24 = vcombine.high %v13785_v17, %v13789_v18  ;;  %v13793_v28 = vld [vmem:[%s16382_s21 + $0x1580] sm:$0xff] }
 0x3e7   : > { %7966 = vmatpush1.bf16.msra.mxu0 %v14204_v48  ;;  %v13745_v48 = vld [vmem:[%s16382_s21 + $0x1400] sm:$0xff] }
 0x3e8   : > { %8130 = vmatpush1.bf16.msra.mxu1 %v14206_v34  ;;  %7967 = vmatprep.subr.bf16.mxu0 %v14213_v35  ;;  %v13749_v34 = vld [vmem:[%s16382_s21 + $0x1420] sm:$0xff]  ;;  %v13746_v35 = vld [vmem:[%s16382_s21 + $0x1408] sm:$0xff] }
 0x3e9   : > { %8131 = vmatprep.subr.bf16.mxu1 %v14215_v2  ;;  %v13750_v2 = vld [vmem:[%s16382_s21 + $0x1428] sm:$0xff]  ;;  %v14269_v40 = vcombine.high %v13745_v48, %v13749_v34  ;;  %v13797_v29 = vld [vmem:[%s16382_s21 + $0x15a0] sm:$0xff] }
 0x3ea   : > { %v14271_v41 = vcombine.high %v13746_v35, %v13750_v2  ;;  %v14270_v52 = vcombine.low %v13746_v35, %v13750_v2  ;;  %v13801_v35 = vld [vmem:[%s16382_s21 + $0x15c0] sm:$0xff] }
 0x3eb   : > { %7968 = vmatpush1.bf16.msra.mxu0 %v14212_v44  ;;  %v13753_v44 = vld [vmem:[%s16382_s21 + $0x1440] sm:$0xff] }
 0x3ec   : > { %8132 = vmatpush1.bf16.msra.mxu1 %v14214_v45  ;;  %7969 = vmatprep.subr.bf16.mxu0 %v14221_v0  ;;  %v13757_v45 = vld [vmem:[%s16382_s21 + $0x1460] sm:$0xff]  ;;  %v14268_v0 = vcombine.low %v13745_v48, %v13749_v34  ;;  %v14317_v48 = vcombine.high %v13793_v28, %v13797_v29 }
 0x3ed   : > { %8133 = vmatprep.subr.bf16.mxu1 %v14223_v33  ;;  %v13754_v33 = vld [vmem:[%s16382_s21 + $0x1448] sm:$0xff]  ;;  %v14277_v53 = vcombine.high %v13753_v44, %v13757_v45  ;;  %v14276_v57 = vcombine.low %v13753_v44, %v13757_v45  ;;  %v13805_v2 = vld [vmem:[%s16382_s21 + $0x15e0] sm:$0xff] }
 0x3ee   : > { %v14278_v58 = vcombine.low %v13754_v33, %v13758_v49  ;;  %v14325_v44 = vcombine.high %v13801_v35, %v13805_v2 }
 0x3ef   : > { %7970 = vmatpush1.bf16.msra.mxu0 %v14220_v54  ;;  %v13761_v54 = vld [vmem:[%s16382_s21 + $0x1480] sm:$0xff] }
 0x3f0   : > { %8134 = vmatpush1.bf16.msra.mxu1 %v14222_v55  ;;  %7971 = vmatprep.subr.bf16.mxu0 %v14229_v26  ;;  %v13765_v55 = vld [vmem:[%s16382_s21 + $0x14a0] sm:$0xff]  ;;  %v17168_v26 = vpack.c.bf16 %v4758_v47, %v4758_v47 }
 0x3f1   : > { %8135 = vmatprep.subr.bf16.mxu1 %v14231_v56  ;;  %v14279_v56 = vcombine.high %v13754_v33, %v13758_v49  ;;  %v14285_v59 = vcombine.high %v13761_v54, %v13765_v55  ;;  %v13769_v47 = vld [vmem:[%s16382_s21 + $0x14c0] sm:$0xff]  ;;  %v13810_v49 = vld [vmem:[%s16382_s21 + $0x1608] sm:$0xff] }
 0x3f2   : > { %v14293_v3 = vcombine.high %v13769_v47, %v13773_v36  ;;  %v13813_v33 = vld [vmem:[%s16382_s21 + $0x1620] sm:$0xff] }
 0x3f3   : > { %7972 = vmatpush1.bf16.msra.mxu0 %v14228_v61  ;;  %v13770_v61 = vld [vmem:[%s16382_s21 + $0x14c8] sm:$0xff] }
 0x3f4   : > { %8136 = vmatpush1.bf16.msra.mxu1 %v14230_v62  ;;  %7973 = vmatprep.subr.bf16.mxu0 %v14237_v63  ;;  %v13774_v62 = vld [vmem:[%s16382_s21 + $0x14e8] sm:$0xff]  ;;  %v14284_v63 = vcombine.low %v13761_v54, %v13765_v55 }
 0x3f5   : > { %8137 = vmatprep.subr.bf16.mxu1 %v14239_v1  ;;  %v14286_v1 = vcombine.low %v13762_v4, %v13766_v42  ;;  %v14295_v6 = vcombine.high %v13770_v61, %v13774_v62  ;;  %v13817_v4 = vld [vmem:[%s16382_s21 + $0x1640] sm:$0xff] }
 0x3f6   : > { %v13821_v42 = vld [vmem:[%s16382_s21 + $0x1660] sm:$0xff] }
 0x3f7   : > { %7974 = vmatpush1.bf16.msra.mxu0 %v14236_v9  ;;  %v13778_v9 = vld [vmem:[%s16382_s21 + $0x1508] sm:$0xff] }
 0x3f8   : > { %8138 = vmatpush1.bf16.msra.mxu1 %v14238_v50  ;;  %7975 = vmatprep.subr.bf16.mxu0 %v14245_v13  ;;  %v13782_v50 = vld [vmem:[%s16382_s21 + $0x1528] sm:$0xff]  ;;  %v14292_v13 = vcombine.low %v13769_v47, %v13773_v36  ;;  %v14341_v47 = vcombine.high %v13817_v4, %v13821_v42 }
 0x3f9   : > { %8139 = vmatprep.subr.bf16.mxu1 %v14247_v14  ;;  %v14294_v14 = vcombine.low %v13770_v61, %v13774_v62  ;;  %v14303_v16 = vcombine.high %v13778_v9, %v13782_v50  ;;  %v13825_v61 = vld [vmem:[%s16382_s21 + $0x1680] sm:$0xff] }
 0x3fa   : > { %v13829_v62 = vld [vmem:[%s16382_s21 + $0x16a0] sm:$0xff] }
 0x3fb   : > { %7976 = vmatpush1.bf16.msra.mxu0 %v14244_v19  ;;  %v13786_v19 = vld [vmem:[%s16382_s21 + $0x1548] sm:$0xff] }
 0x3fc   : > { %8140 = vmatpush1.bf16.msra.mxu1 %v14246_v20  ;;  %7977 = vmatprep.subr.bf16.mxu0 %v14253_v21  ;;  %v13790_v20 = vld [vmem:[%s16382_s21 + $0x1568] sm:$0xff]  ;;  %v14300_v21 = vcombine.low %v13777_v7, %v13781_v8  ;;  %v14349_v7 = vcombine.high %v13825_v61, %v13829_v62 }
 0x3fd   : > { %8141 = vmatprep.subr.bf16.mxu1 %v14255_v22  ;;  %v14302_v22 = vcombine.low %v13778_v9, %v13782_v50  ;;  %v14311_v27 = vcombine.high %v13786_v19, %v13790_v20  ;;  %v13833_v9 = vld [vmem:[%s16382_s21 + $0x16c0] sm:$0xff] }
 0x3fe   : > { %v13837_v50 = vld [vmem:[%s16382_s21 + $0x16e0] sm:$0xff] }
 0x3ff   : > { %7978 = vmatpush1.bf16.msra.mxu0 %v14252_v30  ;;  %v13794_v30 = vld [vmem:[%s16382_s21 + $0x1588] sm:$0xff] }
 0x400   : > { %8142 = vmatpush1.bf16.msra.mxu1 %v14254_v31  ;;  %7979 = vmatprep.subr.bf16.mxu0 %v14261_v32  ;;  %v13798_v31 = vld [vmem:[%s16382_s21 + $0x15a8] sm:$0xff]  ;;  %v14308_v32 = vcombine.low %v13785_v17, %v13789_v18  ;;  %v14357_v17 = vcombine.high %v13833_v9, %v13837_v50 }
 0x401   : > { %8143 = vmatprep.subr.bf16.mxu1 %v14263_v38  ;;  %v14310_v38 = vcombine.low %v13786_v19, %v13790_v20  ;;  %v14319_v34 = vcombine.high %v13794_v30, %v13798_v31  ;;  %v13841_v19 = vld [vmem:[%s16382_s21 + $0x1700] sm:$0xff] }
 0x402   : > { %v13845_v20 = vld [vmem:[%s16382_s21 + $0x1720] sm:$0xff] }
 0x403   : > { %7980 = vmatpush1.bf16.msra.mxu0 %v14260_v37  ;;  %v13802_v37 = vld [vmem:[%s16382_s21 + $0x15c8] sm:$0xff] }
 0x404   : > { %8144 = vmatpush1.bf16.msra.mxu1 %v14262_v39  ;;  %7990 = vmatprep.subr.bf16.mxu0 %v14269_v40  ;;  %v13806_v39 = vld [vmem:[%s16382_s21 + $0x15e8] sm:$0xff]  ;;  %v14316_v40 = vcombine.low %v13793_v28, %v13797_v29  ;;  %v14365_v28 = vcombine.high %v13841_v19, %v13845_v20 }
 0x405   : > { %8154 = vmatprep.subr.bf16.mxu1 %v14271_v41  ;;  %v14318_v41 = vcombine.low %v13794_v30, %v13798_v31  ;;  %v14327_v45 = vcombine.high %v13802_v37, %v13806_v39  ;;  %v14326_v54 = vcombine.low %v13802_v37, %v13806_v39  ;;  %v13849_v30 = vld [vmem:[%s16382_s21 + $0x1740] sm:$0xff] }
 0x406   : > { %7982 = vmatmul.mubr.bf16.vlgmr.msra.gmra.mrb[8].mxu0 %v17160_v51  ;;  %v13853_v31 = vld [vmem:[%s16382_s21 + $0x1760] sm:$0xff] }
 0x407   : > { %8146 = vmatmul.mubr.bf16.vlgmr.msra.gmra.mrb[8].mxu1 %v17160_v51  ;;  %7991 = vmatpush1.bf16.msra.mxu0 %v14268_v0  ;;  %v13809_v0 = vld [vmem:[%s16382_s21 + $0x1600] sm:$0xff] }
 0x408   : > { %8022 = vmatprep.mubr.bf16.mxu0 %v17168_v26  ;;  %8155 = vmatpush1.bf16.msra.mxu1 %v14270_v52  ;;  %v13814_v52 = vld [vmem:[%s16382_s21 + $0x1628] sm:$0xff]  ;;  %v14333_v55 = vcombine.high %v13809_v0, %v13813_v33  ;;  %v13857_v37 = vld [vmem:[%s16382_s21 + $0x1780] sm:$0xff] }
 0x409   : > { %8186 = vmatprep.mubr.bf16.mxu1 %v17168_v26  ;;  %7992 = vmatprep.subr.bf16.mxu0 %v14277_v53  ;;  %v14324_v53 = vcombine.low %v13801_v35, %v13805_v2  ;;  %v14373_v35 = vcombine.high %v13849_v30, %v13853_v31  ;;  %v13861_v39 = vld [vmem:[%s16382_s21 + $0x17a0] sm:$0xff] }
 0x40a   : > { %8156 = vmatprep.subr.bf16.mxu1 %v14279_v56  ;;  %v14335_v56 = vcombine.high %v13810_v49, %v13814_v52 }
 0x40b   : > { %7993 = vmatpush1.bf16.msra.mxu0 %v14276_v57  ;;  %v13818_v57 = vld [vmem:[%s16382_s21 + $0x1648] sm:$0xff] }
 0x40c   : > { %8157 = vmatpush1.bf16.msra.mxu1 %v14278_v58  ;;  %7994 = vmatprep.subr.bf16.mxu0 %v14285_v59  ;;  %v13822_v58 = vld [vmem:[%s16382_s21 + $0x1668] sm:$0xff]  ;;  %v14332_v59 = vcombine.low %v13809_v0, %v13813_v33  ;;  %v14381_v0 = vcombine.high %v13857_v37, %v13861_v39 }
 0x40d   : > { %8158 = vmatprep.subr.bf16.mxu1 %v14287_v43  ;;  %v14334_v43 = vcombine.low %v13810_v49, %v13814_v52  ;;  %v14343_v36 = vcombine.high %v13818_v57, %v13822_v58  ;;  %v13865_v49 = vld [vmem:[%s16382_s21 + $0x17c0] sm:$0xff] }
 0x40e   : > { %v13869_v52 = vld [vmem:[%s16382_s21 + $0x17e0] sm:$0xff] }
 0x40f   : > { %7995 = vmatpush1.bf16.msra.mxu0 %v14284_v63  ;;  %v13826_v63 = vld [vmem:[%s16382_s21 + $0x1688] sm:$0xff] }
 0x410   : > { %8159 = vmatpush1.bf16.msra.mxu1 %v14286_v1  ;;  %7996 = vmatprep.subr.bf16.mxu0 %v14293_v3  ;;  %v13830_v1 = vld [vmem:[%s16382_s21 + $0x16a8] sm:$0xff]  ;;  %v14340_v3 = vcombine.low %v13817_v4, %v13821_v42  ;;  %v14389_v4 = vcombine.high %v13865_v49, %v13869_v52 }
 0x411   : > { %8160 = vmatprep.subr.bf16.mxu1 %v14295_v6  ;;  %v14342_v6 = vcombine.low %v13818_v57, %v13822_v58  ;;  %v14351_v8 = vcombine.high %v13826_v63, %v13830_v1  ;;  %v13873_v57 = vld [vmem:[%s16382_s21 + $0x1800] sm:$0xff] }
 0x412   : > { %v13877_v58 = vld [vmem:[%s16382_s21 + $0x1820] sm:$0xff] }
 0x413   : > { %7997 = vmatpush1.bf16.msra.mxu0 %v14292_v13  ;;  %v13834_v13 = vld [vmem:[%s16382_s21 + $0x16c8] sm:$0xff] }
 0x414   : > { %8161 = vmatpush1.bf16.msra.mxu1 %v14294_v14  ;;  %7998 = vmatprep.subr.bf16.mxu0 %v14301_v15  ;;  %v13838_v14 = vld [vmem:[%s16382_s21 + $0x16e8] sm:$0xff]  ;;  %v14348_v15 = vcombine.low %v13825_v61, %v13829_v62  ;;  %v14397_v61 = vcombine.high %v13873_v57, %v13877_v58 }
 0x415   : > { %8162 = vmatprep.subr.bf16.mxu1 %v14303_v16  ;;  %v14350_v16 = vcombine.low %v13826_v63, %v13830_v1  ;;  %v14359_v18 = vcombine.high %v13834_v13, %v13838_v14  ;;  %v13881_v63 = vld [vmem:[%s16382_s21 + $0x1840] sm:$0xff] }
 0x416   : > { %v13885_v1 = vld [vmem:[%s16382_s21 + $0x1860] sm:$0xff] }
 0x417   : > { %7999 = vmatpush1.bf16.msra.mxu0 %v14300_v21  ;;  %v13842_v21 = vld [vmem:[%s16382_s21 + $0x1708] sm:$0xff]  ;;  %v14404_v23 = vcombine.low %v13881_v63, %v13885_v1 }
 0x418   : > { %8163 = vmatpush1.bf16.msra.mxu1 %v14302_v22  ;;  %8000 = vmatprep.subr.bf16.mxu0 %v14309_v24  ;;  %v13846_v22 = vld [vmem:[%s16382_s21 + $0x1728] sm:$0xff]  ;;  %v14356_v24 = vcombine.low %v13833_v9, %v13837_v50  ;;  %v14405_v50 = vcombine.high %v13881_v63, %v13885_v1  ;;  %v13937_v1 = vld [vmem:[%s16382_s21 + $0x1a00] sm:$0xff] }
 0x419   : > { %8164 = vmatprep.subr.bf16.mxu1 %v14311_v27  ;;  %v14358_v27 = vcombine.low %v13834_v13, %v13838_v14  ;;  %v14367_v29 = vcombine.high %v13842_v21, %v13846_v22  ;;  %v13889_v14 = vld [vmem:[%s16382_s21 + $0x1880] sm:$0xff] }
 0x41b   : > { %8001 = vmatpush1.bf16.msra.mxu0 %v14308_v32  ;;  %v13850_v32 = vld [vmem:[%s16382_s21 + $0x1748] sm:$0xff] }
 0x41c   : > { %8165 = vmatpush1.bf16.msra.mxu1 %v14310_v38  ;;  %8002 = vmatprep.subr.bf16.mxu0 %v14317_v48  ;;  %v13854_v38 = vld [vmem:[%s16382_s21 + $0x1768] sm:$0xff]  ;;  %v14364_v48 = vcombine.low %v13841_v19, %v13845_v20  ;;  %v13897_v20 = vld [vmem:[%s16382_s21 + $0x18c0] sm:$0xff] }
 0x41d   : > { %8166 = vmatprep.subr.bf16.mxu1 %v14319_v34  ;;  %v14366_v34 = vcombine.low %v13842_v21, %v13846_v22  ;;  %v14375_v2 = vcombine.high %v13850_v32, %v13854_v38  ;;  %v13901_v21 = vld [vmem:[%s16382_s21 + $0x18e0] sm:$0xff]  ;;  %v13898_v22 = vld [vmem:[%s16382_s21 + $0x18c8] sm:$0xff] }
 0x41f   : > { %8003 = vmatpush1.bf16.msra.mxu0 %v14316_v40  ;;  %v13858_v40 = vld [vmem:[%s16382_s21 + $0x1788] sm:$0xff] }
 0x420   : > { %8167 = vmatpush1.bf16.msra.mxu1 %v14318_v41  ;;  %8004 = vmatprep.subr.bf16.mxu0 %v14325_v44  ;;  %v13862_v41 = vld [vmem:[%s16382_s21 + $0x17a8] sm:$0xff]  ;;  %v14372_v44 = vcombine.low %v13849_v30, %v13853_v31  ;;  %v13905_v31 = vld [vmem:[%s16382_s21 + $0x1900] sm:$0xff] }
 0x421   : > { %8168 = vmatprep.subr.bf16.mxu1 %v14327_v45  ;;  %v14374_v45 = vcombine.low %v13850_v32, %v13854_v38  ;;  %v14383_v33 = vcombine.high %v13858_v40, %v13862_v41  ;;  %v13909_v32 = vld [vmem:[%s16382_s21 + $0x1920] sm:$0xff]  ;;  %v13906_v38 = vld [vmem:[%s16382_s21 + $0x1908] sm:$0xff] }
 0x423   : > { %8005 = vmatpush1.bf16.msra.mxu0 %v14324_v53  ;;  %v13866_v53 = vld [vmem:[%s16382_s21 + $0x17c8] sm:$0xff] }
 0x424   : > { %8169 = vmatpush1.bf16.msra.mxu1 %v14326_v54  ;;  %8006 = vmatprep.subr.bf16.mxu0 %v14333_v55  ;;  %v13870_v54 = vld [vmem:[%s16382_s21 + $0x17e8] sm:$0xff]  ;;  %v14380_v55 = vcombine.low %v13857_v37, %v13861_v39  ;;  %v13913_v39 = vld [vmem:[%s16382_s21 + $0x1940] sm:$0xff] }
 0x425   : > { %8170 = vmatprep.subr.bf16.mxu1 %v14335_v56  ;;  %v14382_v56 = vcombine.low %v13858_v40, %v13862_v41  ;;  %v14391_v42 = vcombine.high %v13866_v53, %v13870_v54  ;;  %v13917_v40 = vld [vmem:[%s16382_s21 + $0x1960] sm:$0xff]  ;;  %v13914_v41 = vld [vmem:[%s16382_s21 + $0x1948] sm:$0xff] }
 0x427   : > { %8007 = vmatpush1.bf16.msra.mxu0 %v14332_v59  ;;  %v13874_v59 = vld [vmem:[%s16382_s21 + $0x1808] sm:$0xff] }
 0x428   : > { %8171 = vmatpush1.bf16.msra.mxu1 %v14334_v43  ;;  %8008 = vmatprep.subr.bf16.mxu0 %v14341_v47  ;;  %v13878_v43 = vld [vmem:[%s16382_s21 + $0x1828] sm:$0xff]  ;;  %v14388_v47 = vcombine.low %v13865_v49, %v13869_v52  ;;  %v13921_v52 = vld [vmem:[%s16382_s21 + $0x1980] sm:$0xff] }
 0x429   : > { %8172 = vmatprep.subr.bf16.mxu1 %v14343_v36  ;;  %v14390_v36 = vcombine.low %v13866_v53, %v13870_v54  ;;  %v14399_v62 = vcombine.high %v13874_v59, %v13878_v43  ;;  %v14398_v9 = vcombine.low %v13874_v59, %v13878_v43  ;;  %v13925_v53 = vld [vmem:[%s16382_s21 + $0x19a0] sm:$0xff]  ;;  %v13922_v54 = vld [vmem:[%s16382_s21 + $0x1988] sm:$0xff] }
 0x42a   : > { %v13933_v59 = vld [vmem:[%s16382_s21 + $0x19e0] sm:$0xff]  ;;  %v13930_v43 = vld [vmem:[%s16382_s21 + $0x19c8] sm:$0xff] }
 0x42b   : > { %8009 = vmatpush1.bf16.msra.mxu0 %v14340_v3  ;;  %v13882_v3 = vld [vmem:[%s16382_s21 + $0x1848] sm:$0xff] }
 0x42c   : > { %8173 = vmatpush1.bf16.msra.mxu1 %v14342_v6  ;;  %8010 = vmatprep.subr.bf16.mxu0 %v14349_v7  ;;  %v13886_v6 = vld [vmem:[%s16382_s21 + $0x1868] sm:$0xff]  ;;  %v14396_v7 = vcombine.low %v13873_v57, %v13877_v58  ;;  %v13929_v58 = vld [vmem:[%s16382_s21 + $0x19c0] sm:$0xff] }
 0x42d   : > { %8174 = vmatprep.subr.bf16.mxu1 %v14351_v8  ;;  %v17238_v8 = vpack.c.bf16 %v4757_v46, %v4757_v46  ;;  %v14407_v13 = vcombine.high %v13882_v3, %v13886_v6  ;;  %v14406_v46 = vcombine.low %v13882_v3, %v13886_v6  ;;  %v13941_v3 = vld [vmem:[%s16382_s21 + $0x1a20] sm:$0xff]  ;;  %v13938_v6 = vld [vmem:[%s16382_s21 + $0x1a08] sm:$0xff] }
 0x42f   : > { %8011 = vmatpush1.bf16.msra.mxu0 %v14348_v15  ;;  %v13893_v15 = vld [vmem:[%s16382_s21 + $0x18a0] sm:$0xff] }
 0x430   : > { %8175 = vmatpush1.bf16.msra.mxu1 %v14350_v16  ;;  %8012 = vmatprep.subr.bf16.mxu0 %v14357_v17  ;;  %v13890_v16 = vld [vmem:[%s16382_s21 + $0x1888] sm:$0xff] }
 0x431   : > { %8176 = vmatprep.subr.bf16.mxu1 %v14359_v18  ;;  %v13894_v17 = vld [vmem:[%s16382_s21 + $0x18a8] sm:$0xff]  ;;  %v14413_v18 = vcombine.high %v13889_v14, %v13893_v15 }
 0x432   : > { %v14415_v19 = vcombine.high %v13890_v16, %v13894_v17 }
 0x433   : > { %8013 = vmatpush1.bf16.msra.mxu0 %v14356_v24  ;;  %v13902_v24 = vld [vmem:[%s16382_s21 + $0x18e8] sm:$0xff] }
 0x434   : > { %8177 = vmatpush1.bf16.msra.mxu1 %v14358_v27  ;;  %8014 = vmatprep.subr.bf16.mxu0 %v14365_v28  ;;  %v14412_v27 = vcombine.low %v13889_v14, %v13893_v15  ;;  %v14414_v28 = vcombine.low %v13890_v16, %v13894_v17  ;;  %v14423_v30 = vcombine.high %v13898_v22, %v13902_v24  ;;  %v13945_v15 = vld [vmem:[%s16382_s21 + $0x1a40] sm:$0xff]  ;;  %v13946_v17 = vld [vmem:[%s16382_s21 + $0x1a48] sm:$0xff] }
 0x435   : > { %8178 = vmatprep.subr.bf16.mxu1 %v14367_v29  ;;  %v14421_v29 = vcombine.high %v13897_v20, %v13901_v21  ;;  %v13949_v16 = vld [vmem:[%s16382_s21 + $0x1a60] sm:$0xff] }
 0x437   : > { %8015 = vmatpush1.bf16.msra.mxu0 %v14364_v48  ;;  %v13910_v48 = vld [vmem:[%s16382_s21 + $0x1928] sm:$0xff] }
 0x438   : > { %8179 = vmatpush1.bf16.msra.mxu1 %v14366_v34  ;;  %8016 = vmatprep.subr.bf16.mxu0 %v14373_v35  ;;  %v14420_v34 = vcombine.low %v13897_v20, %v13901_v21  ;;  %v14422_v35 = vcombine.low %v13898_v22, %v13902_v24  ;;  %v14431_v37 = vcombine.high %v13906_v38, %v13910_v48  ;;  %v13953_v21 = vld [vmem:[%s16382_s21 + $0x1a80] sm:$0xff]  ;;  %v13954_v24 = vld [vmem:[%s16382_s21 + $0x1a88] sm:$0xff] }
 0x439   : > { %8180 = vmatprep.subr.bf16.mxu1 %v14375_v2  ;;  %v14429_v2 = vcombine.high %v13905_v31, %v13909_v32  ;;  %v13957_v22 = vld [vmem:[%s16382_s21 + $0x1aa0] sm:$0xff] }
 0x43b   : > { %8017 = vmatpush1.bf16.msra.mxu0 %v14372_v44  ;;  %v13918_v44 = vld [vmem:[%s16382_s21 + $0x1968] sm:$0xff] }
 0x43c   : > { %8181 = vmatpush1.bf16.msra.mxu1 %v14374_v45  ;;  %8018 = vmatprep.subr.bf16.mxu0 %v14381_v0  ;;  %v14428_v45 = vcombine.low %v13905_v31, %v13909_v32  ;;  %v14430_v0 = vcombine.low %v13906_v38, %v13910_v48  ;;  %v14439_v49 = vcombine.high %v13914_v41, %v13918_v44  ;;  %v13961_v32 = vld [vmem:[%s16382_s21 + $0x1ac0] sm:$0xff]  ;;  %v13962_v48 = vld [vmem:[%s16382_s21 + $0x1ac8] sm:$0xff] }
 0x43d   : > { %8182 = vmatprep.subr.bf16.mxu1 %v14383_v33  ;;  %v14437_v33 = vcombine.high %v13913_v39, %v13917_v40  ;;  %v13965_v38 = vld [vmem:[%s16382_s21 + $0x1ae0] sm:$0xff] }
 0x43f   : > { %8019 = vmatpush1.bf16.msra.mxu0 %v14380_v55  ;;  %v13926_v55 = vld [vmem:[%s16382_s21 + $0x19a8] sm:$0xff] }
 0x440   : > { %8183 = vmatpush1.bf16.msra.mxu1 %v14382_v56  ;;  %8020 = vmatprep.subr.bf16.mxu0 %v14389_v4  ;;  %v14436_v56 = vcombine.low %v13913_v39, %v13917_v40  ;;  %v14438_v4 = vcombine.low %v13914_v41, %v13918_v44  ;;  %v14447_v57 = vcombine.high %v13922_v54, %v13926_v55  ;;  %v13969_v40 = vld [vmem:[%s16382_s21 + $0x1b00] sm:$0xff]  ;;  %v13970_v44 = vld [vmem:[%s16382_s21 + $0x1b08] sm:$0xff] }
 0x441   : > { %8184 = vmatprep.subr.bf16.mxu1 %v14391_v42  ;;  %v14445_v42 = vcombine.high %v13921_v52, %v13925_v53  ;;  %v13973_v41 = vld [vmem:[%s16382_s21 + $0x1b20] sm:$0xff] }
 0x443   : > { %8021 = vmatpush1.bf16.msra.mxu0 %v14388_v47  ;;  %v13934_v47 = vld [vmem:[%s16382_s21 + $0x19e8] sm:$0xff] }
 0x444   : > { %8185 = vmatpush1.bf16.msra.mxu1 %v14390_v36  ;;  %8031 = vmatprep.subr.bf16.mxu0 %v14397_v61  ;;  %v14444_v36 = vcombine.low %v13921_v52, %v13925_v53  ;;  %v14446_v61 = vcombine.low %v13922_v54, %v13926_v55  ;;  %v14455_v63 = vcombine.high %v13930_v43, %v13934_v47  ;;  %v13977_v53 = vld [vmem:[%s16382_s21 + $0x1b40] sm:$0xff]  ;;  %v13978_v55 = vld [vmem:[%s16382_s21 + $0x1b48] sm:$0xff] }
 0x445   : > { %8195 = vmatprep.subr.bf16.mxu1 %v14399_v62  ;;  %v14453_v62 = vcombine.high %v13929_v58, %v13933_v59  ;;  %v13981_v54 = vld [vmem:[%s16382_s21 + $0x1b60] sm:$0xff] }
 0x446   : > { %8023 = vmatmul.mubr.bf16.vlgmr.msra.gmra.mrb[8].mxu0 %v17238_v8 }
 0x447   : > { %8187 = vmatmul.mubr.bf16.vlgmr.msra.gmra.mrb[8].mxu1 %v17238_v8  ;;  %8032 = vmatpush1.bf16.msra.mxu0 %v14396_v7  ;;  %v13942_v7 = vld [vmem:[%s16382_s21 + $0x1a28] sm:$0xff] }
 0x448   : > { %8196 = vmatpush1.bf16.msra.mxu1 %v14398_v9  ;;  %8033 = vmatprep.subr.bf16.mxu0 %v14405_v50  ;;  %v14452_v9 = vcombine.low %v13929_v58, %v13933_v59  ;;  %v14454_v50 = vcombine.low %v13930_v43, %v13934_v47  ;;  %v14463_v14 = vcombine.high %v13938_v6, %v13942_v7  ;;  %v13985_v59 = vld [vmem:[%s16382_s21 + $0x1b80] sm:$0xff]  ;;  %v13986_v47 = vld [vmem:[%s16382_s21 + $0x1b88] sm:$0xff] }
 0x449   : > { %8197 = vmatprep.subr.bf16.mxu1 %v14407_v13  ;;  %v14461_v13 = vcombine.high %v13937_v1, %v13941_v3  ;;  %v13989_v43 = vld [vmem:[%s16382_s21 + $0x1ba0] sm:$0xff] }
 0x44b   : > { %8034 = vmatpush1.bf16.msra.mxu0 %v14404_v23  ;;  %v13950_v23 = vld [vmem:[%s16382_s21 + $0x1a68] sm:$0xff] }
 0x44c   : > { %8198 = vmatpush1.bf16.msra.mxu1 %v14406_v46  ;;  %8035 = vmatprep.subr.bf16.mxu0 %v14413_v18  ;;  %v14460_v46 = vcombine.low %v13937_v1, %v13941_v3  ;;  %v14462_v18 = vcombine.low %v13938_v6, %v13942_v7  ;;  %v14471_v20 = vcombine.high %v13946_v17, %v13950_v23  ;;  %v13993_v3 = vld [vmem:[%s16382_s21 + $0x1bc0] sm:$0xff]  ;;  %v13994_v7 = vld [vmem:[%s16382_s21 + $0x1bc8] sm:$0xff] }
 0x44d   : > { %8199 = vmatprep.subr.bf16.mxu1 %v14415_v19  ;;  %v14469_v19 = vcombine.high %v13945_v15, %v13949_v16  ;;  %v13997_v6 = vld [vmem:[%s16382_s21 + $0x1be0] sm:$0xff] }
 0x44f   : > { %8036 = vmatpush1.bf16.msra.mxu0 %v14412_v27  ;;  %v13958_v27 = vld [vmem:[%s16382_s21 + $0x1aa8] sm:$0xff] }
 0x450   : > { %8200 = vmatpush1.bf16.msra.mxu1 %v14414_v28  ;;  %8037 = vmatprep.subr.bf16.mxu0 %v14421_v29  ;;  %v14468_v28 = vcombine.low %v13945_v15, %v13949_v16  ;;  %v14470_v29 = vcombine.low %v13946_v17, %v13950_v23  ;;  %v14479_v31 = vcombine.high %v13954_v24, %v13958_v27  ;;  %v17299_v16 = vld [vmem:[%s16382_s21 + $0x1c00] sm:$0xff]  ;;  %v17305_v23 = vld [vmem:[%s16382_s21 + $0x1c08] sm:$0xff] }
 0x451   : > { %8201 = vmatprep.subr.bf16.mxu1 %v14423_v30  ;;  %v14477_v30 = vcombine.high %v13953_v21, %v13957_v22  ;;  %v17302_v17 = vld [vmem:[%s16382_s21 + $0x1c20] sm:$0xff] }
 0x453   : > { %8038 = vmatpush1.bf16.msra.mxu0 %v14420_v34  ;;  %v13966_v34 = vld [vmem:[%s16382_s21 + $0x1ae8] sm:$0xff] }
 0x454   : > { %8202 = vmatpush1.bf16.msra.mxu1 %v14422_v35  ;;  %8039 = vmatprep.subr.bf16.mxu0 %v14429_v2  ;;  %v14476_v35 = vcombine.low %v13953_v21, %v13957_v22  ;;  %v14478_v2 = vcombine.low %v13954_v24, %v13958_v27  ;;  %v14487_v39 = vcombine.high %v13962_v48, %v13966_v34  ;;  %v17312_v22 = vsub.s32 4, %v16991_v60 }
 0x455   : > { %8203 = vmatprep.subr.bf16.mxu1 %v14431_v37  ;;  %v14485_v37 = vcombine.high %v13961_v32, %v13965_v38  ;;  %v17315_v24 = vsub.s32 6, %v16991_v60  ;;  %v17318_v27 = vsub.s32 5, %v16991_v60 }
 0x457   : > { %8040 = vmatpush1.bf16.msra.mxu0 %v14428_v45  ;;  %v13974_v45 = vld [vmem:[%s16382_s21 + $0x1b28] sm:$0xff] }
 0x458   : > { %8204 = vmatpush1.bf16.msra.mxu1 %v14430_v0  ;;  %8041 = vmatprep.subr.bf16.mxu0 %v14437_v33  ;;  %v14484_v0 = vcombine.low %v13961_v32, %v13965_v38  ;;  %v14486_v33 = vcombine.low %v13962_v48, %v13966_v34  ;;  %v14495_v52 = vcombine.high %v13970_v44, %v13974_v45 }
 0x459   : > { %8205 = vmatprep.subr.bf16.mxu1 %v14439_v49  ;;  %v14493_v49 = vcombine.high %v13969_v40, %v13973_v41 }
 0x45b   : > { %8042 = vmatpush1.bf16.msra.mxu0 %v14436_v56  ;;  %v13982_v56 = vld [vmem:[%s16382_s21 + $0x1b68] sm:$0xff] }
 0x45c   : > { %8206 = vmatpush1.bf16.msra.mxu1 %v14438_v4  ;;  %8043 = vmatprep.subr.bf16.mxu0 %v14445_v42  ;;  %v14492_v4 = vcombine.low %v13969_v40, %v13973_v41  ;;  %v14494_v42 = vcombine.low %v13970_v44, %v13974_v45  ;;  %v14503_v58 = vcombine.high %v13978_v55, %v13982_v56 }
 0x45d   : > { %8207 = vmatprep.subr.bf16.mxu1 %v14447_v57  ;;  %v14501_v57 = vcombine.high %v13977_v53, %v13981_v54 }
 0x45f   : > { %8044 = vmatpush1.bf16.msra.mxu0 %v14444_v36  ;;  %v13990_v36 = vld [vmem:[%s16382_s21 + $0x1ba8] sm:$0xff] }
 0x460   : > { %8208 = vmatpush1.bf16.msra.mxu1 %v14446_v61  ;;  %8045 = vmatprep.subr.bf16.mxu0 %v14453_v62  ;;  %v14500_v61 = vcombine.low %v13977_v53, %v13981_v54  ;;  %v14502_v62 = vcombine.low %v13978_v55, %v13982_v56  ;;  %v14511_v1 = vcombine.high %v13986_v47, %v13990_v36  ;;  %v14009_v54 = vld [vmem:[%s16382_s21 + $0x1c40] sm:$0xff]  ;;  %v14010_v56 = vld [vmem:[%s16382_s21 + $0x1c48] sm:$0xff] }
 0x461   : > { %8209 = vmatprep.subr.bf16.mxu1 %v14455_v63  ;;  %v14509_v63 = vcombine.high %v13985_v59, %v13989_v43  ;;  %v14013_v55 = vld [vmem:[%s16382_s21 + $0x1c60] sm:$0xff] }
 0x463   : > { %8046 = vmatpush1.bf16.msra.mxu0 %v14452_v9  ;;  %v13998_v9 = vld [vmem:[%s16382_s21 + $0x1be8] sm:$0xff] }
 0x464   : > { %8210 = vmatpush1.bf16.msra.mxu1 %v14454_v50  ;;  %8047 = vmatprep.subr.bf16.mxu0 %v14461_v13  ;;  %v14508_v50 = vcombine.low %v13985_v59, %v13989_v43  ;;  %v14510_v13 = vcombine.low %v13986_v47, %v13990_v36  ;;  %v14519_v15 = vcombine.high %v13994_v7, %v13998_v9  ;;  %v14017_v43 = vld [vmem:[%s16382_s21 + $0x1c80] sm:$0xff] }
 0x465   : > { %8211 = vmatprep.subr.bf16.mxu1 %v14463_v14  ;;  %v14517_v14 = vcombine.high %v13993_v3, %v13997_v6  ;;  %v14533_v47 = vcombine.high %v14009_v54, %v14013_v55 }
 0x467   : > { %8048 = vmatpush1.bf16.msra.mxu0 %v14460_v46  ;;  %v14006_v46 = vld [vmem:[%s16382_s21 + $0x1c28] sm:$0xff] }
 0x468   : > { %8212 = vmatpush1.bf16.msra.mxu1 %v14462_v18  ;;  %8049 = vmatprep.subr.bf16.mxu0 %v14469_v19  ;;  %v14516_v18 = vcombine.low %v13993_v3, %v13997_v6  ;;  %v14518_v19 = vcombine.low %v13994_v7, %v13998_v9  ;;  %v14527_v21 = vcombine.high %v17305_v23, %v14006_v46 }
 0x469   : > { %8213 = vmatprep.subr.bf16.mxu1 %v14471_v20  ;;  %v14525_v20 = vcombine.high %v17299_v16, %v17302_v17  ;;  %v14532_v3 = vcombine.low %v14009_v54, %v14013_v55  ;;  %v14057_v55 = vld [vmem:[%s16382_s21 + $0x1dc0] sm:$0xff] }
 0x46b   : > { %8050 = vmatpush1.bf16.msra.mxu0 %v14468_v28  ;;  %v17321_v28 = vsub.s32 7, %v16991_v60 }
 0x46c   : > { %8214 = vmatpush1.bf16.msra.mxu1 %v14470_v29  ;;  %8051 = vmatprep.subr.bf16.mxu0 %v14477_v30  ;;  %v15781_v29 = vld [vmem:[%s17000_s15] sm:$0xff] }
 0x46d   : > { %8215 = vmatprep.subr.bf16.mxu1 %v14479_v31  ;;  %v1482_v30 = vrot.slane %v15781_v29, %v17312_v22  ;;  %v1490_v31 = vrot.slane %v15781_v29, %v17315_v24  ;;  %v1486_v32 = vrot.slane %v15781_v29, %v17318_v27  ;;  %v1494_v38 = vrot.slane %v15781_v29, %v17321_v28 }
 0x46f   : > { %8052 = vmatpush1.bf16.msra.mxu0 %v14476_v35 }
 0x470   : > { %8216 = vmatpush1.bf16.msra.mxu1 %v14478_v2  ;;  %8053 = vmatprep.subr.bf16.mxu0 %v14485_v37 }
 0x471   : > { %8217 = vmatprep.subr.bf16.mxu1 %v14487_v39 }
 0x473   : > { %8054 = vmatpush1.bf16.msra.mxu0 %v14484_v0 }
 0x474   : > { %8218 = vmatpush1.bf16.msra.mxu1 %v14486_v33  ;;  %8055 = vmatprep.subr.bf16.mxu0 %v14493_v49 }
 0x475   : > { %8219 = vmatprep.subr.bf16.mxu1 %v14495_v52 }
 0x477   : > { %8056 = vmatpush1.bf16.msra.mxu0 %v14492_v4  ;;  %v14014_v4 = vld [vmem:[%s16382_s21 + $0x1c68] sm:$0xff] }
 0x478   : > { %8220 = vmatpush1.bf16.msra.mxu1 %v14494_v42  ;;  %8057 = vmatprep.subr.bf16.mxu0 %v14501_v57  ;;  %v14524_v57 = vcombine.low %v17299_v16, %v17302_v17  ;;  %v14535_v36 = vcombine.high %v14010_v56, %v14014_v4  ;;  %v14534_v6 = vcombine.low %v14010_v56, %v14014_v4  ;;  %v14061_v56 = vld [vmem:[%s16382_s21 + $0x1de0] sm:$0xff]  ;;  %v14058_v4 = vld [vmem:[%s16382_s21 + $0x1dc8] sm:$0xff] }
 0x479   : > { %8221 = vmatprep.subr.bf16.mxu1 %v14503_v58  ;;  %v14526_v58 = vcombine.low %v17305_v23, %v14006_v46 }
 0x47b   : > { %8058 = vmatpush1.bf16.msra.mxu0 %v14500_v61  ;;  %v14021_v61 = vld [vmem:[%s16382_s21 + $0x1ca0] sm:$0xff] }
 0x47c   : > { %8222 = vmatpush1.bf16.msra.mxu1 %v14502_v62  ;;  %8059 = vmatprep.subr.bf16.mxu0 %v14509_v63  ;;  %v14018_v62 = vld [vmem:[%s16382_s21 + $0x1c88] sm:$0xff]  ;;  %v14541_v7 = vcombine.high %v14017_v43, %v14021_v61  ;;  %v14540_v16 = vcombine.low %v14017_v43, %v14021_v61  ;;  %v14065_v61 = vld [vmem:[%s16382_s21 + $0x1e00] sm:$0xff] }
 0x47d   : > { %8223 = vmatprep.subr.bf16.mxu1 %v14511_v1  ;;  %v14022_v63 = vld [vmem:[%s16382_s21 + $0x1ca8] sm:$0xff] }
 0x47e   : > { %v14543_v9 = vcombine.high %v14018_v62, %v14022_v63  ;;  %v14542_v17 = vcombine.low %v14018_v62, %v14022_v63  ;;  %v14069_v62 = vld [vmem:[%s16382_s21 + $0x1e20] sm:$0xff]  ;;  %v14066_v63 = vld [vmem:[%s16382_s21 + $0x1e08] sm:$0xff] }
 0x47f   : > { %8060 = vmatpush1.bf16.msra.mxu0 %v14508_v50  ;;  %v14025_v50 = vld [vmem:[%s16382_s21 + $0x1cc0] sm:$0xff] }
 0x480   : > { %8224 = vmatpush1.bf16.msra.mxu1 %v14510_v13  ;;  %8061 = vmatprep.subr.bf16.mxu0 %v14517_v14  ;;  %v14029_v13 = vld [vmem:[%s16382_s21 + $0x1ce0] sm:$0xff]  ;;  %v14026_v14 = vld [vmem:[%s16382_s21 + $0x1cc8] sm:$0xff] }
 0x481   : > { %8225 = vmatprep.subr.bf16.mxu1 %v14519_v15  ;;  %v14030_v15 = vld [vmem:[%s16382_s21 + $0x1ce8] sm:$0xff]  ;;  %v14549_v23 = vcombine.high %v14025_v50, %v14029_v13  ;;  %v14548_v29 = vcombine.low %v14025_v50, %v14029_v13  ;;  %v14073_v13 = vld [vmem:[%s16382_s21 + $0x1e40] sm:$0xff] }
 0x482   : > { %v14551_v46 = vcombine.high %v14026_v14, %v14030_v15 }
 0x483   : > { %8062 = vmatpush1.bf16.msra.mxu0 %v14516_v18  ;;  %v14033_v18 = vld [vmem:[%s16382_s21 + $0x1d00] sm:$0xff] }
 0x484   : > { %8226 = vmatpush1.bf16.msra.mxu1 %v14518_v19  ;;  %8072 = vmatprep.subr.bf16.mxu0 %v14525_v20  ;;  %v14037_v19 = vld [vmem:[%s16382_s21 + $0x1d20] sm:$0xff]  ;;  %v14034_v20 = vld [vmem:[%s16382_s21 + $0x1d08] sm:$0xff] }
 0x485   : > { %8236 = vmatprep.subr.bf16.mxu1 %v14527_v21  ;;  %v14038_v21 = vld [vmem:[%s16382_s21 + $0x1d28] sm:$0xff] }
 0x499   : > { %v4576_v48 = vpop.f32.mrb[4].mxu0  ;;  %v4740_v35 = vpop.f32.mrb[4].mxu1 }
 0x49a   : > { %v15501_v34 = vadd.f32 %v4576_v48, %v1482_v30  ;;  %v4578_v2 = vpop.f32.mrb[5].mxu0  ;;  %v17328_v37 = vadd.f32 %v4740_v35, %v1490_v31  ;;  %v4742_v39 = vpop.f32.mrb[5].mxu1  ;;  %v14550_v30 = vcombine.low %v14026_v14, %v14030_v15  ;;  %v14557_v31 = vcombine.high %v14033_v18, %v14037_v19  ;;  %v14045_v48 = vld [vmem:[%s16382_s21 + $0x1d60] sm:$0xff]  ;;  %v14046_v35 = vld [vmem:[%s16382_s21 + $0x1d68] sm:$0xff] }
 0x49b   : > { %v15502_v60 = vadd.f32 %v4578_v2, %v1486_v32  ;;  %v4580_v40 = vpop.f32.mrb[6].mxu0  ;;  %v15504_v44 = vadd.f32 %v4742_v39, %v1494_v38  ;;  %v4744_v45 = vpop.f32.mrb[6].mxu1  ;;  %v14559_v32 = vcombine.high %v14034_v20, %v14038_v21  ;;  %v14041_v38 = vld [vmem:[%s16382_s21 + $0x1d40] sm:$0xff]  ;;  %v14556_v2 = vcombine.low %v14033_v18, %v14037_v19  ;;  %v14074_v15 = vld [vmem:[%s16382_s21 + $0x1e48] sm:$0xff] }
 0x49c   : > { %4751 = vst [vmem:[%s16400_s30 + $0x20] sm:$0xff] %v15501_v34  ;;  %v4759_v41 = vmax.f32 %v15501_v34, 0.0  ;;  %v4581_v0 = vpop.f32.mrb[7].mxu0  ;;  %4753 = vst [vmem:[%s16400_s30 + $0x30] sm:$0xff] %v17328_v37  ;;  %v4761_v33 = vmax.f32 %v17328_v37, 0.0  ;;  %v4745_v52 = vpop.f32.mrb[7].mxu1  ;;  %v14565_v39 = vcombine.high %v14041_v38, %v14045_v48 }
 0x49d   : > { %4752 = vst [vmem:[%s16400_s30 + $0x28] sm:$0xff] %v15502_v60  ;;  %v4760_v49 = vmax.f32 %v15502_v60, 0.0  ;;  %4754 = vst [vmem:[%s16400_s30 + $0x38] sm:$0xff] %v15504_v44  ;;  %v4762_v53 = vmax.f32 %v15504_v44, 0.0  ;;  %v14042_v34 = vld [vmem:[%s16382_s21 + $0x1d48] sm:$0xff]  ;;  %v14558_v60 = vcombine.low %v14034_v20, %v14038_v21  ;;  %v14053_v44 = vld [vmem:[%s16382_s21 + $0x1da0] sm:$0xff] }
 0x49e   : > { %v17345_v59 = vpack.c.bf16 %v4759_v41, %v4759_v41  ;;  %v14567_v40 = vcombine.high %v14042_v34, %v14046_v35  ;;  %v14049_v41 = vld [vmem:[%s16382_s21 + $0x1d80] sm:$0xff]  ;;  %v14050_v45 = vld [vmem:[%s16382_s21 + $0x1d88] sm:$0xff]  ;;  %v14566_v52 = vcombine.low %v14042_v34, %v14046_v35  ;;  %v13640_v37 = vld [vmem:[%s16382_s21 + $0x10b8] sm:$0xff] }
 0x49f   : > { %v17340_v42 = vpack.c.bf16 %v4760_v49, %v4760_v49  ;;  %v17355_v1 = vpack.c.bf16 %v4762_v53, %v4762_v53  ;;  %v14054_v0 = vld [vmem:[%s16382_s21 + $0x1da8] sm:$0xff]  ;;  %v14564_v49 = vcombine.low %v14041_v38, %v14045_v48  ;;  %v14573_v53 = vcombine.high %v14049_v41, %v14053_v44  ;;  %v14077_v14 = vld [vmem:[%s16382_s21 + $0x1e60] sm:$0xff] }
 0x4a0   : > { %v14575_v54 = vcombine.high %v14050_v45, %v14054_v0  ;;  %v14574_v43 = vcombine.low %v14050_v45, %v14054_v0  ;;  %v14081_v19 = vld [vmem:[%s16382_s21 + $0x1e80] sm:$0xff]  ;;  %v14082_v21 = vld [vmem:[%s16382_s21 + $0x1e88] sm:$0xff] }
 0x4a1   : > { %8063 = vmatprep.mubr.bf16.mxu0 %v17340_v42  ;;  %8227 = vmatprep.mubr.bf16.mxu1 %v17340_v42  ;;  %v14085_v20 = vld [vmem:[%s16382_s21 + $0x1ea0] sm:$0xff]  ;;  %v14090_v35 = vld [vmem:[%s16382_s21 + $0x1ec8] sm:$0xff] }
 0x4a2   : > { %8064 = vmatmul.mubr.bf16.vlgmr.msra.gmra.mrb[8].mxu0 %v17345_v59  ;;  %8228 = vmatmul.mubr.bf16.vlgmr.msra.gmra.mrb[8].mxu1 %v17345_v59  ;;  %v14089_v48 = vld [vmem:[%s16382_s21 + $0x1ec0] sm:$0xff]  ;;  %v14098_v0 = vld [vmem:[%s16382_s21 + $0x1f08] sm:$0xff] }
 0x4a3   : > { %8073 = vmatpush1.bf16.msra.mxu0 %v14524_v57  ;;  %8237 = vmatpush1.bf16.msra.mxu1 %v14526_v58  ;;  %v14062_v57 = vld [vmem:[%s16382_s21 + $0x1de8] sm:$0xff]  ;;  %v14572_v58 = vcombine.low %v14049_v41, %v14053_v44  ;;  %v14093_v34 = vld [vmem:[%s16382_s21 + $0x1ee0] sm:$0xff] }
 0x4a4   : > { %8104 = vmatprep.mubr.bf16.mxu0 %v17355_v1  ;;  %8268 = vmatprep.mubr.bf16.mxu1 %v17355_v1  ;;  %v14097_v44 = vld [vmem:[%s16382_s21 + $0x1f00] sm:$0xff] }
 0x4a5   : > { %8074 = vmatprep.subr.bf16.mxu0 %v14533_v47  ;;  %8238 = vmatprep.subr.bf16.mxu1 %v14535_v36  ;;  %v14581_v47 = vcombine.high %v14057_v55, %v14061_v56  ;;  %v14583_v36 = vcombine.high %v14058_v4, %v14062_v57  ;;  %v14101_v45 = vld [vmem:[%s16382_s21 + $0x1f20] sm:$0xff] }
 0x4a7   : > { %8075 = vmatpush1.bf16.msra.mxu0 %v14532_v3  ;;  %8239 = vmatpush1.bf16.msra.mxu1 %v14534_v6  ;;  %v14070_v3 = vld [vmem:[%s16382_s21 + $0x1e28] sm:$0xff]  ;;  %v14580_v6 = vcombine.low %v14057_v55, %v14061_v56  ;;  %v14105_v56 = vld [vmem:[%s16382_s21 + $0x1f40] sm:$0xff] }
 0x4a8   : > { %8076 = vmatprep.subr.bf16.mxu0 %v14541_v7  ;;  %8240 = vmatprep.subr.bf16.mxu1 %v14543_v9  ;;  %v14582_v7 = vcombine.low %v14058_v4, %v14062_v57  ;;  %v14589_v9 = vcombine.high %v14065_v61, %v14069_v62  ;;  %v14591_v50 = vcombine.high %v14066_v63, %v14070_v3  ;;  %v14109_v4 = vld [vmem:[%s16382_s21 + $0x1f60] sm:$0xff]  ;;  %v14106_v57 = vld [vmem:[%s16382_s21 + $0x1f48] sm:$0xff] }
 0x4ab   : > { %8077 = vmatpush1.bf16.msra.mxu0 %v14540_v16  ;;  %8241 = vmatpush1.bf16.msra.mxu1 %v14542_v17  ;;  %v14078_v16 = vld [vmem:[%s16382_s21 + $0x1e68] sm:$0xff]  ;;  %v14588_v17 = vcombine.low %v14065_v61, %v14069_v62  ;;  %v14113_v62 = vld [vmem:[%s16382_s21 + $0x1f80] sm:$0xff] }
 0x4ac   : > { %8078 = vmatprep.subr.bf16.mxu0 %v14549_v23  ;;  %8242 = vmatprep.subr.bf16.mxu1 %v14551_v46  ;;  %v14590_v23 = vcombine.low %v14066_v63, %v14070_v3  ;;  %v14597_v46 = vcombine.high %v14073_v13, %v14077_v14  ;;  %v14599_v18 = vcombine.high %v14074_v15, %v14078_v16  ;;  %v14117_v63 = vld [vmem:[%s16382_s21 + $0x1fa0] sm:$0xff]  ;;  %v14114_v3 = vld [vmem:[%s16382_s21 + $0x1f88] sm:$0xff] }
 0x4af   : > { %8079 = vmatpush1.bf16.msra.mxu0 %v14548_v29  ;;  %8243 = vmatpush1.bf16.msra.mxu1 %v14550_v30  ;;  %v14086_v29 = vld [vmem:[%s16382_s21 + $0x1ea8] sm:$0xff]  ;;  %v14596_v30 = vcombine.low %v14073_v13, %v14077_v14  ;;  %v14121_v14 = vld [vmem:[%s16382_s21 + $0x1fc0] sm:$0xff] }
 0x4b0   : > { %8080 = vmatprep.subr.bf16.mxu0 %v14557_v31  ;;  %8244 = vmatprep.subr.bf16.mxu1 %v14559_v32  ;;  %v14598_v31 = vcombine.low %v14074_v15, %v14078_v16  ;;  %v14605_v32 = vcombine.high %v14081_v19, %v14085_v20  ;;  %v14607_v38 = vcombine.high %v14082_v21, %v14086_v29  ;;  %v14125_v15 = vld [vmem:[%s16382_s21 + $0x1fe0] sm:$0xff]  ;;  %v14122_v16 = vld [vmem:[%s16382_s21 + $0x1fc8] sm:$0xff] }
 0x4b3   : > { %8081 = vmatpush1.bf16.msra.mxu0 %v14556_v2  ;;  %8245 = vmatpush1.bf16.msra.mxu1 %v14558_v60  ;;  %v14094_v2 = vld [vmem:[%s16382_s21 + $0x1ee8] sm:$0xff]  ;;  %v14604_v60 = vcombine.low %v14081_v19, %v14085_v20  ;;  %v13619_v20 = vld [vmem:[%s16382_s21 + $0x1010] sm:$0xff] }
 0x4b4   : > { %8082 = vmatprep.subr.bf16.mxu0 %v14565_v39  ;;  %8246 = vmatprep.subr.bf16.mxu1 %v14567_v40  ;;  %v14606_v39 = vcombine.low %v14082_v21, %v14086_v29  ;;  %v14613_v40 = vcombine.high %v14089_v48, %v14093_v34  ;;  %v14615_v41 = vcombine.high %v14090_v35, %v14094_v2  ;;  %v13623_v21 = vld [vmem:[%s16382_s21 + $0x1030] sm:$0xff]  ;;  %v13620_v29 = vld [vmem:[%s16382_s21 + $0x1018] sm:$0xff] }
 0x4b7   : > { %8083 = vmatpush1.bf16.msra.mxu0 %v14564_v49  ;;  %8247 = vmatpush1.bf16.msra.mxu1 %v14566_v52  ;;  %v14102_v49 = vld [vmem:[%s16382_s21 + $0x1f28] sm:$0xff]  ;;  %v14612_v52 = vcombine.low %v14089_v48, %v14093_v34  ;;  %v13627_v34 = vld [vmem:[%s16382_s21 + $0x1050] sm:$0xff] }
 0x4b8   : > { %8084 = vmatprep.subr.bf16.mxu0 %v14573_v53  ;;  %8248 = vmatprep.subr.bf16.mxu1 %v14575_v54  ;;  %v14614_v53 = vcombine.low %v14090_v35, %v14094_v2  ;;  %v14621_v54 = vcombine.high %v14097_v44, %v14101_v45  ;;  %v14623_v55 = vcombine.high %v14098_v0, %v14102_v49  ;;  %v13631_v35 = vld [vmem:[%s16382_s21 + $0x1070] sm:$0xff]  ;;  %v13628_v2 = vld [vmem:[%s16382_s21 + $0x1058] sm:$0xff] }
 0x4bb   : > { %8085 = vmatpush1.bf16.msra.mxu0 %v14572_v58  ;;  %8249 = vmatpush1.bf16.msra.mxu1 %v14574_v43  ;;  %v14110_v58 = vld [vmem:[%s16382_s21 + $0x1f68] sm:$0xff]  ;;  %v14620_v43 = vcombine.low %v14097_v44, %v14101_v45  ;;  %v14153_v44 = vcombine.high %v13627_v34, %v13631_v35 }
 0x4bc   : > { %8086 = vmatprep.subr.bf16.mxu0 %v14581_v47  ;;  %8250 = vmatprep.subr.bf16.mxu1 %v14583_v36  ;;  %v14622_v47 = vcombine.low %v14098_v0, %v14102_v49  ;;  %v14629_v36 = vcombine.high %v14105_v56, %v14109_v4  ;;  %v14631_v61 = vcombine.high %v14106_v57, %v14110_v58  ;;  %v13635_v0 = vld [vmem:[%s16382_s21 + $0x1090] sm:$0xff] }
 0x4bd   : > { %v13639_v49 = vld [vmem:[%s16382_s21 + $0x10b0] sm:$0xff] }
 0x4bf   : > { %8087 = vmatpush1.bf16.msra.mxu0 %v14580_v6  ;;  %8251 = vmatpush1.bf16.msra.mxu1 %v14582_v7  ;;  %v14118_v6 = vld [vmem:[%s16382_s21 + $0x1fa8] sm:$0xff]  ;;  %v14628_v7 = vcombine.low %v14105_v56, %v14109_v4  ;;  %v13643_v56 = vld [vmem:[%s16382_s21 + $0x10d0] sm:$0xff] }
 0x4c0   : > { %8088 = vmatprep.subr.bf16.mxu0 %v14589_v9  ;;  %8252 = vmatprep.subr.bf16.mxu1 %v14591_v50  ;;  %v14630_v9 = vcombine.low %v14106_v57, %v14110_v58  ;;  %v14637_v50 = vcombine.high %v14113_v62, %v14117_v63  ;;  %v14639_v13 = vcombine.high %v14114_v3, %v14118_v6  ;;  %v13647_v4 = vld [vmem:[%s16382_s21 + $0x10f0] sm:$0xff]  ;;  %v13644_v57 = vld [vmem:[%s16382_s21 + $0x10d8] sm:$0xff] }
 0x4c1   : > { %v13648_v58 = vld [vmem:[%s16382_s21 + $0x10f8] sm:$0xff] }
 0x4c3   : > { %8089 = vmatpush1.bf16.msra.mxu0 %v14588_v17  ;;  %8253 = vmatpush1.bf16.msra.mxu1 %v14590_v23  ;;  %v14126_v17 = vld [vmem:[%s16382_s21 + $0x1fe8] sm:$0xff]  ;;  %v14636_v23 = vcombine.low %v14113_v62, %v14117_v63  ;;  %v13655_v62 = vld [vmem:[%s16382_s21 + $0x1130] sm:$0xff]  ;;  %v13652_v63 = vld [vmem:[%s16382_s21 + $0x1118] sm:$0xff] }
 0x4c4   : > { %8090 = vmatprep.subr.bf16.mxu0 %v14597_v46  ;;  %8254 = vmatprep.subr.bf16.mxu1 %v14599_v18  ;;  %v14638_v46 = vcombine.low %v14114_v3, %v14118_v6  ;;  %v14645_v18 = vcombine.high %v14121_v14, %v14125_v15  ;;  %v14647_v19 = vcombine.high %v14122_v16, %v14126_v17  ;;  %v13656_v3 = vld [vmem:[%s16382_s21 + $0x1138] sm:$0xff] }
 0x4c5   : > { %v14168_v6 = vcombine.low %v13643_v56, %v13647_v4 }
 0x4c7   : > { %8091 = vmatpush1.bf16.msra.mxu0 %v14596_v30  ;;  %8255 = vmatpush1.bf16.msra.mxu1 %v14598_v31  ;;  %v13624_v30 = vld [vmem:[%s16382_s21 + $0x1038] sm:$0xff]  ;;  %v14644_v31 = vcombine.low %v14121_v14, %v14125_v15  ;;  %v13663_v14 = vld [vmem:[%s16382_s21 + $0x1170] sm:$0xff] }
 0x4c8   : > { %8092 = vmatprep.subr.bf16.mxu0 %v14605_v32  ;;  %8256 = vmatprep.subr.bf16.mxu1 %v14607_v38  ;;  %v14646_v32 = vcombine.low %v14122_v16, %v14126_v17  ;;  %v14145_v38 = vcombine.high %v13619_v20, %v13623_v21  ;;  %v14147_v48 = vcombine.high %v13620_v29, %v13624_v30  ;;  %v13660_v15 = vld [vmem:[%s16382_s21 + $0x1158] sm:$0xff] }
 0x4c9   : > { %v13664_v16 = vld [vmem:[%s16382_s21 + $0x1178] sm:$0xff] }
 0x4cb   : > { %8093 = vmatpush1.bf16.msra.mxu0 %v14604_v60  ;;  %8257 = vmatpush1.bf16.msra.mxu1 %v14606_v39  ;;  %v13632_v60 = vld [vmem:[%s16382_s21 + $0x1078] sm:$0xff]  ;;  %v14144_v39 = vcombine.low %v13619_v20, %v13623_v21  ;;  %v13671_v20 = vld [vmem:[%s16382_s21 + $0x11b0] sm:$0xff] }
 0x4cc   : > { %8094 = vmatprep.subr.bf16.mxu0 %v14613_v40  ;;  %8258 = vmatprep.subr.bf16.mxu1 %v14615_v41  ;;  %v17422_v40 = vpack.c.bf16 %v4761_v33, %v4761_v33  ;;  %v14146_v41 = vcombine.low %v13620_v29, %v13624_v30  ;;  %v14155_v45 = vcombine.high %v13628_v2, %v13632_v60  ;;  %v13668_v21 = vld [vmem:[%s16382_s21 + $0x1198] sm:$0xff] }
 0x4cd   : > { %v14152_v33 = vcombine.low %v13627_v34, %v13631_v35  ;;  %v13672_v29 = vld [vmem:[%s16382_s21 + $0x11b8] sm:$0xff]  ;;  %v13679_v34 = vld [vmem:[%s16382_s21 + $0x11f0] sm:$0xff] }
 0x4ce   : > { %v13676_v35 = vld [vmem:[%s16382_s21 + $0x11d8] sm:$0xff] }
 0x4cf   : > { %8095 = vmatpush1.bf16.msra.mxu0 %v14612_v52  ;;  %8259 = vmatpush1.bf16.msra.mxu1 %v14614_v53  ;;  %v13636_v52 = vld [vmem:[%s16382_s21 + $0x1098] sm:$0xff]  ;;  %v14154_v53 = vcombine.low %v13628_v2, %v13632_v60 }
 0x4d0   : > { %8096 = vmatprep.subr.bf16.mxu0 %v14621_v54  ;;  %8260 = vmatprep.subr.bf16.mxu1 %v14623_v55  ;;  %v14161_v54 = vcombine.high %v13635_v0, %v13639_v49  ;;  %v14163_v55 = vcombine.high %v13636_v52, %v13640_v37  ;;  %v13680_v2 = vld [vmem:[%s16382_s21 + $0x11f8] sm:$0xff] }
 0x4d3   : > { %8097 = vmatpush1.bf16.msra.mxu0 %v14620_v43  ;;  %8261 = vmatpush1.bf16.msra.mxu1 %v14622_v47  ;;  %v14160_v43 = vcombine.low %v13635_v0, %v13639_v49  ;;  %v14162_v47 = vcombine.low %v13636_v52, %v13640_v37  ;;  %v13687_v0 = vld [vmem:[%s16382_s21 + $0x1230] sm:$0xff]  ;;  %v13684_v49 = vld [vmem:[%s16382_s21 + $0x1218] sm:$0xff] }
 0x4d4   : > { %8098 = vmatprep.subr.bf16.mxu0 %v14629_v36  ;;  %8262 = vmatprep.subr.bf16.mxu1 %v14631_v61  ;;  %v14171_v36 = vcombine.high %v13644_v57, %v13648_v58  ;;  %v13651_v61 = vld [vmem:[%s16382_s21 + $0x1110] sm:$0xff]  ;;  %v13688_v52 = vld [vmem:[%s16382_s21 + $0x1238] sm:$0xff] }
 0x4d5   : > { %v14176_v17 = vcombine.low %v13651_v61, %v13655_v62 }
 0x4d7   : > { %8099 = vmatpush1.bf16.msra.mxu0 %v14628_v7  ;;  %8263 = vmatpush1.bf16.msra.mxu1 %v14630_v9  ;;  %v14170_v7 = vcombine.low %v13644_v57, %v13648_v58  ;;  %v14177_v9 = vcombine.high %v13651_v61, %v13655_v62  ;;  %v13696_v57 = vld [vmem:[%s16382_s21 + $0x1278] sm:$0xff]  ;;  %v13703_v61 = vld [vmem:[%s16382_s21 + $0x12b0] sm:$0xff] }
 0x4d8   : > { %8100 = vmatprep.subr.bf16.mxu0 %v14637_v50  ;;  %8264 = vmatprep.subr.bf16.mxu1 %v14639_v13  ;;  %v14179_v50 = vcombine.high %v13652_v63, %v13656_v3  ;;  %v13659_v13 = vld [vmem:[%s16382_s21 + $0x1150] sm:$0xff]  ;;  %v13700_v62 = vld [vmem:[%s16382_s21 + $0x1298] sm:$0xff] }
 0x4d9   : > { %v14184_v30 = vcombine.low %v13659_v13, %v13663_v14 }
 0x4db   : > { %8101 = vmatpush1.bf16.msra.mxu0 %v14636_v23  ;;  %8265 = vmatpush1.bf16.msra.mxu1 %v14638_v46  ;;  %v14178_v23 = vcombine.low %v13652_v63, %v13656_v3  ;;  %v14185_v46 = vcombine.high %v13659_v13, %v13663_v14  ;;  %v13704_v63 = vld [vmem:[%s16382_s21 + $0x12b8] sm:$0xff]  ;;  %v13711_v13 = vld [vmem:[%s16382_s21 + $0x12f0] sm:$0xff] }
 0x4dc   : > { %8102 = vmatprep.subr.bf16.mxu0 %v14645_v18  ;;  %8266 = vmatprep.subr.bf16.mxu1 %v14647_v19  ;;  %v14187_v18 = vcombine.high %v13660_v15, %v13664_v16  ;;  %v13667_v19 = vld [vmem:[%s16382_s21 + $0x1190] sm:$0xff]  ;;  %v13708_v14 = vld [vmem:[%s16382_s21 + $0x12d8] sm:$0xff] }
 0x4dd   : > { %v14192_v60 = vcombine.low %v13667_v19, %v13671_v20 }
 0x4df   : > { %8103 = vmatpush1.bf16.msra.mxu0 %v14644_v31  ;;  %8267 = vmatpush1.bf16.msra.mxu1 %v14646_v32  ;;  %v14186_v31 = vcombine.low %v13660_v15, %v13664_v16  ;;  %v14193_v32 = vcombine.high %v13667_v19, %v13671_v20  ;;  %v13712_v15 = vld [vmem:[%s16382_s21 + $0x12f8] sm:$0xff]  ;;  %v13719_v19 = vld [vmem:[%s16382_s21 + $0x1330] sm:$0xff] }
 0x4e0   : > { %8277 = vmatprep.subr.bf16.mxu0 %v14145_v38  ;;  %8441 = vmatprep.subr.bf16.mxu1 %v14147_v48  ;;  %v14195_v38 = vcombine.high %v13668_v21, %v13672_v29  ;;  %v13675_v48 = vld [vmem:[%s16382_s21 + $0x11d0] sm:$0xff]  ;;  %v13716_v20 = vld [vmem:[%s16382_s21 + $0x1318] sm:$0xff] }
 0x4e1   : > { %v14200_v37 = vcombine.low %v13675_v48, %v13679_v34 }
 0x4e2   : > { %8105 = vmatmul.mubr.bf16.vlgmr.msra.gmra.mrb[8].mxu0 %v17422_v40  ;;  %8269 = vmatmul.mubr.bf16.vlgmr.msra.gmra.mrb[8].mxu1 %v17422_v40 }
 0x4e3   : > { %8278 = vmatpush1.bf16.msra.mxu0 %v14144_v39  ;;  %8309 = vmatprep.mubr.bf16.mxu0 %v17090_v25  ;;  %v14194_v39 = vcombine.low %v13668_v21, %v13672_v29  ;;  %v13720_v21 = vld [vmem:[%s16382_s21 + $0x1338] sm:$0xff] }
 0x4e4   : > { %8442 = vmatpush1.bf16.msra.mxu1 %v14146_v41  ;;  %8473 = vmatprep.mubr.bf16.mxu1 %v17090_v25  ;;  %v14169_v25 = vcombine.high %v13643_v56, %v13647_v4  ;;  %v14201_v41 = vcombine.high %v13675_v48, %v13679_v34  ;;  %v13695_v56 = vld [vmem:[%s16382_s21 + $0x1270] sm:$0xff]  ;;  %v13692_v4 = vld [vmem:[%s16382_s21 + $0x1258] sm:$0xff] }
 0x4e5   : > { %8279 = vmatprep.subr.bf16.mxu0 %v14153_v44  ;;  %8443 = vmatprep.subr.bf16.mxu1 %v14155_v45  ;;  %v14203_v44 = vcombine.high %v13676_v35, %v13680_v2  ;;  %v13683_v45 = vld [vmem:[%s16382_s21 + $0x1210] sm:$0xff]  ;;  %v13724_v34 = vld [vmem:[%s16382_s21 + $0x1358] sm:$0xff] }
 0x4e6   : > { %v14208_v58 = vcombine.low %v13683_v45, %v13687_v0  ;;  %v13727_v48 = vld [vmem:[%s16382_s21 + $0x1370] sm:$0xff] }
 0x4e7   : > { %8280 = vmatpush1.bf16.msra.mxu0 %v14152_v33  ;;  %v14202_v33 = vcombine.low %v13676_v35, %v13680_v2  ;;  %v13728_v35 = vld [vmem:[%s16382_s21 + $0x1378] sm:$0xff] }
 0x4e8   : > { %8444 = vmatpush1.bf16.msra.mxu1 %v14154_v53  ;;  %8281 = vmatprep.subr.bf16.mxu0 %v14161_v54  ;;  %v14209_v53 = vcombine.high %v13683_v45, %v13687_v0  ;;  %v14211_v54 = vcombine.high %v13684_v49, %v13688_v52  ;;  %v13735_v45 = vld [vmem:[%s16382_s21 + $0x13b0] sm:$0xff]  ;;  %v13732_v0 = vld [vmem:[%s16382_s21 + $0x1398] sm:$0xff] }
 0x4e9   : > { %8445 = vmatprep.subr.bf16.mxu1 %v14163_v55  ;;  %v13691_v55 = vld [vmem:[%s16382_s21 + $0x1250] sm:$0xff] }
 0x4ea   : > { %v14216_v3 = vcombine.low %v13691_v55, %v13695_v56 }
 0x4eb   : > { %8282 = vmatpush1.bf16.msra.mxu0 %v14160_v43  ;;  %v14210_v43 = vcombine.low %v13684_v49, %v13688_v52  ;;  %v13736_v49 = vld [vmem:[%s16382_s21 + $0x13b8] sm:$0xff] }
 0x4ec   : > { %8446 = vmatpush1.bf16.msra.mxu1 %v14162_v47  ;;  %8283 = vmatprep.subr.bf16.mxu0 %v14169_v25  ;;  %v14217_v47 = vcombine.high %v13691_v55, %v13695_v56  ;;  %v14219_v25 = vcombine.high %v13692_v4, %v13696_v57  ;;  %v13743_v55 = vld [vmem:[%s16382_s21 + $0x13f0] sm:$0xff]  ;;  %v13740_v56 = vld [vmem:[%s16382_s21 + $0x13d8] sm:$0xff] }
 0x4ed   : > { %8447 = vmatprep.subr.bf16.mxu1 %v14171_v36  ;;  %v13699_v36 = vld [vmem:[%s16382_s21 + $0x1290] sm:$0xff] }
 0x4ee   : > { %v14224_v16 = vcombine.low %v13699_v36, %v13703_v61 }
 0x4ef   : > { %8284 = vmatpush1.bf16.msra.mxu0 %v14168_v6  ;;  %v14218_v6 = vcombine.low %v13692_v4, %v13696_v57  ;;  %v13744_v4 = vld [vmem:[%s16382_s21 + $0x13f8] sm:$0xff] }
 0x4f0   : > { %8448 = vmatpush1.bf16.msra.mxu1 %v14170_v7  ;;  %8285 = vmatprep.subr.bf16.mxu0 %v14177_v9  ;;  %v14225_v7 = vcombine.high %v13699_v36, %v13703_v61  ;;  %v14227_v9 = vcombine.high %v13700_v62, %v13704_v63  ;;  %v13751_v36 = vld [vmem:[%s16382_s21 + $0x1430] sm:$0xff]  ;;  %v13748_v61 = vld [vmem:[%s16382_s21 + $0x1418] sm:$0xff] }
 0x4f1   : > { %8449 = vmatprep.subr.bf16.mxu1 %v14179_v50  ;;  %v13707_v50 = vld [vmem:[%s16382_s21 + $0x12d0] sm:$0xff] }
 0x4f2   : > { %v14232_v29 = vcombine.low %v13707_v50, %v13711_v13 }
 0x4f3   : > { %8286 = vmatpush1.bf16.msra.mxu0 %v14176_v17  ;;  %v14226_v17 = vcombine.low %v13700_v62, %v13704_v63  ;;  %v13752_v62 = vld [vmem:[%s16382_s21 + $0x1438] sm:$0xff] }
 0x4f4   : > { %8450 = vmatpush1.bf16.msra.mxu1 %v14178_v23  ;;  %8287 = vmatprep.subr.bf16.mxu0 %v14185_v46  ;;  %v14233_v23 = vcombine.high %v13707_v50, %v13711_v13  ;;  %v14235_v46 = vcombine.high %v13708_v14, %v13712_v15  ;;  %v13759_v50 = vld [vmem:[%s16382_s21 + $0x1470] sm:$0xff] }
 0x4f5   : > { %8451 = vmatprep.subr.bf16.mxu1 %v14187_v18  ;;  %v13715_v18 = vld [vmem:[%s16382_s21 + $0x1310] sm:$0xff] }
 0x4f6   : > { %v14240_v2 = vcombine.low %v13715_v18, %v13719_v19 }
 0x4f7   : > { %8288 = vmatpush1.bf16.msra.mxu0 %v14184_v30  ;;  %v14234_v30 = vcombine.low %v13708_v14, %v13712_v15  ;;  %v13756_v14 = vld [vmem:[%s16382_s21 + $0x1458] sm:$0xff] }
 0x4f8   : > { %8452 = vmatpush1.bf16.msra.mxu1 %v14186_v31  ;;  %8289 = vmatprep.subr.bf16.mxu0 %v14193_v32  ;;  %v14241_v31 = vcombine.high %v13715_v18, %v13719_v19  ;;  %v14243_v32 = vcombine.high %v13716_v20, %v13720_v21  ;;  %v13760_v15 = vld [vmem:[%s16382_s21 + $0x1478] sm:$0xff] }
 0x4f9   : > { %8453 = vmatprep.subr.bf16.mxu1 %v14195_v38  ;;  %v13723_v38 = vld [vmem:[%s16382_s21 + $0x1350] sm:$0xff]  ;;  %v14283_v18 = vcombine.high %v13756_v14, %v13760_v15  ;;  %v13764_v19 = vld [vmem:[%s16382_s21 + $0x1498] sm:$0xff] }
 0x4fa   : > { %v14248_v52 = vcombine.low %v13723_v38, %v13727_v48 }
 0x4fb   : > { %8290 = vmatpush1.bf16.msra.mxu0 %v14192_v60  ;;  %v14242_v60 = vcombine.low %v13716_v20, %v13720_v21  ;;  %v13768_v20 = vld [vmem:[%s16382_s21 + $0x14b8] sm:$0xff] }
 0x4fc   : > { %8454 = vmatpush1.bf16.msra.mxu1 %v14194_v39  ;;  %8291 = vmatprep.subr.bf16.mxu0 %v14201_v41  ;;  %v14249_v39 = vcombine.high %v13723_v38, %v13727_v48  ;;  %v14251_v41 = vcombine.high %v13724_v34, %v13728_v35  ;;  %v13775_v38 = vld [vmem:[%s16382_s21 + $0x14f0] sm:$0xff]  ;;  %v13772_v48 = vld [vmem:[%s16382_s21 + $0x14d8] sm:$0xff] }
 0x4fd   : > { %8455 = vmatprep.subr.bf16.mxu1 %v14203_v44  ;;  %v13731_v44 = vld [vmem:[%s16382_s21 + $0x1390] sm:$0xff] }
 0x4fe   : > { %v14256_v57 = vcombine.low %v13731_v44, %v13735_v45 }
 0x4ff   : > { %8292 = vmatpush1.bf16.msra.mxu0 %v14200_v37  ;;  %v14250_v37 = vcombine.low %v13724_v34, %v13728_v35  ;;  %v14290_v35 = vcombine.low %v13764_v19, %v13768_v20 }
 0x500   : > { %8456 = vmatpush1.bf16.msra.mxu1 %v14202_v33  ;;  %8293 = vmatprep.subr.bf16.mxu0 %v14209_v53  ;;  %v14257_v33 = vcombine.high %v13731_v44, %v13735_v45  ;;  %v14259_v53 = vcombine.high %v13732_v0, %v13736_v49  ;;  %v13784_v44 = vld [vmem:[%s16382_s21 + $0x1538] sm:$0xff] }
 0x501   : > { %8457 = vmatprep.subr.bf16.mxu1 %v14211_v54  ;;  %v13739_v54 = vld [vmem:[%s16382_s21 + $0x13d0] sm:$0xff] }
 0x502   : > { %v14264_v63 = vcombine.low %v13739_v54, %v13743_v55 }
 0x503   : > { %8294 = vmatpush1.bf16.msra.mxu0 %v14208_v58  ;;  %v14258_v58 = vcombine.low %v13732_v0, %v13736_v49 }
 0x504   : > { %8458 = vmatpush1.bf16.msra.mxu1 %v14210_v43  ;;  %8295 = vmatprep.subr.bf16.mxu0 %v14217_v47  ;;  %v14265_v43 = vcombine.high %v13739_v54, %v13743_v55  ;;  %v14267_v47 = vcombine.high %v13740_v56, %v13744_v4  ;;  %v13792_v54 = vld [vmem:[%s16382_s21 + $0x1578] sm:$0xff] }
 0x505   : > { %8459 = vmatprep.subr.bf16.mxu1 %v14219_v25  ;;  %v13747_v25 = vld [vmem:[%s16382_s21 + $0x1410] sm:$0xff] }
 0x506   : > { %v14272_v13 = vcombine.low %v13747_v25, %v13751_v36 }
 0x507   : > { %8296 = vmatpush1.bf16.msra.mxu0 %v14216_v3  ;;  %v14266_v3 = vcombine.low %v13740_v56, %v13744_v4 }
 0x508   : > { %8460 = vmatpush1.bf16.msra.mxu1 %v14218_v6  ;;  %8297 = vmatprep.subr.bf16.mxu0 %v14225_v7  ;;  %v14273_v6 = vcombine.high %v13747_v25, %v13751_v36  ;;  %v14275_v7 = vcombine.high %v13748_v61, %v13752_v62  ;;  %v13800_v25 = vld [vmem:[%s16382_s21 + $0x15b8] sm:$0xff] }
 0x509   : > { %8461 = vmatprep.subr.bf16.mxu1 %v14227_v9  ;;  %v13755_v9 = vld [vmem:[%s16382_s21 + $0x1450] sm:$0xff] }
 0x50a   : > { %v14280_v21 = vcombine.low %v13755_v9, %v13759_v50 }
 0x50b   : > { %8298 = vmatpush1.bf16.msra.mxu0 %v14224_v16  ;;  %v14274_v16 = vcombine.low %v13748_v61, %v13752_v62 }
 0x50c   : > { %8462 = vmatpush1.bf16.msra.mxu1 %v14226_v17  ;;  %8299 = vmatprep.subr.bf16.mxu0 %v14233_v23  ;;  %v14281_v17 = vcombine.high %v13755_v9, %v13759_v50  ;;  %v13763_v23 = vld [vmem:[%s16382_s21 + $0x1490] sm:$0xff]  ;;  %v13808_v9 = vld [vmem:[%s16382_s21 + $0x15f8] sm:$0xff] }
 0x50d   : > { %8463 = vmatprep.subr.bf16.mxu1 %v14235_v46  ;;  %v13767_v46 = vld [vmem:[%s16382_s21 + $0x14b0] sm:$0xff] }
 0x50e   : > { %v14288_v34 = vcombine.low %v13763_v23, %v13767_v46 }
 0x50f   : > { %8300 = vmatpush1.bf16.msra.mxu0 %v14232_v29  ;;  %v14282_v29 = vcombine.low %v13756_v14, %v13760_v15 }
 0x510   : > { %8464 = vmatpush1.bf16.msra.mxu1 %v14234_v30  ;;  %8301 = vmatprep.subr.bf16.mxu0 %v14241_v31  ;;  %v14289_v30 = vcombine.high %v13763_v23, %v13767_v46  ;;  %v14291_v31 = vcombine.high %v13764_v19, %v13768_v20  ;;  %v13812_v23 = vld [vmem:[%s16382_s21 + $0x1618] sm:$0xff] }
 0x511   : > { %8465 = vmatprep.subr.bf16.mxu1 %v14243_v32  ;;  %v13771_v32 = vld [vmem:[%s16382_s21 + $0x14d0] sm:$0xff]  ;;  %v13816_v46 = vld [vmem:[%s16382_s21 + $0x1638] sm:$0xff] }
 0x512   : > { %v14296_v45 = vcombine.low %v13771_v32, %v13775_v38 }
 0x513   : > { %8302 = vmatpush1.bf16.msra.mxu0 %v14240_v2  ;;  %v14297_v2 = vcombine.high %v13771_v32, %v13775_v38  ;;  %v13824_v32 = vld [vmem:[%s16382_s21 + $0x1678] sm:$0xff] }
 0x514   : > { %8466 = vmatpush1.bf16.msra.mxu1 %v14242_v60  ;;  %8303 = vmatprep.subr.bf16.mxu0 %v14249_v39  ;;  %v13779_v60 = vld [vmem:[%s16382_s21 + $0x1510] sm:$0xff] }
 0x515   : > { %8467 = vmatprep.subr.bf16.mxu1 %v14251_v41  ;;  %v13783_v39 = vld [vmem:[%s16382_s21 + $0x1530] sm:$0xff]  ;;  %v13780_v41 = vld [vmem:[%s16382_s21 + $0x1518] sm:$0xff] }
 0x516   : > { %v14305_v49 = vcombine.high %v13779_v60, %v13783_v39  ;;  %v14304_v55 = vcombine.low %v13779_v60, %v13783_v39  ;;  %v14306_v56 = vcombine.low %v13780_v41, %v13784_v44  ;;  %v13832_v60 = vld [vmem:[%s16382_s21 + $0x16b8] sm:$0xff] }
 0x517   : > { %8304 = vmatpush1.bf16.msra.mxu0 %v14248_v52  ;;  %v14307_v52 = vcombine.high %v13780_v41, %v13784_v44 }
 0x518   : > { %8468 = vmatpush1.bf16.msra.mxu1 %v14250_v37  ;;  %8305 = vmatprep.subr.bf16.mxu0 %v14257_v33  ;;  %v13787_v37 = vld [vmem:[%s16382_s21 + $0x1550] sm:$0xff] }
 0x519   : > { %8469 = vmatprep.subr.bf16.mxu1 %v14259_v53  ;;  %v13791_v33 = vld [vmem:[%s16382_s21 + $0x1570] sm:$0xff]  ;;  %v13788_v53 = vld [vmem:[%s16382_s21 + $0x1558] sm:$0xff] }
 0x51a   : > { %v14313_v4 = vcombine.high %v13787_v37, %v13791_v33  ;;  %v14312_v36 = vcombine.low %v13787_v37, %v13791_v33  ;;  %v14314_v61 = vcombine.low %v13788_v53, %v13792_v54  ;;  %v13840_v37 = vld [vmem:[%s16382_s21 + $0x16f8] sm:$0xff] }
 0x51b   : > { %8306 = vmatpush1.bf16.msra.mxu0 %v14256_v57  ;;  %v14315_v57 = vcombine.high %v13788_v53, %v13792_v54 }
 0x51c   : > { %8470 = vmatpush1.bf16.msra.mxu1 %v14258_v58  ;;  %8307 = vmatprep.subr.bf16.mxu0 %v14265_v43  ;;  %v13795_v58 = vld [vmem:[%s16382_s21 + $0x1590] sm:$0xff] }
 0x51d   : > { %8471 = vmatprep.subr.bf16.mxu1 %v14267_v47  ;;  %v13799_v43 = vld [vmem:[%s16382_s21 + $0x15b0] sm:$0xff]  ;;  %v13796_v47 = vld [vmem:[%s16382_s21 + $0x1598] sm:$0xff] }
 0x51e   : > { %v14321_v62 = vcombine.high %v13795_v58, %v13799_v43  ;;  %v14320_v50 = vcombine.low %v13795_v58, %v13799_v43  ;;  %v13848_v58 = vld [vmem:[%s16382_s21 + $0x1738] sm:$0xff] }
 0x51f   : > { %8308 = vmatpush1.bf16.msra.mxu0 %v14264_v63  ;;  %v14323_v63 = vcombine.high %v13796_v47, %v13800_v25 }
 0x520   : > { %8472 = vmatpush1.bf16.msra.mxu1 %v14266_v3  ;;  %8318 = vmatprep.subr.bf16.mxu0 %v14273_v6  ;;  %v13803_v3 = vld [vmem:[%s16382_s21 + $0x15d0] sm:$0xff] }
 0x521   : > { %8482 = vmatprep.subr.bf16.mxu1 %v14275_v7  ;;  %v13807_v6 = vld [vmem:[%s16382_s21 + $0x15f0] sm:$0xff]  ;;  %v13804_v7 = vld [vmem:[%s16382_s21 + $0x15d8] sm:$0xff] }
 0x522   : > { %8310 = vmatmul.mubr.bf16.vlgmr.msra.gmra.mrb[12].mxu0 %v17160_v51  ;;  %v14329_v14 = vcombine.high %v13803_v3, %v13807_v6  ;;  %v14331_v15 = vcombine.high %v13804_v7, %v13808_v9  ;;  %v14330_v19 = vcombine.low %v13804_v7, %v13808_v9 }
 0x523   : > { %8474 = vmatmul.mubr.bf16.vlgmr.msra.gmra.mrb[12].mxu1 %v17160_v51  ;;  %8319 = vmatpush1.bf16.msra.mxu0 %v14272_v13  ;;  %v13776_v51 = vld [vmem:[%s16382_s21 + $0x14f8] sm:$0xff]  ;;  %v14322_v13 = vcombine.low %v13796_v47, %v13800_v25 }
 0x524   : > { %8350 = vmatprep.mubr.bf16.mxu0 %v17168_v26  ;;  %8483 = vmatpush1.bf16.msra.mxu1 %v14274_v16  ;;  %v14298_v0 = vcombine.low %v13772_v48, %v13776_v51  ;;  %v13811_v16 = vld [vmem:[%s16382_s21 + $0x1610] sm:$0xff] }
 0x525   : > { %8514 = vmatprep.mubr.bf16.mxu1 %v17168_v26  ;;  %8320 = vmatprep.subr.bf16.mxu0 %v14281_v17  ;;  %v14299_v26 = vcombine.high %v13772_v48, %v13776_v51  ;;  %v13815_v17 = vld [vmem:[%s16382_s21 + $0x1630] sm:$0xff]  ;;  %v14338_v48 = vcombine.low %v13812_v23, %v13816_v46 }
 0x526   : > { %8484 = vmatprep.subr.bf16.mxu1 %v14283_v18  ;;  %v14328_v18 = vcombine.low %v13803_v3, %v13807_v6  ;;  %v14337_v20 = vcombine.high %v13811_v16, %v13815_v17  ;;  %v14336_v38 = vcombine.low %v13811_v16, %v13815_v17  ;;  %v13856_v3 = vld [vmem:[%s16382_s21 + $0x1778] sm:$0xff] }
 0x527   : > { %8321 = vmatpush1.bf16.msra.mxu0 %v14280_v21  ;;  %v14339_v21 = vcombine.high %v13812_v23, %v13816_v46  ;;  %v13864_v16 = vld [vmem:[%s16382_s21 + $0x17b8] sm:$0xff] }
 0x528   : > { %8485 = vmatpush1.bf16.msra.mxu1 %v14282_v29  ;;  %8322 = vmatprep.subr.bf16.mxu0 %v14289_v30  ;;  %v13819_v29 = vld [vmem:[%s16382_s21 + $0x1650] sm:$0xff] }
 0x529   : > { %8486 = vmatprep.subr.bf16.mxu1 %v14291_v31  ;;  %v13823_v30 = vld [vmem:[%s16382_s21 + $0x1670] sm:$0xff]  ;;  %v13820_v31 = vld [vmem:[%s16382_s21 + $0x1658] sm:$0xff] }
 0x52a   : > { %v14345_v51 = vcombine.high %v13819_v29, %v13823_v30  ;;  %v14344_v39 = vcombine.low %v13819_v29, %v13823_v30  ;;  %v14346_v41 = vcombine.low %v13820_v31, %v13824_v32  ;;  %v13872_v29 = vld [vmem:[%s16382_s21 + $0x17f8] sm:$0xff] }
 0x52b   : > { %8323 = vmatpush1.bf16.msra.mxu0 %v14288_v34  ;;  %v14347_v34 = vcombine.high %v13820_v31, %v13824_v32 }
 0x52c   : > { %8487 = vmatpush1.bf16.msra.mxu1 %v14290_v35  ;;  %8324 = vmatprep.subr.bf16.mxu0 %v14297_v2  ;;  %v13827_v35 = vld [vmem:[%s16382_s21 + $0x1690] sm:$0xff] }
 0x52d   : > { %8488 = vmatprep.subr.bf16.mxu1 %v14299_v26  ;;  %v13831_v2 = vld [vmem:[%s16382_s21 + $0x16b0] sm:$0xff]  ;;  %v13828_v26 = vld [vmem:[%s16382_s21 + $0x1698] sm:$0xff] }
 0x52e   : > { %v14353_v44 = vcombine.high %v13827_v35, %v13831_v2  ;;  %v14352_v33 = vcombine.low %v13827_v35, %v13831_v2  ;;  %v14354_v53 = vcombine.low %v13828_v26, %v13832_v60  ;;  %v13880_v35 = vld [vmem:[%s16382_s21 + $0x1838] sm:$0xff] }
 0x52f   : > { %8325 = vmatpush1.bf16.msra.mxu0 %v14296_v45  ;;  %v14355_v45 = vcombine.high %v13828_v26, %v13832_v60 }
 0x530   : > { %8489 = vmatpush1.bf16.msra.mxu1 %v14298_v0  ;;  %8326 = vmatprep.subr.bf16.mxu0 %v14305_v49  ;;  %v13835_v0 = vld [vmem:[%s16382_s21 + $0x16d0] sm:$0xff] }
 0x531   : > { %8490 = vmatprep.subr.bf16.mxu1 %v14307_v52  ;;  %v13839_v49 = vld [vmem:[%s16382_s21 + $0x16f0] sm:$0xff]  ;;  %v13836_v52 = vld [vmem:[%s16382_s21 + $0x16d8] sm:$0xff] }
 0x532   : > { %v14361_v54 = vcombine.high %v13835_v0, %v13839_v49  ;;  %v14360_v43 = vcombine.low %v13835_v0, %v13839_v49  ;;  %v14362_v47 = vcombine.low %v13836_v52, %v13840_v37  ;;  %v13884_v0 = vld [vmem:[%s16382_s21 + $0x1858] sm:$0xff] }
 0x533   : > { %8327 = vmatpush1.bf16.msra.mxu0 %v14304_v55  ;;  %v14363_v55 = vcombine.high %v13836_v52, %v13840_v37  ;;  %v13888_v49 = vld [vmem:[%s16382_s21 + $0x1878] sm:$0xff] }
 0x534   : > { %8491 = vmatpush1.bf16.msra.mxu1 %v14306_v56  ;;  %8328 = vmatprep.subr.bf16.mxu0 %v14313_v4  ;;  %v13843_v56 = vld [vmem:[%s16382_s21 + $0x1710] sm:$0xff] }
 0x535   : > { %8492 = vmatprep.subr.bf16.mxu1 %v14315_v57  ;;  %v13847_v4 = vld [vmem:[%s16382_s21 + $0x1730] sm:$0xff]  ;;  %v13844_v57 = vld [vmem:[%s16382_s21 + $0x1718] sm:$0xff] }
 0x536   : > { %v14369_v25 = vcombine.high %v13843_v56, %v13847_v4  ;;  %v14368_v6 = vcombine.low %v13843_v56, %v13847_v4  ;;  %v14370_v7 = vcombine.low %v13844_v57, %v13848_v58  ;;  %v13896_v56 = vld [vmem:[%s16382_s21 + $0x18b8] sm:$0xff] }
 0x537   : > { %8329 = vmatpush1.bf16.msra.mxu0 %v14312_v36  ;;  %v14371_v36 = vcombine.high %v13844_v57, %v13848_v58  ;;  %v14410_v57 = vcombine.low %v13884_v0, %v13888_v49 }
 0x538   : > { %8493 = vmatpush1.bf16.msra.mxu1 %v14314_v61  ;;  %8330 = vmatprep.subr.bf16.mxu0 %v14321_v62  ;;  %v13851_v61 = vld [vmem:[%s16382_s21 + $0x1750] sm:$0xff] }
 0x539   : > { %8494 = vmatprep.subr.bf16.mxu1 %v14323_v63  ;;  %v13855_v62 = vld [vmem:[%s16382_s21 + $0x1770] sm:$0xff]  ;;  %v13852_v63 = vld [vmem:[%s16382_s21 + $0x1758] sm:$0xff] }
 0x53a   : > { %v14377_v9 = vcombine.high %v13851_v61, %v13855_v62  ;;  %v14376_v17 = vcombine.low %v13851_v61, %v13855_v62  ;;  %v14378_v23 = vcombine.low %v13852_v63, %v13856_v3 }
 0x53b   : > { %8331 = vmatpush1.bf16.msra.mxu0 %v14320_v50  ;;  %v14379_v50 = vcombine.high %v13852_v63, %v13856_v3  ;;  %v13907_v3 = vld [vmem:[%s16382_s21 + $0x1910] sm:$0xff] }
 0x53c   : > { %8495 = vmatpush1.bf16.msra.mxu1 %v14322_v13  ;;  %8332 = vmatprep.subr.bf16.mxu0 %v14329_v14  ;;  %v13859_v13 = vld [vmem:[%s16382_s21 + $0x1790] sm:$0xff] }
 0x53d   : > { %8496 = vmatprep.subr.bf16.mxu1 %v14331_v15  ;;  %v13863_v14 = vld [vmem:[%s16382_s21 + $0x17b0] sm:$0xff]  ;;  %v13860_v15 = vld [vmem:[%s16382_s21 + $0x1798] sm:$0xff] }
 0x53e   : > { %v14385_v46 = vcombine.high %v13859_v13, %v13863_v14  ;;  %v14384_v30 = vcombine.low %v13859_v13, %v13863_v14  ;;  %v14386_v31 = vcombine.low %v13860_v15, %v13864_v16 }
 0x53f   : > { %8333 = vmatpush1.bf16.msra.mxu0 %v14328_v18  ;;  %v14387_v18 = vcombine.high %v13860_v15, %v13864_v16  ;;  %v13915_v16 = vld [vmem:[%s16382_s21 + $0x1950] sm:$0xff] }
 0x540   : > { %8497 = vmatpush1.bf16.msra.mxu1 %v14330_v19  ;;  %8334 = vmatprep.subr.bf16.mxu0 %v14337_v20  ;;  %v13867_v19 = vld [vmem:[%s16382_s21 + $0x17d0] sm:$0xff] }
 0x541   : > { %8498 = vmatprep.subr.bf16.mxu1 %v14339_v21  ;;  %v13871_v20 = vld [vmem:[%s16382_s21 + $0x17f0] sm:$0xff]  ;;  %v13868_v21 = vld [vmem:[%s16382_s21 + $0x17d8] sm:$0xff] }
 0x542   : > { %v14393_v32 = vcombine.high %v13867_v19, %v13871_v20  ;;  %v14392_v2 = vcombine.low %v13867_v19, %v13871_v20  ;;  %v14394_v26 = vcombine.low %v13868_v21, %v13872_v29 }
 0x543   : > { %8335 = vmatpush1.bf16.msra.mxu0 %v14336_v38  ;;  %v14395_v38 = vcombine.high %v13868_v21, %v13872_v29  ;;  %v13923_v29 = vld [vmem:[%s16382_s21 + $0x1990] sm:$0xff] }
 0x544   : > { %8499 = vmatpush1.bf16.msra.mxu1 %v14338_v48  ;;  %8336 = vmatprep.subr.bf16.mxu0 %v14345_v51  ;;  %v13875_v48 = vld [vmem:[%s16382_s21 + $0x1810] sm:$0xff] }
 0x545   : > { %8500 = vmatprep.subr.bf16.mxu1 %v14347_v34  ;;  %v13879_v51 = vld [vmem:[%s16382_s21 + $0x1830] sm:$0xff]  ;;  %v13876_v34 = vld [vmem:[%s16382_s21 + $0x1818] sm:$0xff] }
 0x546   : > { %v14401_v60 = vcombine.high %v13875_v48, %v13879_v51  ;;  %v14402_v52 = vcombine.low %v13876_v34, %v13880_v35 }
 0x547   : > { %8337 = vmatpush1.bf16.msra.mxu0 %v14344_v39  ;;  %v14403_v39 = vcombine.high %v13876_v34, %v13880_v35  ;;  %v13931_v35 = vld [vmem:[%s16382_s21 + $0x19d0] sm:$0xff] }
 0x548   : > { %8501 = vmatpush1.bf16.msra.mxu1 %v14346_v41  ;;  %8338 = vmatprep.subr.bf16.mxu0 %v14353_v44  ;;  %v13883_v41 = vld [vmem:[%s16382_s21 + $0x1850] sm:$0xff] }
 0x549   : > { %8502 = vmatprep.subr.bf16.mxu1 %v14355_v45  ;;  %v13887_v44 = vld [vmem:[%s16382_s21 + $0x1870] sm:$0xff]  ;;  %v14400_v45 = vcombine.low %v13875_v48, %v13879_v51 }
 0x54a   : > { %v14409_v37 = vcombine.high %v13883_v41, %v13887_v44  ;;  %v14408_v4 = vcombine.low %v13883_v41, %v13887_v44 }
 0x54b   : > { %8339 = vmatpush1.bf16.msra.mxu0 %v14352_v33  ;;  %v13891_v33 = vld [vmem:[%s16382_s21 + $0x1890] sm:$0xff] }
 0x54c   : > { %8503 = vmatpush1.bf16.msra.mxu1 %v14354_v53  ;;  %8340 = vmatprep.subr.bf16.mxu0 %v14361_v54  ;;  %v13895_v53 = vld [vmem:[%s16382_s21 + $0x18b0] sm:$0xff]  ;;  %v14411_v54 = vcombine.high %v13884_v0, %v13888_v49 }
 0x54d   : > { %8504 = vmatprep.subr.bf16.mxu1 %v14363_v55  ;;  %v13892_v55 = vld [vmem:[%s16382_s21 + $0x1898] sm:$0xff]  ;;  %v14417_v58 = vcombine.high %v13891_v33, %v13895_v53  ;;  %v14416_v61 = vcombine.low %v13891_v33, %v13895_v53  ;;  %v13939_v0 = vld [vmem:[%s16382_s21 + $0x1a10] sm:$0xff] }
 0x54e   : > { %v14418_v62 = vcombine.low %v13892_v55, %v13896_v56  ;;  %v13943_v49 = vld [vmem:[%s16382_s21 + $0x1a30] sm:$0xff] }
 0x54f   : > { %8341 = vmatpush1.bf16.msra.mxu0 %v14360_v43  ;;  %v14419_v43 = vcombine.high %v13892_v55, %v13896_v56  ;;  %v13947_v56 = vld [vmem:[%s16382_s21 + $0x1a50] sm:$0xff] }
 0x550   : > { %8505 = vmatpush1.bf16.msra.mxu1 %v14362_v47  ;;  %8342 = vmatprep.subr.bf16.mxu0 %v14369_v25  ;;  %v13899_v47 = vld [vmem:[%s16382_s21 + $0x18d0] sm:$0xff] }
 0x551   : > { %8506 = vmatprep.subr.bf16.mxu1 %v14371_v36  ;;  %v13903_v25 = vld [vmem:[%s16382_s21 + $0x18f0] sm:$0xff]  ;;  %v13900_v36 = vld [vmem:[%s16382_s21 + $0x18d8] sm:$0xff] }
 0x552   : > { %v14425_v63 = vcombine.high %v13899_v47, %v13903_v25 }
 0x553   : > { %8343 = vmatpush1.bf16.msra.mxu0 %v14368_v6  ;;  %v13911_v6 = vld [vmem:[%s16382_s21 + $0x1930] sm:$0xff] }
 0x554   : > { %8507 = vmatpush1.bf16.msra.mxu1 %v14370_v7  ;;  %8344 = vmatprep.subr.bf16.mxu0 %v14377_v9  ;;  %v13908_v7 = vld [vmem:[%s16382_s21 + $0x1918] sm:$0xff]  ;;  %v14433_v14 = vcombine.high %v13907_v3, %v13911_v6 }
 0x555   : > { %8508 = vmatprep.subr.bf16.mxu1 %v14379_v50  ;;  %v13912_v9 = vld [vmem:[%s16382_s21 + $0x1938] sm:$0xff]  ;;  %v14424_v50 = vcombine.low %v13899_v47, %v13903_v25 }
 0x556   : > { %v14435_v15 = vcombine.high %v13908_v7, %v13912_v9  ;;  %v14434_v19 = vcombine.low %v13908_v7, %v13912_v9  ;;  %v13963_v9 = vld [vmem:[%s16382_s21 + $0x1ad0] sm:$0xff] }
 0x557   : > { %8345 = vmatpush1.bf16.msra.mxu0 %v14376_v17  ;;  %v13919_v17 = vld [vmem:[%s16382_s21 + $0x1970] sm:$0xff] }
 0x558   : > { %8509 = vmatpush1.bf16.msra.mxu1 %v14378_v23  ;;  %8346 = vmatprep.subr.bf16.mxu0 %v14385_v46  ;;  %v13916_v23 = vld [vmem:[%s16382_s21 + $0x1958] sm:$0xff]  ;;  %v14441_v20 = vcombine.high %v13915_v16, %v13919_v17 }
 0x559   : > { %8510 = vmatprep.subr.bf16.mxu1 %v14387_v18  ;;  %v13920_v46 = vld [vmem:[%s16382_s21 + $0x1978] sm:$0xff]  ;;  %v14432_v18 = vcombine.low %v13907_v3, %v13911_v6 }
 0x55a   : > { %v14443_v21 = vcombine.high %v13916_v23, %v13920_v46  ;;  %v14442_v48 = vcombine.low %v13916_v23, %v13920_v46  ;;  %v13971_v46 = vld [vmem:[%s16382_s21 + $0x1b10] sm:$0xff] }
 0x55b   : > { %8347 = vmatpush1.bf16.msra.mxu0 %v14384_v30  ;;  %v13927_v30 = vld [vmem:[%s16382_s21 + $0x19b0] sm:$0xff] }
 0x55c   : > { %8511 = vmatpush1.bf16.msra.mxu1 %v14386_v31  ;;  %8348 = vmatprep.subr.bf16.mxu0 %v14393_v32  ;;  %v13924_v31 = vld [vmem:[%s16382_s21 + $0x1998] sm:$0xff]  ;;  %v14449_v51 = vcombine.high %v13923_v29, %v13927_v30 }
 0x55d   : > { %8512 = vmatprep.subr.bf16.mxu1 %v14395_v38  ;;  %v13928_v32 = vld [vmem:[%s16382_s21 + $0x19b8] sm:$0xff]  ;;  %v14440_v38 = vcombine.low %v13915_v16, %v13919_v17 }
 0x55e   : > { %v14451_v34 = vcombine.high %v13924_v31, %v13928_v32  ;;  %v14450_v41 = vcombine.low %v13924_v31, %v13928_v32  ;;  %v13979_v32 = vld [vmem:[%s16382_s21 + $0x1b50] sm:$0xff] }
 0x55f   : > { %8349 = vmatpush1.bf16.msra.mxu0 %v14392_v2  ;;  %v13935_v2 = vld [vmem:[%s16382_s21 + $0x19f0] sm:$0xff] }
 0x560   : > { %8513 = vmatpush1.bf16.msra.mxu1 %v14394_v26  ;;  %8359 = vmatprep.subr.bf16.mxu0 %v14401_v60  ;;  %v13932_v26 = vld [vmem:[%s16382_s21 + $0x19d8] sm:$0xff]  ;;  %v14457_v44 = vcombine.high %v13931_v35, %v13935_v2  ;;  %v14456_v33 = vcombine.low %v13931_v35, %v13935_v2 }
 0x561   : > { %8523 = vmatprep.subr.bf16.mxu1 %v14403_v39  ;;  %v13936_v60 = vld [vmem:[%s16382_s21 + $0x19f8] sm:$0xff]  ;;  %v14448_v39 = vcombine.low %v13923_v29, %v13927_v30 }
 0x562   : > { %8351 = vmatmul.mubr.bf16.vlgmr.msra.gmra.mrb[12].mxu0 %v17238_v8  ;;  %v14458_v53 = vcombine.low %v13932_v26, %v13936_v60 }
 0x563   : > { %8515 = vmatmul.mubr.bf16.vlgmr.msra.gmra.mrb[12].mxu1 %v17238_v8  ;;  %8360 = vmatpush1.bf16.msra.mxu0 %v14400_v45  ;;  %v13904_v8 = vld [vmem:[%s16382_s21 + $0x18f8] sm:$0xff]  ;;  %v14459_v45 = vcombine.high %v13932_v26, %v13936_v60  ;;  %v13987_v60 = vld [vmem:[%s16382_s21 + $0x1b90] sm:$0xff] }
 0x564   : > { %8391 = vmatprep.mubr.bf16.mxu0 %v17340_v42  ;;  %8524 = vmatpush1.bf16.msra.mxu1 %v14402_v52  ;;  %v14426_v13 = vcombine.low %v13900_v36, %v13904_v8  ;;  %v13940_v52 = vld [vmem:[%s16382_s21 + $0x1a18] sm:$0xff] }
 0x565   : > { %8555 = vmatprep.mubr.bf16.mxu1 %v17340_v42  ;;  %8361 = vmatprep.subr.bf16.mxu0 %v14409_v37  ;;  %v14427_v42 = vcombine.high %v13900_v36, %v13904_v8  ;;  %v13944_v37 = vld [vmem:[%s16382_s21 + $0x1a38] sm:$0xff]  ;;  %v13955_v8 = vld [vmem:[%s16382_s21 + $0x1a90] sm:$0xff] }
 0x566   : > { %8525 = vmatprep.subr.bf16.mxu1 %v14411_v54  ;;  %v14465_v54 = vcombine.high %v13939_v0, %v13943_v49  ;;  %v14467_v55 = vcombine.high %v13940_v52, %v13944_v37  ;;  %v14466_v47 = vcombine.low %v13940_v52, %v13944_v37  ;;  %v13995_v37 = vld [vmem:[%s16382_s21 + $0x1bd0] sm:$0xff] }
 0x567   : > { %8362 = vmatpush1.bf16.msra.mxu0 %v14408_v4  ;;  %v13951_v4 = vld [vmem:[%s16382_s21 + $0x1a70] sm:$0xff] }
 0x568   : > { %8526 = vmatpush1.bf16.msra.mxu1 %v14410_v57  ;;  %8363 = vmatprep.subr.bf16.mxu0 %v14417_v58  ;;  %v13948_v57 = vld [vmem:[%s16382_s21 + $0x1a58] sm:$0xff]  ;;  %v14473_v25 = vcombine.high %v13947_v56, %v13951_v4 }
 0x569   : > { %8527 = vmatprep.subr.bf16.mxu1 %v14419_v43  ;;  %v13952_v58 = vld [vmem:[%s16382_s21 + $0x1a78] sm:$0xff]  ;;  %v14464_v43 = vcombine.low %v13939_v0, %v13943_v49 }
 0x56a   : > { %v14475_v36 = vcombine.high %v13948_v57, %v13952_v58  ;;  %v14474_v3 = vcombine.low %v13948_v57, %v13952_v58  ;;  %v14003_v58 = vld [vmem:[%s16382_s21 + $0x1c10] sm:$0xff] }
 0x56b   : > { %8364 = vmatpush1.bf16.msra.mxu0 %v14416_v61  ;;  %v13959_v61 = vld [vmem:[%s16382_s21 + $0x1ab0] sm:$0xff] }
 0x56c   : > { %8528 = vmatpush1.bf16.msra.mxu1 %v14418_v62  ;;  %8365 = vmatprep.subr.bf16.mxu0 %v14425_v63  ;;  %v13956_v62 = vld [vmem:[%s16382_s21 + $0x1a98] sm:$0xff]  ;;  %v14481_v6 = vcombine.high %v13955_v8, %v13959_v61 }
 0x56d   : > { %8529 = vmatprep.subr.bf16.mxu1 %v14427_v42  ;;  %v13960_v63 = vld [vmem:[%s16382_s21 + $0x1ab8] sm:$0xff]  ;;  %v14472_v42 = vcombine.low %v13947_v56, %v13951_v4 }
 0x56e   : > { %v14483_v7 = vcombine.high %v13956_v62, %v13960_v63  ;;  %v14482_v16 = vcombine.low %v13956_v62, %v13960_v63  ;;  %v14011_v63 = vld [vmem:[%s16382_s21 + $0x1c50] sm:$0xff] }
 0x56f   : > { %8366 = vmatpush1.bf16.msra.mxu0 %v14424_v50  ;;  %v13967_v50 = vld [vmem:[%s16382_s21 + $0x1af0] sm:$0xff] }
 0x570   : > { %8530 = vmatpush1.bf16.msra.mxu1 %v14426_v13  ;;  %8367 = vmatprep.subr.bf16.mxu0 %v14433_v14  ;;  %v13964_v13 = vld [vmem:[%s16382_s21 + $0x1ad8] sm:$0xff]  ;;  %v14489_v17 = vcombine.high %v13963_v9, %v13967_v50 }
 0x571   : > { %8531 = vmatprep.subr.bf16.mxu1 %v14435_v15  ;;  %v13968_v14 = vld [vmem:[%s16382_s21 + $0x1af8] sm:$0xff]  ;;  %v14480_v15 = vcombine.low %v13955_v8, %v13959_v61 }
 0x572   : > { %v14491_v23 = vcombine.high %v13964_v13, %v13968_v14  ;;  %v14490_v29 = vcombine.low %v13964_v13, %v13968_v14  ;;  %v14019_v13 = vld [vmem:[%s16382_s21 + $0x1c90] sm:$0xff] }
 0x573   : > { %8368 = vmatpush1.bf16.msra.mxu0 %v14432_v18  ;;  %v13975_v18 = vld [vmem:[%s16382_s21 + $0x1b30] sm:$0xff] }
 0x574   : > { %8532 = vmatpush1.bf16.msra.mxu1 %v14434_v19  ;;  %8369 = vmatprep.subr.bf16.mxu0 %v14441_v20  ;;  %v13972_v19 = vld [vmem:[%s16382_s21 + $0x1b18] sm:$0xff]  ;;  %v14497_v30 = vcombine.high %v13971_v46, %v13975_v18  ;;  %v14023_v14 = vld [vmem:[%s16382_s21 + $0x1cb0] sm:$0xff] }
 0x575   : > { %8533 = vmatprep.subr.bf16.mxu1 %v14443_v21  ;;  %v13976_v20 = vld [vmem:[%s16382_s21 + $0x1b38] sm:$0xff]  ;;  %v14488_v21 = vcombine.low %v13963_v9, %v13967_v50 }
 0x576   : > { %v14499_v31 = vcombine.high %v13972_v19, %v13976_v20  ;;  %v14498_v35 = vcombine.low %v13972_v19, %v13976_v20  ;;  %v14027_v20 = vld [vmem:[%s16382_s21 + $0x1cd0] sm:$0xff] }
 0x577   : > { %8370 = vmatpush1.bf16.msra.mxu0 %v14440_v38  ;;  %v13983_v38 = vld [vmem:[%s16382_s21 + $0x1b70] sm:$0xff] }
 0x578   : > { %8534 = vmatpush1.bf16.msra.mxu1 %v14442_v48  ;;  %8371 = vmatprep.subr.bf16.mxu0 %v14449_v51  ;;  %v13980_v48 = vld [vmem:[%s16382_s21 + $0x1b58] sm:$0xff]  ;;  %v14505_v2 = vcombine.high %v13979_v32, %v13983_v38 }
 0x579   : > { %8535 = vmatprep.subr.bf16.mxu1 %v14451_v34  ;;  %v13984_v51 = vld [vmem:[%s16382_s21 + $0x1b78] sm:$0xff]  ;;  %v14496_v34 = vcombine.low %v13971_v46, %v13975_v18  ;;  %v14545_v18 = vcombine.high %v14019_v13, %v14023_v14 }
 0x57a   : > { %v14507_v26 = vcombine.high %v13980_v48, %v13984_v51  ;;  %v14506_v0 = vcombine.low %v13980_v48, %v13984_v51  ;;  %v14039_v48 = vld [vmem:[%s16382_s21 + $0x1d30] sm:$0xff]  ;;  %v14036_v51 = vld [vmem:[%s16382_s21 + $0x1d18] sm:$0xff] }
 0x57b   : > { %8372 = vmatpush1.bf16.msra.mxu0 %v14448_v39  ;;  %v13991_v39 = vld [vmem:[%s16382_s21 + $0x1bb0] sm:$0xff] }
 0x57c   : > { %8536 = vmatpush1.bf16.msra.mxu1 %v14450_v41  ;;  %8373 = vmatprep.subr.bf16.mxu0 %v14457_v44  ;;  %v13988_v41 = vld [vmem:[%s16382_s21 + $0x1b98] sm:$0xff]  ;;  %v14513_v49 = vcombine.high %v13987_v60, %v13991_v39 }
 0x57d   : > { %8537 = vmatprep.subr.bf16.mxu1 %v14459_v45  ;;  %v13992_v44 = vld [vmem:[%s16382_s21 + $0x1bb8] sm:$0xff]  ;;  %v14504_v45 = vcombine.low %v13979_v32, %v13983_v38  ;;  %v14035_v38 = vld [vmem:[%s16382_s21 + $0x1d10] sm:$0xff] }
 0x57e   : > { %v14515_v52 = vcombine.high %v13988_v41, %v13992_v44  ;;  %v14514_v56 = vcombine.low %v13988_v41, %v13992_v44  ;;  %v14047_v41 = vld [vmem:[%s16382_s21 + $0x1d70] sm:$0xff]  ;;  %v14044_v44 = vld [vmem:[%s16382_s21 + $0x1d58] sm:$0xff] }
 0x57f   : > { %8374 = vmatpush1.bf16.msra.mxu0 %v14456_v33  ;;  %v13999_v33 = vld [vmem:[%s16382_s21 + $0x1bf0] sm:$0xff] }
 0x580   : > { %8538 = vmatpush1.bf16.msra.mxu1 %v14458_v53  ;;  %8375 = vmatprep.subr.bf16.mxu0 %v14465_v54  ;;  %v13996_v53 = vld [vmem:[%s16382_s21 + $0x1bd8] sm:$0xff]  ;;  %v14521_v4 = vcombine.high %v13995_v37, %v13999_v33 }
 0x581   : > { %8539 = vmatprep.subr.bf16.mxu1 %v14467_v55  ;;  %v14000_v54 = vld [vmem:[%s16382_s21 + $0x1bf8] sm:$0xff]  ;;  %v14512_v55 = vcombine.low %v13987_v60, %v13991_v39  ;;  %v14043_v39 = vld [vmem:[%s16382_s21 + $0x1d50] sm:$0xff] }
 0x582   : > { %v14523_v57 = vcombine.high %v13996_v53, %v14000_v54  ;;  %v14522_v8 = vcombine.low %v13996_v53, %v14000_v54  ;;  %v14051_v53 = vld [vmem:[%s16382_s21 + $0x1d90] sm:$0xff] }
 0x583   : > { %8376 = vmatpush1.bf16.msra.mxu0 %v14464_v43  ;;  %v14007_v43 = vld [vmem:[%s16382_s21 + $0x1c30] sm:$0xff] }
 0x584   : > { %8540 = vmatpush1.bf16.msra.mxu1 %v14466_v47  ;;  %8377 = vmatprep.subr.bf16.mxu0 %v14473_v25  ;;  %v14004_v47 = vld [vmem:[%s16382_s21 + $0x1c18] sm:$0xff]  ;;  %v14529_v61 = vcombine.high %v14003_v58, %v14007_v43  ;;  %v14055_v54 = vld [vmem:[%s16382_s21 + $0x1db0] sm:$0xff] }
 0x585   : > { %8541 = vmatprep.subr.bf16.mxu1 %v14475_v36  ;;  %v14008_v25 = vld [vmem:[%s16382_s21 + $0x1c38] sm:$0xff]  ;;  %v14520_v36 = vcombine.low %v13995_v37, %v13999_v33  ;;  %v14569_v37 = vcombine.high %v14043_v39, %v14047_v41 }
 0x586   : > { %v14531_v62 = vcombine.high %v14004_v47, %v14008_v25  ;;  %v14530_v9 = vcombine.low %v14004_v47, %v14008_v25  ;;  %v14568_v47 = vcombine.low %v14043_v39, %v14047_v41  ;;  %v14075_v39 = vld [vmem:[%s16382_s21 + $0x1e50] sm:$0xff] }
 0x587   : > { %8378 = vmatpush1.bf16.msra.mxu0 %v14472_v42  ;;  %v14015_v42 = vld [vmem:[%s16382_s21 + $0x1c70] sm:$0xff] }
 0x588   : > { %8542 = vmatpush1.bf16.msra.mxu1 %v14474_v3  ;;  %8379 = vmatprep.subr.bf16.mxu0 %v14481_v6  ;;  %v14528_v3 = vcombine.low %v14003_v58, %v14007_v43  ;;  %v14012_v6 = vld [vmem:[%s16382_s21 + $0x1c58] sm:$0xff]  ;;  %v14537_v50 = vcombine.high %v14011_v63, %v14015_v42  ;;  %v14079_v41 = vld [vmem:[%s16382_s21 + $0x1e70] sm:$0xff] }
 0x589   : > { %8543 = vmatprep.subr.bf16.mxu1 %v14483_v7  ;;  %v14016_v7 = vld [vmem:[%s16382_s21 + $0x1c78] sm:$0xff] }
 0x58a   : > { %v14538_v46 = vcombine.low %v14012_v6, %v14016_v7 }
 0x58b   : > { %8380 = vmatpush1.bf16.msra.mxu0 %v14480_v15  ;;  %v14539_v15 = vcombine.high %v14012_v6, %v14016_v7 }
 0x58c   : > { %8544 = vmatpush1.bf16.msra.mxu1 %v14482_v16  ;;  %8381 = vmatprep.subr.bf16.mxu0 %v14489_v17  ;;  %v14020_v16 = vld [vmem:[%s16382_s21 + $0x1c98] sm:$0xff] }
 0x58d   : > { %8545 = vmatprep.subr.bf16.mxu1 %v14491_v23  ;;  %v14024_v17 = vld [vmem:[%s16382_s21 + $0x1cb8] sm:$0xff]  ;;  %v14536_v23 = vcombine.low %v14011_v63, %v14015_v42  ;;  %v14059_v63 = vld [vmem:[%s16382_s21 + $0x1dd0] sm:$0xff] }
 0x58e   : > { %v14547_v19 = vcombine.high %v14020_v16, %v14024_v17  ;;  %v14063_v42 = vld [vmem:[%s16382_s21 + $0x1df0] sm:$0xff] }
 0x58f   : > { %8382 = vmatpush1.bf16.msra.mxu0 %v14488_v21  ;;  %v14031_v21 = vld [vmem:[%s16382_s21 + $0x1cf0] sm:$0xff] }
 0x590   : > { %8546 = vmatpush1.bf16.msra.mxu1 %v14490_v29  ;;  %8383 = vmatprep.subr.bf16.mxu0 %v14497_v30  ;;  %v14028_v29 = vld [vmem:[%s16382_s21 + $0x1cd8] sm:$0xff]  ;;  %v14544_v30 = vcombine.low %v14019_v13, %v14023_v14  ;;  %v14553_v32 = vcombine.high %v14027_v20, %v14031_v21 }
 0x591   : > { %8547 = vmatprep.subr.bf16.mxu1 %v14499_v31  ;;  %v14546_v31 = vcombine.low %v14020_v16, %v14024_v17  ;;  %v14064_v13 = vld [vmem:[%s16382_s21 + $0x1df8] sm:$0xff] }
 0x593   : > { %8384 = vmatpush1.bf16.msra.mxu0 %v14496_v34  ;;  %v14040_v34 = vld [vmem:[%s16382_s21 + $0x1d38] sm:$0xff] }
 0x594   : > { %8548 = vmatpush1.bf16.msra.mxu1 %v14498_v35  ;;  %8385 = vmatprep.subr.bf16.mxu0 %v14505_v2  ;;  %v14552_v35 = vcombine.low %v14027_v20, %v14031_v21  ;;  %v14563_v60 = vcombine.high %v14036_v51, %v14040_v34 }
 0x595   : > { %8549 = vmatprep.subr.bf16.mxu1 %v14507_v26  ;;  %v14561_v26 = vcombine.high %v14035_v38, %v14039_v48 }
 0x597   : > { %8386 = vmatpush1.bf16.msra.mxu0 %v14504_v45  ;;  %v14048_v45 = vld [vmem:[%s16382_s21 + $0x1d78] sm:$0xff] }
 0x598   : > { %8550 = vmatpush1.bf16.msra.mxu1 %v14506_v0  ;;  %8387 = vmatprep.subr.bf16.mxu0 %v14513_v49  ;;  %v14560_v0 = vcombine.low %v14035_v38, %v14039_v48  ;;  %v17649_v49 = vld [vmem:[%s17000_s15 + $0x8] sm:$0xff]  ;;  %v14571_v33 = vcombine.high %v14044_v44, %v14048_v45  ;;  %v14570_v25 = vcombine.low %v14044_v44, %v14048_v45 }
 0x599   : > { %8551 = vmatprep.subr.bf16.mxu1 %v14515_v52  ;;  %v14562_v52 = vcombine.low %v14036_v51, %v14040_v34  ;;  %v5328_v58 = vrot.slane %v17649_v49, %v17007_v11  ;;  %v5336_v43 = vrot.slane %v17649_v49, %v17010_v12  ;;  %v14068_v38 = vld [vmem:[%s16382_s21 + $0x1e18] sm:$0xff] }
 0x59a   : > { %v14072_v48 = vld [vmem:[%s16382_s21 + $0x1e38] sm:$0xff] }
 0x59b   : > { %8388 = vmatpush1.bf16.msra.mxu0 %v14512_v55  ;;  %v5324_v55 = vrot.slane %v17649_v49, %v16996_v5  ;;  %v14076_v44 = vld [vmem:[%s16382_s21 + $0x1e58] sm:$0xff] }
 0x59c   : > { %8552 = vmatpush1.bf16.msra.mxu1 %v14514_v56  ;;  %8389 = vmatprep.subr.bf16.mxu0 %v14521_v4  ;;  %v5332_v56 = vrot.slane %v17649_v49, %v17004_v10  ;;  %v14052_v4 = vld [vmem:[%s16382_s21 + $0x1d98] sm:$0xff] }
 0x59d   : > { %8553 = vmatprep.subr.bf16.mxu1 %v14523_v57  ;;  %v14056_v57 = vld [vmem:[%s16382_s21 + $0x1db8] sm:$0xff] }
 0x59e   : > { %v14578_v21 = vcombine.low %v14052_v4, %v14056_v57  ;;  %v14080_v45 = vld [vmem:[%s16382_s21 + $0x1e78] sm:$0xff] }
 0x59f   : > { %8390 = vmatpush1.bf16.msra.mxu0 %v14520_v36  ;;  %v14577_v36 = vcombine.high %v14051_v53, %v14055_v54 }
 0x5a0   : > { %8554 = vmatpush1.bf16.msra.mxu1 %v14522_v8  ;;  %8400 = vmatprep.subr.bf16.mxu0 %v14529_v61 }
 0x5a1   : > { %8564 = vmatprep.subr.bf16.mxu1 %v14531_v62  ;;  %v14579_v62 = vcombine.high %v14052_v4, %v14056_v57  ;;  %v14600_v4 = vcombine.low %v14075_v39, %v14079_v41  ;;  %v14602_v57 = vcombine.low %v14076_v44, %v14080_v45 }
 0x5a2   : > { %8392 = vmatmul.mubr.bf16.vlgmr.msra.gmra.mrb[12].mxu0 %v17345_v59 }
 0x5a3   : > { %8556 = vmatmul.mubr.bf16.vlgmr.msra.gmra.mrb[12].mxu1 %v17345_v59  ;;  %8401 = vmatpush1.bf16.msra.mxu0 %v14528_v3  ;;  %v14032_v59 = vld [vmem:[%s16382_s21 + $0x1cf8] sm:$0xff] }
 0x5a4   : > { %8432 = vmatprep.mubr.bf16.mxu0 %v17355_v1  ;;  %8565 = vmatpush1.bf16.msra.mxu1 %v14530_v9  ;;  %v14554_v2 = vcombine.low %v14028_v29, %v14032_v59 }
 0x5a5   : > { %8596 = vmatprep.mubr.bf16.mxu1 %v17355_v1  ;;  %8402 = vmatprep.subr.bf16.mxu0 %v14537_v50  ;;  %v14555_v1 = vcombine.high %v14028_v29, %v14032_v59  ;;  %v14060_v50 = vld [vmem:[%s16382_s21 + $0x1dd8] sm:$0xff]  ;;  %v14585_v29 = vcombine.high %v14059_v63, %v14063_v42 }
 0x5a6   : > { %8566 = vmatprep.subr.bf16.mxu1 %v14539_v15 }
 0x5a7   : > { %8403 = vmatpush1.bf16.msra.mxu0 %v14536_v23  ;;  %v14576_v23 = vcombine.low %v14051_v53, %v14055_v54  ;;  %v14083_v53 = vld [vmem:[%s16382_s21 + $0x1e90] sm:$0xff] }
 0x5a8   : > { %8567 = vmatpush1.bf16.msra.mxu1 %v14538_v46  ;;  %8404 = vmatprep.subr.bf16.mxu0 %v14545_v18  ;;  %v14087_v54 = vld [vmem:[%s16382_s21 + $0x1eb0] sm:$0xff] }
 0x5a9   : > { %8568 = vmatprep.subr.bf16.mxu1 %v14547_v19 }
 0x5ab   : > { %8405 = vmatpush1.bf16.msra.mxu0 %v14544_v30 }
 0x5ac   : > { %8569 = vmatpush1.bf16.msra.mxu1 %v14546_v31  ;;  %8406 = vmatprep.subr.bf16.mxu0 %v14553_v32  ;;  %v14587_v31 = vcombine.high %v14060_v50, %v14064_v13  ;;  %v14067_v32 = vld [vmem:[%s16382_s21 + $0x1e10] sm:$0xff] }
 0x5ad   : > { %8570 = vmatprep.subr.bf16.mxu1 %v14555_v1  ;;  %v14071_v1 = vld [vmem:[%s16382_s21 + $0x1e30] sm:$0xff] }
 0x5af   : > { %8407 = vmatpush1.bf16.msra.mxu0 %v14552_v35  ;;  %v14584_v35 = vcombine.low %v14059_v63, %v14063_v42 }
 0x5b0   : > { %8571 = vmatpush1.bf16.msra.mxu1 %v14554_v2  ;;  %8408 = vmatprep.subr.bf16.mxu0 %v14561_v26  ;;  %v14586_v2 = vcombine.low %v14060_v50, %v14064_v13  ;;  %v14593_v26 = vcombine.high %v14067_v32, %v14071_v1 }
 0x5b1   : > { %8572 = vmatprep.subr.bf16.mxu1 %v14563_v60  ;;  %v14595_v60 = vcombine.high %v14068_v38, %v14072_v48 }
 0x5b3   : > { %8409 = vmatpush1.bf16.msra.mxu0 %v14560_v0  ;;  %v14592_v0 = vcombine.low %v14067_v32, %v14071_v1 }
 0x5b4   : > { %8573 = vmatpush1.bf16.msra.mxu1 %v14562_v52  ;;  %8410 = vmatprep.subr.bf16.mxu0 %v14569_v37  ;;  %v14594_v52 = vcombine.low %v14068_v38, %v14072_v48  ;;  %v14601_v37 = vcombine.high %v14075_v39, %v14079_v41 }
 0x5b5   : > { %v8106_v8 = vpop.f32.mrb[8].mxu0  ;;  %v8270_v61 = vpop.f32.mrb[8].mxu1  ;;  %8574 = vmatprep.subr.bf16.mxu1 %v14571_v33  ;;  %v14603_v33 = vcombine.high %v14076_v44, %v14080_v45 }
 0x5b6   : > { %v15505_v3 = vadd.f32 %v8106_v8, %v5324_v55  ;;  %v15507_v6 = vadd.f32 %v8270_v61, %v5332_v56  ;;  %v8108_v7 = vpop.f32.mrb[9].mxu0  ;;  %v8272_v9 = vpop.f32.mrb[9].mxu1  ;;  %v14084_v55 = vld [vmem:[%s16382_s21 + $0x1e98] sm:$0xff]  ;;  %v14608_v61 = vcombine.low %v14083_v53, %v14087_v54 }
 0x5b7   : > { %v15506_v14 = vadd.f32 %v8108_v7, %v5328_v58  ;;  %v15508_v15 = vadd.f32 %v8272_v9, %v5336_v43  ;;  %v8110_v16 = vpop.f32.mrb[10].mxu0  ;;  %v8274_v17 = vpop.f32.mrb[10].mxu1  ;;  %8411 = vmatpush1.bf16.msra.mxu0 %v14568_v47  ;;  %v14088_v56 = vld [vmem:[%s16382_s21 + $0x1eb8] sm:$0xff]  ;;  %v14609_v58 = vcombine.high %v14083_v53, %v14087_v54  ;;  %v14091_v47 = vld [vmem:[%s16382_s21 + $0x1ed0] sm:$0xff] }
 0x5b8   : > { %14652 = vst [vmem:[%s16400_s30 + $0x40] sm:$0xff] %v15505_v3  ;;  %v8614_v46 = vmax.f32 %v15505_v3, 0.0  ;;  %14654 = vst [vmem:[%s16400_s30 + $0x50] sm:$0xff] %v15507_v6  ;;  %v8616_v18 = vmax.f32 %v15507_v6, 0.0  ;;  %8575 = vmatpush1.bf16.msra.mxu1 %v14570_v25  ;;  %v8111_v19 = vpop.f32.mrb[11].mxu0  ;;  %v8275_v20 = vpop.f32.mrb[11].mxu1  ;;  %8412 = vmatprep.subr.bf16.mxu0 %v14577_v36  ;;  %v14611_v43 = vcombine.high %v14084_v55, %v14088_v56 }
 0x5b9   : > { %14653 = vst [vmem:[%s16400_s30 + $0x48] sm:$0xff] %v15506_v14  ;;  %v8615_v59 = vmax.f32 %v15506_v14, 0.0  ;;  %14655 = vst [vmem:[%s16400_s30 + $0x58] sm:$0xff] %v15508_v15  ;;  %v8617_v30 = vmax.f32 %v15508_v15, 0.0  ;;  %8576 = vmatprep.subr.bf16.mxu1 %v14579_v62  ;;  %v14095_v25 = vld [vmem:[%s16382_s21 + $0x1ef0] sm:$0xff]  ;;  %v14092_v36 = vld [vmem:[%s16382_s21 + $0x1ed8] sm:$0xff]  ;;  %v14610_v62 = vcombine.low %v14084_v55, %v14088_v56 }
 0x5ba   : > { %v14096_v8 = vld [vmem:[%s16382_s21 + $0x1ef8] sm:$0xff]  ;;  %v14617_v63 = vcombine.high %v14091_v47, %v14095_v25  ;;  %v14099_v3 = vld [vmem:[%s16382_s21 + $0x1f10] sm:$0xff]  ;;  %v14616_v50 = vcombine.low %v14091_v47, %v14095_v25 }
 0x5bb   : > { %v15201_v51 = vpack.c.bf16 %v8615_v59, %v8614_v46  ;;  %v15202_v34 = vpack.c.bf16 %v8617_v30, %v8616_v18  ;;  %8413 = vmatpush1.bf16.msra.mxu0 %v14576_v23  ;;  %v14619_v42 = vcombine.high %v14092_v36, %v14096_v8  ;;  %v14103_v6 = vld [vmem:[%s16382_s21 + $0x1f30] sm:$0xff]  ;;  %v14100_v7 = vld [vmem:[%s16382_s21 + $0x1f18] sm:$0xff]  ;;  %v14618_v13 = vcombine.low %v14092_v36, %v14096_v8 }
 0x5bc   : > { %8577 = vmatpush1.bf16.msra.mxu1 %v14578_v21  ;;  %8414 = vmatprep.subr.bf16.mxu0 %v14585_v29  ;;  %v14104_v9 = vld [vmem:[%s16382_s21 + $0x1f38] sm:$0xff]  ;;  %v14625_v14 = vcombine.high %v14099_v3, %v14103_v6  ;;  %v14107_v16 = vld [vmem:[%s16382_s21 + $0x1f50] sm:$0xff]  ;;  %v14624_v18 = vcombine.low %v14099_v3, %v14103_v6 }
 0x5bd   : > { %8654 = vst [vmem:[#allocation2] sm:$0xff] %v15201_v51  ;;  %8655 = vst [vmem:[#allocation2 + $0x8] sm:$0xff] %v15202_v34  ;;  %8578 = vmatprep.subr.bf16.mxu1 %v14587_v31  ;;  %v14627_v15 = vcombine.high %v14100_v7, %v14104_v9  ;;  %v14111_v17 = vld [vmem:[%s16382_s21 + $0x1f70] sm:$0xff]  ;;  %v14108_v23 = vld [vmem:[%s16382_s21 + $0x1f58] sm:$0xff]  ;;  %v14626_v19 = vcombine.low %v14100_v7, %v14104_v9 }
 0x5be   : > { %v14112_v46 = vld [vmem:[%s16382_s21 + $0x1f78] sm:$0xff]  ;;  %v14633_v20 = vcombine.high %v14107_v16, %v14111_v17  ;;  %v14115_v29 = vld [vmem:[%s16382_s21 + $0x1f90] sm:$0xff]  ;;  %v14632_v32 = vcombine.low %v14107_v16, %v14111_v17 }
 0x5bf   : > { %8415 = vmatpush1.bf16.msra.mxu0 %v14584_v35  ;;  %v14635_v21 = vcombine.high %v14108_v23, %v14112_v46  ;;  %v14119_v59 = vld [vmem:[%s16382_s21 + $0x1fb0] sm:$0xff]  ;;  %v14116_v30 = vld [vmem:[%s16382_s21 + $0x1f98] sm:$0xff]  ;;  %v14634_v1 = vcombine.low %v14108_v23, %v14112_v46 }
 0x5c0   : > { %8579 = vmatpush1.bf16.msra.mxu1 %v14586_v2  ;;  %8416 = vmatprep.subr.bf16.mxu0 %v14593_v26  ;;  %v14120_v31 = vld [vmem:[%s16382_s21 + $0x1fb8] sm:$0xff]  ;;  %v14641_v38 = vcombine.high %v14115_v29, %v14119_v59  ;;  %v14123_v51 = vld [vmem:[%s16382_s21 + $0x1fd0] sm:$0xff]  ;;  %v14640_v26 = vcombine.low %v14115_v29, %v14119_v59 }
 0x5c1   : > { %8580 = vmatprep.subr.bf16.mxu1 %v14595_v60  ;;  %v14643_v48 = vcombine.high %v14116_v30, %v14120_v31  ;;  %v14127_v34 = vld [vmem:[%s16382_s21 + $0x1ff0] sm:$0xff]  ;;  %v14124_v35 = vld [vmem:[%s16382_s21 + $0x1fd8] sm:$0xff]  ;;  %v14642_v60 = vcombine.low %v14116_v30, %v14120_v31 }
 0x5c2   : > { %v14128_v2 = vld [vmem:[%s16382_s21 + $0x1ff8] sm:$0xff]  ;;  %v14649_v39 = vcombine.high %v14123_v51, %v14127_v34  ;;  %v14648_v44 = vcombine.low %v14123_v51, %v14127_v34  ;;  %v8666_v3 = vld [vmem:[#allocation12] sm:$0xff] (!%p14664_p10) }
 0x5c3   : > { %8417 = vmatpush1.bf16.msra.mxu0 %v14592_v0  ;;  %v14651_v41 = vcombine.high %v14124_v35, %v14128_v2  ;;  %v14650_v45 = vcombine.low %v14124_v35, %v14128_v2  ;;  %v5340_v0 = vrot.slane %v17649_v49, %v17312_v22  ;;  %v8670_v6 = vld [vmem:[#allocation12 + $0x20] sm:$0xff] (!%p14664_p10)  ;;  %v8667_v7 = vld [vmem:[#allocation12 + $0x8] sm:$0xff] (!%p14664_p10) }
 0x5c4   : > { %8581 = vmatpush1.bf16.msra.mxu1 %v14594_v52  ;;  %8418 = vmatprep.subr.bf16.mxu0 %v14601_v37  ;;  %v5348_v52 = vrot.slane %v17649_v49, %v17315_v24  ;;  %v5344_v37 = vrot.slane %v17649_v49, %v17318_v27  ;;  %v14674_v9 = vcombine.high (!%p14664_p10), %v8666_v3, %v8670_v6  ;;  %v8675_v46 = vld [vmem:[#allocation12 + $0x48] sm:$0xff] (!%p14664_p10) }
 0x5c5   : > { %8582 = vmatprep.subr.bf16.mxu1 %v14603_v33  ;;  %v5352_v33 = vrot.slane %v17649_v49, %v17321_v28  ;;  %v8683_v29 = vld [vmem:[#allocation12 + $0x88] sm:$0xff] (!%p14664_p10) }
 0x5c6   : > { %v8687_v59 = vld [vmem:[#allocation12 + $0xa8] sm:$0xff] (!%p14664_p10) }
 0x5c7   : > { %8419 = vmatpush1.bf16.msra.mxu0 %v14600_v4  ;;  %v8691_v51 = vld [vmem:[#allocation12 + $0xc8] sm:$0xff] (!%p14664_p10)  ;;  %v14691_v2 = vcombine.low (!%p14664_p10), %v8683_v29, %v8687_v59 }
 0x5c8   : > { %8583 = vmatpush1.bf16.msra.mxu1 %v14602_v57  ;;  %8420 = vmatprep.subr.bf16.mxu0 %v14609_v58  ;;  %v8695_v34 = vld [vmem:[#allocation12 + $0xe8] sm:$0xff] (!%p14664_p10) }
 0x5c9   : > { %8584 = vmatprep.subr.bf16.mxu1 %v14611_v43 }
 0x5cb   : > { %8421 = vmatpush1.bf16.msra.mxu0 %v14608_v61 }
 0x5cc   : > { %8585 = vmatpush1.bf16.msra.mxu1 %v14610_v62  ;;  %8422 = vmatprep.subr.bf16.mxu0 %v14617_v63 }
 0x5cd   : > { %8586 = vmatprep.subr.bf16.mxu1 %v14619_v42 }
 0x5cf   : > { %8423 = vmatpush1.bf16.msra.mxu0 %v14616_v50  ;;  %v8671_v50 = vld [vmem:[#allocation12 + $0x28] sm:$0xff] (!%p14664_p10) }
 0x5d0   : > { %8587 = vmatpush1.bf16.msra.mxu1 %v14618_v13  ;;  %8424 = vmatprep.subr.bf16.mxu0 %v14625_v14  ;;  %v14673_v13 = vcombine.low (!%p14664_p10), %v8666_v3, %v8670_v6  ;;  %v8674_v14 = vld [vmem:[#allocation12 + $0x40] sm:$0xff] (!%p14664_p10)  ;;  %v14676_v16 = vcombine.high (!%p14664_p10), %v8667_v7, %v8671_v50  ;;  %v14675_v17 = vcombine.low (!%p14664_p10), %v8667_v7, %v8671_v50  ;;  %v8723_v7 = vld [vmem:[#allocation12 + $0x1c8] sm:$0xff] (!%p14664_p10) }
 0x5d1   : > { %8588 = vmatprep.subr.bf16.mxu1 %v14627_v15  ;;  %v8678_v15 = vld [vmem:[#allocation12 + $0x60] sm:$0xff] (!%p14664_p10) }
 0x5d2   : > { %v14682_v23 = vcombine.high (!%p14664_p10), %v8674_v14, %v8678_v15  ;;  %v14681_v30 = vcombine.low (!%p14664_p10), %v8674_v14, %v8678_v15  ;;  %v8726_v3 = vld [vmem:[#allocation12 + $0x1e0] sm:$0xff] (!%p14664_p10) }
 0x5d3   : > { %8425 = vmatpush1.bf16.msra.mxu0 %v14624_v18  ;;  %v8679_v18 = vld [vmem:[#allocation12 + $0x68] sm:$0xff] (!%p14664_p10) }
 0x5d4   : > { %8589 = vmatpush1.bf16.msra.mxu1 %v14626_v19  ;;  %8426 = vmatprep.subr.bf16.mxu0 %v14633_v20  ;;  %v8682_v19 = vld [vmem:[#allocation12 + $0x80] sm:$0xff] (!%p14664_p10)  ;;  %v14684_v20 = vcombine.high (!%p14664_p10), %v8675_v46, %v8679_v18  ;;  %v14683_v31 = vcombine.low (!%p14664_p10), %v8675_v46, %v8679_v18  ;;  %v8735_v46 = vld [vmem:[#allocation12 + $0x228] sm:$0xff] (!%p14664_p10) }
 0x5d5   : > { %8590 = vmatprep.subr.bf16.mxu1 %v14635_v21  ;;  %v8686_v21 = vld [vmem:[#allocation12 + $0xa0] sm:$0xff] (!%p14664_p10) }
 0x5d6   : > { %v14689_v35 = vcombine.low (!%p14664_p10), %v8682_v19, %v8686_v21 }
 0x5d7   : > { %8427 = vmatpush1.bf16.msra.mxu0 %v14632_v32  ;;  %v14690_v32 = vcombine.high (!%p14664_p10), %v8682_v19, %v8686_v21 }
 0x5d8   : > { %8591 = vmatpush1.bf16.msra.mxu1 %v14634_v1  ;;  %8428 = vmatprep.subr.bf16.mxu0 %v14641_v38  ;;  %v14692_v1 = vcombine.high (!%p14664_p10), %v8683_v29, %v8687_v59  ;;  %v8690_v38 = vld [vmem:[#allocation12 + $0xc0] sm:$0xff] (!%p14664_p10) }
 0x5d9   : > { %8592 = vmatprep.subr.bf16.mxu1 %v14643_v48  ;;  %v8694_v48 = vld [vmem:[#allocation12 + $0xe0] sm:$0xff] (!%p14664_p10) }
 0x5da   : > { %v8738_v29 = vld [vmem:[#allocation12 + $0x240] sm:$0xff] (!%p14664_p10) }
 0x5db   : > { %8429 = vmatpush1.bf16.msra.mxu0 %v14640_v26  ;;  %v14698_v26 = vcombine.high (!%p14664_p10), %v8690_v38, %v8694_v48  ;;  %v8742_v59 = vld [vmem:[#allocation12 + $0x260] sm:$0xff] (!%p14664_p10) }
 0x5dc   : > { %8593 = vmatpush1.bf16.msra.mxu1 %v14642_v60  ;;  %8430 = vmatprep.subr.bf16.mxu0 %v14649_v39  ;;  %v14700_v60 = vcombine.high (!%p14664_p10), %v8691_v51, %v8695_v34  ;;  %v8698_v39 = vld [vmem:[#allocation12 + $0x100] sm:$0xff] (!%p14664_p10) }
 0x5dd   : > { %8594 = vmatprep.subr.bf16.mxu1 %v14651_v41  ;;  %v8702_v41 = vld [vmem:[#allocation12 + $0x120] sm:$0xff] (!%p14664_p10) }
 0x5df   : > { %8431 = vmatpush1.bf16.msra.mxu0 %v14648_v44  ;;  %v8699_v44 = vld [vmem:[#allocation12 + $0x108] sm:$0xff] (!%p14664_p10) }
 0x5e0   : > { %8595 = vmatpush1.bf16.msra.mxu1 %v14650_v45  ;;  %11808 = vmatprep.subr.bf16.mxu0 (!%p14664_p10), %v14674_v9  ;;  %v8703_v45 = vld [vmem:[#allocation12 + $0x128] sm:$0xff] (!%p14664_p10) }
 0x5e1   : > { %11972 = vmatprep.subr.bf16.mxu1 (!%p14664_p10), %v14676_v16  ;;  %v8727_v9 = vld [vmem:[#allocation12 + $0x1e8] sm:$0xff] (!%p14664_p10)  ;;  %v8730_v16 = vld [vmem:[#allocation12 + $0x200] sm:$0xff] (!%p14664_p10) }
 0x5e2   : > { %8433 = vmatmul.mubr.bf16.vlgmr.msra.gmra.mrb[12].mxu0 %v17422_v40  ;;  %v14732_v15 = vcombine.high (!%p14664_p10), %v8723_v7, %v8727_v9  ;;  %v14731_v19 = vcombine.low (!%p14664_p10), %v8723_v7, %v8727_v9  ;;  %v8778_v7 = vld [vmem:[#allocation12 + $0x380] sm:$0xff] (!%p14664_p10) }
 0x5e3   : > { %8597 = vmatmul.mubr.bf16.vlgmr.msra.gmra.mrb[12].mxu1 %v17422_v40  ;;  %11809 = vmatpush1.bf16.msra.mxu0 (!%p14664_p10), %v14673_v13  ;;  %v8782_v9 = vld [vmem:[#allocation12 + $0x3a0] sm:$0xff] (!%p14664_p10) }
 0x5e4   : > { %11973 = vmatpush1.bf16.msra.mxu1 (!%p14664_p10), %v14675_v17  ;;  %11810 = vmatprep.subr.bf16.mxu0 (!%p14664_p10), %v14682_v23  ;;  %v8734_v17 = vld [vmem:[#allocation12 + $0x220] sm:$0xff] (!%p14664_p10)  ;;  %v8731_v23 = vld [vmem:[#allocation12 + $0x208] sm:$0xff] (!%p14664_p10) }
 0x5e5   : > { %11974 = vmatprep.subr.bf16.mxu1 (!%p14664_p10), %v14684_v20  ;;  %v14738_v20 = vcombine.high (!%p14664_p10), %v8730_v16, %v8734_v17  ;;  %v14740_v21 = vcombine.high (!%p14664_p10), %v8731_v23, %v8735_v46 }
 0x5e7   : > { %11811 = vmatpush1.bf16.msra.mxu0 (!%p14664_p10), %v14681_v30  ;;  %v8739_v30 = vld [vmem:[#allocation12 + $0x248] sm:$0xff] (!%p14664_p10) }
 0x5e8   : > { %11975 = vmatpush1.bf16.msra.mxu1 (!%p14664_p10), %v14683_v31  ;;  %11812 = vmatprep.subr.bf16.mxu0 (!%p14664_p10), %v14690_v32  ;;  %v8743_v31 = vld [vmem:[#allocation12 + $0x268] sm:$0xff] (!%p14664_p10)  ;;  %v14737_v32 = vcombine.low (!%p14664_p10), %v8730_v16, %v8734_v17  ;;  %v14786_v16 = vcombine.high (!%p14664_p10), %v8778_v7, %v8782_v9 }
 0x5e9   : > { %11976 = vmatprep.subr.bf16.mxu1 (!%p14664_p10), %v14692_v1  ;;  %v14739_v1 = vcombine.low (!%p14664_p10), %v8731_v23, %v8735_v46  ;;  %v8786_v23 = vld [vmem:[#allocation12 + $0x3c0] sm:$0xff] (!%p14664_p10) }
 0x5ea   : > { %v8790_v46 = vld [vmem:[#allocation12 + $0x3e0] sm:$0xff] (!%p14664_p10) }
 0x5eb   : > { %11813 = vmatpush1.bf16.msra.mxu0 (!%p14664_p10), %v14689_v35  ;;  %v8747_v35 = vld [vmem:[#allocation12 + $0x288] sm:$0xff] (!%p14664_p10) }
 0x5ec   : > { %11977 = vmatpush1.bf16.msra.mxu1 (!%p14664_p10), %v14691_v2  ;;  %11814 = vmatprep.subr.bf16.mxu0 (!%p14664_p10), %v14698_v26  ;;  %v8751_v2 = vld [vmem:[#allocation12 + $0x2a8] sm:$0xff] (!%p14664_p10)  ;;  %v14745_v26 = vcombine.low (!%p14664_p10), %v8738_v29, %v8742_v59 }
 0x5ed   : > { %11978 = vmatprep.subr.bf16.mxu1 (!%p14664_p10), %v14700_v60  ;;  %v14747_v60 = vcombine.low (!%p14664_p10), %v8739_v30, %v8743_v31 }
 0x6b5   : > { %v8434_v53 = vpop.f32.mrb[12].mxu0 }
 0x6b6   : > { %v15509_v54 = vadd.f32 %v8434_v53, %v5340_v0  ;;  %v8598_v55 = vpop.f32.mrb[12].mxu1  ;;  %v8436_v56 = vpop.f32.mrb[13].mxu0  ;;  %v14697_v0 = vcombine.low (!%p14664_p10), %v8690_v38, %v8694_v48  ;;  %v8706_v53 = vld [vmem:[#allocation12 + $0x140] sm:$0xff] (!%p14664_p10)  ;;  %v14746_v38 = vcombine.high (!%p14664_p10), %v8738_v29, %v8742_v59  ;;  %v14748_v48 = vcombine.high (!%p14664_p10), %v8739_v30, %v8743_v31 }
 0x6b7   : > { %v15511_v40 = vadd.f32 %v8598_v55, %v5348_v52  ;;  %v15510_v4 = vadd.f32 %v8436_v56, %v5344_v37  ;;  %v8600_v57 = vpop.f32.mrb[13].mxu1  ;;  %v8438_v58 = vpop.f32.mrb[14].mxu0  ;;  %v14699_v52 = vcombine.low (!%p14664_p10), %v8691_v51, %v8695_v34  ;;  %v14706_v37 = vcombine.high (!%p14664_p10), %v8698_v39, %v8702_v41  ;;  %v8707_v55 = vld [vmem:[#allocation12 + $0x148] sm:$0xff] (!%p14664_p10)  ;;  %v8746_v51 = vld [vmem:[#allocation12 + $0x280] sm:$0xff] (!%p14664_p10) }
 0x6b8   : > { %14656 = vst [vmem:[%s16400_s30 + $0x60] sm:$0xff] %v15509_v54  ;;  %v8618_v43 = vmax.f32 %v15509_v54, 0.0  ;;  %v15512_v47 = vadd.f32 %v8600_v57, %v5352_v33  ;;  %v8602_v25 = vpop.f32.mrb[14].mxu1  ;;  %v8439_v36 = vpop.f32.mrb[15].mxu0  ;;  %8661 = sbr.rel (%p14664_p10) target bundleno = 2657 (0xa61), region = 92  ;;  %v14708_v33 = vcombine.high (!%p14664_p10), %v8699_v44, %v8703_v45  ;;  %v8710_v54 = vld [vmem:[#allocation12 + $0x160] sm:$0xff] (!%p14664_p10)  ;;  %11815 = vmatpush1.bf16.msra.mxu0 (!%p14664_p10), %v14697_v0  ;;  %v14794_v29 = vcombine.high (!%p14664_p10), %v8786_v23, %v8790_v46 }
 0x6b9   : > { %14658 = vst [vmem:[%s16400_s30 + $0x70] sm:$0xff] %v15511_v40  ;;  %v8620_v8 = vmax.f32 %v15511_v40, 0.0  ;;  %14657 = vst [vmem:[%s16400_s30 + $0x68] sm:$0xff] %v15510_v4  ;;  %v8619_v61 = vmax.f32 %v15510_v4, 0.0  ;;  %v8603_v49 = vpop.f32.mrb[15].mxu1  ;;  %v8711_v56 = vld [vmem:[#allocation12 + $0x168] sm:$0xff] (!%p14664_p10)  ;;  %v14705_v40 = vcombine.low (!%p14664_p10), %v8698_v39, %v8702_v41  ;;  %11979 = vmatpush1.bf16.msra.mxu1 (!%p14664_p10), %v14699_v52  ;;  %11816 = vmatprep.subr.bf16.mxu0 (!%p14664_p10), %v14706_v37 }
 0x6ba   : > { %14659 = vst [vmem:[%s16400_s30 + $0x78] sm:$0xff] %v15512_v47  ;;  %v8621_v62 = vmax.f32 %v15512_v47, 0.0  ;;  %v14707_v4 = vcombine.low (!%p14664_p10), %v8699_v44, %v8703_v45  ;;  %v14714_v57 = vcombine.high (!%p14664_p10), %v8706_v53, %v8710_v54  ;;  %11980 = vmatprep.subr.bf16.mxu1 (!%p14664_p10), %v14708_v33  ;;  %v14716_v58 = vcombine.high (!%p14664_p10), %v8707_v55, %v8711_v56  ;;  %v8718_v47 = vld [vmem:[#allocation12 + $0x1a0] sm:$0xff] (!%p14664_p10)  ;;  %v8715_v25 = vld [vmem:[#allocation12 + $0x188] sm:$0xff] (!%p14664_p10)  ;;  %s18290_s30 = sld [smem:[#allocation23_spill]] (!%p14664_p10) }
 0x6bb   : > { %v15203_v63 = vpack.c.bf16 %v8619_v61, %v8618_v43  ;;  %v8714_v43 = vld [vmem:[#allocation12 + $0x180] sm:$0xff] (!%p14664_p10)  ;;  %v8719_v36 = vld [vmem:[#allocation12 + $0x1a8] sm:$0xff] (!%p14664_p10)  ;;  %v14715_v61 = vcombine.low (!%p14664_p10), %v8707_v55, %v8711_v56  ;;  %v14756_v41 = vcombine.high (!%p14664_p10), %v8747_v35, %v8751_v2  ;;  %v14755_v33 = vcombine.low (!%p14664_p10), %v8747_v35, %v8751_v2 }
 0x6bc   : > { %v15204_v42 = vpack.c.bf16 %v8621_v62, %v8620_v8  ;;  %11817 = vmatpush1.bf16.msra.mxu0 (!%p14664_p10), %v14705_v40  ;;  %v14713_v8 = vcombine.low (!%p14664_p10), %v8706_v53, %v8710_v54  ;;  %v14722_v49 = vcombine.high (!%p14664_p10), %v8714_v43, %v8718_v47  ;;  %v17718_v62 = vld [vmem:[#allocation2] sm:$0xff] (!%p14664_p10)  ;;  %v14721_v50 = vcombine.low (!%p14664_p10), %v8714_v43, %v8718_v47  ;;  %v8755_v0 = vld [vmem:[#allocation12 + $0x2c8] sm:$0xff] (!%p14664_p10) }
 0x6bd   : > { %8656 = vst [vmem:[#allocation2 + $0x10] sm:$0xff] %v15203_v63  ;;  %11981 = vmatpush1.bf16.msra.mxu1 (!%p14664_p10), %v14707_v4  ;;  %11818 = vmatprep.subr.bf16.mxu0 (!%p14664_p10), %v14714_v57  ;;  %v14724_v63 = vcombine.high (!%p14664_p10), %v8715_v25, %v8719_v36  ;;  %v17722_v6 = vcombine.high (!%p14664_p10), %v17718_v62, %v17718_v62  ;;  %v8750_v34 = vld [vmem:[#allocation12 + $0x2a0] sm:$0xff] (!%p14664_p10)  ;;  %v8759_v52 = vld [vmem:[#allocation12 + $0x2e8] sm:$0xff] (!%p14664_p10) }
 0x6be   : > { %8657 = vst [vmem:[#allocation2 + $0x18] sm:$0xff] %v15204_v42  ;;  %11982 = vmatprep.subr.bf16.mxu1 (!%p14664_p10), %v14716_v58  ;;  %v8722_v42 = vld [vmem:[#allocation12 + $0x1c0] sm:$0xff] (!%p14664_p10)  ;;  %v14723_v13 = vcombine.low (!%p14664_p10), %v8715_v25, %v8719_v36  ;;  %v14754_v39 = vcombine.high (!%p14664_p10), %v8746_v51, %v8750_v34  ;;  %v14753_v37 = vcombine.low (!%p14664_p10), %v8746_v51, %v8750_v34  ;;  %v8763_v40 = vld [vmem:[#allocation12 + $0x308] sm:$0xff] (!%p14664_p10) }
 0x6bf   : > { %11840 = vmatprep.mubr.bf16.mxu0 %v17722_v6  ;;  %v14730_v14 = vcombine.high %v8722_v42, %v8726_v3  ;;  %12004 = vmatprep.mubr.bf16.mxu1 %v17722_v6  ;;  %v14729_v18 = vcombine.low %v8722_v42, %v8726_v3  ;;  %v8754_v44 = vld [vmem:[#allocation12 + $0x2c0] sm:$0xff]  ;;  %v14764_v54 = vcombine.high %v8755_v0, %v8759_v52  ;;  %v8767_v4 = vld [vmem:[#allocation12 + $0x328] sm:$0xff] }
 0x6c0   : > { %11819 = vmatpush1.bf16.msra.mxu0 %v14713_v8  ;;  %v8758_v45 = vld [vmem:[#allocation12 + $0x2e0] sm:$0xff]  ;;  %v14763_v58 = vcombine.low %v8755_v0, %v8759_v52  ;;  %v14772_v47 = vcombine.high %v8763_v40, %v8767_v4  ;;  %v8771_v8 = vld [vmem:[#allocation12 + $0x348] sm:$0xff] }
 0x6c1   : > { %11983 = vmatpush1.bf16.msra.mxu1 %v14715_v61  ;;  %11820 = vmatprep.subr.bf16.mxu0 %v14722_v49  ;;  %v14762_v53 = vcombine.high %v8754_v44, %v8758_v45  ;;  %v8762_v55 = vld [vmem:[#allocation12 + $0x300] sm:$0xff]  ;;  %v14761_v57 = vcombine.low %v8754_v44, %v8758_v45  ;;  %v8775_v61 = vld [vmem:[#allocation12 + $0x368] sm:$0xff] }
 0x6c2   : > { %11984 = vmatprep.subr.bf16.mxu1 %v14724_v63  ;;  %v8766_v56 = vld [vmem:[#allocation12 + $0x320] sm:$0xff]  ;;  %v14771_v63 = vcombine.low %v8763_v40, %v8767_v4  ;;  %v14780_v3 = vcombine.high %v8771_v8, %v8775_v61 }
 0x6c3   : > { %v14770_v43 = vcombine.high %v8762_v55, %v8766_v56  ;;  %v8770_v25 = vld [vmem:[#allocation12 + $0x340] sm:$0xff]  ;;  %v14769_v49 = vcombine.low %v8762_v55, %v8766_v56 }
 0x6c4   : > { %11821 = vmatpush1.bf16.msra.mxu0 %v14721_v50  ;;  %v8774_v36 = vld [vmem:[#allocation12 + $0x360] sm:$0xff]  ;;  %v8779_v50 = vld [vmem:[#allocation12 + $0x388] sm:$0xff] }
 0x6c5   : > { %11985 = vmatpush1.bf16.msra.mxu1 %v14723_v13  ;;  %11822 = vmatprep.subr.bf16.mxu0 %v14730_v14  ;;  %v14778_v42 = vcombine.high %v8770_v25, %v8774_v36  ;;  %v8783_v13 = vld [vmem:[#allocation12 + $0x3a8] sm:$0xff]  ;;  %v14777_v14 = vcombine.low %v8770_v25, %v8774_v36  ;;  %v8794_v30 = vld [vmem:[#allocation12 + $0x400] sm:$0xff] }
 0x6c6   : > { %11986 = vmatprep.subr.bf16.mxu1 %v14732_v15  ;;  %v14779_v15 = vcombine.low %v8771_v8, %v8775_v61  ;;  %v14788_v17 = vcombine.high %v8779_v50, %v8783_v13  ;;  %v8798_v31 = vld [vmem:[#allocation12 + $0x420] sm:$0xff] }
 0x6c7   : > { %v14802_v51 = vcombine.high %v8794_v30, %v8798_v31  ;;  %v8802_v35 = vld [vmem:[#allocation12 + $0x440] sm:$0xff]  ;;  %v14801_v44 = vcombine.low %v8794_v30, %v8798_v31 }
 0x6c8   : > { %11823 = vmatpush1.bf16.msra.mxu0 %v14729_v18  ;;  %v8787_v18 = vld [vmem:[#allocation12 + $0x3c8] sm:$0xff]  ;;  %v8806_v2 = vld [vmem:[#allocation12 + $0x460] sm:$0xff] }
 0x6c9   : > { %11987 = vmatpush1.bf16.msra.mxu1 %v14731_v19  ;;  %11824 = vmatprep.subr.bf16.mxu0 %v14738_v20  ;;  %v8791_v19 = vld [vmem:[#allocation12 + $0x3e8] sm:$0xff]  ;;  %v14785_v20 = vcombine.low %v8778_v7, %v8782_v9  ;;  %v14810_v0 = vcombine.high %v8802_v35, %v8806_v2  ;;  %v14809_v55 = vcombine.low %v8802_v35, %v8806_v2 }
 0x6ca   : > { %11988 = vmatprep.subr.bf16.mxu1 %v14740_v21  ;;  %v14787_v21 = vcombine.low %v8779_v50, %v8783_v13  ;;  %v14796_v59 = vcombine.high %v8787_v18, %v8791_v19 }
 0x6cc   : > { %11825 = vmatpush1.bf16.msra.mxu0 %v14737_v32  ;;  %v8795_v32 = vld [vmem:[#allocation12 + $0x408] sm:$0xff] }
 0x6cd   : > { %11989 = vmatpush1.bf16.msra.mxu1 %v14739_v1  ;;  %11826 = vmatprep.subr.bf16.mxu0 %v14746_v38  ;;  %v8799_v1 = vld [vmem:[#allocation12 + $0x428] sm:$0xff]  ;;  %v14793_v38 = vcombine.low %v8786_v23, %v8790_v46 }
 0x6ce   : > { %11990 = vmatprep.subr.bf16.mxu1 %v14748_v48  ;;  %v14795_v48 = vcombine.low %v8787_v18, %v8791_v19  ;;  %v14804_v34 = vcombine.high %v8795_v32, %v8799_v1  ;;  %v14803_v45 = vcombine.low %v8795_v32, %v8799_v1 }
 0x6d0   : > { %11827 = vmatpush1.bf16.msra.mxu0 %v14745_v26  ;;  %v17728_v26 = vcombine.low %v17718_v62, %v17718_v62  ;;  %v8811_v62 = vld [vmem:[#allocation12 + $0x488] sm:$0xff] }
 0x6d1   : > { %11991 = vmatpush1.bf16.msra.mxu1 %v14747_v60  ;;  %11828 = vmatprep.subr.bf16.mxu0 %v14754_v39  ;;  %v8803_v60 = vld [vmem:[#allocation12 + $0x448] sm:$0xff] }
 0x6d2   : > { %11992 = vmatprep.subr.bf16.mxu1 %v14756_v41  ;;  %v8807_v39 = vld [vmem:[#allocation12 + $0x468] sm:$0xff] }
 0x6d3   : > { %v17730_v41 = vld [vmem:[#allocation2 + $0x8] sm:$0xff]  ;;  %v14812_v52 = vcombine.high %v8803_v60, %v8807_v39  ;;  %v14811_v56 = vcombine.low %v8803_v60, %v8807_v39 }
 0x6d4   : > { %11829 = vmatpush1.bf16.msra.mxu0 %v14753_v37  ;;  %v8810_v37 = vld [vmem:[#allocation12 + $0x480] sm:$0xff] }
 0x6d5   : > { %11993 = vmatpush1.bf16.msra.mxu1 %v14755_v33  ;;  %11830 = vmatprep.subr.bf16.mxu0 %v14762_v53  ;;  %v8814_v33 = vld [vmem:[#allocation12 + $0x4a0] sm:$0xff]  ;;  %v17734_v53 = vcombine.high %v17730_v41, %v17730_v41 }
 0x6d6   : > { %11994 = vmatprep.subr.bf16.mxu1 %v14764_v54  ;;  %v8815_v54 = vld [vmem:[#allocation12 + $0x4a8] sm:$0xff]  ;;  %v14818_v40 = vcombine.high %v8810_v37, %v8814_v33  ;;  %v14817_v25 = vcombine.low %v8810_v37, %v8814_v33 }
 0x6d7   : > { %v14820_v4 = vcombine.high %v8811_v62, %v8815_v54  ;;  %v14819_v36 = vcombine.low %v8811_v62, %v8815_v54 }
 0x6d8   : > { %11831 = vmatpush1.bf16.msra.mxu0 %v14761_v57  ;;  %v8818_v57 = vld [vmem:[#allocation12 + $0x4c0] sm:$0xff] }
 0x6d9   : > { %11995 = vmatpush1.bf16.msra.mxu1 %v14763_v58  ;;  %11832 = vmatprep.subr.bf16.mxu0 %v14770_v43  ;;  %v8822_v58 = vld [vmem:[#allocation12 + $0x4e0] sm:$0xff]  ;;  %v8819_v43 = vld [vmem:[#allocation12 + $0x4c8] sm:$0xff] }
 0x6da   : > { %11996 = vmatprep.subr.bf16.mxu1 %v14772_v47  ;;  %v8823_v47 = vld [vmem:[#allocation12 + $0x4e8] sm:$0xff]  ;;  %v14826_v8 = vcombine.high %v8818_v57, %v8822_v58  ;;  %v14825_v7 = vcombine.low %v8818_v57, %v8822_v58 }
 0x6db   : > { %v14828_v61 = vcombine.high %v8819_v43, %v8823_v47  ;;  %v14827_v9 = vcombine.low %v8819_v43, %v8823_v47 }
 0x6dc   : > { %11833 = vmatpush1.bf16.msra.mxu0 %v14769_v49  ;;  %v8826_v49 = vld [vmem:[#allocation12 + $0x500] sm:$0xff] }
 0x6dd   : > { %11997 = vmatpush1.bf16.msra.mxu1 %v14771_v63  ;;  %11834 = vmatprep.subr.bf16.mxu0 %v14778_v42  ;;  %v8830_v63 = vld [vmem:[#allocation12 + $0x520] sm:$0xff]  ;;  %v8827_v42 = vld [vmem:[#allocation12 + $0x508] sm:$0xff] }
 0x6de   : > { %11998 = vmatprep.subr.bf16.mxu1 %v14780_v3  ;;  %v8831_v3 = vld [vmem:[#allocation12 + $0x528] sm:$0xff]  ;;  %v14834_v50 = vcombine.high %v8826_v49, %v8830_v63  ;;  %v14833_v23 = vcombine.low %v8826_v49, %v8830_v63 }
 0x6df   : > { %v14836_v13 = vcombine.high %v8827_v42, %v8831_v3  ;;  %v14835_v46 = vcombine.low %v8827_v42, %v8831_v3 }
 0x6e0   : > { %11835 = vmatpush1.bf16.msra.mxu0 %v14777_v14  ;;  %v8834_v14 = vld [vmem:[#allocation12 + $0x540] sm:$0xff] }
 0x6e1   : > { %11999 = vmatpush1.bf16.msra.mxu1 %v14779_v15  ;;  %11836 = vmatprep.subr.bf16.mxu0 %v14786_v16  ;;  %v8838_v15 = vld [vmem:[#allocation12 + $0x560] sm:$0xff]  ;;  %v8835_v16 = vld [vmem:[#allocation12 + $0x548] sm:$0xff] }
 0x6e2   : > { %12000 = vmatprep.subr.bf16.mxu1 %v14788_v17  ;;  %v8839_v17 = vld [vmem:[#allocation12 + $0x568] sm:$0xff]  ;;  %v14842_v18 = vcombine.high %v8834_v14, %v8838_v15  ;;  %v14841_v30 = vcombine.low %v8834_v14, %v8838_v15 }
 0x6e3   : > { %v14844_v19 = vcombine.high %v8835_v16, %v8839_v17  ;;  %v14843_v31 = vcombine.low %v8835_v16, %v8839_v17 }
 0x6e4   : > { %11837 = vmatpush1.bf16.msra.mxu0 %v14785_v20  ;;  %v8842_v20 = vld [vmem:[#allocation12 + $0x580] sm:$0xff] }
 0x6e5   : > { %12001 = vmatpush1.bf16.msra.mxu1 %v14787_v21  ;;  %11838 = vmatprep.subr.bf16.mxu0 %v14794_v29  ;;  %v8846_v21 = vld [vmem:[#allocation12 + $0x5a0] sm:$0xff]  ;;  %v8843_v29 = vld [vmem:[#allocation12 + $0x588] sm:$0xff] }
 0x6e6   : > { %12002 = vmatprep.subr.bf16.mxu1 %v14796_v59  ;;  %v8847_v59 = vld [vmem:[#allocation12 + $0x5a8] sm:$0xff]  ;;  %v14850_v32 = vcombine.high %v8842_v20, %v8846_v21  ;;  %v14849_v35 = vcombine.low %v8842_v20, %v8846_v21 }
 0x6e7   : > { %v14852_v1 = vcombine.high %v8843_v29, %v8847_v59  ;;  %v14851_v2 = vcombine.low %v8843_v29, %v8847_v59 }
 0x6e8   : > { %11839 = vmatpush1.bf16.msra.mxu0 %v14793_v38  ;;  %v8850_v38 = vld [vmem:[#allocation12 + $0x5c0] sm:$0xff] }
 0x6e9   : > { %12003 = vmatpush1.bf16.msra.mxu1 %v14795_v48  ;;  %11849 = vmatprep.subr.bf16.mxu0 %v14802_v51  ;;  %v8854_v48 = vld [vmem:[#allocation12 + $0x5e0] sm:$0xff]  ;;  %v8851_v51 = vld [vmem:[#allocation12 + $0x5c8] sm:$0xff] }
 0x6ea   : > { %12013 = vmatprep.subr.bf16.mxu1 %v14804_v34  ;;  %v8855_v34 = vld [vmem:[#allocation12 + $0x5e8] sm:$0xff]  ;;  %v14858_v60 = vcombine.high %v8850_v38, %v8854_v48  ;;  %v14857_v37 = vcombine.low %v8850_v38, %v8854_v48 }
 0x6eb   : > { %11841 = vmatmul.mubr.bf16.vlgmr.msra.gmra.mrb[0].mxu0 %v17728_v26  ;;  %v14860_v39 = vcombine.high %v8851_v51, %v8855_v34  ;;  %v14859_v33 = vcombine.low %v8851_v51, %v8855_v34 }
 0x6ec   : > { %11850 = vmatpush1.bf16.msra.mxu0 %v14801_v44  ;;  %12005 = vmatmul.mubr.bf16.vlgmr.msra.gmra.mrb[0].mxu1 %v17728_v26  ;;  %v8858_v44 = vld [vmem:[#allocation12 + $0x600] sm:$0xff] }
 0x6ed   : > { %12014 = vmatpush1.bf16.msra.mxu1 %v14803_v45  ;;  %11851 = vmatprep.subr.bf16.mxu0 %v14810_v0  ;;  %v8862_v45 = vld [vmem:[#allocation12 + $0x620] sm:$0xff]  ;;  %v8859_v0 = vld [vmem:[#allocation12 + $0x608] sm:$0xff] }
 0x6ee   : > { %12015 = vmatprep.subr.bf16.mxu1 %v14812_v52  ;;  %11881 = vmatprep.mubr.bf16.mxu0 %v17734_v53  ;;  %v8863_v52 = vld [vmem:[#allocation12 + $0x628] sm:$0xff]  ;;  %v14866_v62 = vcombine.high %v8858_v44, %v8862_v45  ;;  %v14865_v57 = vcombine.low %v8858_v44, %v8862_v45 }
 0x6ef   : > { %12045 = vmatprep.mubr.bf16.mxu1 %v17734_v53  ;;  %v14868_v54 = vcombine.high %v8859_v0, %v8863_v52  ;;  %v14867_v58 = vcombine.low %v8859_v0, %v8863_v52 }
 0x6f0   : > { %11852 = vmatpush1.bf16.msra.mxu0 %v14809_v55  ;;  %v8866_v55 = vld [vmem:[#allocation12 + $0x640] sm:$0xff] }
 0x6f1   : > { %12016 = vmatpush1.bf16.msra.mxu1 %v14811_v56  ;;  %11853 = vmatprep.subr.bf16.mxu0 %v14818_v40  ;;  %v8870_v56 = vld [vmem:[#allocation12 + $0x660] sm:$0xff]  ;;  %v8867_v40 = vld [vmem:[#allocation12 + $0x648] sm:$0xff] }
 0x6f2   : > { %12017 = vmatprep.subr.bf16.mxu1 %v14820_v4  ;;  %v8871_v4 = vld [vmem:[#allocation12 + $0x668] sm:$0xff]  ;;  %v14874_v43 = vcombine.high %v8866_v55, %v8870_v56  ;;  %v14873_v49 = vcombine.low %v8866_v55, %v8870_v56 }
 0x6f3   : > { %v14876_v47 = vcombine.high %v8867_v40, %v8871_v4  ;;  %v14875_v63 = vcombine.low %v8867_v40, %v8871_v4 }
 0x6f4   : > { %11854 = vmatpush1.bf16.msra.mxu0 %v14817_v25  ;;  %v8874_v25 = vld [vmem:[#allocation12 + $0x680] sm:$0xff] }
 0x6f5   : > { %12018 = vmatpush1.bf16.msra.mxu1 %v14819_v36  ;;  %11855 = vmatprep.subr.bf16.mxu0 %v14826_v8  ;;  %v8878_v36 = vld [vmem:[#allocation12 + $0x6a0] sm:$0xff]  ;;  %v8875_v8 = vld [vmem:[#allocation12 + $0x688] sm:$0xff] }
 0x6f6   : > { %12019 = vmatprep.subr.bf16.mxu1 %v14828_v61  ;;  %v8879_v61 = vld [vmem:[#allocation12 + $0x6a8] sm:$0xff]  ;;  %v14882_v42 = vcombine.high %v8874_v25, %v8878_v36  ;;  %v14881_v14 = vcombine.low %v8874_v25, %v8878_v36 }
 0x6f7   : > { %v14884_v3 = vcombine.high %v8875_v8, %v8879_v61  ;;  %v14883_v15 = vcombine.low %v8875_v8, %v8879_v61 }
 0x6f8   : > { %11856 = vmatpush1.bf16.msra.mxu0 %v14825_v7  ;;  %v8882_v7 = vld [vmem:[#allocation12 + $0x6c0] sm:$0xff] }
 0x6f9   : > { %12020 = vmatpush1.bf16.msra.mxu1 %v14827_v9  ;;  %11857 = vmatprep.subr.bf16.mxu0 %v14834_v50  ;;  %v8886_v9 = vld [vmem:[#allocation12 + $0x6e0] sm:$0xff]  ;;  %v8883_v50 = vld [vmem:[#allocation12 + $0x6c8] sm:$0xff] }
 0x6fa   : > { %12021 = vmatprep.subr.bf16.mxu1 %v14836_v13  ;;  %v8887_v13 = vld [vmem:[#allocation12 + $0x6e8] sm:$0xff]  ;;  %v14890_v16 = vcombine.high %v8882_v7, %v8886_v9  ;;  %v14889_v20 = vcombine.low %v8882_v7, %v8886_v9 }
 0x6fb   : > { %v14892_v17 = vcombine.high %v8883_v50, %v8887_v13  ;;  %v14891_v21 = vcombine.low %v8883_v50, %v8887_v13  ;;  %v8935_v7 = vld [vmem:[#allocation12 + $0x868] sm:$0xff] }
 0x6fc   : > { %11858 = vmatpush1.bf16.msra.mxu0 %v14833_v23  ;;  %v8890_v23 = vld [vmem:[#allocation12 + $0x700] sm:$0xff]  ;;  %v17744_v9 = vld [vmem:[#allocation2 + $0x10] sm:$0xff] }
 0x6fd   : > { %12022 = vmatpush1.bf16.msra.mxu1 %v14835_v46  ;;  %11859 = vmatprep.subr.bf16.mxu0 %v14842_v18  ;;  %v8894_v46 = vld [vmem:[#allocation12 + $0x720] sm:$0xff]  ;;  %v8891_v18 = vld [vmem:[#allocation12 + $0x708] sm:$0xff] }
 0x6fe   : > { %12023 = vmatprep.subr.bf16.mxu1 %v14844_v19  ;;  %v8895_v19 = vld [vmem:[#allocation12 + $0x728] sm:$0xff]  ;;  %v14898_v29 = vcombine.high %v8890_v23, %v8894_v46  ;;  %v14897_v38 = vcombine.low %v8890_v23, %v8894_v46  ;;  %v17748_v23 = vcombine.high %v17744_v9, %v17744_v9 }
 0x6ff   : > { %v14900_v59 = vcombine.high %v8891_v18, %v8895_v19  ;;  %v14899_v48 = vcombine.low %v8891_v18, %v8895_v19  ;;  %v8943_v46 = vld [vmem:[#allocation12 + $0x8a8] sm:$0xff] }
 0x700   : > { %11860 = vmatpush1.bf16.msra.mxu0 %v14841_v30  ;;  %v8898_v30 = vld [vmem:[#allocation12 + $0x740] sm:$0xff] }
 0x701   : > { %12024 = vmatpush1.bf16.msra.mxu1 %v14843_v31  ;;  %11861 = vmatprep.subr.bf16.mxu0 %v14850_v32  ;;  %v8902_v31 = vld [vmem:[#allocation12 + $0x760] sm:$0xff]  ;;  %v8899_v32 = vld [vmem:[#allocation12 + $0x748] sm:$0xff] }
 0x702   : > { %12025 = vmatprep.subr.bf16.mxu1 %v14852_v1  ;;  %v8903_v1 = vld [vmem:[#allocation12 + $0x768] sm:$0xff]  ;;  %v14906_v51 = vcombine.high %v8898_v30, %v8902_v31  ;;  %v14905_v44 = vcombine.low %v8898_v30, %v8902_v31 }
 0x703   : > { %v14908_v34 = vcombine.high %v8899_v32, %v8903_v1  ;;  %v14907_v45 = vcombine.low %v8899_v32, %v8903_v1  ;;  %v8947_v30 = vld [vmem:[#allocation12 + $0x8c8] sm:$0xff] }
 0x704   : > { %11862 = vmatpush1.bf16.msra.mxu0 %v14849_v35  ;;  %v8906_v35 = vld [vmem:[#allocation12 + $0x780] sm:$0xff]  ;;  %v8951_v31 = vld [vmem:[#allocation12 + $0x8e8] sm:$0xff] }
 0x705   : > { %12026 = vmatpush1.bf16.msra.mxu1 %v14851_v2  ;;  %11863 = vmatprep.subr.bf16.mxu0 %v14858_v60  ;;  %v8910_v2 = vld [vmem:[#allocation12 + $0x7a0] sm:$0xff]  ;;  %v8907_v60 = vld [vmem:[#allocation12 + $0x788] sm:$0xff] }
 0x706   : > { %12027 = vmatprep.subr.bf16.mxu1 %v14860_v39  ;;  %v8911_v39 = vld [vmem:[#allocation12 + $0x7a8] sm:$0xff]  ;;  %v14914_v0 = vcombine.high %v8906_v35, %v8910_v2  ;;  %v14913_v55 = vcombine.low %v8906_v35, %v8910_v2 }
 0x707   : > { %v14916_v52 = vcombine.high %v8907_v60, %v8911_v39  ;;  %v14915_v56 = vcombine.low %v8907_v60, %v8911_v39  ;;  %v8955_v35 = vld [vmem:[#allocation12 + $0x908] sm:$0xff]  ;;  %v14955_v39 = vcombine.low %v8947_v30, %v8951_v31 }
 0x708   : > { %11864 = vmatpush1.bf16.msra.mxu0 %v14857_v37  ;;  %v8914_v37 = vld [vmem:[#allocation12 + $0x7c0] sm:$0xff]  ;;  %v8959_v2 = vld [vmem:[#allocation12 + $0x928] sm:$0xff] }
 0x709   : > { %12028 = vmatpush1.bf16.msra.mxu1 %v14859_v33  ;;  %11865 = vmatprep.subr.bf16.mxu0 %v14866_v62  ;;  %v8918_v33 = vld [vmem:[#allocation12 + $0x7e0] sm:$0xff]  ;;  %v8915_v62 = vld [vmem:[#allocation12 + $0x7c8] sm:$0xff] }
 0x70a   : > { %12029 = vmatprep.subr.bf16.mxu1 %v14868_v54  ;;  %v8919_v54 = vld [vmem:[#allocation12 + $0x7e8] sm:$0xff]  ;;  %v14922_v40 = vcombine.high %v8914_v37, %v8918_v33  ;;  %v14921_v25 = vcombine.low %v8914_v37, %v8918_v33 }
 0x70b   : > { %v14924_v4 = vcombine.high %v8915_v62, %v8919_v54  ;;  %v14923_v36 = vcombine.low %v8915_v62, %v8919_v54  ;;  %v8963_v37 = vld [vmem:[#allocation12 + $0x948] sm:$0xff]  ;;  %v14963_v54 = vcombine.low %v8955_v35, %v8959_v2 }
 0x70c   : > { %11866 = vmatpush1.bf16.msra.mxu0 %v14865_v57  ;;  %v8922_v57 = vld [vmem:[#allocation12 + $0x800] sm:$0xff]  ;;  %v8967_v33 = vld [vmem:[#allocation12 + $0x968] sm:$0xff] }
 0x70d   : > { %12030 = vmatpush1.bf16.msra.mxu1 %v14867_v58  ;;  %11867 = vmatprep.subr.bf16.mxu0 %v14874_v43  ;;  %v8926_v58 = vld [vmem:[#allocation12 + $0x820] sm:$0xff]  ;;  %v8923_v43 = vld [vmem:[#allocation12 + $0x808] sm:$0xff] }
 0x70e   : > { %12031 = vmatprep.subr.bf16.mxu1 %v14876_v47  ;;  %v8927_v47 = vld [vmem:[#allocation12 + $0x828] sm:$0xff]  ;;  %v14930_v8 = vcombine.high %v8922_v57, %v8926_v58  ;;  %v14929_v50 = vcombine.low %v8922_v57, %v8926_v58 }
 0x70f   : > { %v14932_v61 = vcombine.high %v8923_v43, %v8927_v47  ;;  %v14931_v13 = vcombine.low %v8923_v43, %v8927_v47  ;;  %v8971_v57 = vld [vmem:[#allocation12 + $0x988] sm:$0xff]  ;;  %v14971_v47 = vcombine.low %v8963_v37, %v8967_v33 }
 0x710   : > { %11868 = vmatpush1.bf16.msra.mxu0 %v14873_v49  ;;  %v8930_v49 = vld [vmem:[#allocation12 + $0x840] sm:$0xff]  ;;  %v8975_v58 = vld [vmem:[#allocation12 + $0x9a8] sm:$0xff] }
 0x711   : > { %12032 = vmatpush1.bf16.msra.mxu1 %v14875_v63  ;;  %11869 = vmatprep.subr.bf16.mxu0 %v14882_v42  ;;  %v8934_v63 = vld [vmem:[#allocation12 + $0x860] sm:$0xff]  ;;  %v17742_v42 = vcombine.low %v17730_v41, %v17730_v41  ;;  %v8939_v41 = vld [vmem:[#allocation12 + $0x888] sm:$0xff] }
 0x712   : > { %12033 = vmatprep.subr.bf16.mxu1 %v14884_v3  ;;  %v8931_v3 = vld [vmem:[#allocation12 + $0x848] sm:$0xff]  ;;  %v14937_v18 = vcombine.low %v8930_v49, %v8934_v63  ;;  %v14947_v1 = vcombine.low %v8939_v41, %v8943_v46 }
 0x713   : > { %v14939_v19 = vcombine.low %v8931_v3, %v8935_v7 }
 0x714   : > { %11870 = vmatpush1.bf16.msra.mxu0 %v14881_v14  ;;  %v14938_v14 = vcombine.high %v8930_v49, %v8934_v63  ;;  %v8979_v49 = vld [vmem:[#allocation12 + $0x9c8] sm:$0xff] }
 0x715   : > { %12034 = vmatpush1.bf16.msra.mxu1 %v14883_v15  ;;  %11871 = vmatprep.subr.bf16.mxu0 %v14890_v16  ;;  %v14940_v15 = vcombine.high %v8931_v3, %v8935_v7  ;;  %v8938_v16 = vld [vmem:[#allocation12 + $0x880] sm:$0xff]  ;;  %v8983_v63 = vld [vmem:[#allocation12 + $0x9e8] sm:$0xff]  ;;  %v14979_v7 = vcombine.low %v8971_v57, %v8975_v58 }
 0x716   : > { %12035 = vmatprep.subr.bf16.mxu1 %v14892_v17  ;;  %v8942_v17 = vld [vmem:[#allocation12 + $0x8a0] sm:$0xff] }
 0x717   : > { %v14945_v32 = vcombine.low %v8938_v16, %v8942_v17 }
 0x718   : > { %11872 = vmatpush1.bf16.msra.mxu0 %v14889_v20  ;;  %v14946_v20 = vcombine.high %v8938_v16, %v8942_v17  ;;  %v8987_v16 = vld [vmem:[#allocation12 + $0xa08] sm:$0xff] }
 0x719   : > { %12036 = vmatpush1.bf16.msra.mxu1 %v14891_v21  ;;  %11873 = vmatprep.subr.bf16.mxu0 %v14898_v29  ;;  %v14948_v21 = vcombine.high %v8939_v41, %v8943_v46  ;;  %v8946_v29 = vld [vmem:[#allocation12 + $0x8c0] sm:$0xff]  ;;  %v8991_v17 = vld [vmem:[#allocation12 + $0xa28] sm:$0xff]  ;;  %v14987_v46 = vcombine.low %v8979_v49, %v8983_v63 }
 0x71a   : > { %12037 = vmatprep.subr.bf16.mxu1 %v14900_v59  ;;  %v8950_v59 = vld [vmem:[#allocation12 + $0x8e0] sm:$0xff] }
 0x71b   : > { %v14953_v60 = vcombine.low %v8946_v29, %v8950_v59 }
 0x71c   : > { %11874 = vmatpush1.bf16.msra.mxu0 %v14897_v38  ;;  %v14954_v38 = vcombine.high %v8946_v29, %v8950_v59  ;;  %v8995_v29 = vld [vmem:[#allocation12 + $0xa48] sm:$0xff] }
 0x71d   : > { %12038 = vmatpush1.bf16.msra.mxu1 %v14899_v48  ;;  %11875 = vmatprep.subr.bf16.mxu0 %v14906_v51  ;;  %v14956_v48 = vcombine.high %v8947_v30, %v8951_v31  ;;  %v8954_v51 = vld [vmem:[#allocation12 + $0x900] sm:$0xff]  ;;  %v8999_v59 = vld [vmem:[#allocation12 + $0xa68] sm:$0xff]  ;;  %v14995_v31 = vcombine.low %v8987_v16, %v8991_v17 }
 0x71e   : > { %12039 = vmatprep.subr.bf16.mxu1 %v14908_v34  ;;  %v8958_v34 = vld [vmem:[#allocation12 + $0x920] sm:$0xff] }
 0x71f   : > { %v14961_v62 = vcombine.low %v8954_v51, %v8958_v34 }
 0x720   : > { %11876 = vmatpush1.bf16.msra.mxu0 %v14905_v44  ;;  %v14962_v44 = vcombine.high %v8954_v51, %v8958_v34  ;;  %v9003_v51 = vld [vmem:[#allocation12 + $0xa88] sm:$0xff] }
 0x721   : > { %12040 = vmatpush1.bf16.msra.mxu1 %v14907_v45  ;;  %11877 = vmatprep.subr.bf16.mxu0 %v14914_v0  ;;  %v14964_v45 = vcombine.high %v8955_v35, %v8959_v2  ;;  %v8962_v0 = vld [vmem:[#allocation12 + $0x940] sm:$0xff]  ;;  %v9007_v34 = vld [vmem:[#allocation12 + $0xaa8] sm:$0xff]  ;;  %v15003_v2 = vcombine.low %v8995_v29, %v8999_v59 }
 0x722   : > { %12041 = vmatprep.subr.bf16.mxu1 %v14916_v52  ;;  %v8966_v52 = vld [vmem:[#allocation12 + $0x960] sm:$0xff] }
 0x723   : > { %v14969_v43 = vcombine.low %v8962_v0, %v8966_v52 }
 0x724   : > { %11878 = vmatpush1.bf16.msra.mxu0 %v14913_v55  ;;  %v14970_v55 = vcombine.high %v8962_v0, %v8966_v52  ;;  %v9011_v0 = vld [vmem:[#allocation12 + $0xac8] sm:$0xff] }
 0x725   : > { %12042 = vmatpush1.bf16.msra.mxu1 %v14915_v56  ;;  %11879 = vmatprep.subr.bf16.mxu0 %v14922_v40  ;;  %v14972_v56 = vcombine.high %v8963_v37, %v8967_v33  ;;  %v8970_v40 = vld [vmem:[#allocation12 + $0x980] sm:$0xff]  ;;  %v9015_v52 = vld [vmem:[#allocation12 + $0xae8] sm:$0xff]  ;;  %v15011_v33 = vcombine.low %v9003_v51, %v9007_v34 }
 0x726   : > { %12043 = vmatprep.subr.bf16.mxu1 %v14924_v4  ;;  %v8974_v4 = vld [vmem:[#allocation12 + $0x9a0] sm:$0xff] }
 0x727   : > { %v14977_v3 = vcombine.low %v8970_v40, %v8974_v4 }
 0x728   : > { %11880 = vmatpush1.bf16.msra.mxu0 %v14921_v25  ;;  %v14978_v25 = vcombine.high %v8970_v40, %v8974_v4  ;;  %v9019_v40 = vld [vmem:[#allocation12 + $0xb08] sm:$0xff] }
 0x729   : > { %12044 = vmatpush1.bf16.msra.mxu1 %v14923_v36  ;;  %11890 = vmatprep.subr.bf16.mxu0 %v14930_v8  ;;  %v14980_v36 = vcombine.high %v8971_v57, %v8975_v58  ;;  %v8978_v8 = vld [vmem:[#allocation12 + $0x9c0] sm:$0xff]  ;;  %v9023_v4 = vld [vmem:[#allocation12 + $0xb28] sm:$0xff]  ;;  %v15019_v58 = vcombine.low %v9011_v0, %v9015_v52 }
 0x72a   : > { %12054 = vmatprep.subr.bf16.mxu1 %v14932_v61  ;;  %v8982_v61 = vld [vmem:[#allocation12 + $0x9e0] sm:$0xff] }
 0x72b   : > { %11882 = vmatmul.mubr.bf16.vlgmr.msra.gmra.mrb[0].mxu0 %v17742_v42  ;;  %v14985_v41 = vcombine.low %v8978_v8, %v8982_v61 }
 0x72c   : > { %11891 = vmatpush1.bf16.msra.mxu0 %v14929_v50  ;;  %12046 = vmatmul.mubr.bf16.vlgmr.msra.gmra.mrb[0].mxu1 %v17742_v42  ;;  %v14986_v50 = vcombine.high %v8978_v8, %v8982_v61  ;;  %v9027_v8 = vld [vmem:[#allocation12 + $0xb48] sm:$0xff] }
 0x72d   : > { %12055 = vmatpush1.bf16.msra.mxu1 %v14931_v13  ;;  %11892 = vmatprep.subr.bf16.mxu0 %v14938_v14  ;;  %v14988_v13 = vcombine.high %v8979_v49, %v8983_v63  ;;  %v8986_v14 = vld [vmem:[#allocation12 + $0xa00] sm:$0xff]  ;;  %v9031_v61 = vld [vmem:[#allocation12 + $0xb68] sm:$0xff]  ;;  %v15027_v63 = vcombine.low %v9019_v40, %v9023_v4 }
 0x72e   : > { %12056 = vmatprep.subr.bf16.mxu1 %v14940_v15  ;;  %11922 = vmatprep.mubr.bf16.mxu0 %v17748_v23  ;;  %v8990_v15 = vld [vmem:[#allocation12 + $0xa20] sm:$0xff] }
 0x72f   : > { %12086 = vmatprep.mubr.bf16.mxu1 %v17748_v23  ;;  %v14993_v30 = vcombine.low %v8986_v14, %v8990_v15 }
 0x730   : > { %11893 = vmatpush1.bf16.msra.mxu0 %v14937_v18  ;;  %v14994_v18 = vcombine.high %v8986_v14, %v8990_v15  ;;  %v9035_v14 = vld [vmem:[#allocation12 + $0xb88] sm:$0xff] }
 0x731   : > { %12057 = vmatpush1.bf16.msra.mxu1 %v14939_v19  ;;  %11894 = vmatprep.subr.bf16.mxu0 %v14946_v20  ;;  %v14996_v19 = vcombine.high %v8987_v16, %v8991_v17  ;;  %v8994_v20 = vld [vmem:[#allocation12 + $0xa40] sm:$0xff]  ;;  %v9039_v15 = vld [vmem:[#allocation12 + $0xba8] sm:$0xff]  ;;  %v15035_v17 = vcombine.low %v9027_v8, %v9031_v61 }
 0x732   : > { %12058 = vmatprep.subr.bf16.mxu1 %v14948_v21  ;;  %v8998_v21 = vld [vmem:[#allocation12 + $0xa60] sm:$0xff] }
 0x733   : > { %v15001_v35 = vcombine.low %v8994_v20, %v8998_v21 }
 0x734   : > { %11895 = vmatpush1.bf16.msra.mxu0 %v14945_v32  ;;  %v15002_v32 = vcombine.high %v8994_v20, %v8998_v21  ;;  %v9043_v20 = vld [vmem:[#allocation12 + $0xbc8] sm:$0xff] }
 0x735   : > { %12059 = vmatpush1.bf16.msra.mxu1 %v14947_v1  ;;  %11896 = vmatprep.subr.bf16.mxu0 %v14954_v38  ;;  %v15004_v1 = vcombine.high %v8995_v29, %v8999_v59  ;;  %v9002_v38 = vld [vmem:[#allocation12 + $0xa80] sm:$0xff]  ;;  %v9047_v21 = vld [vmem:[#allocation12 + $0xbe8] sm:$0xff]  ;;  %v15043_v59 = vcombine.low %v9035_v14, %v9039_v15 }
 0x736   : > { %12060 = vmatprep.subr.bf16.mxu1 %v14956_v48  ;;  %v9006_v48 = vld [vmem:[#allocation12 + $0xaa0] sm:$0xff] }
 0x737   : > { %v15009_v37 = vcombine.low %v9002_v38, %v9006_v48 }
 0x738   : > { %11897 = vmatpush1.bf16.msra.mxu0 %v14953_v60  ;;  %v15010_v60 = vcombine.high %v9002_v38, %v9006_v48  ;;  %v9051_v38 = vld [vmem:[#allocation12 + $0xc08] sm:$0xff] }
 0x739   : > { %12061 = vmatpush1.bf16.msra.mxu1 %v14955_v39  ;;  %11898 = vmatprep.subr.bf16.mxu0 %v14962_v44  ;;  %v15012_v39 = vcombine.high %v9003_v51, %v9007_v34  ;;  %v9010_v44 = vld [vmem:[#allocation12 + $0xac0] sm:$0xff]  ;;  %v9055_v48 = vld [vmem:[#allocation12 + $0xc28] sm:$0xff]  ;;  %v15051_v34 = vcombine.low %v9043_v20, %v9047_v21 }
 0x73a   : > { %12062 = vmatprep.subr.bf16.mxu1 %v14964_v45  ;;  %v9014_v45 = vld [vmem:[#allocation12 + $0xae0] sm:$0xff] }
 0x73b   : > { %v15017_v57 = vcombine.low %v9010_v44, %v9014_v45 }
 0x73c   : > { %11899 = vmatpush1.bf16.msra.mxu0 %v14961_v62  ;;  %v15018_v62 = vcombine.high %v9010_v44, %v9014_v45  ;;  %v17756_v44 = vcombine.low %v17744_v9, %v17744_v9  ;;  %v9059_v45 = vld [vmem:[#allocation12 + $0xc48] sm:$0xff] }
 0x73d   : > { %12063 = vmatpush1.bf16.msra.mxu1 %v14963_v54  ;;  %11900 = vmatprep.subr.bf16.mxu0 %v14970_v55  ;;  %v15020_v54 = vcombine.high %v9011_v0, %v9015_v52  ;;  %v9018_v55 = vld [vmem:[#allocation12 + $0xb00] sm:$0xff]  ;;  %v9063_v0 = vld [vmem:[#allocation12 + $0xc68] sm:$0xff]  ;;  %v17758_v52 = vld [vmem:[#allocation2 + $0x18] sm:$0xff] }
 0x73e   : > { %12064 = vmatprep.subr.bf16.mxu1 %v14972_v56  ;;  %v9022_v56 = vld [vmem:[#allocation12 + $0xb20] sm:$0xff]  ;;  %v9067_v9 = vld [vmem:[#allocation12 + $0xc88] sm:$0xff] }
 0x73f   : > { %v15025_v49 = vcombine.low %v9018_v55, %v9022_v56 }
 0x740   : > { %11901 = vmatpush1.bf16.msra.mxu0 %v14969_v43  ;;  %v15026_v43 = vcombine.high %v9018_v55, %v9022_v56  ;;  %v9066_v55 = vld [vmem:[#allocation12 + $0xc80] sm:$0xff] }
 0x741   : > { %12065 = vmatpush1.bf16.msra.mxu1 %v14971_v47  ;;  %11902 = vmatprep.subr.bf16.mxu0 %v14978_v25  ;;  %v15028_v47 = vcombine.high %v9019_v40, %v9023_v4  ;;  %v9026_v25 = vld [vmem:[#allocation12 + $0xb40] sm:$0xff]  ;;  %v17762_v40 = vcombine.high %v17758_v52, %v17758_v52  ;;  %v9071_v4 = vld [vmem:[#allocation12 + $0xca8] sm:$0xff] }
 0x742   : > { %12066 = vmatprep.subr.bf16.mxu1 %v14980_v36  ;;  %v9030_v36 = vld [vmem:[#allocation12 + $0xb60] sm:$0xff] }
 0x743   : > { %v15033_v16 = vcombine.low %v9026_v25, %v9030_v36  ;;  %v9070_v56 = vld [vmem:[#allocation12 + $0xca0] sm:$0xff] }
 0x744   : > { %11903 = vmatpush1.bf16.msra.mxu0 %v14977_v3  ;;  %v15034_v3 = vcombine.high %v9026_v25, %v9030_v36  ;;  %v9074_v25 = vld [vmem:[#allocation12 + $0xcc0] sm:$0xff] }
 0x745   : > { %12067 = vmatpush1.bf16.msra.mxu1 %v14979_v7  ;;  %11904 = vmatprep.subr.bf16.mxu0 %v14986_v50  ;;  %v15036_v7 = vcombine.high %v9027_v8, %v9031_v61  ;;  %v9034_v50 = vld [vmem:[#allocation12 + $0xb80] sm:$0xff]  ;;  %v9075_v8 = vld [vmem:[#allocation12 + $0xcc8] sm:$0xff] }
 0x746   : > { %12068 = vmatprep.subr.bf16.mxu1 %v14988_v13  ;;  %v9038_v13 = vld [vmem:[#allocation12 + $0xba0] sm:$0xff]  ;;  %v9079_v61 = vld [vmem:[#allocation12 + $0xce8] sm:$0xff] }
 0x747   : > { %v15041_v29 = vcombine.low %v9034_v50, %v9038_v13  ;;  %v9078_v36 = vld [vmem:[#allocation12 + $0xce0] sm:$0xff] }
 0x748   : > { %11905 = vmatpush1.bf16.msra.mxu0 %v14985_v41  ;;  %v15042_v41 = vcombine.high %v9034_v50, %v9038_v13  ;;  %v9082_v50 = vld [vmem:[#allocation12 + $0xd00] sm:$0xff] }
 0x749   : > { %12069 = vmatpush1.bf16.msra.mxu1 %v14987_v46  ;;  %11906 = vmatprep.subr.bf16.mxu0 %v14994_v18  ;;  %v15044_v46 = vcombine.high %v9035_v14, %v9039_v15  ;;  %v9042_v18 = vld [vmem:[#allocation12 + $0xbc0] sm:$0xff]  ;;  %v9083_v14 = vld [vmem:[#allocation12 + $0xd08] sm:$0xff] }
 0x74a   : > { %12070 = vmatprep.subr.bf16.mxu1 %v14996_v19  ;;  %v9046_v19 = vld [vmem:[#allocation12 + $0xbe0] sm:$0xff]  ;;  %v9087_v15 = vld [vmem:[#allocation12 + $0xd28] sm:$0xff] }
 0x74b   : > { %v15049_v51 = vcombine.low %v9042_v18, %v9046_v19  ;;  %v9086_v13 = vld [vmem:[#allocation12 + $0xd20] sm:$0xff] }
 0x74c   : > { %11907 = vmatpush1.bf16.msra.mxu0 %v14993_v30  ;;  %v15050_v30 = vcombine.high %v9042_v18, %v9046_v19  ;;  %v9090_v18 = vld [vmem:[#allocation12 + $0xd40] sm:$0xff] }
 0x74d   : > { %12071 = vmatpush1.bf16.msra.mxu1 %v14995_v31  ;;  %11908 = vmatprep.subr.bf16.mxu0 %v15002_v32  ;;  %v15052_v31 = vcombine.high %v9043_v20, %v9047_v21  ;;  %v9050_v32 = vld [vmem:[#allocation12 + $0xc00] sm:$0xff]  ;;  %v9091_v20 = vld [vmem:[#allocation12 + $0xd48] sm:$0xff] }
 0x74e   : > { %12072 = vmatprep.subr.bf16.mxu1 %v15004_v1  ;;  %v9054_v1 = vld [vmem:[#allocation12 + $0xc20] sm:$0xff]  ;;  %v9095_v21 = vld [vmem:[#allocation12 + $0xd68] sm:$0xff] }
 0x74f   : > { %v9094_v19 = vld [vmem:[#allocation12 + $0xd60] sm:$0xff] }
 0x750   : > { %11909 = vmatpush1.bf16.msra.mxu0 %v15001_v35  ;;  %v15058_v35 = vcombine.high %v9050_v32, %v9054_v1 }
 0x751   : > { %12073 = vmatpush1.bf16.msra.mxu1 %v15003_v2  ;;  %11910 = vmatprep.subr.bf16.mxu0 %v15010_v60  ;;  %v15060_v2 = vcombine.high %v9051_v38, %v9055_v48  ;;  %v9058_v60 = vld [vmem:[#allocation12 + $0xc40] sm:$0xff] }
 0x752   : > { %12074 = vmatprep.subr.bf16.mxu1 %v15012_v39  ;;  %v9062_v39 = vld [vmem:[#allocation12 + $0xc60] sm:$0xff] }
 0x754   : > { %11911 = vmatpush1.bf16.msra.mxu0 %v15009_v37  ;;  %v15057_v37 = vcombine.low %v9050_v32, %v9054_v1  ;;  %v9098_v32 = vld [vmem:[#allocation12 + $0xd80] sm:$0xff] }
 0x755   : > { %12075 = vmatpush1.bf16.msra.mxu1 %v15011_v33  ;;  %11912 = vmatprep.subr.bf16.mxu0 %v15018_v62  ;;  %v15059_v33 = vcombine.low %v9051_v38, %v9055_v48  ;;  %v15066_v62 = vcombine.high %v9058_v60, %v9062_v39  ;;  %v9102_v1 = vld [vmem:[#allocation12 + $0xda0] sm:$0xff]  ;;  %v9099_v38 = vld [vmem:[#allocation12 + $0xd88] sm:$0xff] }
 0x756   : > { %12076 = vmatprep.subr.bf16.mxu1 %v15020_v54  ;;  %v15068_v54 = vcombine.high %v9059_v45, %v9063_v0  ;;  %v9103_v48 = vld [vmem:[#allocation12 + $0xda8] sm:$0xff] }
 0x758   : > { %11913 = vmatpush1.bf16.msra.mxu0 %v15017_v57  ;;  %v15065_v57 = vcombine.low %v9058_v60, %v9062_v39  ;;  %v9106_v60 = vld [vmem:[#allocation12 + $0xdc0] sm:$0xff] }
 0x759   : > { %12077 = vmatpush1.bf16.msra.mxu1 %v15019_v58  ;;  %11914 = vmatprep.subr.bf16.mxu0 %v15026_v43  ;;  %v15067_v58 = vcombine.low %v9059_v45, %v9063_v0  ;;  %v15074_v43 = vcombine.high %v9066_v55, %v9070_v56  ;;  %v9110_v39 = vld [vmem:[#allocation12 + $0xde0] sm:$0xff]  ;;  %v9107_v45 = vld [vmem:[#allocation12 + $0xdc8] sm:$0xff] }
 0x75a   : > { %12078 = vmatprep.subr.bf16.mxu1 %v15028_v47  ;;  %v15076_v47 = vcombine.high %v9067_v9, %v9071_v4  ;;  %v9111_v0 = vld [vmem:[#allocation12 + $0xde8] sm:$0xff] }
 0x75c   : > { %11915 = vmatpush1.bf16.msra.mxu0 %v15025_v49  ;;  %v15073_v49 = vcombine.low %v9066_v55, %v9070_v56  ;;  %v9114_v55 = vld [vmem:[#allocation12 + $0xe00] sm:$0xff] }
 0x75d   : > { %12079 = vmatpush1.bf16.msra.mxu1 %v15027_v63  ;;  %11916 = vmatprep.subr.bf16.mxu0 %v15034_v3  ;;  %v15075_v63 = vcombine.low %v9067_v9, %v9071_v4  ;;  %v15082_v3 = vcombine.high %v9074_v25, %v9078_v36  ;;  %v9118_v56 = vld [vmem:[#allocation12 + $0xe20] sm:$0xff]  ;;  %v9115_v9 = vld [vmem:[#allocation12 + $0xe08] sm:$0xff] }
 0x75e   : > { %12080 = vmatprep.subr.bf16.mxu1 %v15036_v7  ;;  %v15084_v7 = vcombine.high %v9075_v8, %v9079_v61  ;;  %v9119_v4 = vld [vmem:[#allocation12 + $0xe28] sm:$0xff] }
 0x760   : > { %11917 = vmatpush1.bf16.msra.mxu0 %v15033_v16  ;;  %v15081_v16 = vcombine.low %v9074_v25, %v9078_v36  ;;  %v9122_v25 = vld [vmem:[#allocation12 + $0xe40] sm:$0xff] }
 0x761   : > { %12081 = vmatpush1.bf16.msra.mxu1 %v15035_v17  ;;  %11918 = vmatprep.subr.bf16.mxu0 %v15042_v41  ;;  %v15083_v17 = vcombine.low %v9075_v8, %v9079_v61  ;;  %v15090_v41 = vcombine.high %v9082_v50, %v9086_v13  ;;  %v9126_v36 = vld [vmem:[#allocation12 + $0xe60] sm:$0xff]  ;;  %v9123_v8 = vld [vmem:[#allocation12 + $0xe48] sm:$0xff] }
 0x762   : > { %12082 = vmatprep.subr.bf16.mxu1 %v15044_v46  ;;  %v15092_v46 = vcombine.high %v9083_v14, %v9087_v15  ;;  %v9127_v61 = vld [vmem:[#allocation12 + $0xe68] sm:$0xff] }
 0x764   : > { %11919 = vmatpush1.bf16.msra.mxu0 %v15041_v29  ;;  %v15089_v29 = vcombine.low %v9082_v50, %v9086_v13  ;;  %v9130_v50 = vld [vmem:[#allocation12 + $0xe80] sm:$0xff] }
 0x765   : > { %12083 = vmatpush1.bf16.msra.mxu1 %v15043_v59  ;;  %11920 = vmatprep.subr.bf16.mxu0 %v15050_v30  ;;  %v15091_v59 = vcombine.low %v9083_v14, %v9087_v15  ;;  %v15098_v30 = vcombine.high %v9090_v18, %v9094_v19  ;;  %v9134_v13 = vld [vmem:[#allocation12 + $0xea0] sm:$0xff]  ;;  %v9131_v14 = vld [vmem:[#allocation12 + $0xe88] sm:$0xff] }
 0x766   : > { %12084 = vmatprep.subr.bf16.mxu1 %v15052_v31  ;;  %v15100_v31 = vcombine.high %v9091_v20, %v9095_v21  ;;  %v9135_v15 = vld [vmem:[#allocation12 + $0xea8] sm:$0xff] }
 0x768   : > { %11921 = vmatpush1.bf16.msra.mxu0 %v15049_v51  ;;  %v15097_v51 = vcombine.low %v9090_v18, %v9094_v19  ;;  %v9138_v18 = vld [vmem:[#allocation12 + $0xec0] sm:$0xff] }
 0x769   : > { %12085 = vmatpush1.bf16.msra.mxu1 %v15051_v34  ;;  %11931 = vmatprep.subr.bf16.mxu0 %v15058_v35  ;;  %v15099_v34 = vcombine.low %v9091_v20, %v9095_v21  ;;  %v15106_v35 = vcombine.high %v9098_v32, %v9102_v1  ;;  %v9142_v19 = vld [vmem:[#allocation12 + $0xee0] sm:$0xff]  ;;  %v9139_v20 = vld [vmem:[#allocation12 + $0xec8] sm:$0xff] }
 0x76a   : > { %12095 = vmatprep.subr.bf16.mxu1 %v15060_v2  ;;  %v15108_v2 = vcombine.high %v9099_v38, %v9103_v48  ;;  %v9143_v21 = vld [vmem:[#allocation12 + $0xee8] sm:$0xff] }
 0x76b   : > { %11923 = vmatmul.mubr.bf16.vlgmr.msra.gmra.mrb[0].mxu0 %v17756_v44 }
 0x76c   : > { %11932 = vmatpush1.bf16.msra.mxu0 %v15057_v37  ;;  %12087 = vmatmul.mubr.bf16.vlgmr.msra.gmra.mrb[0].mxu1 %v17756_v44  ;;  %v15105_v37 = vcombine.low %v9098_v32, %v9102_v1  ;;  %v9146_v32 = vld [vmem:[#allocation12 + $0xf00] sm:$0xff] }
 0x76d   : > { %12096 = vmatpush1.bf16.msra.mxu1 %v15059_v33  ;;  %11933 = vmatprep.subr.bf16.mxu0 %v15066_v62  ;;  %v15107_v33 = vcombine.low %v9099_v38, %v9103_v48  ;;  %v15114_v62 = vcombine.high %v9106_v60, %v9110_v39  ;;  %v9150_v1 = vld [vmem:[#allocation12 + $0xf20] sm:$0xff]  ;;  %v9147_v38 = vld [vmem:[#allocation12 + $0xf08] sm:$0xff] }
 0x76e   : > { %12097 = vmatprep.subr.bf16.mxu1 %v15068_v54  ;;  %11963 = vmatprep.mubr.bf16.mxu0 %v17762_v40  ;;  %v15116_v54 = vcombine.high %v9107_v45, %v9111_v0  ;;  %v9151_v48 = vld [vmem:[#allocation12 + $0xf28] sm:$0xff] }
 0x76f   : > { %12127 = vmatprep.mubr.bf16.mxu1 %v17762_v40 }
 0x770   : > { %11934 = vmatpush1.bf16.msra.mxu0 %v15065_v57  ;;  %v15113_v57 = vcombine.low %v9106_v60, %v9110_v39  ;;  %v9154_v60 = vld [vmem:[#allocation12 + $0xf40] sm:$0xff] }
 0x771   : > { %12098 = vmatpush1.bf16.msra.mxu1 %v15067_v58  ;;  %11935 = vmatprep.subr.bf16.mxu0 %v15074_v43  ;;  %v15115_v58 = vcombine.low %v9107_v45, %v9111_v0  ;;  %v15122_v43 = vcombine.high %v9114_v55, %v9118_v56  ;;  %v9158_v39 = vld [vmem:[#allocation12 + $0xf60] sm:$0xff]  ;;  %v9155_v45 = vld [vmem:[#allocation12 + $0xf48] sm:$0xff] }
 0x772   : > { %12099 = vmatprep.subr.bf16.mxu1 %v15076_v47  ;;  %v15124_v47 = vcombine.high %v9115_v9, %v9119_v4  ;;  %v9159_v0 = vld [vmem:[#allocation12 + $0xf68] sm:$0xff] }
 0x774   : > { %11936 = vmatpush1.bf16.msra.mxu0 %v15073_v49  ;;  %v15121_v49 = vcombine.low %v9114_v55, %v9118_v56  ;;  %v9162_v55 = vld [vmem:[#allocation12 + $0xf80] sm:$0xff] }
 0x775   : > { %12100 = vmatpush1.bf16.msra.mxu1 %v15075_v63  ;;  %11937 = vmatprep.subr.bf16.mxu0 %v15082_v3  ;;  %v15123_v63 = vcombine.low %v9115_v9, %v9119_v4  ;;  %v15130_v3 = vcombine.high %v9122_v25, %v9126_v36  ;;  %v9166_v56 = vld [vmem:[#allocation12 + $0xfa0] sm:$0xff]  ;;  %v9163_v9 = vld [vmem:[#allocation12 + $0xf88] sm:$0xff] }
 0x776   : > { %12101 = vmatprep.subr.bf16.mxu1 %v15084_v7  ;;  %v15132_v7 = vcombine.high %v9123_v8, %v9127_v61  ;;  %v9167_v4 = vld [vmem:[#allocation12 + $0xfa8] sm:$0xff] }
 0x778   : > { %11938 = vmatpush1.bf16.msra.mxu0 %v15081_v16  ;;  %v15129_v16 = vcombine.low %v9122_v25, %v9126_v36  ;;  %v9170_v25 = vld [vmem:[#allocation12 + $0xfc0] sm:$0xff] }
 0x779   : > { %12102 = vmatpush1.bf16.msra.mxu1 %v15083_v17  ;;  %11939 = vmatprep.subr.bf16.mxu0 %v15090_v41  ;;  %v15131_v17 = vcombine.low %v9123_v8, %v9127_v61  ;;  %v15138_v41 = vcombine.high %v9130_v50, %v9134_v13  ;;  %v9174_v36 = vld [vmem:[#allocation12 + $0xfe0] sm:$0xff]  ;;  %v9171_v8 = vld [vmem:[#allocation12 + $0xfc8] sm:$0xff] }
 0x77a   : > { %12103 = vmatprep.subr.bf16.mxu1 %v15092_v46  ;;  %v15140_v46 = vcombine.high %v9131_v14, %v9135_v15  ;;  %v9175_v61 = vld [vmem:[#allocation12 + $0xfe8] sm:$0xff] }
 0x77c   : > { %11940 = vmatpush1.bf16.msra.mxu0 %v15089_v29  ;;  %v15137_v29 = vcombine.low %v9130_v50, %v9134_v13  ;;  %v8668_v50 = vld [vmem:[#allocation12 + $0x10] sm:$0xff] }
 0x77d   : > { %12104 = vmatpush1.bf16.msra.mxu1 %v15091_v59  ;;  %11941 = vmatprep.subr.bf16.mxu0 %v15098_v30  ;;  %v15139_v59 = vcombine.low %v9131_v14, %v9135_v15  ;;  %v15146_v30 = vcombine.high %v9138_v18, %v9142_v19  ;;  %v8672_v13 = vld [vmem:[#allocation12 + $0x30] sm:$0xff]  ;;  %v8669_v14 = vld [vmem:[#allocation12 + $0x18] sm:$0xff] }
 0x77e   : > { %12105 = vmatprep.subr.bf16.mxu1 %v15100_v31  ;;  %v15148_v31 = vcombine.high %v9139_v20, %v9143_v21  ;;  %v8673_v15 = vld [vmem:[#allocation12 + $0x38] sm:$0xff] }
 0x780   : > { %11942 = vmatpush1.bf16.msra.mxu0 %v15097_v51  ;;  %v15145_v51 = vcombine.low %v9138_v18, %v9142_v19  ;;  %v8676_v18 = vld [vmem:[#allocation12 + $0x50] sm:$0xff] }
 0x781   : > { %12106 = vmatpush1.bf16.msra.mxu1 %v15099_v34  ;;  %11943 = vmatprep.subr.bf16.mxu0 %v15106_v35  ;;  %v15147_v34 = vcombine.low %v9139_v20, %v9143_v21  ;;  %v15154_v35 = vcombine.high %v9146_v32, %v9150_v1  ;;  %v8680_v19 = vld [vmem:[#allocation12 + $0x70] sm:$0xff]  ;;  %v17770_v20 = vcombine.low %v17758_v52, %v17758_v52  ;;  %v8677_v21 = vld [vmem:[#allocation12 + $0x58] sm:$0xff] }
 0x782   : > { %12107 = vmatprep.subr.bf16.mxu1 %v15108_v2  ;;  %v15156_v2 = vcombine.high %v9147_v38, %v9151_v48  ;;  %v14685_v52 = vcombine.low %v8676_v18, %v8680_v19 }
 0x784   : > { %11944 = vmatpush1.bf16.msra.mxu0 %v15105_v37  ;;  %v15153_v37 = vcombine.low %v9146_v32, %v9150_v1  ;;  %v8684_v1 = vld [vmem:[#allocation12 + $0x90] sm:$0xff] }
 0x785   : > { %12108 = vmatpush1.bf16.msra.mxu1 %v15107_v33  ;;  %11945 = vmatprep.subr.bf16.mxu0 %v15114_v62  ;;  %v15155_v33 = vcombine.low %v9147_v38, %v9151_v48  ;;  %v15162_v62 = vcombine.high %v9154_v60, %v9158_v39  ;;  %v8688_v38 = vld [vmem:[#allocation12 + $0xb0] sm:$0xff]  ;;  %v8685_v48 = vld [vmem:[#allocation12 + $0x98] sm:$0xff] }
 0x786   : > { %12109 = vmatprep.subr.bf16.mxu1 %v15116_v54  ;;  %v15164_v54 = vcombine.high %v9155_v45, %v9159_v0 }
 0x788   : > { %11946 = vmatpush1.bf16.msra.mxu0 %v15113_v57  ;;  %v15161_v57 = vcombine.low %v9154_v60, %v9158_v39  ;;  %v8692_v60 = vld [vmem:[#allocation12 + $0xd0] sm:$0xff] }
 0x789   : > { %12110 = vmatpush1.bf16.msra.mxu1 %v15115_v58  ;;  %11947 = vmatprep.subr.bf16.mxu0 %v15122_v43  ;;  %v15163_v58 = vcombine.low %v9155_v45, %v9159_v0  ;;  %v15170_v43 = vcombine.high %v9162_v55, %v9166_v56  ;;  %v8696_v39 = vld [vmem:[#allocation12 + $0xf0] sm:$0xff]  ;;  %v8693_v45 = vld [vmem:[#allocation12 + $0xd8] sm:$0xff] }
 0x78a   : > { %12111 = vmatprep.subr.bf16.mxu1 %v15124_v47  ;;  %v15172_v47 = vcombine.high %v9163_v9, %v9167_v4  ;;  %v8697_v0 = vld [vmem:[#allocation12 + $0xf8] sm:$0xff] }
 0x78c   : > { %11948 = vmatpush1.bf16.msra.mxu0 %v15121_v49  ;;  %v15169_v49 = vcombine.low %v9162_v55, %v9166_v56  ;;  %v8700_v55 = vld [vmem:[#allocation12 + $0x110] sm:$0xff] }
 0x78d   : > { %12112 = vmatpush1.bf16.msra.mxu1 %v15123_v63  ;;  %11949 = vmatprep.subr.bf16.mxu0 %v15130_v3  ;;  %v15171_v63 = vcombine.low %v9163_v9, %v9167_v4  ;;  %v15178_v3 = vcombine.high %v9170_v25, %v9174_v36  ;;  %v8704_v56 = vld [vmem:[#allocation12 + $0x130] sm:$0xff]  ;;  %v8701_v9 = vld [vmem:[#allocation12 + $0x118] sm:$0xff] }
 0x78e   : > { %12113 = vmatprep.subr.bf16.mxu1 %v15132_v7  ;;  %v15180_v7 = vcombine.high %v9171_v8, %v9175_v61  ;;  %v8705_v4 = vld [vmem:[#allocation12 + $0x138] sm:$0xff] }
 0x790   : > { %11950 = vmatpush1.bf16.msra.mxu0 %v15129_v16  ;;  %v15177_v16 = vcombine.low %v9170_v25, %v9174_v36  ;;  %v8712_v25 = vld [vmem:[#allocation12 + $0x170] sm:$0xff]  ;;  %v8709_v36 = vld [vmem:[#allocation12 + $0x158] sm:$0xff] }
 0x791   : > { %12114 = vmatpush1.bf16.msra.mxu1 %v15131_v17  ;;  %11951 = vmatprep.subr.bf16.mxu0 %v15138_v41  ;;  %v15179_v17 = vcombine.low %v9171_v8, %v9175_v61  ;;  %v14678_v41 = vcombine.high %v8668_v50, %v8672_v13  ;;  %v8713_v8 = vld [vmem:[#allocation12 + $0x178] sm:$0xff]  ;;  %v14709_v61 = vcombine.low %v8700_v55, %v8704_v56 }
 0x792   : > { %12115 = vmatprep.subr.bf16.mxu1 %v15140_v46  ;;  %v14680_v46 = vcombine.high %v8669_v14, %v8673_v15 }
 0x794   : > { %11952 = vmatpush1.bf16.msra.mxu0 %v15137_v29  ;;  %v8681_v29 = vld [vmem:[#allocation12 + $0x78] sm:$0xff] }
 0x795   : > { %12116 = vmatpush1.bf16.msra.mxu1 %v15139_v59  ;;  %11953 = vmatprep.subr.bf16.mxu0 %v15146_v30  ;;  %v14677_v59 = vcombine.low %v8668_v50, %v8672_v13  ;;  %v14679_v30 = vcombine.low %v8669_v14, %v8673_v15  ;;  %v14688_v32 = vcombine.high %v8677_v21, %v8681_v29  ;;  %v8720_v50 = vld [vmem:[#allocation12 + $0x1b0] sm:$0xff]  ;;  %v8717_v13 = vld [vmem:[#allocation12 + $0x198] sm:$0xff] }
 0x796   : > { %12117 = vmatprep.subr.bf16.mxu1 %v15148_v31  ;;  %v14686_v31 = vcombine.high %v8676_v18, %v8680_v19  ;;  %v8721_v14 = vld [vmem:[#allocation12 + $0x1b8] sm:$0xff]  ;;  %v8728_v18 = vld [vmem:[#allocation12 + $0x1f0] sm:$0xff] }
 0x797   : > { %v8725_v19 = vld [vmem:[#allocation12 + $0x1d8] sm:$0xff] }
 0x798   : > { %11954 = vmatpush1.bf16.msra.mxu0 %v15145_v51  ;;  %v8689_v51 = vld [vmem:[#allocation12 + $0xb8] sm:$0xff] }
 0x799   : > { %12118 = vmatpush1.bf16.msra.mxu1 %v15147_v34  ;;  %11955 = vmatprep.subr.bf16.mxu0 %v15154_v35  ;;  %v14687_v34 = vcombine.low %v8677_v21, %v8681_v29  ;;  %v14694_v35 = vcombine.high %v8684_v1, %v8688_v38  ;;  %v8729_v21 = vld [vmem:[#allocation12 + $0x1f8] sm:$0xff] }
 0x79a   : > { %12119 = vmatprep.subr.bf16.mxu1 %v15156_v2  ;;  %v14696_v2 = vcombine.high %v8685_v48, %v8689_v51 }
 0x79c   : > { %11956 = vmatpush1.bf16.msra.mxu0 %v15153_v37  ;;  %v14693_v37 = vcombine.low %v8684_v1, %v8688_v38  ;;  %v8736_v1 = vld [vmem:[#allocation12 + $0x230] sm:$0xff]  ;;  %v8733_v38 = vld [vmem:[#allocation12 + $0x218] sm:$0xff] }
 0x79d   : > { %12120 = vmatpush1.bf16.msra.mxu1 %v15155_v33  ;;  %11957 = vmatprep.subr.bf16.mxu0 %v15162_v62  ;;  %v14695_v33 = vcombine.low %v8685_v48, %v8689_v51  ;;  %v14702_v62 = vcombine.high %v8692_v60, %v8696_v39  ;;  %v8737_v48 = vld [vmem:[#allocation12 + $0x238] sm:$0xff] }
 0x79e   : > { %12121 = vmatprep.subr.bf16.mxu1 %v15164_v54  ;;  %v14704_v54 = vcombine.high %v8693_v45, %v8697_v0 }
 0x7a0   : > { %11958 = vmatpush1.bf16.msra.mxu0 %v15161_v57  ;;  %v14701_v57 = vcombine.low %v8692_v60, %v8696_v39  ;;  %v8744_v60 = vld [vmem:[#allocation12 + $0x270] sm:$0xff]  ;;  %v8741_v39 = vld [vmem:[#allocation12 + $0x258] sm:$0xff] }
 0x7a1   : > { %12122 = vmatpush1.bf16.msra.mxu1 %v15163_v58  ;;  %11959 = vmatprep.subr.bf16.mxu0 %v15170_v43  ;;  %v14703_v58 = vcombine.low %v8693_v45, %v8697_v0  ;;  %v14710_v43 = vcombine.high %v8700_v55, %v8704_v56  ;;  %v8745_v45 = vld [vmem:[#allocation12 + $0x278] sm:$0xff]  ;;  %v8752_v55 = vld [vmem:[#allocation12 + $0x2b0] sm:$0xff] }
 0x7a2   : > { %12123 = vmatprep.subr.bf16.mxu1 %v15172_v47  ;;  %v8708_v47 = vld [vmem:[#allocation12 + $0x150] sm:$0xff]  ;;  %v8749_v56 = vld [vmem:[#allocation12 + $0x298] sm:$0xff] }
 0x7a3   : > { %v14717_v15 = vcombine.low %v8708_v47, %v8712_v25 }
 0x7a4   : > { %11960 = vmatpush1.bf16.msra.mxu0 %v15169_v49  ;;  %v14711_v49 = vcombine.low %v8701_v9, %v8705_v4 }
 0x7a5   : > { %12124 = vmatpush1.bf16.msra.mxu1 %v15171_v63  ;;  %11961 = vmatprep.subr.bf16.mxu0 %v15178_v3  ;;  %v14718_v63 = vcombine.high %v8708_v47, %v8712_v25  ;;  %v14720_v3 = vcombine.high %v8709_v36, %v8713_v8  ;;  %v8760_v47 = vld [vmem:[#allocation12 + $0x2f0] sm:$0xff]  ;;  %v8757_v25 = vld [vmem:[#allocation12 + $0x2d8] sm:$0xff] }
 0x7a6   : > { %12125 = vmatprep.subr.bf16.mxu1 %v15180_v7  ;;  %v8716_v7 = vld [vmem:[#allocation12 + $0x190] sm:$0xff] }
 0x7a7   : > { %v14725_v29 = vcombine.low %v8716_v7, %v8720_v50 }
 0x7a8   : > { %11962 = vmatpush1.bf16.msra.mxu0 %v15177_v16  ;;  %v14719_v16 = vcombine.low %v8709_v36, %v8713_v8  ;;  %v8761_v36 = vld [vmem:[#allocation12 + $0x2f8] sm:$0xff] }
 0x7a9   : > { %12126 = vmatpush1.bf16.msra.mxu1 %v15179_v17  ;;  %12136 = vmatprep.subr.bf16.mxu0 %v14678_v41  ;;  %v14726_v17 = vcombine.high %v8716_v7, %v8720_v50  ;;  %v14728_v41 = vcombine.high %v8717_v13, %v8721_v14  ;;  %v8768_v7 = vld [vmem:[#allocation12 + $0x330] sm:$0xff]  ;;  %v8765_v50 = vld [vmem:[#allocation12 + $0x318] sm:$0xff] }
 0x7aa   : > { %12300 = vmatprep.subr.bf16.mxu1 %v14680_v46  ;;  %v8724_v46 = vld [vmem:[#allocation12 + $0x1d0] sm:$0xff] }
 0x7ab   : > { %11964 = vmatmul.mubr.bf16.vlgmr.msra.gmra.mrb[0].mxu0 %v17770_v20  ;;  %v14733_v51 = vcombine.low %v8724_v46, %v8728_v18 }
 0x7ac   : > { %12128 = vmatmul.mubr.bf16.vlgmr.msra.gmra.mrb[0].mxu1 %v17770_v20  ;;  %12137 = vmatpush1.bf16.msra.mxu0 %v14677_v59  ;;  %v14727_v59 = vcombine.low %v8717_v13, %v8721_v14  ;;  %v8769_v13 = vld [vmem:[#allocation12 + $0x338] sm:$0xff] }
 0x7ad   : > { %12301 = vmatpush1.bf16.msra.mxu1 %v14679_v30  ;;  %12138 = vmatprep.subr.bf16.mxu0 %v14686_v31  ;;  %v14734_v30 = vcombine.high %v8724_v46, %v8728_v18  ;;  %v14736_v31 = vcombine.high %v8725_v19, %v8729_v21  ;;  %v8776_v46 = vld [vmem:[#allocation12 + $0x370] sm:$0xff]  ;;  %v8773_v18 = vld [vmem:[#allocation12 + $0x358] sm:$0xff] }
 0x7ae   : > { %12302 = vmatprep.subr.bf16.mxu1 %v14688_v32  ;;  %12168 = vmatprep.mubr.bf16.mxu0 %v17722_v6  ;;  %v8732_v32 = vld [vmem:[#allocation12 + $0x210] sm:$0xff] }
 0x7af   : > { %12332 = vmatprep.mubr.bf16.mxu1 %v17722_v6  ;;  %v14712_v6 = vcombine.high %v8701_v9, %v8705_v4  ;;  %v14741_v0 = vcombine.low %v8732_v32, %v8736_v1  ;;  %v8753_v9 = vld [vmem:[#allocation12 + $0x2b8] sm:$0xff] }
 0x7b0   : > { %12139 = vmatpush1.bf16.msra.mxu0 %v14685_v52  ;;  %v14735_v52 = vcombine.low %v8725_v19, %v8729_v21  ;;  %v8777_v19 = vld [vmem:[#allocation12 + $0x378] sm:$0xff] }
 0x7b1   : > { %12303 = vmatpush1.bf16.msra.mxu1 %v14687_v34  ;;  %12140 = vmatprep.subr.bf16.mxu0 %v14694_v35  ;;  %v14742_v34 = vcombine.high %v8732_v32, %v8736_v1  ;;  %v14744_v35 = vcombine.high %v8733_v38, %v8737_v48  ;;  %v8784_v32 = vld [vmem:[#allocation12 + $0x3b0] sm:$0xff]  ;;  %v8781_v1 = vld [vmem:[#allocation12 + $0x398] sm:$0xff] }
 0x7b2   : > { %12304 = vmatprep.subr.bf16.mxu1 %v14696_v2  ;;  %v8740_v2 = vld [vmem:[#allocation12 + $0x250] sm:$0xff] }
 0x7b3   : > { %v14749_v4 = vcombine.low %v8740_v2, %v8744_v60 }
 0x7b4   : > { %12141 = vmatpush1.bf16.msra.mxu0 %v14693_v37  ;;  %v14743_v37 = vcombine.low %v8733_v38, %v8737_v48  ;;  %v8785_v38 = vld [vmem:[#allocation12 + $0x3b8] sm:$0xff] }
 0x7b5   : > { %12305 = vmatpush1.bf16.msra.mxu1 %v14695_v33  ;;  %12142 = vmatprep.subr.bf16.mxu0 %v14702_v62  ;;  %v14750_v33 = vcombine.high %v8740_v2, %v8744_v60  ;;  %v14752_v62 = vcombine.high %v8741_v39, %v8745_v45  ;;  %v8792_v2 = vld [vmem:[#allocation12 + $0x3f0] sm:$0xff]  ;;  %v8789_v60 = vld [vmem:[#allocation12 + $0x3d8] sm:$0xff] }
 0x7b6   : > { %12306 = vmatprep.subr.bf16.mxu1 %v14704_v54  ;;  %v8748_v54 = vld [vmem:[#allocation12 + $0x290] sm:$0xff] }
 0x7b7   : > { %v14757_v8 = vcombine.low %v8748_v54, %v8752_v55 }
 0x7b8   : > { %12143 = vmatpush1.bf16.msra.mxu0 %v14701_v57  ;;  %v14751_v57 = vcombine.low %v8741_v39, %v8745_v45  ;;  %v8793_v39 = vld [vmem:[#allocation12 + $0x3f8] sm:$0xff] }
 0x7b9   : > { %12307 = vmatpush1.bf16.msra.mxu1 %v14703_v58  ;;  %12144 = vmatprep.subr.bf16.mxu0 %v14710_v43  ;;  %v14758_v58 = vcombine.high %v8748_v54, %v8752_v55  ;;  %v14760_v43 = vcombine.high %v8749_v56, %v8753_v9  ;;  %v8800_v54 = vld [vmem:[#allocation12 + $0x430] sm:$0xff]  ;;  %v8797_v55 = vld [vmem:[#allocation12 + $0x418] sm:$0xff] }
 0x7ba   : > { %12308 = vmatprep.subr.bf16.mxu1 %v14712_v6  ;;  %v8756_v6 = vld [vmem:[#allocation12 + $0x2d0] sm:$0xff] }
 0x7bb   : > { %v14765_v14 = vcombine.low %v8756_v6, %v8760_v47 }
 0x7bc   : > { %12145 = vmatpush1.bf16.msra.mxu0 %v14709_v61  ;;  %v14759_v61 = vcombine.low %v8749_v56, %v8753_v9  ;;  %v8801_v56 = vld [vmem:[#allocation12 + $0x438] sm:$0xff] }
 0x7bd   : > { %12309 = vmatpush1.bf16.msra.mxu1 %v14711_v49  ;;  %12146 = vmatprep.subr.bf16.mxu0 %v14718_v63  ;;  %v14766_v49 = vcombine.high %v8756_v6, %v8760_v47  ;;  %v14768_v63 = vcombine.high %v8757_v25, %v8761_v36  ;;  %v8808_v6 = vld [vmem:[#allocation12 + $0x470] sm:$0xff]  ;;  %v8805_v47 = vld [vmem:[#allocation12 + $0x458] sm:$0xff] }
 0x7be   : > { %12310 = vmatprep.subr.bf16.mxu1 %v14720_v3  ;;  %v8764_v3 = vld [vmem:[#allocation12 + $0x310] sm:$0xff] }
 0x7bf   : > { %v14773_v21 = vcombine.low %v8764_v3, %v8768_v7 }
 0x7c0   : > { %12147 = vmatpush1.bf16.msra.mxu0 %v14717_v15  ;;  %v14767_v15 = vcombine.low %v8757_v25, %v8761_v36  ;;  %v8809_v25 = vld [vmem:[#allocation12 + $0x478] sm:$0xff] }
 0x7c1   : > { %12311 = vmatpush1.bf16.msra.mxu1 %v14719_v16  ;;  %12148 = vmatprep.subr.bf16.mxu0 %v14726_v17  ;;  %v14774_v16 = vcombine.high %v8764_v3, %v8768_v7  ;;  %v14776_v17 = vcombine.high %v8765_v50, %v8769_v13  ;;  %v8816_v3 = vld [vmem:[#allocation12 + $0x4b0] sm:$0xff]  ;;  %v8813_v7 = vld [vmem:[#allocation12 + $0x498] sm:$0xff] }
 0x7c2   : > { %12312 = vmatprep.subr.bf16.mxu1 %v14728_v41  ;;  %v8772_v41 = vld [vmem:[#allocation12 + $0x350] sm:$0xff] }
 0x7c3   : > { %v14781_v48 = vcombine.low %v8772_v41, %v8776_v46 }
 0x7c4   : > { %12149 = vmatpush1.bf16.msra.mxu0 %v14725_v29  ;;  %v14775_v29 = vcombine.low %v8765_v50, %v8769_v13  ;;  %v8817_v50 = vld [vmem:[#allocation12 + $0x4b8] sm:$0xff] }
 0x7c5   : > { %12313 = vmatpush1.bf16.msra.mxu1 %v14727_v59  ;;  %12150 = vmatprep.subr.bf16.mxu0 %v14734_v30  ;;  %v14782_v59 = vcombine.high %v8772_v41, %v8776_v46  ;;  %v14784_v30 = vcombine.high %v8773_v18, %v8777_v19  ;;  %v8824_v41 = vld [vmem:[#allocation12 + $0x4f0] sm:$0xff]  ;;  %v8821_v46 = vld [vmem:[#allocation12 + $0x4d8] sm:$0xff] }
 0x7c6   : > { %12314 = vmatprep.subr.bf16.mxu1 %v14736_v31  ;;  %v8780_v31 = vld [vmem:[#allocation12 + $0x390] sm:$0xff] }
 0x7c7   : > { %v14789_v45 = vcombine.low %v8780_v31, %v8784_v32 }
 0x7c8   : > { %12151 = vmatpush1.bf16.msra.mxu0 %v14733_v51  ;;  %v14783_v51 = vcombine.low %v8773_v18, %v8777_v19  ;;  %v8825_v18 = vld [vmem:[#allocation12 + $0x4f8] sm:$0xff] }
 0x7c9   : > { %12315 = vmatpush1.bf16.msra.mxu1 %v14735_v52  ;;  %12152 = vmatprep.subr.bf16.mxu0 %v14742_v34  ;;  %v14790_v52 = vcombine.high %v8780_v31, %v8784_v32  ;;  %v14792_v34 = vcombine.high %v8781_v1, %v8785_v38  ;;  %v8829_v31 = vld [vmem:[#allocation12 + $0x518] sm:$0xff] }
 0x7ca   : > { %12316 = vmatprep.subr.bf16.mxu1 %v14744_v35  ;;  %v8788_v35 = vld [vmem:[#allocation12 + $0x3d0] sm:$0xff]  ;;  %v8833_v32 = vld [vmem:[#allocation12 + $0x538] sm:$0xff] }
 0x7cb   : > { %v14797_v9 = vcombine.low %v8788_v35, %v8792_v2 }
 0x7cc   : > { %12153 = vmatpush1.bf16.msra.mxu0 %v14741_v0  ;;  %v14791_v0 = vcombine.low %v8781_v1, %v8785_v38  ;;  %v14831_v38 = vcombine.low %v8821_v46, %v8825_v18 }
 0x7cd   : > { %12317 = vmatpush1.bf16.msra.mxu1 %v14743_v37  ;;  %12154 = vmatprep.subr.bf16.mxu0 %v14750_v33  ;;  %v14798_v37 = vcombine.high %v8788_v35, %v8792_v2  ;;  %v14800_v33 = vcombine.high %v8789_v60, %v8793_v39  ;;  %v8841_v35 = vld [vmem:[#allocation12 + $0x578] sm:$0xff] }
 0x7ce   : > { %12318 = vmatprep.subr.bf16.mxu1 %v14752_v62  ;;  %v8796_v62 = vld [vmem:[#allocation12 + $0x410] sm:$0xff] }
 0x7cf   : > { %v14805_v36 = vcombine.low %v8796_v62, %v8800_v54 }
 0x7d0   : > { %12155 = vmatpush1.bf16.msra.mxu0 %v14749_v4  ;;  %v14799_v4 = vcombine.low %v8789_v60, %v8793_v39  ;;  %v14839_v60 = vcombine.low %v8829_v31, %v8833_v32 }
 0x7d1   : > { %12319 = vmatpush1.bf16.msra.mxu1 %v14751_v57  ;;  %12156 = vmatprep.subr.bf16.mxu0 %v14758_v58  ;;  %v14806_v57 = vcombine.high %v8796_v62, %v8800_v54  ;;  %v14808_v58 = vcombine.high %v8797_v55, %v8801_v56  ;;  %v8849_v62 = vld [vmem:[#allocation12 + $0x5b8] sm:$0xff] }
 0x7d2   : > { %12320 = vmatprep.subr.bf16.mxu1 %v14760_v43  ;;  %v8804_v43 = vld [vmem:[#allocation12 + $0x450] sm:$0xff] }
 0x7d3   : > { %v14813_v13 = vcombine.low %v8804_v43, %v8808_v6 }
 0x7d4   : > { %12157 = vmatpush1.bf16.msra.mxu0 %v14757_v8  ;;  %v14807_v8 = vcombine.low %v8797_v55, %v8801_v56 }
 0x7d5   : > { %12321 = vmatpush1.bf16.msra.mxu1 %v14759_v61  ;;  %12158 = vmatprep.subr.bf16.mxu0 %v14766_v49  ;;  %v14814_v61 = vcombine.high %v8804_v43, %v8808_v6  ;;  %v14816_v49 = vcombine.high %v8805_v47, %v8809_v25  ;;  %v8857_v43 = vld [vmem:[#allocation12 + $0x5f8] sm:$0xff] }
 0x7d6   : > { %12322 = vmatprep.subr.bf16.mxu1 %v14768_v63  ;;  %v8812_v63 = vld [vmem:[#allocation12 + $0x490] sm:$0xff] }
 0x7d7   : > { %v14821_v19 = vcombine.low %v8812_v63, %v8816_v3 }
 0x7d8   : > { %12159 = vmatpush1.bf16.msra.mxu0 %v14765_v14  ;;  %v14815_v14 = vcombine.low %v8805_v47, %v8809_v25 }
 0x7d9   : > { %12323 = vmatpush1.bf16.msra.mxu1 %v14767_v15  ;;  %12160 = vmatprep.subr.bf16.mxu0 %v14774_v16  ;;  %v14822_v15 = vcombine.high %v8812_v63, %v8816_v3  ;;  %v14824_v16 = vcombine.high %v8813_v7, %v8817_v50  ;;  %v8865_v63 = vld [vmem:[#allocation12 + $0x638] sm:$0xff] }
 0x7da   : > { %12324 = vmatprep.subr.bf16.mxu1 %v14776_v17  ;;  %v8820_v17 = vld [vmem:[#allocation12 + $0x4d0] sm:$0xff] }
 0x7db   : > { %v14829_v1 = vcombine.low %v8820_v17, %v8824_v41 }
 0x7dc   : > { %12161 = vmatpush1.bf16.msra.mxu0 %v14773_v21  ;;  %v14830_v21 = vcombine.high %v8820_v17, %v8824_v41  ;;  %v8873_v17 = vld [vmem:[#allocation12 + $0x678] sm:$0xff] }
 0x7dd   : > { %12325 = vmatpush1.bf16.msra.mxu1 %v14775_v29  ;;  %12162 = vmatprep.subr.bf16.mxu0 %v14782_v59  ;;  %v14832_v29 = vcombine.high %v8821_v46, %v8825_v18  ;;  %v8828_v59 = vld [vmem:[#allocation12 + $0x510] sm:$0xff] }
 0x7de   : > { %12326 = vmatprep.subr.bf16.mxu1 %v14784_v30  ;;  %v8832_v30 = vld [vmem:[#allocation12 + $0x530] sm:$0xff] }
 0x7df   : > { %v14837_v2 = vcombine.low %v8828_v59, %v8832_v30 }
 0x7e0   : > { %12163 = vmatpush1.bf16.msra.mxu0 %v14781_v48  ;;  %v14838_v48 = vcombine.high %v8828_v59, %v8832_v30  ;;  %v8881_v59 = vld [vmem:[#allocation12 + $0x6b8] sm:$0xff] }
 0x7e1   : > { %12327 = vmatpush1.bf16.msra.mxu1 %v14783_v51  ;;  %12164 = vmatprep.subr.bf16.mxu0 %v14790_v52  ;;  %v8836_v51 = vld [vmem:[#allocation12 + $0x550] sm:$0xff] }
 0x7e2   : > { %12328 = vmatprep.subr.bf16.mxu1 %v14792_v34  ;;  %v8840_v52 = vld [vmem:[#allocation12 + $0x570] sm:$0xff]  ;;  %v8837_v34 = vld [vmem:[#allocation12 + $0x558] sm:$0xff] }
 0x7e3   : > { %v14846_v39 = vcombine.high %v8836_v51, %v8840_v52  ;;  %v14845_v54 = vcombine.low %v8836_v51, %v8840_v52  ;;  %v14847_v55 = vcombine.low %v8837_v34, %v8841_v35  ;;  %v8889_v51 = vld [vmem:[#allocation12 + $0x6f8] sm:$0xff] }
 0x7e4   : > { %12165 = vmatpush1.bf16.msra.mxu0 %v14789_v45  ;;  %v14848_v45 = vcombine.high %v8837_v34, %v8841_v35 }
 0x7e5   : > { %12329 = vmatpush1.bf16.msra.mxu1 %v14791_v0  ;;  %12166 = vmatprep.subr.bf16.mxu0 %v14798_v37  ;;  %v8844_v0 = vld [vmem:[#allocation12 + $0x590] sm:$0xff] }
 0x7e6   : > { %12330 = vmatprep.subr.bf16.mxu1 %v14800_v33  ;;  %v8848_v37 = vld [vmem:[#allocation12 + $0x5b0] sm:$0xff]  ;;  %v8845_v33 = vld [vmem:[#allocation12 + $0x598] sm:$0xff] }
 0x7e7   : > { %v14854_v56 = vcombine.high %v8844_v0, %v8848_v37  ;;  %v14853_v6 = vcombine.low %v8844_v0, %v8848_v37  ;;  %v14855_v47 = vcombine.low %v8845_v33, %v8849_v62  ;;  %v8897_v0 = vld [vmem:[#allocation12 + $0x738] sm:$0xff] }
 0x7e8   : > { %12167 = vmatpush1.bf16.msra.mxu0 %v14797_v9  ;;  %v14856_v9 = vcombine.high %v8845_v33, %v8849_v62 }
 0x7e9   : > { %12331 = vmatpush1.bf16.msra.mxu1 %v14799_v4  ;;  %12177 = vmatprep.subr.bf16.mxu0 %v14806_v57  ;;  %v8852_v4 = vld [vmem:[#allocation12 + $0x5d0] sm:$0xff] }
 0x7ea   : > { %12341 = vmatprep.subr.bf16.mxu1 %v14808_v58  ;;  %v8856_v57 = vld [vmem:[#allocation12 + $0x5f0] sm:$0xff]  ;;  %v8853_v58 = vld [vmem:[#allocation12 + $0x5d8] sm:$0xff] }
 0x7eb   : > { %12169 = vmatmul.mubr.bf16.vlgmr.msra.gmra.mrb[4].mxu0 %v17728_v26  ;;  %v14862_v25 = vcombine.high %v8852_v4, %v8856_v57  ;;  %v14861_v3 = vcombine.low %v8852_v4, %v8856_v57  ;;  %v8905_v4 = vld [vmem:[#allocation12 + $0x778] sm:$0xff] }
 0x7ec   : > { %12178 = vmatpush1.bf16.msra.mxu0 %v14805_v36  ;;  %12333 = vmatmul.mubr.bf16.vlgmr.msra.gmra.mrb[4].mxu1 %v17728_v26  ;;  %v14823_v26 = vcombine.low %v8813_v7, %v8817_v50  ;;  %v14864_v36 = vcombine.high %v8853_v58, %v8857_v43  ;;  %v14863_v7 = vcombine.low %v8853_v58, %v8857_v43 }
 0x7ed   : > { %12342 = vmatpush1.bf16.msra.mxu1 %v14807_v8  ;;  %12179 = vmatprep.subr.bf16.mxu0 %v14814_v61  ;;  %v8860_v8 = vld [vmem:[#allocation12 + $0x610] sm:$0xff] }
 0x7ee   : > { %12343 = vmatprep.subr.bf16.mxu1 %v14816_v49  ;;  %12209 = vmatprep.mubr.bf16.mxu0 %v17734_v53  ;;  %v8864_v61 = vld [vmem:[#allocation12 + $0x630] sm:$0xff]  ;;  %v8861_v49 = vld [vmem:[#allocation12 + $0x618] sm:$0xff] }
 0x7ef   : > { %12373 = vmatprep.mubr.bf16.mxu1 %v17734_v53  ;;  %v14840_v53 = vcombine.high %v8829_v31, %v8833_v32  ;;  %v14870_v50 = vcombine.high %v8860_v8, %v8864_v61  ;;  %v14869_v41 = vcombine.low %v8860_v8, %v8864_v61  ;;  %v14871_v46 = vcombine.low %v8861_v49, %v8865_v63  ;;  %v8913_v8 = vld [vmem:[#allocation12 + $0x7b8] sm:$0xff] }
 0x7f0   : > { %12180 = vmatpush1.bf16.msra.mxu0 %v14813_v13  ;;  %v14872_v13 = vcombine.high %v8861_v49, %v8865_v63 }
 0x7f1   : > { %12344 = vmatpush1.bf16.msra.mxu1 %v14815_v14  ;;  %12181 = vmatprep.subr.bf16.mxu0 %v14822_v15  ;;  %v8868_v14 = vld [vmem:[#allocation12 + $0x650] sm:$0xff] }
 0x7f2   : > { %12345 = vmatprep.subr.bf16.mxu1 %v14824_v16  ;;  %v8872_v15 = vld [vmem:[#allocation12 + $0x670] sm:$0xff]  ;;  %v8869_v16 = vld [vmem:[#allocation12 + $0x658] sm:$0xff] }
 0x7f3   : > { %v14878_v18 = vcombine.high %v8868_v14, %v8872_v15  ;;  %v14877_v30 = vcombine.low %v8868_v14, %v8872_v15  ;;  %v14879_v31 = vcombine.low %v8869_v16, %v8873_v17  ;;  %v8921_v14 = vld [vmem:[#allocation12 + $0x7f8] sm:$0xff] }
 0x7f4   : > { %12182 = vmatpush1.bf16.msra.mxu0 %v14821_v19  ;;  %v14880_v19 = vcombine.high %v8869_v16, %v8873_v17 }
 0x7f5   : > { %12346 = vmatpush1.bf16.msra.mxu1 %v14823_v26  ;;  %12183 = vmatprep.subr.bf16.mxu0 %v14830_v21  ;;  %v8876_v26 = vld [vmem:[#allocation12 + $0x690] sm:$0xff] }
 0x7f6   : > { %12347 = vmatprep.subr.bf16.mxu1 %v14832_v29  ;;  %v8880_v21 = vld [vmem:[#allocation12 + $0x6b0] sm:$0xff]  ;;  %v8877_v29 = vld [vmem:[#allocation12 + $0x698] sm:$0xff] }
 0x7f7   : > { %v14886_v32 = vcombine.high %v8876_v26, %v8880_v21  ;;  %v14885_v52 = vcombine.low %v8876_v26, %v8880_v21  ;;  %v14887_v34 = vcombine.low %v8877_v29, %v8881_v59  ;;  %v8929_v26 = vld [vmem:[#allocation12 + $0x838] sm:$0xff] }
 0x7f8   : > { %12184 = vmatpush1.bf16.msra.mxu0 %v14829_v1  ;;  %v14888_v1 = vcombine.high %v8877_v29, %v8881_v59 }
 0x7f9   : > { %12348 = vmatpush1.bf16.msra.mxu1 %v14831_v38  ;;  %12185 = vmatprep.subr.bf16.mxu0 %v14838_v48  ;;  %v8884_v38 = vld [vmem:[#allocation12 + $0x6d0] sm:$0xff] }
 0x7fa   : > { %12349 = vmatprep.subr.bf16.mxu1 %v14840_v53  ;;  %v8888_v48 = vld [vmem:[#allocation12 + $0x6f0] sm:$0xff]  ;;  %v8885_v53 = vld [vmem:[#allocation12 + $0x6d8] sm:$0xff] }
 0x7fb   : > { %v14894_v35 = vcombine.high %v8884_v38, %v8888_v48  ;;  %v14893_v37 = vcombine.low %v8884_v38, %v8888_v48  ;;  %v14895_v33 = vcombine.low %v8885_v53, %v8889_v51  ;;  %v8937_v38 = vld [vmem:[#allocation12 + $0x878] sm:$0xff] }
 0x7fc   : > { %12186 = vmatpush1.bf16.msra.mxu0 %v14837_v2  ;;  %v14896_v2 = vcombine.high %v8885_v53, %v8889_v51 }
 0x7fd   : > { %12350 = vmatpush1.bf16.msra.mxu1 %v14839_v60  ;;  %12187 = vmatprep.subr.bf16.mxu0 %v14846_v39  ;;  %v8892_v60 = vld [vmem:[#allocation12 + $0x710] sm:$0xff] }
 0x7fe   : > { %12351 = vmatprep.subr.bf16.mxu1 %v14848_v45  ;;  %v8896_v39 = vld [vmem:[#allocation12 + $0x730] sm:$0xff]  ;;  %v8893_v45 = vld [vmem:[#allocation12 + $0x718] sm:$0xff] }
 0x7ff   : > { %v14902_v62 = vcombine.high %v8892_v60, %v8896_v39  ;;  %v14901_v57 = vcombine.low %v8892_v60, %v8896_v39  ;;  %v14903_v58 = vcombine.low %v8893_v45, %v8897_v0  ;;  %v8945_v60 = vld [vmem:[#allocation12 + $0x8b8] sm:$0xff] }
 0x800   : > { %12188 = vmatpush1.bf16.msra.mxu0 %v14845_v54  ;;  %v14904_v54 = vcombine.high %v8893_v45, %v8897_v0 }
 0x801   : > { %12352 = vmatpush1.bf16.msra.mxu1 %v14847_v55  ;;  %12189 = vmatprep.subr.bf16.mxu0 %v14854_v56  ;;  %v8900_v55 = vld [vmem:[#allocation12 + $0x750] sm:$0xff] }
 0x802   : > { %12353 = vmatprep.subr.bf16.mxu1 %v14856_v9  ;;  %v8904_v56 = vld [vmem:[#allocation12 + $0x770] sm:$0xff]  ;;  %v8901_v9 = vld [vmem:[#allocation12 + $0x758] sm:$0xff] }
 0x803   : > { %v14910_v43 = vcombine.high %v8900_v55, %v8904_v56  ;;  %v14909_v61 = vcombine.low %v8900_v55, %v8904_v56  ;;  %v14911_v49 = vcombine.low %v8901_v9, %v8905_v4  ;;  %v8953_v55 = vld [vmem:[#allocation12 + $0x8f8] sm:$0xff] }
 0x804   : > { %12190 = vmatpush1.bf16.msra.mxu0 %v14853_v6  ;;  %v14912_v6 = vcombine.high %v8901_v9, %v8905_v4 }
 0x805   : > { %12354 = vmatpush1.bf16.msra.mxu1 %v14855_v47  ;;  %12191 = vmatprep.subr.bf16.mxu0 %v14862_v25  ;;  %v8908_v47 = vld [vmem:[#allocation12 + $0x790] sm:$0xff] }
 0x806   : > { %12355 = vmatprep.subr.bf16.mxu1 %v14864_v36  ;;  %v8912_v25 = vld [vmem:[#allocation12 + $0x7b0] sm:$0xff]  ;;  %v8909_v36 = vld [vmem:[#allocation12 + $0x798] sm:$0xff] }
 0x807   : > { %v14918_v63 = vcombine.high %v8908_v47, %v8912_v25  ;;  %v14917_v15 = vcombine.low %v8908_v47, %v8912_v25  ;;  %v14919_v16 = vcombine.low %v8909_v36, %v8913_v8 }
 0x808   : > { %12192 = vmatpush1.bf16.msra.mxu0 %v14861_v3  ;;  %v14920_v3 = vcombine.high %v8909_v36, %v8913_v8  ;;  %v8964_v8 = vld [vmem:[#allocation12 + $0x950] sm:$0xff] }
 0x809   : > { %12356 = vmatpush1.bf16.msra.mxu1 %v14863_v7  ;;  %12193 = vmatprep.subr.bf16.mxu0 %v14870_v50  ;;  %v8916_v7 = vld [vmem:[#allocation12 + $0x7d0] sm:$0xff] }
 0x80a   : > { %12357 = vmatprep.subr.bf16.mxu1 %v14872_v13  ;;  %v8920_v50 = vld [vmem:[#allocation12 + $0x7f0] sm:$0xff]  ;;  %v8917_v13 = vld [vmem:[#allocation12 + $0x7d8] sm:$0xff] }
 0x80b   : > { %v14926_v17 = vcombine.high %v8916_v7, %v8920_v50  ;;  %v14925_v21 = vcombine.low %v8916_v7, %v8920_v50  ;;  %v14927_v29 = vcombine.low %v8917_v13, %v8921_v14 }
 0x80c   : > { %12194 = vmatpush1.bf16.msra.mxu0 %v14869_v41  ;;  %v14928_v41 = vcombine.high %v8917_v13, %v8921_v14  ;;  %v8972_v14 = vld [vmem:[#allocation12 + $0x990] sm:$0xff] }
 0x80d   : > { %12358 = vmatpush1.bf16.msra.mxu1 %v14871_v46  ;;  %12195 = vmatprep.subr.bf16.mxu0 %v14878_v18  ;;  %v8924_v46 = vld [vmem:[#allocation12 + $0x810] sm:$0xff] }
 0x80e   : > { %12359 = vmatprep.subr.bf16.mxu1 %v14880_v19  ;;  %v8928_v18 = vld [vmem:[#allocation12 + $0x830] sm:$0xff]  ;;  %v8925_v19 = vld [vmem:[#allocation12 + $0x818] sm:$0xff] }
 0x80f   : > { %v14934_v59 = vcombine.high %v8924_v46, %v8928_v18  ;;  %v14933_v48 = vcombine.low %v8924_v46, %v8928_v18  ;;  %v14935_v53 = vcombine.low %v8925_v19, %v8929_v26 }
 0x810   : > { %12196 = vmatpush1.bf16.msra.mxu0 %v14877_v30  ;;  %v14936_v30 = vcombine.high %v8925_v19, %v8929_v26  ;;  %v8980_v26 = vld [vmem:[#allocation12 + $0x9d0] sm:$0xff] }
 0x811   : > { %12360 = vmatpush1.bf16.msra.mxu1 %v14879_v31  ;;  %12197 = vmatprep.subr.bf16.mxu0 %v14886_v32  ;;  %v8932_v31 = vld [vmem:[#allocation12 + $0x850] sm:$0xff] }
 0x812   : > { %12361 = vmatprep.subr.bf16.mxu1 %v14888_v1  ;;  %v8936_v32 = vld [vmem:[#allocation12 + $0x870] sm:$0xff]  ;;  %v8933_v1 = vld [vmem:[#allocation12 + $0x858] sm:$0xff] }
 0x813   : > { %v14942_v51 = vcombine.high %v8932_v31, %v8936_v32  ;;  %v14941_v39 = vcombine.low %v8932_v31, %v8936_v32  ;;  %v14943_v45 = vcombine.low %v8933_v1, %v8937_v38 }
 0x814   : > { %12198 = vmatpush1.bf16.msra.mxu0 %v14885_v52  ;;  %v14944_v52 = vcombine.high %v8933_v1, %v8937_v38  ;;  %v8988_v38 = vld [vmem:[#allocation12 + $0xa10] sm:$0xff] }
 0x815   : > { %12362 = vmatpush1.bf16.msra.mxu1 %v14887_v34  ;;  %12199 = vmatprep.subr.bf16.mxu0 %v14894_v35  ;;  %v8940_v34 = vld [vmem:[#allocation12 + $0x890] sm:$0xff] }
 0x816   : > { %12363 = vmatprep.subr.bf16.mxu1 %v14896_v2  ;;  %v8944_v35 = vld [vmem:[#allocation12 + $0x8b0] sm:$0xff]  ;;  %v8941_v2 = vld [vmem:[#allocation12 + $0x898] sm:$0xff] }
 0x817   : > { %v14950_v0 = vcombine.high %v8940_v34, %v8944_v35  ;;  %v14949_v56 = vcombine.low %v8940_v34, %v8944_v35 }
 0x818   : > { %12200 = vmatpush1.bf16.msra.mxu0 %v14893_v37  ;;  %v14952_v37 = vcombine.high %v8941_v2, %v8945_v60 }
 0x819   : > { %12364 = vmatpush1.bf16.msra.mxu1 %v14895_v33  ;;  %12201 = vmatprep.subr.bf16.mxu0 %v14902_v62  ;;  %v8948_v33 = vld [vmem:[#allocation12 + $0x8d0] sm:$0xff] }
 0x81a   : > { %12365 = vmatprep.subr.bf16.mxu1 %v14904_v54  ;;  %v8952_v62 = vld [vmem:[#allocation12 + $0x8f0] sm:$0xff]  ;;  %v8949_v54 = vld [vmem:[#allocation12 + $0x8d8] sm:$0xff] }
 0x81b   : > { %v14958_v9 = vcombine.high %v8948_v33, %v8952_v62  ;;  %v14960_v4 = vcombine.high %v8949_v54, %v8953_v55  ;;  %v14957_v47 = vcombine.low %v8948_v33, %v8952_v62  ;;  %v14959_v25 = vcombine.low %v8949_v54, %v8953_v55  ;;  %v9004_v55 = vld [vmem:[#allocation12 + $0xa90] sm:$0xff] }
 0x81c   : > { %12202 = vmatpush1.bf16.msra.mxu0 %v14901_v57  ;;  %v8956_v57 = vld [vmem:[#allocation12 + $0x910] sm:$0xff] }
 0x81d   : > { %12366 = vmatpush1.bf16.msra.mxu1 %v14903_v58  ;;  %12203 = vmatprep.subr.bf16.mxu0 %v14910_v43  ;;  %v8960_v58 = vld [vmem:[#allocation12 + $0x930] sm:$0xff]  ;;  %v8957_v43 = vld [vmem:[#allocation12 + $0x918] sm:$0xff] }
 0x81e   : > { %12367 = vmatprep.subr.bf16.mxu1 %v14912_v6  ;;  %v8961_v6 = vld [vmem:[#allocation12 + $0x938] sm:$0xff]  ;;  %v14966_v36 = vcombine.high %v8956_v57, %v8960_v58 }
 0x81f   : > { %v14967_v7 = vcombine.low %v8957_v43, %v8961_v6 }
 0x820   : > { %12204 = vmatpush1.bf16.msra.mxu0 %v14909_v61  ;;  %v8968_v61 = vld [vmem:[#allocation12 + $0x970] sm:$0xff] }
 0x821   : > { %12368 = vmatpush1.bf16.msra.mxu1 %v14911_v49  ;;  %12205 = vmatprep.subr.bf16.mxu0 %v14918_v63  ;;  %v8965_v49 = vld [vmem:[#allocation12 + $0x958] sm:$0xff]  ;;  %v14974_v50 = vcombine.high %v8964_v8, %v8968_v61 }
 0x822   : > { %12369 = vmatprep.subr.bf16.mxu1 %v14920_v3  ;;  %v8969_v63 = vld [vmem:[#allocation12 + $0x978] sm:$0xff]  ;;  %v14965_v3 = vcombine.low %v8956_v57, %v8960_v58 }
 0x823   : > { %v14976_v13 = vcombine.high %v8965_v49, %v8969_v63  ;;  %v14975_v46 = vcombine.low %v8965_v49, %v8969_v63  ;;  %v9020_v63 = vld [vmem:[#allocation12 + $0xb10] sm:$0xff] }
 0x824   : > { %12206 = vmatpush1.bf16.msra.mxu0 %v14917_v15  ;;  %v8976_v15 = vld [vmem:[#allocation12 + $0x9b0] sm:$0xff] }
 0x825   : > { %12370 = vmatpush1.bf16.msra.mxu1 %v14919_v16  ;;  %12207 = vmatprep.subr.bf16.mxu0 %v14926_v17  ;;  %v8973_v16 = vld [vmem:[#allocation12 + $0x998] sm:$0xff]  ;;  %v14982_v18 = vcombine.high %v8972_v14, %v8976_v15 }
 0x826   : > { %12371 = vmatprep.subr.bf16.mxu1 %v14928_v41  ;;  %v8977_v17 = vld [vmem:[#allocation12 + $0x9b8] sm:$0xff]  ;;  %v14973_v41 = vcombine.low %v8964_v8, %v8968_v61 }
 0x827   : > { %v14984_v19 = vcombine.high %v8973_v16, %v8977_v17  ;;  %v14983_v31 = vcombine.low %v8973_v16, %v8977_v17  ;;  %v9028_v17 = vld [vmem:[#allocation12 + $0xb50] sm:$0xff] }
 0x828   : > { %12208 = vmatpush1.bf16.msra.mxu0 %v14925_v21  ;;  %v8984_v21 = vld [vmem:[#allocation12 + $0x9f0] sm:$0xff] }
 0x829   : > { %12372 = vmatpush1.bf16.msra.mxu1 %v14927_v29  ;;  %12218 = vmatprep.subr.bf16.mxu0 %v14934_v59  ;;  %v8981_v29 = vld [vmem:[#allocation12 + $0x9d8] sm:$0xff]  ;;  %v14990_v32 = vcombine.high %v8980_v26, %v8984_v21 }
 0x82a   : > { %12382 = vmatprep.subr.bf16.mxu1 %v14936_v30  ;;  %v8985_v59 = vld [vmem:[#allocation12 + $0x9f8] sm:$0xff]  ;;  %v14981_v30 = vcombine.low %v8972_v14, %v8976_v15 }
 0x82b   : > { %12210 = vmatmul.mubr.bf16.vlgmr.msra.gmra.mrb[4].mxu0 %v17742_v42  ;;  %v14992_v1 = vcombine.high %v8981_v29, %v8985_v59  ;;  %v14991_v34 = vcombine.low %v8981_v29, %v8985_v59  ;;  %v9036_v59 = vld [vmem:[#allocation12 + $0xb90] sm:$0xff] }
 0x82c   : > { %12219 = vmatpush1.bf16.msra.mxu0 %v14933_v48  ;;  %12374 = vmatmul.mubr.bf16.vlgmr.msra.gmra.mrb[4].mxu1 %v17742_v42  ;;  %v14951_v42 = vcombine.low %v8941_v2, %v8945_v60  ;;  %v8992_v48 = vld [vmem:[#allocation12 + $0xa30] sm:$0xff] }
 0x82d   : > { %12383 = vmatpush1.bf16.msra.mxu1 %v14935_v53  ;;  %12220 = vmatprep.subr.bf16.mxu0 %v14942_v51  ;;  %v8989_v53 = vld [vmem:[#allocation12 + $0xa18] sm:$0xff]  ;;  %v14998_v35 = vcombine.high %v8988_v38, %v8992_v48  ;;  %v8996_v60 = vld [vmem:[#allocation12 + $0xa50] sm:$0xff] }
 0x82e   : > { %12384 = vmatprep.subr.bf16.mxu1 %v14944_v52  ;;  %12250 = vmatprep.mubr.bf16.mxu0 %v17748_v23  ;;  %v8993_v51 = vld [vmem:[#allocation12 + $0xa38] sm:$0xff]  ;;  %v14989_v52 = vcombine.low %v8980_v26, %v8984_v21 }
 0x82f   : > { %12414 = vmatprep.mubr.bf16.mxu1 %v17748_v23  ;;  %v14968_v23 = vcombine.high %v8957_v43, %v8961_v6  ;;  %v15000_v2 = vcombine.high %v8989_v53, %v8993_v51  ;;  %v14999_v33 = vcombine.low %v8989_v53, %v8993_v51  ;;  %v9012_v6 = vld [vmem:[#allocation12 + $0xad0] sm:$0xff] }
 0x830   : > { %12221 = vmatpush1.bf16.msra.mxu0 %v14941_v39  ;;  %v9000_v39 = vld [vmem:[#allocation12 + $0xa70] sm:$0xff] }
 0x831   : > { %12385 = vmatpush1.bf16.msra.mxu1 %v14943_v45  ;;  %12222 = vmatprep.subr.bf16.mxu0 %v14950_v0  ;;  %v8997_v45 = vld [vmem:[#allocation12 + $0xa58] sm:$0xff]  ;;  %v15006_v62 = vcombine.high %v8996_v60, %v9000_v39  ;;  %v9044_v51 = vld [vmem:[#allocation12 + $0xbd0] sm:$0xff] }
 0x832   : > { %12386 = vmatprep.subr.bf16.mxu1 %v14952_v37  ;;  %v9001_v0 = vld [vmem:[#allocation12 + $0xa78] sm:$0xff]  ;;  %v14997_v37 = vcombine.low %v8988_v38, %v8992_v48 }
 0x833   : > { %v15008_v54 = vcombine.high %v8997_v45, %v9001_v0  ;;  %v15007_v57 = vcombine.low %v8997_v45, %v9001_v0  ;;  %v9052_v0 = vld [vmem:[#allocation12 + $0xc10] sm:$0xff] }
 0x834   : > { %12223 = vmatpush1.bf16.msra.mxu0 %v14949_v56  ;;  %v9008_v56 = vld [vmem:[#allocation12 + $0xab0] sm:$0xff] }
 0x835   : > { %12387 = vmatpush1.bf16.msra.mxu1 %v14951_v42  ;;  %12224 = vmatprep.subr.bf16.mxu0 %v14958_v9  ;;  %v9005_v42 = vld [vmem:[#allocation12 + $0xa98] sm:$0xff]  ;;  %v15014_v58 = vcombine.high %v9004_v55, %v9008_v56 }
 0x836   : > { %12388 = vmatprep.subr.bf16.mxu1 %v14960_v4  ;;  %v9009_v9 = vld [vmem:[#allocation12 + $0xab8] sm:$0xff]  ;;  %v15005_v4 = vcombine.low %v8996_v60, %v9000_v39 }
 0x837   : > { %v15016_v43 = vcombine.high %v9005_v42, %v9009_v9  ;;  %v15015_v8 = vcombine.low %v9005_v42, %v9009_v9  ;;  %v9060_v9 = vld [vmem:[#allocation12 + $0xc50] sm:$0xff] }
 0x838   : > { %12225 = vmatpush1.bf16.msra.mxu0 %v14957_v47  ;;  %v9016_v47 = vld [vmem:[#allocation12 + $0xaf0] sm:$0xff] }
 0x839   : > { %12389 = vmatpush1.bf16.msra.mxu1 %v14959_v25  ;;  %12226 = vmatprep.subr.bf16.mxu0 %v14966_v36  ;;  %v9013_v25 = vld [vmem:[#allocation12 + $0xad8] sm:$0xff]  ;;  %v15022_v61 = vcombine.high %v9012_v6, %v9016_v47 }
 0x83a   : > { %12390 = vmatprep.subr.bf16.mxu1 %v14968_v23  ;;  %v9017_v36 = vld [vmem:[#allocation12 + $0xaf8] sm:$0xff]  ;;  %v15013_v23 = vcombine.low %v9004_v55, %v9008_v56 }
 0x83b   : > { %v15024_v49 = vcombine.high %v9013_v25, %v9017_v36  ;;  %v15023_v14 = vcombine.low %v9013_v25, %v9017_v36  ;;  %v9068_v36 = vld [vmem:[#allocation12 + $0xc90] sm:$0xff] }
 0x83c   : > { %12227 = vmatpush1.bf16.msra.mxu0 %v14965_v3  ;;  %v9024_v3 = vld [vmem:[#allocation12 + $0xb30] sm:$0xff] }
 0x83d   : > { %12391 = vmatpush1.bf16.msra.mxu1 %v14967_v7  ;;  %12228 = vmatprep.subr.bf16.mxu0 %v14974_v50  ;;  %v9021_v7 = vld [vmem:[#allocation12 + $0xb18] sm:$0xff]  ;;  %v15030_v15 = vcombine.high %v9020_v63, %v9024_v3 }
 0x83e   : > { %12392 = vmatprep.subr.bf16.mxu1 %v14976_v13  ;;  %v9025_v50 = vld [vmem:[#allocation12 + $0xb38] sm:$0xff]  ;;  %v15021_v13 = vcombine.low %v9012_v6, %v9016_v47 }
 0x83f   : > { %v15032_v16 = vcombine.high %v9021_v7, %v9025_v50  ;;  %v15031_v26 = vcombine.low %v9021_v7, %v9025_v50  ;;  %v9076_v50 = vld [vmem:[#allocation12 + $0xcd0] sm:$0xff] }
 0x840   : > { %12229 = vmatpush1.bf16.msra.mxu0 %v14973_v41  ;;  %v9032_v41 = vld [vmem:[#allocation12 + $0xb70] sm:$0xff] }
 0x841   : > { %12393 = vmatpush1.bf16.msra.mxu1 %v14975_v46  ;;  %12230 = vmatprep.subr.bf16.mxu0 %v14982_v18  ;;  %v9029_v46 = vld [vmem:[#allocation12 + $0xb58] sm:$0xff]  ;;  %v15038_v21 = vcombine.high %v9028_v17, %v9032_v41 }
 0x842   : > { %12394 = vmatprep.subr.bf16.mxu1 %v14984_v19  ;;  %v9033_v18 = vld [vmem:[#allocation12 + $0xb78] sm:$0xff]  ;;  %v15029_v19 = vcombine.low %v9020_v63, %v9024_v3 }
 0x843   : > { %v15040_v29 = vcombine.high %v9029_v46, %v9033_v18  ;;  %v15039_v38 = vcombine.low %v9029_v46, %v9033_v18  ;;  %v9084_v46 = vld [vmem:[#allocation12 + $0xd10] sm:$0xff] }
 0x844   : > { %12231 = vmatpush1.bf16.msra.mxu0 %v14981_v30  ;;  %v9040_v30 = vld [vmem:[#allocation12 + $0xbb0] sm:$0xff] }
 0x845   : > { %12395 = vmatpush1.bf16.msra.mxu1 %v14983_v31  ;;  %12232 = vmatprep.subr.bf16.mxu0 %v14990_v32  ;;  %v9037_v31 = vld [vmem:[#allocation12 + $0xb98] sm:$0xff]  ;;  %v15046_v48 = vcombine.high %v9036_v59, %v9040_v30  ;;  %v9088_v18 = vld [vmem:[#allocation12 + $0xd30] sm:$0xff] }
 0x846   : > { %12396 = vmatprep.subr.bf16.mxu1 %v14992_v1  ;;  %v9041_v32 = vld [vmem:[#allocation12 + $0xbb8] sm:$0xff]  ;;  %v15037_v1 = vcombine.low %v9028_v17, %v9032_v41 }
 0x847   : > { %v15048_v53 = vcombine.high %v9037_v31, %v9041_v32  ;;  %v15047_v60 = vcombine.low %v9037_v31, %v9041_v32  ;;  %v9096_v31 = vld [vmem:[#allocation12 + $0xd70] sm:$0xff]  ;;  %v9093_v32 = vld [vmem:[#allocation12 + $0xd58] sm:$0xff] }
 0x848   : > { %12233 = vmatpush1.bf16.msra.mxu0 %v14989_v52  ;;  %v9048_v52 = vld [vmem:[#allocation12 + $0xbf0] sm:$0xff] }
 0x849   : > { %12397 = vmatpush1.bf16.msra.mxu1 %v14991_v34  ;;  %12234 = vmatprep.subr.bf16.mxu0 %v14998_v35  ;;  %v9045_v34 = vld [vmem:[#allocation12 + $0xbd8] sm:$0xff]  ;;  %v15054_v39 = vcombine.high %v9044_v51, %v9048_v52 }
 0x84a   : > { %12398 = vmatprep.subr.bf16.mxu1 %v15000_v2  ;;  %v9049_v35 = vld [vmem:[#allocation12 + $0xbf8] sm:$0xff]  ;;  %v15045_v2 = vcombine.low %v9036_v59, %v9040_v30  ;;  %v15094_v59 = vcombine.high %v9084_v46, %v9088_v18  ;;  %v9092_v30 = vld [vmem:[#allocation12 + $0xd50] sm:$0xff] }
 0x84b   : > { %v15056_v45 = vcombine.high %v9045_v34, %v9049_v35  ;;  %v15055_v55 = vcombine.low %v9045_v34, %v9049_v35  ;;  %v9100_v34 = vld [vmem:[#allocation12 + $0xd90] sm:$0xff] }
 0x84c   : > { %12235 = vmatpush1.bf16.msra.mxu0 %v14997_v37  ;;  %v9056_v37 = vld [vmem:[#allocation12 + $0xc30] sm:$0xff] }
 0x84d   : > { %12399 = vmatpush1.bf16.msra.mxu1 %v14999_v33  ;;  %12236 = vmatprep.subr.bf16.mxu0 %v15006_v62  ;;  %v9053_v33 = vld [vmem:[#allocation12 + $0xc18] sm:$0xff]  ;;  %v15062_v56 = vcombine.high %v9052_v0, %v9056_v37  ;;  %v9104_v35 = vld [vmem:[#allocation12 + $0xdb0] sm:$0xff] }
 0x84e   : > { %12400 = vmatprep.subr.bf16.mxu1 %v15008_v54  ;;  %v9057_v62 = vld [vmem:[#allocation12 + $0xc38] sm:$0xff]  ;;  %v15053_v54 = vcombine.low %v9044_v51, %v9048_v52  ;;  %v15102_v51 = vcombine.high %v9092_v30, %v9096_v31 }
 0x84f   : > { %v15064_v42 = vcombine.high %v9053_v33, %v9057_v62  ;;  %v15063_v6 = vcombine.low %v9053_v33, %v9057_v62 }
 0x850   : > { %12237 = vmatpush1.bf16.msra.mxu0 %v15005_v4  ;;  %v9064_v4 = vld [vmem:[#allocation12 + $0xc70] sm:$0xff] }
 0x851   : > { %12401 = vmatpush1.bf16.msra.mxu1 %v15007_v57  ;;  %12238 = vmatprep.subr.bf16.mxu0 %v15014_v58  ;;  %v9061_v57 = vld [vmem:[#allocation12 + $0xc58] sm:$0xff]  ;;  %v15070_v47 = vcombine.high %v9060_v9, %v9064_v4 }
 0x852   : > { %12402 = vmatprep.subr.bf16.mxu1 %v15016_v43  ;;  %v9065_v58 = vld [vmem:[#allocation12 + $0xc78] sm:$0xff]  ;;  %v15061_v43 = vcombine.low %v9052_v0, %v9056_v37  ;;  %v15101_v37 = vcombine.low %v9092_v30, %v9096_v31 }
 0x853   : > { %v15072_v25 = vcombine.high %v9061_v57, %v9065_v58  ;;  %v15071_v63 = vcombine.low %v9061_v57, %v9065_v58  ;;  %v9109_v57 = vld [vmem:[#allocation12 + $0xdd8] sm:$0xff] }
 0x854   : > { %12239 = vmatpush1.bf16.msra.mxu0 %v15013_v23  ;;  %v9072_v23 = vld [vmem:[#allocation12 + $0xcb0] sm:$0xff]  ;;  %v9113_v58 = vld [vmem:[#allocation12 + $0xdf8] sm:$0xff] }
 0x855   : > { %12403 = vmatpush1.bf16.msra.mxu1 %v15015_v8  ;;  %12240 = vmatprep.subr.bf16.mxu0 %v15022_v61  ;;  %v9069_v8 = vld [vmem:[#allocation12 + $0xc98] sm:$0xff]  ;;  %v15078_v3 = vcombine.high %v9068_v36, %v9072_v23 }
 0x856   : > { %12404 = vmatprep.subr.bf16.mxu1 %v15024_v49  ;;  %v9073_v61 = vld [vmem:[#allocation12 + $0xcb8] sm:$0xff]  ;;  %v15069_v49 = vcombine.low %v9060_v9, %v9064_v4 }
 0x857   : > { %v15080_v7 = vcombine.high %v9069_v8, %v9073_v61  ;;  %v9133_v30 = vld [vmem:[#allocation12 + $0xe98] sm:$0xff] }
 0x858   : > { %12241 = vmatpush1.bf16.msra.mxu0 %v15021_v13  ;;  %v9080_v13 = vld [vmem:[#allocation12 + $0xcf0] sm:$0xff]  ;;  %v9137_v31 = vld [vmem:[#allocation12 + $0xeb8] sm:$0xff] }
 0x859   : > { %12405 = vmatpush1.bf16.msra.mxu1 %v15023_v14  ;;  %12242 = vmatprep.subr.bf16.mxu0 %v15030_v15  ;;  %v9077_v14 = vld [vmem:[#allocation12 + $0xcd8] sm:$0xff]  ;;  %v15086_v17 = vcombine.high %v9076_v50, %v9080_v13 }
 0x85a   : > { %12406 = vmatprep.subr.bf16.mxu1 %v15032_v16  ;;  %v9081_v15 = vld [vmem:[#allocation12 + $0xcf8] sm:$0xff]  ;;  %v15077_v16 = vcombine.low %v9068_v36, %v9072_v23 }
 0x85b   : > { %v15088_v41 = vcombine.high %v9077_v14, %v9081_v15 }
 0x85c   : > { %12243 = vmatpush1.bf16.msra.mxu0 %v15029_v19  ;;  %v9085_v19 = vld [vmem:[#allocation12 + $0xd18] sm:$0xff] }
 0x85d   : > { %12407 = vmatpush1.bf16.msra.mxu1 %v15031_v26  ;;  %12244 = vmatprep.subr.bf16.mxu0 %v15038_v21  ;;  %v9089_v26 = vld [vmem:[#allocation12 + $0xd38] sm:$0xff]  ;;  %v15085_v21 = vcombine.low %v9076_v50, %v9080_v13 }
 0x85e   : > { %12408 = vmatprep.subr.bf16.mxu1 %v15040_v29  ;;  %v15087_v29 = vcombine.low %v9077_v14, %v9081_v15  ;;  %v9117_v50 = vld [vmem:[#allocation12 + $0xe18] sm:$0xff]  ;;  %v15119_v15 = vcombine.low %v9109_v57, %v9113_v58 }
 0x85f   : > { %v9121_v13 = vld [vmem:[#allocation12 + $0xe38] sm:$0xff] }
 0x860   : > { %12245 = vmatpush1.bf16.msra.mxu0 %v15037_v1  ;;  %v9097_v1 = vld [vmem:[#allocation12 + $0xd78] sm:$0xff] }
 0x861   : > { %12409 = vmatpush1.bf16.msra.mxu1 %v15039_v38  ;;  %12246 = vmatprep.subr.bf16.mxu0 %v15046_v48  ;;  %v15093_v38 = vcombine.low %v9084_v46, %v9088_v18  ;;  %v17788_v48 = vld [vmem:[#allocation14] sm:$0xff]  ;;  %v15104_v52 = vcombine.high %v9093_v32, %v9097_v1  ;;  %v15103_v62 = vcombine.low %v9093_v32, %v9097_v1  ;;  %v9125_v46 = vld [vmem:[#allocation12 + $0xe58] sm:$0xff] }
 0x862   : > { %12410 = vmatprep.subr.bf16.mxu1 %v15048_v53  ;;  %v15095_v53 = vcombine.low %v9085_v19, %v9089_v26  ;;  %v9187_v0 = vrot.slane %v17788_v48, %v17007_v11  ;;  %v9195_v33 = vrot.slane %v17788_v48, %v17010_v12  ;;  %v9129_v18 = vld [vmem:[#allocation12 + $0xe78] sm:$0xff] }
 0x863   : > { %v15135_v1 = vcombine.low %v9125_v46, %v9129_v18 }
 0x864   : > { %12247 = vmatpush1.bf16.msra.mxu0 %v15045_v2  ;;  %v9183_v2 = vrot.slane %v17788_v48, %v16996_v5 }
 0x865   : > { %12411 = vmatpush1.bf16.msra.mxu1 %v15047_v60  ;;  %12248 = vmatprep.subr.bf16.mxu0 %v15054_v39  ;;  %v9101_v60 = vld [vmem:[#allocation12 + $0xd98] sm:$0xff] }
 0x866   : > { %12412 = vmatprep.subr.bf16.mxu1 %v15056_v45  ;;  %v9105_v39 = vld [vmem:[#allocation12 + $0xdb8] sm:$0xff]  ;;  %v9191_v45 = vrot.slane %v17788_v48, %v17004_v10 }
 0x867   : > { %v15112_v5 = vcombine.high %v9101_v60, %v9105_v39 }
 0x868   : > { %12249 = vmatpush1.bf16.msra.mxu0 %v15053_v54  ;;  %v15110_v54 = vcombine.high %v9100_v34, %v9104_v35 }
 0x869   : > { %12413 = vmatpush1.bf16.msra.mxu1 %v15055_v55  ;;  %12259 = vmatprep.subr.bf16.mxu0 %v15062_v56  ;;  %v9108_v56 = vld [vmem:[#allocation12 + $0xdd0] sm:$0xff] }
 0x86a   : > { %12423 = vmatprep.subr.bf16.mxu1 %v15064_v42  ;;  %v9112_v42 = vld [vmem:[#allocation12 + $0xdf0] sm:$0xff] }
 0x86b   : > { %12251 = vmatmul.mubr.bf16.vlgmr.msra.gmra.mrb[4].mxu0 %v17756_v44  ;;  %v15117_v14 = vcombine.low %v9108_v56, %v9112_v42 }
 0x86c   : > { %12260 = vmatpush1.bf16.msra.mxu0 %v15061_v43  ;;  %12415 = vmatmul.mubr.bf16.vlgmr.msra.gmra.mrb[4].mxu1 %v17756_v44  ;;  %v15079_v44 = vcombine.low %v9069_v8, %v9073_v61  ;;  %v15111_v8 = vcombine.low %v9101_v60, %v9105_v39  ;;  %v15118_v61 = vcombine.high %v9108_v56, %v9112_v42  ;;  %v9156_v42 = vld [vmem:[#allocation12 + $0xf50] sm:$0xff] }
 0x86d   : > { %12424 = vmatpush1.bf16.msra.mxu1 %v15063_v6  ;;  %12261 = vmatprep.subr.bf16.mxu0 %v15070_v47  ;;  %v15109_v47 = vcombine.low %v9100_v34, %v9104_v35  ;;  %v9141_v34 = vld [vmem:[#allocation12 + $0xed8] sm:$0xff]  ;;  %v15143_v60 = vcombine.low %v9133_v30, %v9137_v31 }
 0x86e   : > { %12425 = vmatprep.subr.bf16.mxu1 %v15072_v25  ;;  %12291 = vmatprep.mubr.bf16.mxu0 %v17762_v40  ;;  %v9145_v35 = vld [vmem:[#allocation12 + $0xef8] sm:$0xff] }
 0x86f   : > { %12455 = vmatprep.mubr.bf16.mxu1 %v17762_v40  ;;  %v15096_v40 = vcombine.high %v9085_v19, %v9089_v26  ;;  %v15127_v26 = vcombine.low %v9117_v50, %v9121_v13 }
 0x870   : > { %12262 = vmatpush1.bf16.msra.mxu0 %v15069_v49 }
 0x871   : > { %12426 = vmatpush1.bf16.msra.mxu1 %v15071_v63  ;;  %12263 = vmatprep.subr.bf16.mxu0 %v15078_v3  ;;  %v15120_v63 = vcombine.high %v9109_v57, %v9113_v58  ;;  %v9116_v3 = vld [vmem:[#allocation12 + $0xe10] sm:$0xff]  ;;  %v9161_v57 = vld [vmem:[#allocation12 + $0xf78] sm:$0xff] }
 0x872   : > { %12427 = vmatprep.subr.bf16.mxu1 %v15080_v7  ;;  %v9120_v7 = vld [vmem:[#allocation12 + $0xe30] sm:$0xff] }
 0x873   : > { %v15125_v19 = vcombine.low %v9116_v3, %v9120_v7 }
 0x874   : > { %12264 = vmatpush1.bf16.msra.mxu0 %v15077_v16  ;;  %v15126_v16 = vcombine.high %v9116_v3, %v9120_v7 }
 0x875   : > { %12428 = vmatpush1.bf16.msra.mxu1 %v15079_v44  ;;  %12265 = vmatprep.subr.bf16.mxu0 %v15086_v17  ;;  %v15128_v44 = vcombine.high %v9117_v50, %v9121_v13  ;;  %v9124_v17 = vld [vmem:[#allocation12 + $0xe50] sm:$0xff] }
 0x876   : > { %12429 = vmatprep.subr.bf16.mxu1 %v15088_v41  ;;  %v9128_v41 = vld [vmem:[#allocation12 + $0xe70] sm:$0xff] }
 0x877   : > { %v15133_v32 = vcombine.low %v9124_v17, %v9128_v41  ;;  %v9172_v50 = vld [vmem:[#allocation12 + $0xfd0] sm:$0xff] }
 0x878   : > { %12266 = vmatpush1.bf16.msra.mxu0 %v15085_v21  ;;  %v15134_v21 = vcombine.high %v9124_v17, %v9128_v41  ;;  %v9176_v13 = vld [vmem:[#allocation12 + $0xff0] sm:$0xff] }
 0x879   : > { %12430 = vmatpush1.bf16.msra.mxu1 %v15087_v29  ;;  %12267 = vmatprep.subr.bf16.mxu0 %v15094_v59  ;;  %v15136_v29 = vcombine.high %v9125_v46, %v9129_v18  ;;  %v9132_v59 = vld [vmem:[#allocation12 + $0xe90] sm:$0xff]  ;;  %v15182_v17 = vcombine.high %v9172_v50, %v9176_v13  ;;  %v12496_v46 = vld [vmem:[%s18291_s23 + $0x80] sm:$0xff]  ;;  %v12497_v18 = vld [vmem:[%s18292_s13 + $0x88] sm:$0xff] }
 0x87a   : > { %12431 = vmatprep.subr.bf16.mxu1 %v15096_v40  ;;  %v9136_v40 = vld [vmem:[#allocation12 + $0xeb0] sm:$0xff] }
 0x87c   : > { %12268 = vmatpush1.bf16.msra.mxu0 %v15093_v38  ;;  %v15142_v38 = vcombine.high %v9132_v59, %v9136_v40 }
 0x87d   : > { %12432 = vmatpush1.bf16.msra.mxu1 %v15095_v53  ;;  %12269 = vmatprep.subr.bf16.mxu0 %v15102_v51  ;;  %v15144_v53 = vcombine.high %v9133_v30, %v9137_v31  ;;  %v9140_v51 = vld [vmem:[#allocation12 + $0xed0] sm:$0xff]  ;;  %v12481_v30 = vld [vmem:[%s18292_s13 + $0x8] sm:$0xff] }
 0x87e   : > { %v11965_v55 = vpop.f32.mrb[0].mxu0  ;;  %12433 = vmatprep.subr.bf16.mxu1 %v15104_v52  ;;  %v9144_v52 = vld [vmem:[#allocation12 + $0xef0] sm:$0xff] }
 0x87f   : > { %v17798_v9 = vadd.f32 %v11965_v55, %v9183_v2  ;;  %v12129_v4 = vpop.f32.mrb[0].mxu1  ;;  %v11967_v10 = vpop.f32.mrb[1].mxu0  ;;  %v15141_v2 = vcombine.low %v9132_v59, %v9136_v40  ;;  %v15150_v39 = vcombine.high %v9140_v51, %v9144_v52  ;;  %v15151_v55 = vcombine.low %v9141_v34, %v9145_v35  ;;  %v12480_v40 = vld [vmem:[%s18292_s13] sm:$0xff] }
 0x880   : > { %v17800_v11 = vadd.f32 %v12129_v4, %v9191_v45  ;;  %v17802_v43 = vadd.f32 %v11967_v10, %v9187_v0  ;;  %v12131_v6 = vpop.f32.mrb[1].mxu1  ;;  %v11969_v12 = vpop.f32.mrb[2].mxu0  ;;  %12270 = vmatpush1.bf16.msra.mxu0 %v15101_v37  ;;  %v15152_v45 = vcombine.high %v9141_v34, %v9145_v35  ;;  %v9148_v0 = vld [vmem:[#allocation12 + $0xf10] sm:$0xff]  ;;  %v9157_v10 = vld [vmem:[#allocation12 + $0xf58] sm:$0xff]  ;;  %v15369_v59 = vpack.c.bf16 %v12497_v18, %v12496_v46  ;;  %v12489_v18 = vld [vmem:[%s18292_s13 + $0x48] sm:$0xff] }
 0x881   : > { %12464 = vst [vmem:[%s18290_s30] sm:$0xff] %v17798_v9  ;;  %v17808_v25 = vadd.f32 %v12131_v6, %v9195_v33  ;;  %v12133_v36 = vpop.f32.mrb[2].mxu1  ;;  %12434 = vmatpush1.bf16.msra.mxu1 %v15103_v62  ;;  %v11970_v23 = vpop.f32.mrb[3].mxu0  ;;  %12271 = vmatprep.subr.bf16.mxu0 %v15110_v54  ;;  %v9152_v37 = vld [vmem:[#allocation12 + $0xf30] sm:$0xff]  ;;  %v9149_v33 = vld [vmem:[#allocation12 + $0xf18] sm:$0xff]  ;;  %v15149_v54 = vcombine.low %v9140_v51, %v9144_v52 }
 0x882   : > { %12466 = vst [vmem:[%s18290_s30 + $0x10] sm:$0xff] %v17800_v11  ;;  %12465 = vst [vmem:[%s18290_s30 + $0x8] sm:$0xff] %v17802_v43  ;;  %v12134_v49 = vpop.f32.mrb[3].mxu1  ;;  %12435 = vmatprep.subr.bf16.mxu1 %v15112_v5  ;;  %v9153_v62 = vld [vmem:[#allocation12 + $0xf38] sm:$0xff]  ;;  %v15158_v5 = vcombine.high %v9148_v0, %v9152_v37  ;;  %v9160_v4 = vld [vmem:[#allocation12 + $0xf70] sm:$0xff]  ;;  %v15157_v58 = vcombine.low %v9148_v0, %v9152_v37  ;;  %v15371_v51 = vpack.c.bf16 %v12481_v30, %v12480_v40 }
 0x883   : > { %12467 = vst [vmem:[%s18290_s30 + $0x18] sm:$0xff] %v17808_v25  ;;  %v15160_v56 = vcombine.high %v9149_v33, %v9153_v62  ;;  %v15159_v6 = vcombine.low %v9149_v33, %v9153_v62  ;;  %v15166_v12 = vcombine.high %v9156_v42, %v9160_v4  ;;  %v9164_v36 = vld [vmem:[#allocation12 + $0xf90] sm:$0xff]  ;;  %v15165_v49 = vcombine.low %v9156_v42, %v9160_v4  ;;  %v12500_v37 = vld [vmem:[%s18292_s13 + $0xa0] sm:$0xff]  ;;  %v12501_v33 = vld [vmem:[%s18292_s13 + $0xa8] sm:$0xff] }
 0x884   : > { %12272 = vmatpush1.bf16.msra.mxu0 %v15109_v47  ;;  %v15168_v47 = vcombine.high %v9157_v10, %v9161_v57  ;;  %v9168_v23 = vld [vmem:[#allocation12 + $0xfb0] sm:$0xff]  ;;  %v12473_v62 = vmax.f32 %v17802_v43, 0.0  ;;  %v15377_v4 = vpack.c.bf16 %v12501_v33, %v12500_v37  ;;  %v12488_v46 = vld [vmem:[%s18292_s13 + $0x40] sm:$0xff] }
 0x885   : > { %12436 = vmatpush1.bf16.msra.mxu1 %v15111_v8  ;;  %12273 = vmatprep.subr.bf16.mxu0 %v15118_v61  ;;  %v9165_v8 = vld [vmem:[#allocation12 + $0xf98] sm:$0xff]  ;;  %v15174_v3 = vcombine.high %v9164_v36, %v9168_v23  ;;  %v12530_v52 = vld [vmem:[%s18292_s13 + $0x190] sm:$0xff] }
 0x886   : > { %12437 = vmatprep.subr.bf16.mxu1 %v15120_v63  ;;  %v9169_v61 = vld [vmem:[#allocation12 + $0xfb8] sm:$0xff]  ;;  %v15167_v63 = vcombine.low %v9157_v10, %v9161_v57  ;;  %v12485_v57 = vld [vmem:[%s18292_s13 + $0x28] sm:$0xff]  ;;  %v12538_v40 = vld [vmem:[%s18292_s13 + $0x1d0] sm:$0xff] }
 0x887   : > { %v15176_v7 = vcombine.high %v9165_v8, %v9169_v61  ;;  %v12531_v34 = vld [vmem:[%s18292_s13 + $0x198] sm:$0xff]  ;;  %v12484_v10 = vld [vmem:[%s18292_s13 + $0x20] sm:$0xff] }
 0x888   : > { %12274 = vmatpush1.bf16.msra.mxu0 %v15117_v14  ;;  %v9173_v14 = vld [vmem:[#allocation12 + $0xfd8] sm:$0xff] }
 0x889   : > { %12438 = vmatpush1.bf16.msra.mxu1 %v15119_v15  ;;  %12275 = vmatprep.subr.bf16.mxu0 %v15126_v16  ;;  %v9177_v15 = vld [vmem:[#allocation12 + $0xff8] sm:$0xff]  ;;  %v15173_v16 = vcombine.low %v9164_v36, %v9168_v23  ;;  %v15379_v23 = vpack.c.bf16 %v12485_v57, %v12484_v10 }
 0x88a   : > { %12439 = vmatprep.subr.bf16.mxu1 %v15128_v44  ;;  %v15175_v44 = vcombine.low %v9165_v8, %v9169_v61  ;;  %v15184_v41 = vcombine.high %v9173_v14, %v9177_v15  ;;  %v12515_v0 = vld [vmem:[%s18292_s13 + $0x118] sm:$0xff]  ;;  %v12492_v33 = vld [vmem:[%s18292_s13 + $0x60] sm:$0xff] }
 0x88b   : > { %v12535_v36 = vld [vmem:[%s18292_s13 + $0x1b8] sm:$0xff] }
 0x88c   : > { %12276 = vmatpush1.bf16.msra.mxu0 %v15125_v19  ;;  %v12528_v19 = vld [vmem:[%s18292_s13 + $0x180] sm:$0xff]  ;;  %v12539_v30 = vld [vmem:[%s18292_s13 + $0x1d8] sm:$0xff] }
 0x88d   : > { %12440 = vmatpush1.bf16.msra.mxu1 %v15127_v26  ;;  %12277 = vmatprep.subr.bf16.mxu0 %v15134_v21  ;;  %v12529_v26 = vld [vmem:[%s18292_s13 + $0x188] sm:$0xff]  ;;  %v15181_v21 = vcombine.low %v9172_v50, %v9176_v13  ;;  %v12519_v50 = vld [vmem:[%s18292_s13 + $0x138] sm:$0xff]  ;;  %v12504_v13 = vld [vmem:[%s18292_s13 + $0xc0] sm:$0xff] }
 0x88e   : > { %12441 = vmatprep.subr.bf16.mxu1 %v15136_v29  ;;  %v15183_v29 = vcombine.low %v9173_v14, %v9177_v15  ;;  %v15401_v31 = vpack.c.bf16 %v12529_v26, %v12528_v19  ;;  %v12505_v14 = vld [vmem:[%s18292_s13 + $0xc8] sm:$0xff]  ;;  %v12536_v15 = vld [vmem:[%s18292_s13 + $0x1c0] sm:$0xff] }
 0x88f   : > { %v12520_v19 = vld [vmem:[%s18292_s13 + $0x140] sm:$0xff] }
 0x890   : > { %12278 = vmatpush1.bf16.msra.mxu0 %v15133_v32  ;;  %v12512_v32 = vld [vmem:[%s18292_s13 + $0x100] sm:$0xff] }
 0x891   : > { %12442 = vmatpush1.bf16.msra.mxu1 %v15135_v1  ;;  %12279 = vmatprep.subr.bf16.mxu0 %v15142_v38  ;;  %v12513_v1 = vld [vmem:[%s18292_s13 + $0x108] sm:$0xff]  ;;  %v12498_v38 = vld [vmem:[%s18292_s13 + $0x90] sm:$0xff] }
 0x892   : > { %12443 = vmatprep.subr.bf16.mxu1 %v15144_v53  ;;  %v12499_v53 = vld [vmem:[%s18292_s13 + $0x98] sm:$0xff]  ;;  %v15403_v35 = vpack.c.bf16 %v12513_v1, %v12512_v32 }
 0x894   : > { %12280 = vmatpush1.bf16.msra.mxu0 %v15141_v2  ;;  %v12482_v2 = vld [vmem:[%s18292_s13 + $0x10] sm:$0xff] }
 0x895   : > { %12444 = vmatpush1.bf16.msra.mxu1 %v15143_v60  ;;  %12281 = vmatprep.subr.bf16.mxu0 %v15150_v39  ;;  %v12483_v60 = vld [vmem:[%s18292_s13 + $0x18] sm:$0xff]  ;;  %v12514_v39 = vld [vmem:[%s18292_s13 + $0x110] sm:$0xff] }
 0x896   : > { %12445 = vmatprep.subr.bf16.mxu1 %v15152_v45  ;;  %v15373_v45 = vpack.c.bf16 %v12499_v53, %v12498_v38  ;;  %v15375_v42 = vpack.c.bf16 %v12483_v60, %v12482_v2  ;;  %v15407_v43 = vpack.c.bf16 %v12515_v0, %v12514_v39  ;;  %v12490_v38 = vld [vmem:[%s18292_s13 + $0x50] sm:$0xff]  ;;  %v12491_v53 = vld [vmem:[%s18292_s13 + $0x58] sm:$0xff]  ;;  %v12509_v2 = vld [vmem:[%s18292_s13 + $0xe8] sm:$0xff] }
 0x897   : > { %v12540_v60 = vld [vmem:[%s18292_s13 + $0x1e0] sm:$0xff]  ;;  %v12541_v39 = vld [vmem:[%s18292_s13 + $0x1e8] sm:$0xff] }
 0x898   : > { %12282 = vmatpush1.bf16.msra.mxu0 %v15149_v54  ;;  %v15405_v54 = vpack.c.bf16 %v12531_v34, %v12530_v52  ;;  %v15421_v52 = vpack.c.bf16 %v12539_v30, %v12538_v40  ;;  %v12523_v34 = vld [vmem:[%s18292_s13 + $0x158] sm:$0xff]  ;;  %v12474_v40 = vmax.f32 %v17800_v11, 0.0  ;;  %v12597_v11 = vld [vmem:[%s18292_s13 + $0x3a8] sm:$0xff] }
 0x899   : > { %12446 = vmatpush1.bf16.msra.mxu1 %v15151_v55  ;;  %12283 = vmatprep.subr.bf16.mxu0 %v15158_v5  ;;  %v12532_v55 = vld [vmem:[%s18292_s13 + $0x1a0] sm:$0xff]  ;;  %v12533_v5 = vld [vmem:[%s18292_s13 + $0x1a8] sm:$0xff]  ;;  %v12579_v30 = vld [vmem:[%s18292_s13 + $0x318] sm:$0xff] }
 0x89a   : > { %12447 = vmatprep.subr.bf16.mxu1 %v15160_v56  ;;  %v12475_v56 = vmax.f32 %v17808_v25, 0.0  ;;  %v12516_v25 = vld [vmem:[%s18292_s13 + $0x120] sm:$0xff] }
 0x89c   : > { %12284 = vmatpush1.bf16.msra.mxu0 %v15157_v58  ;;  %v12517_v58 = vld [vmem:[%s18292_s13 + $0x128] sm:$0xff] }
 0x89d   : > { %12448 = vmatpush1.bf16.msra.mxu1 %v15159_v6  ;;  %12285 = vmatprep.subr.bf16.mxu0 %v15166_v12  ;;  %v12502_v6 = vld [vmem:[%s18292_s13 + $0xb0] sm:$0xff]  ;;  %v12503_v12 = vld [vmem:[%s18292_s13 + $0xb8] sm:$0xff]  ;;  %v15411_v8 = vpack.c.bf16 %v12517_v58, %v12516_v25 }
 0x89e   : > { %12449 = vmatprep.subr.bf16.mxu1 %v15168_v47  ;;  %v12534_v47 = vld [vmem:[%s18292_s13 + $0x1b0] sm:$0xff]  ;;  %v15381_v61 = vpack.c.bf16 %v12503_v12, %v12502_v6  ;;  %v12495_v58 = vld [vmem:[%s18292_s13 + $0x78] sm:$0xff] }
 0x89f   : > { %v12526_v6 = vld [vmem:[%s18292_s13 + $0x170] sm:$0xff] }
 0x8a0   : > { %12286 = vmatpush1.bf16.msra.mxu0 %v15165_v49  ;;  %v12486_v49 = vld [vmem:[%s18292_s13 + $0x30] sm:$0xff] }
 0x8a1   : > { %12450 = vmatpush1.bf16.msra.mxu1 %v15167_v63  ;;  %12287 = vmatprep.subr.bf16.mxu0 %v15174_v3  ;;  %v12487_v63 = vld [vmem:[%s18292_s13 + $0x38] sm:$0xff]  ;;  %v12518_v3 = vld [vmem:[%s18292_s13 + $0x130] sm:$0xff] }
 0x8a2   : > { %12451 = vmatprep.subr.bf16.mxu1 %v15176_v7  ;;  %v15413_v7 = vpack.c.bf16 %v12535_v36, %v12534_v47  ;;  %v12527_v47 = vld [vmem:[%s18292_s13 + $0x178] sm:$0xff]  ;;  %v12560_v36 = vld [vmem:[%s18292_s13 + $0x280] sm:$0xff] }
 0x8a4   : > { %12288 = vmatpush1.bf16.msra.mxu0 %v15173_v16  ;;  %v12537_v16 = vld [vmem:[%s18292_s13 + $0x1c8] sm:$0xff] }
 0x8a5   : > { %12452 = vmatpush1.bf16.msra.mxu1 %v15175_v44  ;;  %12289 = vmatprep.subr.bf16.mxu0 %v15182_v17  ;;  %v15383_v44 = vpack.c.bf16 %v12487_v63, %v12486_v49  ;;  %v15415_v17 = vpack.c.bf16 %v12519_v50, %v12518_v3  ;;  %v15417_v26 = vpack.c.bf16 %v12537_v16, %v12536_v15  ;;  %v12545_v50 = vld [vmem:[%s18292_s13 + $0x208] sm:$0xff]  ;;  %v12562_v16 = vld [vmem:[%s18292_s13 + $0x290] sm:$0xff] }
 0x8a6   : > { %12453 = vmatprep.subr.bf16.mxu1 %v15184_v41  ;;  %v15385_v41 = vpack.c.bf16 %v12505_v14, %v12504_v13  ;;  %v15431_v63 = vpack.c.bf16 %v12527_v47, %v12526_v6  ;;  %v12576_v13 = vld [vmem:[%s18292_s13 + $0x300] sm:$0xff]  ;;  %v12577_v15 = vld [vmem:[%s18292_s13 + $0x308] sm:$0xff] }
 0x8a7   : > { %v12553_v47 = vld [vmem:[%s18292_s13 + $0x248] sm:$0xff] }
 0x8a8   : > { %12290 = vmatpush1.bf16.msra.mxu0 %v15181_v21  ;;  %v12521_v21 = vld [vmem:[%s18292_s13 + $0x148] sm:$0xff] }
 0x8a9   : > { %12454 = vmatpush1.bf16.msra.mxu1 %v15183_v29  ;;  %15370 = vmatprep.subr.bf16.mxu0 %v15369_v59  ;;  %v12506_v29 = vld [vmem:[%s18292_s13 + $0xd0] sm:$0xff]  ;;  %v12507_v59 = vld [vmem:[%s18292_s13 + $0xd8] sm:$0xff]  ;;  %v15419_v32 = vpack.c.bf16 %v12521_v21, %v12520_v19  ;;  %v15467_v19 = vpack.c.bf16 %v12577_v15, %v12576_v13 }
 0x8aa   : > { %15402 = vmatprep.subr.bf16.mxu1 %v15401_v31  ;;  %v15387_v31 = vpack.c.bf16 %v12489_v18, %v12488_v46  ;;  %v15389_v1 = vpack.c.bf16 %v12507_v59, %v12506_v29  ;;  %v12472_v18 = vmax.f32 %v17798_v9, 0.0  ;;  %v12546_v21 = vld [vmem:[%s18292_s13 + $0x210] sm:$0xff]  ;;  %v12547_v29 = vld [vmem:[%s18292_s13 + $0x218] sm:$0xff] }
 0x8ab   : > { %12292 = vmatmul.mubr.bf16.vlgmr.msra.gmra.mrb[4].mxu0 %v17770_v20  ;;  %v12578_v59 = vld [vmem:[%s18292_s13 + $0x310] sm:$0xff]  ;;  %v12555_v15 = vld [vmem:[%s18292_s13 + $0x258] sm:$0xff] }
 0x8ac   : > { %12456 = vmatmul.mubr.bf16.vlgmr.msra.gmra.mrb[4].mxu1 %v17770_v20  ;;  %15372 = vmatpush3.bf16.msra.mxu0 %v15371_v51  ;;  %v15409_v20 = vpack.c.bf16 %v12533_v5, %v12532_v55  ;;  %v12522_v51 = vld [vmem:[%s18292_s13 + $0x150] sm:$0xff]  ;;  %v15425_v55 = vpack.c.bf16 %v12541_v39, %v12540_v60  ;;  %v12525_v5 = vld [vmem:[%s18292_s13 + $0x168] sm:$0xff] }
 0x8ad   : > { %12679 = vmatprep.mubr.f32.mxu0 %v12473_v62  ;;  %15404 = vmatpush3.bf16.msra.mxu1 %v15403_v35  ;;  %v12508_v35 = vld [vmem:[%s18292_s13 + $0xe0] sm:$0xff]  ;;  %v15423_v0 = vpack.c.bf16 %v12523_v34, %v12522_v51  ;;  %v12493_v62 = vld [vmem:[%s18292_s13 + $0x68] sm:$0xff]  ;;  %v12566_v39 = vld [vmem:[%s18292_s13 + $0x2b0] sm:$0xff] }
 0x8ae   : > { %12749 = vmatprep.mubr.f32.mxu1 %v12475_v56  ;;  %15374 = vmatprep.subr.bf16.mxu0 %v15373_v45  ;;  %v15391_v45 = vpack.c.bf16 %v12491_v53, %v12490_v38  ;;  %v15393_v37 = vpack.c.bf16 %v12509_v2, %v12508_v35  ;;  %v12510_v56 = vld [vmem:[%s18292_s13 + $0xf0] sm:$0xff]  ;;  %v15395_v10 = vpack.c.bf16 %v12493_v62, %v12492_v33  ;;  %v12549_v34 = vld [vmem:[%s18292_s13 + $0x228] sm:$0xff]  ;;  %v12580_v35 = vld [vmem:[%s18292_s13 + $0x320] sm:$0xff] }
 0x8af   : > { %15406 = vmatprep.subr.bf16.mxu1 %v15405_v54  ;;  %v12524_v54 = vld [vmem:[%s18292_s13 + $0x160] sm:$0xff]  ;;  %v15439_v38 = vpack.c.bf16 %v12547_v29, %v12546_v21  ;;  %v15471_v53 = vpack.c.bf16 %v12579_v30, %v12578_v59  ;;  %v12581_v60 = vld [vmem:[%s18292_s13 + $0x328] sm:$0xff] }
 0x8b0   : > { %15376 = vmatpush3.bf16.msra.mxu0 %v15375_v42  ;;  %v12511_v42 = vld [vmem:[%s18292_s13 + $0xf8] sm:$0xff]  ;;  %v15427_v57 = vpack.c.bf16 %v12525_v5, %v12524_v54  ;;  %v15475_v62 = vpack.c.bf16 %v12581_v60, %v12580_v35  ;;  %v12588_v30 = vld [vmem:[%s18292_s13 + $0x360] sm:$0xff] }
 0x8b1   : > { %15408 = vmatpush3.bf16.msra.mxu1 %v15407_v43  ;;  %15378 = vmatprep.subr.bf16.mxu0 %v15377_v4  ;;  %v12542_v43 = vld [vmem:[%s18292_s13 + $0x1f0] sm:$0xff]  ;;  %v12543_v4 = vld [vmem:[%s18292_s13 + $0x1f8] sm:$0xff]  ;;  %v15397_v25 = vpack.c.bf16 %v12511_v42, %v12510_v56 }
 0x8b2   : > { %15410 = vmatprep.subr.bf16.mxu1 %v15409_v20  ;;  %v12494_v20 = vld [vmem:[%s18292_s13 + $0x70] sm:$0xff]  ;;  %v15429_v12 = vpack.c.bf16 %v12543_v4, %v12542_v43  ;;  %v12551_v5 = vld [vmem:[%s18292_s13 + $0x238] sm:$0xff]  ;;  %v12568_v4 = vld [vmem:[%s18292_s13 + $0x2c0] sm:$0xff] }
 0x8b3   : > { %v15399_v49 = vpack.c.bf16 %v12495_v58, %v12494_v20  ;;  %v12582_v56 = vld [vmem:[%s18292_s13 + $0x330] sm:$0xff]  ;;  %v12583_v43 = vld [vmem:[%s18292_s13 + $0x338] sm:$0xff] }
 0x8b4   : > { %15380 = vmatpush3.bf16.msra.mxu0 %v15379_v23  ;;  %v12561_v23 = vld [vmem:[%s18292_s13 + $0x288] sm:$0xff]  ;;  %v15479_v58 = vpack.c.bf16 %v12583_v43, %v12582_v56  ;;  %v12559_v35 = vld [vmem:[%s18292_s13 + $0x278] sm:$0xff] }
 0x8b5   : > { %15412 = vmatpush3.bf16.msra.mxu1 %v15411_v8  ;;  %15382 = vmatprep.subr.bf16.mxu0 %v15381_v61  ;;  %v12592_v8 = vld [vmem:[%s18292_s13 + $0x380] sm:$0xff]  ;;  %v12593_v61 = vld [vmem:[%s18292_s13 + $0x388] sm:$0xff]  ;;  %v15433_v3 = vpack.c.bf16 %v12561_v23, %v12560_v36 }
 0x8b6   : > { %15414 = vmatprep.subr.bf16.mxu1 %v15413_v7  ;;  %v12544_v7 = vld [vmem:[%s18292_s13 + $0x200] sm:$0xff]  ;;  %v15465_v14 = vpack.c.bf16 %v12593_v61, %v12592_v8  ;;  %v12585_v8 = vld [vmem:[%s18292_s13 + $0x348] sm:$0xff]  ;;  %v12570_v61 = vld [vmem:[%s18292_s13 + $0x2d0] sm:$0xff] }
 0x8b7   : > { %v15435_v46 = vpack.c.bf16 %v12545_v50, %v12544_v7  ;;  %v12584_v36 = vld [vmem:[%s18292_s13 + $0x340] sm:$0xff] }
 0x8b8   : > { %15384 = vmatpush3.bf16.msra.mxu0 %v15383_v44  ;;  %v12563_v44 = vld [vmem:[%s18292_s13 + $0x298] sm:$0xff]  ;;  %v15483_v50 = vpack.c.bf16 %v12585_v8, %v12584_v36 }
 0x8b9   : > { %15416 = vmatpush3.bf16.msra.mxu1 %v15415_v17  ;;  %15386 = vmatprep.subr.bf16.mxu0 %v15385_v41  ;;  %v12594_v17 = vld [vmem:[%s18292_s13 + $0x390] sm:$0xff]  ;;  %v12595_v41 = vld [vmem:[%s18292_s13 + $0x398] sm:$0xff] }
 0x8ba   : > { %15418 = vmatprep.subr.bf16.mxu1 %v15417_v26  ;;  %v15437_v26 = vpack.c.bf16 %v12563_v44, %v12562_v16  ;;  %v15469_v9 = vpack.c.bf16 %v12595_v41, %v12594_v17  ;;  %v12586_v16 = vld [vmem:[%s18292_s13 + $0x350] sm:$0xff]  ;;  %v12587_v17 = vld [vmem:[%s18292_s13 + $0x358] sm:$0xff]  ;;  %v12572_v41 = vld [vmem:[%s18292_s13 + $0x2e0] sm:$0xff] }
 0x8bb   : > { %v15487_v21 = vpack.c.bf16 %v12587_v17, %v12586_v16 }
 0x8bc   : > { %15388 = vmatpush3.bf16.msra.mxu0 %v15387_v31  ;;  %v12564_v31 = vld [vmem:[%s18292_s13 + $0x2a0] sm:$0xff] }
 0x8bd   : > { %15420 = vmatpush3.bf16.msra.mxu1 %v15419_v32  ;;  %15390 = vmatprep.subr.bf16.mxu0 %v15389_v1  ;;  %v12565_v32 = vld [vmem:[%s18292_s13 + $0x2a8] sm:$0xff]  ;;  %v12596_v1 = vld [vmem:[%s18292_s13 + $0x3a0] sm:$0xff] }
 0x8be   : > { %15422 = vmatprep.subr.bf16.mxu1 %v15421_v52  ;;  %v15441_v51 = vpack.c.bf16 %v12565_v32, %v12564_v31  ;;  %v12548_v52 = vld [vmem:[%s18292_s13 + $0x220] sm:$0xff]  ;;  %v15473_v2 = vpack.c.bf16 %v12597_v11, %v12596_v1  ;;  %v12589_v32 = vld [vmem:[%s18292_s13 + $0x368] sm:$0xff]  ;;  %v12574_v11 = vld [vmem:[%s18292_s13 + $0x2f0] sm:$0xff] }
 0x8bf   : > { %v15443_v33 = vpack.c.bf16 %v12549_v34, %v12548_v52  ;;  %v15491_v1 = vpack.c.bf16 %v12589_v32, %v12588_v30  ;;  %v12607_v52 = vld [vmem:[%s18292_s13 + $0x3f8] sm:$0xff]  ;;  %v12558_v34 = vld [vmem:[%s18292_s13 + $0x270] sm:$0xff] }
 0x8c0   : > { %15392 = vmatpush3.bf16.msra.mxu0 %v15391_v45  ;;  %v12567_v45 = vld [vmem:[%s18292_s13 + $0x2b8] sm:$0xff]  ;;  %v15463_v60 = vpack.c.bf16 %v12559_v35, %v12558_v34 }
 0x8c1   : > { %15424 = vmatpush3.bf16.msra.mxu1 %v15423_v0  ;;  %15394 = vmatprep.subr.bf16.mxu0 %v15393_v37  ;;  %v12598_v0 = vld [vmem:[%s18292_s13 + $0x3b0] sm:$0xff]  ;;  %v12599_v37 = vld [vmem:[%s18292_s13 + $0x3b8] sm:$0xff]  ;;  %v15445_v54 = vpack.c.bf16 %v12567_v45, %v12566_v39 }
 0x8c2   : > { %15426 = vmatprep.subr.bf16.mxu1 %v15425_v55  ;;  %v12550_v55 = vld [vmem:[%s18292_s13 + $0x230] sm:$0xff]  ;;  %v15477_v42 = vpack.c.bf16 %v12599_v37, %v12598_v0  ;;  %v12591_v45 = vld [vmem:[%s18292_s13 + $0x378] sm:$0xff]  ;;  %v9199_v37 = vrot.slane %v17788_v48, %v17312_v22 }
 0x8c3   : > { %v15447_v20 = vpack.c.bf16 %v12551_v5, %v12550_v55  ;;  %v12590_v39 = vld [vmem:[%s18292_s13 + $0x370] sm:$0xff] }
 0x8c4   : > { %15396 = vmatpush3.bf16.msra.mxu0 %v15395_v10  ;;  %v12569_v10 = vld [vmem:[%s18292_s13 + $0x2c8] sm:$0xff]  ;;  %v15495_v0 = vpack.c.bf16 %v12591_v45, %v12590_v39 }
 0x8c5   : > { %15428 = vmatpush3.bf16.msra.mxu1 %v15427_v57  ;;  %15398 = vmatprep.subr.bf16.mxu0 %v15397_v25  ;;  %v12600_v57 = vld [vmem:[%s18292_s13 + $0x3c0] sm:$0xff]  ;;  %v12601_v25 = vld [vmem:[%s18292_s13 + $0x3c8] sm:$0xff]  ;;  %v15449_v6 = vpack.c.bf16 %v12569_v10, %v12568_v4 }
 0x8c6   : > { %15430 = vmatprep.subr.bf16.mxu1 %v15429_v12  ;;  %v12552_v12 = vld [vmem:[%s18292_s13 + $0x240] sm:$0xff]  ;;  %v15481_v23 = vpack.c.bf16 %v12601_v25, %v12600_v57 }
 0x8c7   : > { %v15451_v7 = vpack.c.bf16 %v12553_v47, %v12552_v12  ;;  %v15185_v47 = vld [vmem:[#allocation3] ss:$0 sm:$0xff] }
 0x8c8   : > { %15400 = vmatpush3.bf16.msra.mxu0 %v15399_v49  ;;  %v12571_v49 = vld [vmem:[%s18292_s13 + $0x2d8] sm:$0xff] }
 0x8c9   : > { %15432 = vmatpush3.bf16.msra.mxu1 %v15431_v63  ;;  %15434 = vmatprep.subr.bf16.mxu0 %v15433_v3  ;;  %v12602_v63 = vld [vmem:[%s18292_s13 + $0x3d0] sm:$0xff]  ;;  %v12603_v3 = vld [vmem:[%s18292_s13 + $0x3d8] sm:$0xff]  ;;  %v15453_v13 = vpack.c.bf16 %v12571_v49, %v12570_v61 }
 0x8ca   : > { %15466 = vmatprep.subr.bf16.mxu1 %v15465_v14  ;;  %v12554_v14 = vld [vmem:[%s18292_s13 + $0x250] sm:$0xff]  ;;  %v15485_v44 = vpack.c.bf16 %v12603_v3, %v12602_v63 }
 0x8cb   : > { %12680 = vmatmul.mubr.f32.vlgmr.msra.gmra.mrb[8].mxu0 %v12472_v18  ;;  %v12604_v18 = vld [vmem:[%s18292_s13 + $0x3e0] sm:$0xff] }
 0x8cc   : > { %12750 = vmatmul.mubr.f32.vlgmr.msra.gmra.mrb[8].mxu1 %v12474_v40  ;;  %15436 = vmatpush3.bf16.msra.mxu0 %v15435_v46  ;;  %v12573_v46 = vld [vmem:[%s18292_s13 + $0x2e8] sm:$0xff]  ;;  %v12556_v40 = vld [vmem:[%s18292_s13 + $0x260] sm:$0xff] }
 0x8cd   : > { %15468 = vmatpush3.bf16.msra.mxu1 %v15467_v19  ;;  %15438 = vmatprep.subr.bf16.mxu0 %v15437_v26  ;;  %v12605_v19 = vld [vmem:[%s18292_s13 + $0x3e8] sm:$0xff]  ;;  %v15455_v26 = vpack.c.bf16 %v12555_v15, %v12554_v14  ;;  %v15457_v29 = vpack.c.bf16 %v12573_v46, %v12572_v41 }
 0x8ce   : > { %15470 = vmatprep.subr.bf16.mxu1 %v15469_v9  ;;  %v15489_v59 = vpack.c.bf16 %v12605_v19, %v12604_v18  ;;  %v12557_v9 = vld [vmem:[%s18292_s13 + $0x268] sm:$0xff] }
 0x8cf   : > { %v15459_v31 = vpack.c.bf16 %v12557_v9, %v12556_v40 }
 0x8d0   : > { %15440 = vmatpush3.bf16.msra.mxu0 %v15439_v38  ;;  %v12575_v38 = vld [vmem:[%s18292_s13 + $0x2f8] sm:$0xff] }
 0x8d1   : > { %15472 = vmatpush3.bf16.msra.mxu1 %v15471_v53  ;;  %15442 = vmatprep.subr.bf16.mxu0 %v15441_v51  ;;  %v12606_v53 = vld [vmem:[%s18292_s13 + $0x3f0] sm:$0xff]  ;;  %v15461_v51 = vpack.c.bf16 %v12575_v38, %v12574_v11 }
 0x8d2   : > { %15474 = vmatprep.subr.bf16.mxu1 %v15473_v2  ;;  %v15493_v2 = vpack.c.bf16 %v12607_v52, %v12606_v53 }
 0x8d4   : > { %15444 = vmatpush3.bf16.msra.mxu0 %v15443_v33  ;;  %v9207_v33 = vrot.slane %v17788_v48, %v17315_v24 }
 0x8d5   : > { %15476 = vmatpush3.bf16.msra.mxu1 %v15475_v62  ;;  %15446 = vmatprep.subr.bf16.mxu0 %v15445_v54  ;;  %v9203_v62 = vrot.slane %v17788_v48, %v17318_v27  ;;  %v9211_v54 = vrot.slane %v17788_v48, %v17321_v28 }
 0x8d6   : > { %15478 = vmatprep.subr.bf16.mxu1 %v15477_v42 }
 0x8d8   : > { %15448 = vmatpush3.bf16.msra.mxu0 %v15447_v20 }
 0x8d9   : > { %15480 = vmatpush3.bf16.msra.mxu1 %v15479_v58  ;;  %15450 = vmatprep.subr.bf16.mxu0 %v15449_v6 }
 0x8da   : > { %15482 = vmatprep.subr.bf16.mxu1 %v15481_v23 }
 0x8dc   : > { %15452 = vmatpush3.bf16.msra.mxu0 %v15451_v7 }
 0x8dd   : > { %15484 = vmatpush3.bf16.msra.mxu1 %v15483_v50  ;;  %15454 = vmatprep.subr.bf16.mxu0 %v15453_v13 }
 0x8de   : > { %15486 = vmatprep.subr.bf16.mxu1 %v15485_v44 }
 0x8e0   : > { %15456 = vmatpush3.bf16.msra.mxu0 %v15455_v26 }
 0x8e1   : > { %15488 = vmatpush3.bf16.msra.mxu1 %v15487_v21  ;;  %15458 = vmatprep.subr.bf16.mxu0 %v15457_v29 }
 0x8e2   : > { %15490 = vmatprep.subr.bf16.mxu1 %v15489_v59 }
 0x8e4   : > { %15460 = vmatpush3.bf16.msra.mxu0 %v15459_v31 }
 0x8e5   : > { %15492 = vmatpush3.bf16.msra.mxu1 %v15491_v1  ;;  %15462 = vmatprep.subr.bf16.mxu0 %v15461_v51 }
 0x8e6   : > { %15494 = vmatprep.subr.bf16.mxu1 %v15493_v2 }
 0x8e8   : > { %15464 = vmatpush3.bf16.msra.mxu0 %v15463_v60 }
 0x8e9   : > { %15496 = vmatpush3.bf16.msra.mxu1 %v15495_v0 }
 0x97e   : > { %v12293_v55 = vpop.f32.mrb[4].mxu0 }
 0x97f   : > { %v15613_v5 = vadd.f32 %v12293_v55, %v9199_v37  ;;  %v12457_v56 = vpop.f32.mrb[4].mxu1  ;;  %v12295_v42 = vpop.f32.mrb[5].mxu0 }
 0x980   : > { %v15615_v43 = vadd.f32 %v12457_v56, %v9207_v33  ;;  %v15614_v4 = vadd.f32 %v12295_v42, %v9203_v62  ;;  %v12459_v10 = vpop.f32.mrb[5].mxu1  ;;  %v12297_v57 = vpop.f32.mrb[6].mxu0 }
 0x981   : > { %12468 = vst [vmem:[%s18290_s30 + $0x20] sm:$0xff] %v15613_v5  ;;  %v15616_v22 = vadd.f32 %v12459_v10, %v9211_v54  ;;  %v12461_v24 = vpop.f32.mrb[6].mxu1  ;;  %v12298_v25 = vpop.f32.mrb[7].mxu0  ;;  %v12476_v48 = vmax.f32 %v15613_v5, 0.0 }
 0x982   : > { %12470 = vst [vmem:[%s18290_s30 + $0x30] sm:$0xff] %v15615_v43  ;;  %12469 = vst [vmem:[%s18290_s30 + $0x28] sm:$0xff] %v15614_v4  ;;  %v12477_v27 = vmax.f32 %v15614_v4, 0.0  ;;  %v12462_v28 = vpop.f32.mrb[7].mxu1  ;;  %v12478_v58 = vmax.f32 %v15615_v43, 0.0 }
 0x983   : > { %12471 = vst [vmem:[%s18290_s30 + $0x38] sm:$0xff] %v15616_v22  ;;  %v12479_v20 = vmax.f32 %v15616_v22, 0.0 }
 0x984   : > { %12819 = vmatprep.mubr.f32.mxu0 %v12477_v27 }
 0x985   : > { %12889 = vmatprep.mubr.f32.mxu1 %v12479_v20  ;;  %12820 = vmatmul.mubr.f32.vlgmr.msra.gmra.mrb[10].mxu0 %v12476_v48 }
 0x986   : > { %12890 = vmatmul.mubr.f32.vlgmr.msra.gmra.mrb[10].mxu1 %v12478_v58 }
 0x99e   : > { %v15237_v6 = vpop.f32.mrb[8].mxu0 }
 0x99f   : > { %v15272_v12 = vpop.f32.mrb[8].mxu1  ;;  %v15238_v36 = vpop.f32.mrb[9].mxu0 }
 0x9a0   : > { %v15239_v23 = vadd.f32 %v15238_v36, %v15237_v6  ;;  %v15273_v8 = vpop.f32.mrb[9].mxu1 }
 0x9a1   : > { %v15274_v61 = vadd.f32 %v15273_v8, %v15272_v12 }
 0x9a2   : > { %v12682_v49 = vadd.f32 %v15239_v23, %v15185_v47 }
 0x9a4   : > { %v12752_v63 = vadd.f32 %v15274_v61, %v12682_v49 }
 0xa58   : > { %v15307_v3 = vpop.f32.mrb[10].mxu0 }
 0xa59   : > { %v15342_v7 = vpop.f32.mrb[10].mxu1  ;;  %v15308_v50 = vpop.f32.mrb[11].mxu0 }
 0xa5a   : > { %v15309_v13 = vadd.f32 %v15308_v50, %v15307_v3  ;;  %v15343_v14 = vpop.f32.mrb[11].mxu1 }
 0xa5b   : > { %v15344_v15 = vadd.f32 %v15343_v14, %v15342_v7 }
 0xa5c   : > { %v12822_v16 = vadd.f32 %v15309_v13, %v12752_v63 }
 0xa5e   : > { %v12892_v44 = vadd.f32 %v15344_v15, %v12822_v16 }
 0xa60   : > { %12896 = vst.msk [vmem:[%s18293_s1] sm:$0xff] %vm12895_vm4, %v12892_v44 }
 0xa61 PF: > { %p28_p8 = scmp.ge.s32.totalorder %s16305_s22, 5   ;;  %s18294_s23 = smov %s16038_s24 }
 0xa62   : > { %s18295_s24 = smov %s16042_s25  ;;  %s18296_s25 = smov %s16317_s27 }
 0xa63   : > { %s18297_s26 = smov %s16305_s22  ;;  %30 = sbr.rel (!%p28_p8) target bundleno = 12 (0xc), region = 157 }
 0xa6a   :  { %12939 = vsyncpa [#allocation5], 1 }
 0xa6b   :  { %12941 = vsyncpa [#allocation5 + $0x1], 1 }
 0xa6c   :  { %12942 = vsyncpa [#allocation7], 1 }
 0xa6d   :  { %12943 = vsyncpa [#allocation10], 1 }
 0xa6e   :  { %12945 = vsyncpa [#allocation10 + $0x1], 1 }
 0xa6f   :  { %12946 = vsyncpa [#allocation13], 1 }

</bundles_post_ra>
